<compile_context>
chip_gen: v7x
topology: tpu7x:2x2x1
jax: 0.10.0
libtpu: 0.0.40
codegen_flags: <defaults>
</compile_context>

<pallas_src>
import functools

import jax
import jax.numpy as jnp
import numpy as np
from jax import lax
from jax.experimental import pallas as pl
from jax.experimental.pallas import tpu as pltpu

EPS = 1e-5  # nn.GroupNorm default eps


# ---------------------------------------------------------------------------
# In-kernel helpers
# ---------------------------------------------------------------------------
def _group_norm_swish(x, mask, gamma, beta, m_cg, m_gc, inv_count, x_is_clean):
    """GroupNorm (f32 two-pass stats) + Swish over a (rows, C) slab -> bf16.

    `mask` is (rows, 1): 1.0 on valid rows, 0.0 on halo/scratch rows.  Masked
    rows do not contribute to the statistics and are zeroed in the returned
    activations (they act as the zero padding of the following convolution).
    If `x_is_clean`, the masked rows of `x` are already exactly zero, so the
    first-moment sum skips the mask multiply.
    """
    s1 = jnp.sum(x if x_is_clean else x * mask, axis=0, keepdims=True)       # (1, C)
    mean_g = jnp.dot(s1, m_cg, preferred_element_type=jnp.float32) * inv_count
    mean_c = jnp.dot(mean_g, m_gc, preferred_element_type=jnp.float32)       # (1, C)
    diff = x - mean_c
    dm = diff * mask
    s2 = jnp.sum(dm * dm, axis=0, keepdims=True)                             # (1, C)
    var_g = jnp.dot(s2, m_cg, preferred_element_type=jnp.float32) * inv_count
    inv_c = jnp.dot(lax.rsqrt(var_g + EPS), m_gc,
                    preferred_element_type=jnp.float32)                      # (1, C)
    scale = inv_c * gamma                                                    # (1, C) row fold
    xn = diff * scale + beta
    act = xn * jax.nn.sigmoid(xn) * mask
    return act.astype(jnp.bfloat16)                                          # single cast


def _conv3x3(tap, w_ref, Wp, C, fused, extra=None):
    """3x3 'same' conv over a padded-flat bf16 slab, f32 accumulation.

    tap(off) -> (Lout, C) bf16 slice of the padded slab at flat offset `off`.
    w_ref    : (9*C [+ Ce], Cout) bf16, K tap-major / channel-minor; optional
               shortcut rows stacked at the bottom.
    extra    : optional (Lout, Ce) bf16 block folded in as the trailing K rows
               (the 1x1 shortcut).
    fused    : single K=9C(+Ce) matmul (small C) vs. 3 per-dy K=3C matmuls
               (large C; 3x smaller im2col working set).
    """
    if fused:
        blocks = [tap(dy * Wp + dx) for dy in range(3) for dx in range(3)]
        if extra is not None:
            blocks.append(extra)
        return jnp.dot(jnp.concatenate(blocks, axis=1), w_ref[...],
                       preferred_element_type=jnp.float32)
    acc = None
    for dy in range(3):
        lhs = jnp.concatenate([tap(dy * Wp + dx) for dx in range(3)], axis=1)
        part = jnp.dot(lhs, w_ref[dy * 3 * C:(dy + 1) * 3 * C, :],
                       preferred_element_type=jnp.float32)
        acc = part if acc is None else acc + part
    if extra is not None:
        acc = acc + jnp.dot(extra, w_ref[9 * C:, :],
                            preferred_element_type=jnp.float32)
    return acc


# ---------------------------------------------------------------------------
# The Pallas kernel (one batch element per grid step)
# ---------------------------------------------------------------------------
def residual_block_kernel(xp_ref, temb_ref, mi_ref, mo_ref,
                          g1_ref, bn1_ref, m1_ref, mt1_ref, w1_ref,
                          g2_ref, bn2_ref, m2_ref, mt2_ref, w2_ref, b2_ref,
                          o_ref, p2_ref,
                          *, H, W, Cin, Cout, G, has_shortcut,
                          fuse1, fuse2, pad0):
    Wp = W + 2
    Lout = H * Wp
    Nflat = (H + 3) * Wp

    xp = xp_ref[0]                       # (Nflat, Cin) f32, halo rows are zero
    mask_in = mi_ref[...]                # (Nflat, 1)  1 on real pixels
    mask_out = mo_ref[...]               # (Lout, 1)   1 on valid columns (x < W)

    inv1 = 1.0 / float(H * W * (Cin // G))
    inv2 = 1.0 / float(H * W * (Cout // G))

    # Zero the (tiny) halo rows of the persistent conv2-input scratch each step
    # (cheap, and correct regardless of how the batch axis is split over cores).
    top = pad0 + Wp + 1                  # 16-aligned by construction of pad0
    bot = 2 * Wp - 1
    p2_ref[0:top, :] = jnp.zeros((top, Cout), jnp.bfloat16)
    p2_ref[top + Lout:, :] = jnp.zeros((bot, Cout), jnp.bfloat16)

    # --- norm1 + swish (bf16 slab, halo forced to zero -> conv1 zero padding) -
    a1 = _group_norm_swish(xp, mask_in, g1_ref[...], bn1_ref[...],
                           m1_ref[...], mt1_ref[...], inv1, x_is_clean=True)

    # --- conv1 (+ folded bias/time-embedding row) -----------------------------
    h = _conv3x3(lambda o: a1[o:o + Lout, :], w1_ref, Wp, Cin, fuse1)
    h = h + temb_ref[0]                  # temb row = time_emb(t) + conv1 bias

    # --- norm2 + swish (scratch columns masked out of stats and zeroed) ------
    a2 = _group_norm_swish(h, mask_out, g2_ref[...], bn2_ref[...],
                           m2_ref[...], mt2_ref[...], inv2, x_is_clean=False)

    # Store a2 into the padded-flat scratch at an aligned offset; the zeroed
    # scratch columns of a2 land exactly on the left/right halo positions.
    p2_ref[top:top + Lout, :] = a2

    # --- conv2 (+ folded 1x1 shortcut as an extra tap block) ------------------
    x_win = xp[Wp + 1: Wp + 1 + Lout, :]          # input aligned with outputs
    extra = x_win.astype(jnp.bfloat16) if has_shortcut else None
    h2 = _conv3x3(lambda o: p2_ref[pad0 + o: pad0 + o + Lout, :],
                  w2_ref, Wp, Cout, fuse2, extra=extra)
    h2 = h2 + b2_ref[...]                # conv2 bias (+ shortcut bias folded)
    if not has_shortcut:                 # nn.Identity(): plain residual add
        h2 = h2 + x_win

    o_ref[0] = h2.astype(o_ref.dtype)


# ---------------------------------------------------------------------------
# Wrapper (layout plumbing + pallas_call)
# ---------------------------------------------------------------------------
def _one_hot_group(C, G):
    Cg = C // G
    m = (np.arange(C)[:, None] // Cg == np.arange(G)[None, :]).astype(np.float32)
    return jnp.asarray(m), jnp.asarray(m.T)          # (C, G), (G, C)


def _make_masks(H, W):
    Wp = W + 2
    Nflat = (H + 3) * Wp
    Lout = H * Wp
    row = np.arange(Nflat) // Wp
    col = np.arange(Nflat) % Wp
    mi = ((row >= 1) & (row <= H) & (col >= 1) & (col <= W)).astype(np.float32)
    mo = ((np.arange(Lout) % Wp) < W).astype(np.float32)
    return jnp.asarray(mi[:, None]), jnp.asarray(mo[:, None])


def _vmem_limit_bytes():
    """Generation-aware VMEM limit: ~100 MiB on v5e/v6e (128), ~50 MiB on v7x."""
    try:
        cap = int(pltpu.get_tpu_info().vmem_capacity_bytes)
    except Exception:
        cap = 64 * 1024 * 1024
    return max(32 * 1024 * 1024, min(int(cap * 0.78), cap - 8 * 1024 * 1024))


def residual_block_pallas(x_nhwc, t_emb, kp, *, n_groups):
    N, H, W, Cin = x_nhwc.shape
    Cout = kp["b2"].shape[-1]
    G = n_groups
    Wp = W + 2
    Lout = H * Wp
    Nflat = (H + 3) * Wp
    has_shortcut = bool(kp["has_shortcut"])
    fuse1 = (9 * Cin <= 768)             # fused im2col only while K stays small
    fuse2 = (9 * Cout <= 768)
    pad0 = (-(Wp + 1)) % 16              # 16-row align the conv2 scratch store
    K2 = 9 * Cout + (Cin if has_shortcut else 0)

    # Wrapper-side layout plumbing: pad spatially (1 top / 2 bottom / 1 left /
    # 1 right) and flatten to padded-flat rows; every 3x3 tap is then a static
    # sublane-shifted slice.
    xpad = jnp.pad(x_nhwc, ((0, 0), (1, 2), (1, 1), (0, 0)))
    xflat = xpad.reshape(N, Nflat, Cin)

    # Time-embedding Linear as an ordinary XLA gemm; conv1 bias folded in so the
    # kernel does a single broadcast add after conv1.
    temb = (t_emb @ kp["tw"] + kp["tb"] + kp["b1"]).reshape(N, 1, Cout)

    mi, mo = _make_masks(H, W)
    m1, mt1 = _one_hot_group(Cin, G)
    m2, mt2 = _one_hot_group(Cout, G)

    const2 = lambda n: (0, 0)
    in_specs = [
        pl.BlockSpec((1, Nflat, Cin), lambda n: (n, 0, 0)),   # padded flat x
        pl.BlockSpec((1, 1, Cout), lambda n: (n, 0, 0)),      # temb row (+b1)
        pl.BlockSpec((Nflat, 1), const2),                     # interior mask
        pl.BlockSpec((Lout, 1), const2),                      # valid-column mask
        pl.BlockSpec((1, Cin), const2),                       # gamma1
        pl.BlockSpec((1, Cin), const2),                       # beta1
        pl.BlockSpec((Cin, G), const2),                       # ch->group (norm1)
        pl.BlockSpec((G, Cin), const2),                       # group->ch (norm1)
        pl.BlockSpec((9 * Cin, Cout), const2),                # conv1 fused w (bf16)
        pl.BlockSpec((1, Cout), const2),                      # gamma2
        pl.BlockSpec((1, Cout), const2),                      # beta2
        pl.BlockSpec((Cout, G), const2),                      # ch->group (norm2)
        pl.BlockSpec((G, Cout), const2),                      # group->ch (norm2)
        pl.BlockSpec((K2, Cout), const2),                     # conv2 (+shortcut) w
        pl.BlockSpec((1, Cout), const2),                      # conv2 (+shortcut) b
    ]
    operands = [xflat, temb, mi, mo, kp["g1"], kp["bn1"], m1, mt1, kp["w1"],
                kp["g2"], kp["bn2"], m2, mt2, kp["w2"], kp["b2"]]

    grid_spec = pltpu.PrefetchScalarGridSpec(
        num_scalar_prefetch=0,
        grid=(N,),
        in_specs=in_specs,
        out_specs=pl.BlockSpec((1, Lout, Cout), lambda n: (n, 0, 0)),
        scratch_shapes=[pltpu.VMEM((pad0 + Nflat, Cout), jnp.bfloat16)],
    )

    kernel = functools.partial(residual_block_kernel, H=H, W=W, Cin=Cin,
                               Cout=Cout, G=G, has_shortcut=has_shortcut,
                               fuse1=fuse1, fuse2=fuse2, pad0=pad0)

    flops = 2 * N * Lout * (9 * Cin * Cout + K2 * Cout)
    transc = N * (Nflat * Cin + Lout * Cout)
    bytes_acc = 4 * N * (Nflat * Cin + Lout * Cout) + 2 * (9 * Cin + K2) * Cout

    out_flat = pl.pallas_call(
        kernel,
        out_shape=jax.ShapeDtypeStruct((N, Lout, Cout), jnp.float32),
        grid_spec=grid_spec,
        compiler_params=pltpu.CompilerParams(
            dimension_semantics=("parallel",),
            vmem_limit_bytes=_vmem_limit_bytes()),
        cost_estimate=pl.CostEstimate(flops=int(flops),
                                      transcendentals=int(transc),
                                      bytes_accessed=int(bytes_acc)),
    )(*operands)

    # NOTE: when chaining ResidualBlocks, keep this padded-flat layout as the
    # inter-block activation format and skip the strip below (saves one full
    # output HBM pass).  Here we strip the two scratch columns for comparison.
    return out_flat.reshape(N, H, Wp, Cout)[:, :, :W, :]


# ---------------------------------------------------------------------------
# Deterministic parameter construction (PyTorch-shaped, then kernel layout)
# ---------------------------------------------------------------------------
def make_params(key, Cin, Cout, Tc):
    ks = jax.random.split(key, 12)
    p = {
        "conv1_w": 0.1 * jax.random.normal(ks[0], (Cout, Cin, 3, 3), jnp.float32),
        "conv1_b": 0.1 * jax.random.normal(ks[1], (Cout,), jnp.float32),
        "conv2_w": 0.1 * jax.random.normal(ks[2], (Cout, Cout, 3, 3), jnp.float32),
        "conv2_b": 0.1 * jax.random.normal(ks[3], (Cout,), jnp.float32),
        "time_w": 0.1 * jax.random.normal(ks[4], (Cout, Tc), jnp.float32),
        "time_b": 0.1 * jax.random.normal(ks[5], (Cout,), jnp.float32),
        "g1": 1.0 + 0.1 * jax.random.normal(ks[6], (Cin,), jnp.float32),
        "bn1": 0.1 * jax.random.normal(ks[7], (Cin,), jnp.float32),
        "g2": 1.0 + 0.1 * jax.random.normal(ks[8], (Cout,), jnp.float32),
        "bn2": 0.1 * jax.random.normal(ks[9], (Cout,), jnp.float32),
    }
    if Cin != Cout:
        p["sc_w"] = 0.1 * jax.random.normal(ks[10], (Cout, Cin, 1, 1), jnp.float32)
        p["sc_b"] = 0.1 * jax.random.normal(ks[11], (Cout,), jnp.float32)
    return p


def to_kernel_params(p, Cin, Cout):
    # conv weights -> (kh*kw*C, Cout), tap-major / channel-minor K, bf16 (MXU)
    w1 = jnp.transpose(p["conv1_w"], (2, 3, 1, 0)).reshape(9 * Cin, Cout) \
            .astype(jnp.bfloat16)
    w2 = jnp.transpose(p["conv2_w"], (2, 3, 1, 0)).reshape(9 * Cout, Cout) \
            .astype(jnp.bfloat16)
    b2 = p["conv2_b"].reshape(1, Cout)
    has_shortcut = "sc_w" in p
    if has_shortcut:
        ws = p["sc_w"][:, :, 0, 0].T.astype(jnp.bfloat16)      # (Cin, Cout)
        w2 = jnp.concatenate([w2, ws], axis=0)                 # shortcut folded as extra K
        b2 = b2 + p["sc_b"].reshape(1, Cout)                   # shortcut bias folded
    return {
        "w1": w1, "b1": p["conv1_b"].reshape(1, Cout),
        "w2": w2, "b2": b2,
        "tw": p["time_w"].T,                                   # (Tc, Cout) wrapper gemm
        "tb": p["time_b"].reshape(1, Cout),
        "g1": p["g1"].reshape(1, Cin), "bn1": p["bn1"].reshape(1, Cin),
        "g2": p["g2"].reshape(1, Cout), "bn2": p["bn2"].reshape(1, Cout),
        "has_shortcut": has_shortcut,
    }


# ---------------------------------------------------------------------------
# Pure-JAX reference (f32, highest precision) for correctness check
# ---------------------------------------------------------------------------
def reference_forward(x_nhwc, t_emb, p, n_groups):
    def gn(v, gamma, beta, G):
        N, H, W, C = v.shape
        vr = v.reshape(N, H * W, G, C // G)
        mean = vr.mean(axis=(1, 3), keepdims=True)
        var = ((vr - mean) ** 2).mean(axis=(1, 3), keepdims=True)
        vn = ((vr - mean) / jnp.sqrt(var + EPS)).reshape(N, H, W, C)
        return vn * gamma.reshape(1, 1, 1, C) + beta.reshape(1, 1, 1, C)

    def swish(v):
        return v * jax.nn.sigmoid(v)

    def conv3x3(v, w_torch, b):
        w = jnp.transpose(w_torch, (2, 3, 1, 0))      # HWIO
        y = lax.conv_general_dilated(v, w, (1, 1), "SAME",
                                     dimension_numbers=("NHWC", "HWIO", "NHWC"),
                                     precision=lax.Precision.HIGHEST)
        return y + b.reshape(1, 1, 1, -1)

    h = conv3x3(swish(gn(x_nhwc, p["g1"], p["bn1"], n_groups)),
                p["conv1_w"], p["conv1_b"])
    temb = t_emb @ p["time_w"].T + p["time_b"]
    h = h + temb[:, None, None, :]
    h = conv3x3(swish(gn(h, p["g2"], p["bn2"], n_groups)),
                p["conv2_w"], p["conv2_b"])
    if "sc_w" in p:
        sc = jnp.einsum("nhwc,oc->nhwo", x_nhwc, p["sc_w"][:, :, 0, 0],
                        precision=lax.Precision.HIGHEST) \
             + p["sc_b"].reshape(1, 1, 1, -1)
    else:
        sc = x_nhwc
    return h + sc


def _run_case(N, Cin, Cout, Tc, H, W, G, seed):
    key = jax.random.PRNGKey(seed)
    kx, kt, kparam = jax.random.split(key, 3)
    x_nchw = jax.random.normal(kx, (N, Cin, H, W), jnp.float32)
    t_emb = jax.random.normal(kt, (N, Tc), jnp.float32)

    params = make_params(kparam, Cin, Cout, Tc)
    kparams = to_kernel_params(params, Cin, Cout)

    x_nhwc = jnp.transpose(x_nchw, (0, 2, 3, 1))      # kernel consumes NHWC
    out = jax.block_until_ready(
        residual_block_pallas(x_nhwc, t_emb, kparams, n_groups=G))
    ref = jax.block_until_ready(reference_forward(x_nhwc, t_emb, params, G))

    # bf16 MXU operands (f32 accumulation) vs. f32 reference -> looser tolerance
    np.testing.assert_allclose(np.asarray(out), np.asarray(ref),
                               rtol=5e-2, atol=5e-2)
    return jnp.transpose(out, (0, 3, 1, 2))           # back to NCHW convention


# ---------------------------------------------------------------------------
if __name__ == "__main__":
    # fused im2col + folded 1x1-conv shortcut (Cin != Cout)
    _ = _run_case(N=2, Cin=32, Cout=64, Tc=32, H=16, W=16, G=8, seed=0)
    # fused im2col + identity shortcut (Cin == Cout): plain residual add
    _ = _run_case(N=2, Cin=32, Cout=32, Tc=16, H=8, W=8, G=8, seed=0)
    # split-K (per-dy) im2col path for larger channel counts + folded shortcut
    _ = _run_case(N=1, Cin=96, Cout=128, Tc=16, H=8, W=8, G=32, seed=0)
    print("KERNEL_OK")
</pallas_src>

<mosaic_0001>
module attributes {stable_mosaic.version = 11 : i64} {
  func.func @residual_block_kernel(%arg0: i32, %arg1: memref<1x342x32xf32, #tpu.memory_space<vmem>>, %arg2: memref<1x1x64xf32, #tpu.memory_space<vmem>>, %arg3: memref<342x1xf32, #tpu.memory_space<vmem>>, %arg4: memref<288x1xf32, #tpu.memory_space<vmem>>, %arg5: memref<1x32xf32, #tpu.memory_space<vmem>>, %arg6: memref<1x32xf32, #tpu.memory_space<vmem>>, %arg7: memref<32x8xf32, #tpu.memory_space<vmem>>, %arg8: memref<8x32xf32, #tpu.memory_space<vmem>>, %arg9: memref<288x64xbf16, #tpu.memory_space<vmem>>, %arg10: memref<1x64xf32, #tpu.memory_space<vmem>>, %arg11: memref<1x64xf32, #tpu.memory_space<vmem>>, %arg12: memref<64x8xf32, #tpu.memory_space<vmem>>, %arg13: memref<8x64xf32, #tpu.memory_space<vmem>>, %arg14: memref<608x64xbf16, #tpu.memory_space<vmem>>, %arg15: memref<1x64xf32, #tpu.memory_space<vmem>>, %arg16: memref<1x288x64xf32, #tpu.memory_space<vmem>>, %arg17: memref<355x64xbf16, #tpu.memory_space<vmem>>) attributes {dimension_semantics = [#tpu.dimension_semantics<parallel>], iteration_bounds = array<i64: 2>, scalar_prefetch = 0 : i64, scratch_operands = 1 : i64, tpu.core_type = #tpu.core_type<tc>, window_params = [{transform_indices = @transform_0, window_bounds = array<i64: 1, 342, 32>}, {transform_indices = @transform_1, window_bounds = array<i64: 1, 1, 64>}, {pipeline_mode = #tpu.pipeline_mode<synchronous>, transform_indices = @transform_2, window_bounds = array<i64: 342, 1>}, {pipeline_mode = #tpu.pipeline_mode<synchronous>, transform_indices = @transform_3, window_bounds = array<i64: 288, 1>}, {pipeline_mode = #tpu.pipeline_mode<synchronous>, transform_indices = @transform_4, window_bounds = array<i64: 1, 32>}, {pipeline_mode = #tpu.pipeline_mode<synchronous>, transform_indices = @transform_5, window_bounds = array<i64: 1, 32>}, {pipeline_mode = #tpu.pipeline_mode<synchronous>, transform_indices = @transform_6, window_bounds = array<i64: 32, 8>}, {pipeline_mode = #tpu.pipeline_mode<synchronous>, transform_indices = @transform_7, window_bounds = array<i64: 8, 32>}, {pipeline_mode = #tpu.pipeline_mode<synchronous>, transform_indices = @transform_8, window_bounds = array<i64: 288, 64>}, {pipeline_mode = #tpu.pipeline_mode<synchronous>, transform_indices = @transform_9, window_bounds = array<i64: 1, 64>}, {pipeline_mode = #tpu.pipeline_mode<synchronous>, transform_indices = @transform_10, window_bounds = array<i64: 1, 64>}, {pipeline_mode = #tpu.pipeline_mode<synchronous>, transform_indices = @transform_11, window_bounds = array<i64: 64, 8>}, {pipeline_mode = #tpu.pipeline_mode<synchronous>, transform_indices = @transform_12, window_bounds = array<i64: 8, 64>}, {pipeline_mode = #tpu.pipeline_mode<synchronous>, transform_indices = @transform_13, window_bounds = array<i64: 608, 64>}, {pipeline_mode = #tpu.pipeline_mode<synchronous>, transform_indices = @transform_14, window_bounds = array<i64: 1, 64>}, {transform_indices = @transform_15, window_bounds = array<i64: 1, 288, 64>}]} {
    %c0 = arith.constant 0 : index
    %c0_0 = arith.constant 0 : index
    %c0_1 = arith.constant 0 : index
    %0 = vector.load %arg1[%c0, %c0_0, %c0_1] : memref<1x342x32xf32, #tpu.memory_space<vmem>>, vector<1x342x32xf32>
    %1 = vector.shape_cast %0 : vector<1x342x32xf32> to vector<342x32xf32>
    %c0_2 = arith.constant 0 : index
    %c0_3 = arith.constant 0 : index
    %2 = vector.load %arg3[%c0_2, %c0_3] : memref<342x1xf32, #tpu.memory_space<vmem>>, vector<342x1xf32>
    %c0_4 = arith.constant 0 : index
    %c0_5 = arith.constant 0 : index
    %3 = vector.load %arg4[%c0_4, %c0_5] : memref<288x1xf32, #tpu.memory_space<vmem>>, vector<288x1xf32>
    %cst = arith.constant 0.000000e+00 : bf16
    %4 = vector.broadcast %cst : bf16 to vector<32x64xbf16>
    %c0_6 = arith.constant 0 : index
    %c0_7 = arith.constant 0 : index
    %5 = vector.load %arg17[%c0_6, %c0_7] : memref<355x64xbf16, #tpu.memory_space<vmem>>, vector<32x64xbf16>
    tpu.vector_store %arg17[%c0_6, %c0_7], %4 {strides = array<i32>} : memref<355x64xbf16, #tpu.memory_space<vmem>>, vector<32x64xbf16>,
    %cst_8 = arith.constant 0.000000e+00 : bf16
    %6 = vector.broadcast %cst_8 : bf16 to vector<35x64xbf16>
    %c320 = arith.constant 320 : index
    %c0_9 = arith.constant 0 : index
    %7 = vector.load %arg17[%c320, %c0_9] : memref<355x64xbf16, #tpu.memory_space<vmem>>, vector<35x64xbf16>
    tpu.vector_store %arg17[%c320, %c0_9], %6 {strides = array<i32>} : memref<355x64xbf16, #tpu.memory_space<vmem>>, vector<35x64xbf16>,
    %c0_10 = arith.constant 0 : index
    %c0_11 = arith.constant 0 : index
    %8 = vector.load %arg5[%c0_10, %c0_11] : memref<1x32xf32, #tpu.memory_space<vmem>>, vector<1x32xf32>
    %c0_12 = arith.constant 0 : index
    %c0_13 = arith.constant 0 : index
    %9 = vector.load %arg6[%c0_12, %c0_13] : memref<1x32xf32, #tpu.memory_space<vmem>>, vector<1x32xf32>
    %c0_14 = arith.constant 0 : index
    %c0_15 = arith.constant 0 : index
    %10 = vector.load %arg7[%c0_14, %c0_15] : memref<32x8xf32, #tpu.memory_space<vmem>>, vector<32x8xf32>
    %c0_16 = arith.constant 0 : index
    %c0_17 = arith.constant 0 : index
    %11 = vector.load %arg8[%c0_16, %c0_17] : memref<8x32xf32, #tpu.memory_space<vmem>>, vector<8x32xf32>
    %cst_18 = arith.constant dense<0.000000e+00> : vector<32xf32>
    %12 = vector.multi_reduction <add>, %1, %cst_18 [0] : vector<342x32xf32> to vector<32xf32>
    %13 = vector.shape_cast %12 : vector<32xf32> to vector<1x32xf32>
    %cst_19 = arith.constant dense<0.000000e+00> : vector<1x8xf32>
    %14 = tpu.matmul %13, %10, %cst_19 {dimension_numbers = #tpu.dot_dimension_numbers<[1], [0], [0], [1], [0, 0, 1, 1], [], []>} : vector<1x32xf32>, vector<32x8xf32>, vector<1x8xf32> -> vector<1x8xf32>
    %cst_20 = arith.constant 9.765625E-4 : f32
    %15 = vector.broadcast %cst_20 : f32 to vector<1x8xf32>
    %16 = arith.mulf %14, %15 : vector<1x8xf32>
    %cst_21 = arith.constant dense<0.000000e+00> : vector<1x32xf32>
    %17 = tpu.matmul %16, %11, %cst_21 {dimension_numbers = #tpu.dot_dimension_numbers<[1], [0], [0], [1], [0, 0, 1, 1], [], []>} : vector<1x8xf32>, vector<8x32xf32>, vector<1x32xf32> -> vector<1x32xf32>
    %18 = vector.broadcast %17 : vector<1x32xf32> to vector<342x32xf32>
    %19 = arith.subf %1, %18 : vector<342x32xf32>
    %20 = vector.broadcast %2 : vector<342x1xf32> to vector<342x32xf32>
    %21 = arith.mulf %19, %20 : vector<342x32xf32>
    %22 = arith.mulf %21, %21 : vector<342x32xf32>
    %cst_22 = arith.constant dense<0.000000e+00> : vector<32xf32>
    %23 = vector.multi_reduction <add>, %22, %cst_22 [0] : vector<342x32xf32> to vector<32xf32>
    %24 = vector.shape_cast %23 : vector<32xf32> to vector<1x32xf32>
    %cst_23 = arith.constant dense<0.000000e+00> : vector<1x8xf32>
    %25 = tpu.matmul %24, %10, %cst_23 {dimension_numbers = #tpu.dot_dimension_numbers<[1], [0], [0], [1], [0, 0, 1, 1], [], []>} : vector<1x32xf32>, vector<32x8xf32>, vector<1x8xf32> -> vector<1x8xf32>
    %cst_24 = arith.constant 9.765625E-4 : f32
    %26 = vector.broadcast %cst_24 : f32 to vector<1x8xf32>
    %27 = arith.mulf %25, %26 : vector<1x8xf32>
    %cst_25 = arith.constant 9.99999974E-6 : f32
    %28 = vector.broadcast %cst_25 : f32 to vector<1x8xf32>
    %29 = arith.addf %27, %28 : vector<1x8xf32>
    %30 = math.rsqrt %29 : vector<1x8xf32>
    %cst_26 = arith.constant dense<0.000000e+00> : vector<1x32xf32>
    %31 = tpu.matmul %30, %11, %cst_26 {dimension_numbers = #tpu.dot_dimension_numbers<[1], [0], [0], [1], [0, 0, 1, 1], [], []>} : vector<1x8xf32>, vector<8x32xf32>, vector<1x32xf32> -> vector<1x32xf32>
    %32 = arith.mulf %31, %8 : vector<1x32xf32>
    %33 = vector.broadcast %32 : vector<1x32xf32> to vector<342x32xf32>
    %34 = arith.mulf %19, %33 : vector<342x32xf32>
    %35 = vector.broadcast %9 : vector<1x32xf32> to vector<342x32xf32>
    %36 = arith.addf %34, %35 : vector<342x32xf32>
    %37 = arith.negf %36 : vector<342x32xf32>
    %38 = math.exp %37 : vector<342x32xf32>
    %cst_27 = arith.constant 1.000000e+00 : f32
    %39 = vector.broadcast %cst_27 : f32 to vector<342x32xf32>
    %40 = arith.addf %39, %38 : vector<342x32xf32>
    %41 = arith.divf %39, %40 : vector<342x32xf32>
    %42 = arith.mulf %36, %41 : vector<342x32xf32>
    %43 = vector.broadcast %2 : vector<342x1xf32> to vector<342x32xf32>
    %44 = arith.mulf %42, %43 : vector<342x32xf32>
    %45 = arith.truncf %44 : vector<342x32xf32> to vector<342x32xbf16>
    %46 = vector.extract_strided_slice %45 {offsets = [0, 0], sizes = [288, 32], strides = [1, 1]} : vector<342x32xbf16> to vector<288x32xbf16>
    %47 = vector.extract_strided_slice %45 {offsets = [1, 0], sizes = [288, 32], strides = [1, 1]} : vector<342x32xbf16> to vector<288x32xbf16>
    %48 = vector.extract_strided_slice %45 {offsets = [2, 0], sizes = [288, 32], strides = [1, 1]} : vector<342x32xbf16> to vector<288x32xbf16>
    %49 = vector.extract_strided_slice %45 {offsets = [18, 0], sizes = [288, 32], strides = [1, 1]} : vector<342x32xbf16> to vector<288x32xbf16>
    %50 = vector.extract_strided_slice %45 {offsets = [19, 0], sizes = [288, 32], strides = [1, 1]} : vector<342x32xbf16> to vector<288x32xbf16>
    %51 = vector.extract_strided_slice %45 {offsets = [20, 0], sizes = [288, 32], strides = [1, 1]} : vector<342x32xbf16> to vector<288x32xbf16>
    %52 = vector.extract_strided_slice %45 {offsets = [36, 0], sizes = [288, 32], strides = [1, 1]} : vector<342x32xbf16> to vector<288x32xbf16>
    %53 = vector.extract_strided_slice %45 {offsets = [37, 0], sizes = [288, 32], strides = [1, 1]} : vector<342x32xbf16> to vector<288x32xbf16>
    %54 = vector.extract_strided_slice %45 {offsets = [38, 0], sizes = [288, 32], strides = [1, 1]} : vector<342x32xbf16> to vector<288x32xbf16>
    %55 = tpu.concatenate %46, %47, %48, %49, %50, %51, %52, %53, %54 in 1 : vector<288x32xbf16>, vector<288x32xbf16>, vector<288x32xbf16>, vector<288x32xbf16>, vector<288x32xbf16>, vector<288x32xbf16>, vector<288x32xbf16>, vector<288x32xbf16>, vector<288x32xbf16> -> vector<288x288xbf16>
    %c0_28 = arith.constant 0 : index
    %c0_29 = arith.constant 0 : index
    %56 = vector.load %arg9[%c0_28, %c0_29] : memref<288x64xbf16, #tpu.memory_space<vmem>>, vector<288x64xbf16>
    %cst_30 = arith.constant dense<0.000000e+00> : vector<288x64xf32>
    %57 = tpu.matmul %55, %56, %cst_30 {dimension_numbers = #tpu.dot_dimension_numbers<[1], [0], [0], [1], [0, 0, 1, 1], [], []>} : vector<288x288xbf16>, vector<288x64xbf16>, vector<288x64xf32> -> vector<288x64xf32>
    %c0_31 = arith.constant 0 : index
    %c0_32 = arith.constant 0 : index
    %c0_33 = arith.constant 0 : index
    %58 = vector.load %arg2[%c0_31, %c0_32, %c0_33] : memref<1x1x64xf32, #tpu.memory_space<vmem>>, vector<1x1x64xf32>
    %59 = vector.shape_cast %58 : vector<1x1x64xf32> to vector<1x64xf32>
    %60 = vector.broadcast %59 : vector<1x64xf32> to vector<288x64xf32>
    %61 = arith.addf %57, %60 : vector<288x64xf32>
    %c0_34 = arith.constant 0 : index
    %c0_35 = arith.constant 0 : index
    %62 = vector.load %arg10[%c0_34, %c0_35] : memref<1x64xf32, #tpu.memory_space<vmem>>, vector<1x64xf32>
    %c0_36 = arith.constant 0 : index
    %c0_37 = arith.constant 0 : index
    %63 = vector.load %arg11[%c0_36, %c0_37] : memref<1x64xf32, #tpu.memory_space<vmem>>, vector<1x64xf32>
    %c0_38 = arith.constant 0 : index
    %c0_39 = arith.constant 0 : index
    %64 = vector.load %arg12[%c0_38, %c0_39] : memref<64x8xf32, #tpu.memory_space<vmem>>, vector<64x8xf32>
    %c0_40 = arith.constant 0 : index
    %c0_41 = arith.constant 0 : index
    %65 = vector.load %arg13[%c0_40, %c0_41] : memref<8x64xf32, #tpu.memory_space<vmem>>, vector<8x64xf32>
    %66 = vector.broadcast %3 : vector<288x1xf32> to vector<288x64xf32>
    %67 = arith.mulf %61, %66 : vector<288x64xf32>
    %cst_42 = arith.constant dense<0.000000e+00> : vector<64xf32>
    %68 = vector.multi_reduction <add>, %67, %cst_42 [0] : vector<288x64xf32> to vector<64xf32>
    %69 = vector.shape_cast %68 : vector<64xf32> to vector<1x64xf32>
    %cst_43 = arith.constant dense<0.000000e+00> : vector<1x8xf32>
    %70 = tpu.matmul %69, %64, %cst_43 {dimension_numbers = #tpu.dot_dimension_numbers<[1], [0], [0], [1], [0, 0, 1, 1], [], []>} : vector<1x64xf32>, vector<64x8xf32>, vector<1x8xf32> -> vector<1x8xf32>
    %cst_44 = arith.constant 4.8828125E-4 : f32
    %71 = vector.broadcast %cst_44 : f32 to vector<1x8xf32>
    %72 = arith.mulf %70, %71 : vector<1x8xf32>
    %cst_45 = arith.constant dense<0.000000e+00> : vector<1x64xf32>
    %73 = tpu.matmul %72, %65, %cst_45 {dimension_numbers = #tpu.dot_dimension_numbers<[1], [0], [0], [1], [0, 0, 1, 1], [], []>} : vector<1x8xf32>, vector<8x64xf32>, vector<1x64xf32> -> vector<1x64xf32>
    %74 = vector.broadcast %73 : vector<1x64xf32> to vector<288x64xf32>
    %75 = arith.subf %61, %74 : vector<288x64xf32>
    %76 = vector.broadcast %3 : vector<288x1xf32> to vector<288x64xf32>
    %77 = arith.mulf %75, %76 : vector<288x64xf32>
    %78 = arith.mulf %77, %77 : vector<288x64xf32>
    %cst_46 = arith.constant dense<0.000000e+00> : vector<64xf32>
    %79 = vector.multi_reduction <add>, %78, %cst_46 [0] : vector<288x64xf32> to vector<64xf32>
    %80 = vector.shape_cast %79 : vector<64xf32> to vector<1x64xf32>
    %cst_47 = arith.constant dense<0.000000e+00> : vector<1x8xf32>
    %81 = tpu.matmul %80, %64, %cst_47 {dimension_numbers = #tpu.dot_dimension_numbers<[1], [0], [0], [1], [0, 0, 1, 1], [], []>} : vector<1x64xf32>, vector<64x8xf32>, vector<1x8xf32> -> vector<1x8xf32>
    %cst_48 = arith.constant 4.8828125E-4 : f32
    %82 = vector.broadcast %cst_48 : f32 to vector<1x8xf32>
    %83 = arith.mulf %81, %82 : vector<1x8xf32>
    %cst_49 = arith.constant 9.99999974E-6 : f32
    %84 = vector.broadcast %cst_49 : f32 to vector<1x8xf32>
    %85 = arith.addf %83, %84 : vector<1x8xf32>
    %86 = math.rsqrt %85 : vector<1x8xf32>
    %cst_50 = arith.constant dense<0.000000e+00> : vector<1x64xf32>
    %87 = tpu.matmul %86, %65, %cst_50 {dimension_numbers = #tpu.dot_dimension_numbers<[1], [0], [0], [1], [0, 0, 1, 1], [], []>} : vector<1x8xf32>, vector<8x64xf32>, vector<1x64xf32> -> vector<1x64xf32>
    %88 = arith.mulf %87, %62 : vector<1x64xf32>
    %89 = vector.broadcast %88 : vector<1x64xf32> to vector<288x64xf32>
    %90 = arith.mulf %75, %89 : vector<288x64xf32>
    %91 = vector.broadcast %63 : vector<1x64xf32> to vector<288x64xf32>
    %92 = arith.addf %90, %91 : vector<288x64xf32>
    %93 = arith.negf %92 : vector<288x64xf32>
    %94 = math.exp %93 : vector<288x64xf32>
    %cst_51 = arith.constant 1.000000e+00 : f32
    %95 = vector.broadcast %cst_51 : f32 to vector<288x64xf32>
    %96 = arith.addf %95, %94 : vector<288x64xf32>
    %97 = arith.divf %95, %96 : vector<288x64xf32>
    %98 = arith.mulf %92, %97 : vector<288x64xf32>
    %99 = vector.broadcast %3 : vector<288x1xf32> to vector<288x64xf32>
    %100 = arith.mulf %98, %99 : vector<288x64xf32>
    %101 = arith.truncf %100 : vector<288x64xf32> to vector<288x64xbf16>
    %c32 = arith.constant 32 : index
    %c0_52 = arith.constant 0 : index
    %102 = vector.load %arg17[%c32, %c0_52] : memref<355x64xbf16, #tpu.memory_space<vmem>>, vector<288x64xbf16>
    tpu.vector_store %arg17[%c32, %c0_52], %101 {strides = array<i32>} : memref<355x64xbf16, #tpu.memory_space<vmem>>, vector<288x64xbf16>,
    %103 = vector.extract_strided_slice %1 {offsets = [19, 0], sizes = [288, 32], strides = [1, 1]} : vector<342x32xf32> to vector<288x32xf32>
    %104 = arith.truncf %103 : vector<288x32xf32> to vector<288x32xbf16>
    %c13 = arith.constant 13 : index
    %c0_53 = arith.constant 0 : index
    %105 = vector.load %arg17[%c13, %c0_53] : memref<355x64xbf16, #tpu.memory_space<vmem>>, vector<288x64xbf16>
    %c14 = arith.constant 14 : index
    %c0_54 = arith.constant 0 : index
    %106 = vector.load %arg17[%c14, %c0_54] : memref<355x64xbf16, #tpu.memory_space<vmem>>, vector<288x64xbf16>
    %c15 = arith.constant 15 : index
    %c0_55 = arith.constant 0 : index
    %107 = vector.load %arg17[%c15, %c0_55] : memref<355x64xbf16, #tpu.memory_space<vmem>>, vector<288x64xbf16>
    %c31 = arith.constant 31 : index
    %c0_56 = arith.constant 0 : index
    %108 = vector.load %arg17[%c31, %c0_56] : memref<355x64xbf16, #tpu.memory_space<vmem>>, vector<288x64xbf16>
    %c32_57 = arith.constant 32 : index
    %c0_58 = arith.constant 0 : index
    %109 = vector.load %arg17[%c32_57, %c0_58] : memref<355x64xbf16, #tpu.memory_space<vmem>>, vector<288x64xbf16>
    %c33 = arith.constant 33 : index
    %c0_59 = arith.constant 0 : index
    %110 = vector.load %arg17[%c33, %c0_59] : memref<355x64xbf16, #tpu.memory_space<vmem>>, vector<288x64xbf16>
    %c49 = arith.constant 49 : index
    %c0_60 = arith.constant 0 : index
    %111 = vector.load %arg17[%c49, %c0_60] : memref<355x64xbf16, #tpu.memory_space<vmem>>, vector<288x64xbf16>
    %c50 = arith.constant 50 : index
    %c0_61 = arith.constant 0 : index
    %112 = vector.load %arg17[%c50, %c0_61] : memref<355x64xbf16, #tpu.memory_space<vmem>>, vector<288x64xbf16>
    %c51 = arith.constant 51 : index
    %c0_62 = arith.constant 0 : index
    %113 = vector.load %arg17[%c51, %c0_62] : memref<355x64xbf16, #tpu.memory_space<vmem>>, vector<288x64xbf16>
    %114 = tpu.concatenate %105, %106, %107, %108, %109, %110, %111, %112, %113, %104 in 1 : vector<288x64xbf16>, vector<288x64xbf16>, vector<288x64xbf16>, vector<288x64xbf16>, vector<288x64xbf16>, vector<288x64xbf16>, vector<288x64xbf16>, vector<288x64xbf16>, vector<288x64xbf16>, vector<288x32xbf16> -> vector<288x608xbf16>
    %c0_63 = arith.constant 0 : index
    %c0_64 = arith.constant 0 : index
    %115 = vector.load %arg14[%c0_63, %c0_64] : memref<608x64xbf16, #tpu.memory_space<vmem>>, vector<608x64xbf16>
    %cst_65 = arith.constant dense<0.000000e+00> : vector<288x64xf32>
    %116 = tpu.matmul %114, %115, %cst_65 {dimension_numbers = #tpu.dot_dimension_numbers<[1], [0], [0], [1], [0, 0, 1, 1], [], []>} : vector<288x608xbf16>, vector<608x64xbf16>, vector<288x64xf32> -> vector<288x64xf32>
    %c0_66 = arith.constant 0 : index
    %c0_67 = arith.constant 0 : index
    %117 = vector.load %arg15[%c0_66, %c0_67] : memref<1x64xf32, #tpu.memory_space<vmem>>, vector<1x64xf32>
    %118 = vector.broadcast %117 : vector<1x64xf32> to vector<288x64xf32>
    %119 = arith.addf %116, %118 : vector<288x64xf32>
    %c0_68 = arith.constant 0 : index
    %c0_69 = arith.constant 0 : index
    %c0_70 = arith.constant 0 : index
    %120 = vector.load %arg16[%c0_68, %c0_69, %c0_70] : memref<1x288x64xf32, #tpu.memory_space<vmem>>, vector<1x288x64xf32>
    %121 = vector.shape_cast %120 : vector<1x288x64xf32> to vector<288x64xf32>
    %122 = vector.shape_cast %119 : vector<288x64xf32> to vector<1x288x64xf32>
    tpu.vector_store %arg16[%c0_68, %c0_69, %c0_70], %122 {strides = array<i32>} : memref<1x288x64xf32, #tpu.memory_space<vmem>>, vector<1x288x64xf32>,
    return
  }
  func.func @transform_0(%arg0: i32) -> (i32, i32, i32) {
    %c0_i32 = arith.constant 0 : i32
    %c0_i32_0 = arith.constant 0 : i32
    %c0_i32_1 = arith.constant 0 : i32
    return %arg0, %c0_i32, %c0_i32_0 : i32, i32, i32
  }
  func.func @transform_1(%arg0: i32) -> (i32, i32, i32) {
    %c0_i32 = arith.constant 0 : i32
    %c0_i32_0 = arith.constant 0 : i32
    %c0_i32_1 = arith.constant 0 : i32
    return %arg0, %c0_i32, %c0_i32_0 : i32, i32, i32
  }
  func.func @transform_2(%arg0: i32) -> (i32, i32) {
    %c0_i32 = arith.constant 0 : i32
    %c0_i32_0 = arith.constant 0 : i32
    %c0_i32_1 = arith.constant 0 : i32
    return %c0_i32, %c0_i32_0 : i32, i32
  }
  func.func @transform_3(%arg0: i32) -> (i32, i32) {
    %c0_i32 = arith.constant 0 : i32
    %c0_i32_0 = arith.constant 0 : i32
    %c0_i32_1 = arith.constant 0 : i32
    return %c0_i32, %c0_i32_0 : i32, i32
  }
  func.func @transform_4(%arg0: i32) -> (i32, i32) {
    %c0_i32 = arith.constant 0 : i32
    %c0_i32_0 = arith.constant 0 : i32
    %c0_i32_1 = arith.constant 0 : i32
    return %c0_i32, %c0_i32_0 : i32, i32
  }
  func.func @transform_5(%arg0: i32) -> (i32, i32) {
    %c0_i32 = arith.constant 0 : i32
    %c0_i32_0 = arith.constant 0 : i32
    %c0_i32_1 = arith.constant 0 : i32
    return %c0_i32, %c0_i32_0 : i32, i32
  }
  func.func @transform_6(%arg0: i32) -> (i32, i32) {
    %c0_i32 = arith.constant 0 : i32
    %c0_i32_0 = arith.constant 0 : i32
    %c0_i32_1 = arith.constant 0 : i32
    return %c0_i32, %c0_i32_0 : i32, i32
  }
  func.func @transform_7(%arg0: i32) -> (i32, i32) {
    %c0_i32 = arith.constant 0 : i32
    %c0_i32_0 = arith.constant 0 : i32
    %c0_i32_1 = arith.constant 0 : i32
    return %c0_i32, %c0_i32_0 : i32, i32
  }
  func.func @transform_8(%arg0: i32) -> (i32, i32) {
    %c0_i32 = arith.constant 0 : i32
    %c0_i32_0 = arith.constant 0 : i32
    %c0_i32_1 = arith.constant 0 : i32
    return %c0_i32, %c0_i32_0 : i32, i32
  }
  func.func @transform_9(%arg0: i32) -> (i32, i32) {
    %c0_i32 = arith.constant 0 : i32
    %c0_i32_0 = arith.constant 0 : i32
    %c0_i32_1 = arith.constant 0 : i32
    return %c0_i32, %c0_i32_0 : i32, i32
  }
  func.func @transform_10(%arg0: i32) -> (i32, i32) {
    %c0_i32 = arith.constant 0 : i32
    %c0_i32_0 = arith.constant 0 : i32
    %c0_i32_1 = arith.constant 0 : i32
    return %c0_i32, %c0_i32_0 : i32, i32
  }
  func.func @transform_11(%arg0: i32) -> (i32, i32) {
    %c0_i32 = arith.constant 0 : i32
    %c0_i32_0 = arith.constant 0 : i32
    %c0_i32_1 = arith.constant 0 : i32
    return %c0_i32, %c0_i32_0 : i32, i32
  }
  func.func @transform_12(%arg0: i32) -> (i32, i32) {
    %c0_i32 = arith.constant 0 : i32
    %c0_i32_0 = arith.constant 0 : i32
    %c0_i32_1 = arith.constant 0 : i32
    return %c0_i32, %c0_i32_0 : i32, i32
  }
  func.func @transform_13(%arg0: i32) -> (i32, i32) {
    %c0_i32 = arith.constant 0 : i32
    %c0_i32_0 = arith.constant 0 : i32
    %c0_i32_1 = arith.constant 0 : i32
    return %c0_i32, %c0_i32_0 : i32, i32
  }
  func.func @transform_14(%arg0: i32) -> (i32, i32) {
    %c0_i32 = arith.constant 0 : i32
    %c0_i32_0 = arith.constant 0 : i32
    %c0_i32_1 = arith.constant 0 : i32
    return %c0_i32, %c0_i32_0 : i32, i32
  }
  func.func @transform_15(%arg0: i32) -> (i32, i32, i32) {
    %c0_i32 = arith.constant 0 : i32
    %c0_i32_0 = arith.constant 0 : i32
    %c0_i32_1 = arith.constant 0 : i32
    return %arg0, %c0_i32, %c0_i32_0 : i32, i32, i32
  }
}

</mosaic_0001>

<bundles_post_ra>
// kernel: tpu_custom_call.1
= control target key start
LH: loop header
LB: loop body
LE: loop exit
PB: predicated region body
PF: predicated region fallthrough
CT: control target
= control target key end

     0   :  { %s9142_s18 = smov 0   ;;  %s14920_s0 = inlined_call_operand.vmem [shape: f32[2,342,32], index: 0, kind: input, shape index: {}]   ;;  %s14921_s1 = inlined_call_operand.vmem [shape: f32[2,1,64], index: 1, kind: input, shape index: {}]   ;;  %s14922_s2 = inlined_call_operand.vmem [shape: f32[342,1], index: 2, kind: input, shape index: {}]   ;;  %s14923_s3 = inlined_call_operand.vmem [shape: f32[288,1], index: 3, kind: input, shape index: {}]   ;;  %s14924_s4 = inlined_call_operand.vmem [shape: f32[1,32], index: 4, kind: input, shape index: {}]   ;;  %s14925_s5 = inlined_call_operand.vmem [shape: f32[1,32], index: 5, kind: input, shape index: {}]   ;;  %s14926_s6 = inlined_call_operand.vmem [shape: f32[32,8], index: 6, kind: input, shape index: {}]   ;;  %s14927_s7 = inlined_call_operand.vmem [shape: f32[8,32], index: 7, kind: input, shape index: {}]   ;;  %s14928_s8 = inlined_call_operand.vmem [shape: bf16[288,64], index: 8, kind: input, shape index: {}]   ;;  %s14929_s9 = inlined_call_operand.vmem [shape: f32[1,64], index: 9, kind: input, shape index: {}]   ;;  %s14930_s10 = inlined_call_operand.vmem [shape: f32[1,64], index: 10, kind: input, shape index: {}]   ;;  %s14931_s11 = inlined_call_operand.vmem [shape: f32[64,8], index: 11, kind: input, shape index: {}]   ;;  %s14932_s12 = inlined_call_operand.vmem [shape: f32[8,64], index: 12, kind: input, shape index: {}]   ;;  %s14933_s13 = inlined_call_operand.vmem [shape: bf16[608,64], index: 13, kind: input, shape index: {}]   ;;  %s14934_s14 = inlined_call_operand.vmem [shape: f32[1,64], index: 14, kind: input, shape index: {}]   ;;  %s14935_s15 = inlined_call_operand.vmem [shape: f32[2,288,64], index: 15, kind: output, shape index: {}]  }
   0x1 LB: > { %s7846_s19 = sadd.s32 4294967295, %s9053_s18   ;;  %p7850_p0 = scmp.ge.s32.totalorder %s9053_s18, 1  ;;  %s9053_s18 = sphi %s9142_s18, %s25_s18  }
   0x2   : > { %p445_p1 = scmp.lt.s32.totalorder %s9053_s18, 3 }
   0x4   : > { %p446_p2 = pnand %p7850_p0, %p445_p1 }
   0x6   : > { %449 = sbr.rel (%p446_p2) target bundleno = 3329 (0xd01), region = 80 }
   0xd   : > { %v649_v0 = vld [vmem:[%s14926_s6] sm:$0xff]  ;;  %v650_v1 = vld [vmem:[%s14926_s6 + $0x8] sm:$0xff]  ;;  %v651_v2 = vld [vmem:[%s14926_s6 + $0x10] sm:$0xff]  ;;  %v14940_v3 = vmov 0.0|0.0   ;;  %vm9056_vm0 = vmmov 0   ;;  %v14936_v6 = vmov 0.0  }
   0xe   : > { %8404 = vmatprep.subr.bf16.mxu0 %v14940_v3  ;;  %v9160_v4 = vpack.c.bf16 %v650_v1, %v649_v0  ;;  %v652_v5 = vld [vmem:[%s14926_s6 + $0x18] sm:$0xff]  ;;  %8244 = vmatprep.mubr.msk.f32.mxu0 %vm9056_vm0, %v14936_v6  ;;  %p496_p3 = scmp.lt.s32.totalorder %s7846_s19, 1  ;;  %vm654_vm1 = vcmask 261120   ;;  %vm738_vm2 = vcmask 259072   ;;  %vm821_vm3 = vcmask 64512   ;;  %s9059_s17 = smov 32  }
   0xf   : > { %8247 = vmatprep.subr.mxu1 %v14936_v6  ;;  %8249 = vmatprep.mubr.msk.f32.mxu1 %vm9056_vm0, %v14936_v6  ;;  %v9171_v7 = vpack.c.bf16 %v652_v5, %v651_v2  ;;  %vm2335_vm4 = vcmask 1045504   ;;  %vm2565_vm5 = vcmask 1044480   ;;  %vm2139_vm6 = vcmask 1046528   ;;  %s9060_s20 = smov 64   ;;  %s9061_s23 = smov 96  }
  0x10   : > { %8406 = vmatpush3.bf16.msra.mxu0 %v9160_v4  ;;  %s15778_s19 = smov (!%p496_p3, %s7846_s19), 1  ;;  %vm2252_vm7 = vsmask.f32 6400  ;;  %vm1935_vm8 = vsmask.f32 7424  ;;  %vm2639_vm10 = vcmask 523264  }
  0x11   : > { %8407 = vmatprep.subr.bf16.mxu0 %v14940_v3  ;;  %s8558_s28 = smul.u32 344, %s15778_s19  ;;  %vm2448_vm9 = vsmask.f32 5376  ;;  %vm2676_vm11 = vcmask 785408   ;;  %vm632_vm12 = vcmask 519168   ;;  %s503_s30 = scalar_lea.vmem %s14921_s1, %s15778_s19  ;;  %vm641_vm13 = vcmask 517120  }
  0x12   : > { %vm642_vm14 = vsmask.f32 1280  ;;  %s8559_s25 = smul.u32 288, %s15778_s19 }
  0x13   : > { %s9181_s16 = scalar_lea.vmem %s14920_s0, %s8558_s28  ;;  %vm12493_vm15 = vmand %vm641_vm13, %vm642_vm14 }
  0x14   : > { %8409 = vmatpush3.bf16.msra.mxu0 %v9171_v7  ;;  %v9184_v8 = vld [vmem:[%s9181_s16] sm:$0xff]  ;;  %v9187_v9 = vld [vmem:[%s9181_s16 + $0x8] sm:$0xff]  ;;  %v9190_v10 = vld [vmem:[%s9181_s16 + $0x10] sm:$0xff]  ;;  %s14790_s27 = scalar_lea.vmem %s14935_s15, %s8559_s25 }
  0x15   : > { %8263 = vmatprep.subr.mxu0 %v14936_v6  ;;  %v9194_v11 = vld [vmem:[%s9181_s16 + $0x18] sm:$0xff]  ;;  %v655_v12 = vsel %vm654_vm1, %v9184_v8, 0.0  ;;  %v656_v13 = vsel %vm654_vm1, %v9187_v9, 0.0  ;;  %v658_v14 = vsel %vm654_vm1, %v9190_v10, 0.0  ;;  %v9203_v15 = vld [vmem:[%s9181_s16 + $0x20] sm:$0xff]  ;;  %v9208_v18 = vld [vmem:[%s9181_s16 + $0x28] sm:$0xff] }
  0x16   : > { %v657_v16 = vadd.f32 %v656_v13, %v655_v12  ;;  %v660_v17 = vsel %vm654_vm1, %v9194_v11, 0.0  ;;  %v662_v20 = vsel %vm654_vm1, %v9203_v15, 0.0  ;;  %v9213_v21 = vld [vmem:[%s9181_s16 + $0x30] sm:$0xff]  ;;  %v9216_v22 = vld [vmem:[%s9181_s16 + $0x38] sm:$0xff]  ;;  %v9219_v24 = vld [vmem:[%s9181_s16 + $0x40] sm:$0xff]  ;;  %v664_v27 = vsel %vm654_vm1, %v9208_v18, 0.0 }
  0x17   : > { %v9222_v25 = vld [vmem:[%s9181_s16 + $0x48] sm:$0xff]  ;;  %v9225_v26 = vld [vmem:[%s9181_s16 + $0x50] sm:$0xff]  ;;  %v9230_v28 = vld [vmem:[%s9181_s16 + $0x58] sm:$0xff]  ;;  %v666_v35 = vsel %vm654_vm1, %v9213_v21, 0.0  ;;  %v668_v40 = vsel %vm654_vm1, %v9216_v22, 0.0  ;;  %v670_v41 = vsel %vm654_vm1, %v9219_v24, 0.0 }
  0x18   : > { %v659_v19 = vadd.f32 %v658_v14, %v657_v16  ;;  %v9233_v29 = vld [vmem:[%s9181_s16 + $0x60] sm:$0xff]  ;;  %v9236_v30 = vld [vmem:[%s9181_s16 + $0x68] sm:$0xff]  ;;  %v9239_v32 = vld [vmem:[%s9181_s16 + $0x70] sm:$0xff]  ;;  %v672_v42 = vsel %vm654_vm1, %v9222_v25, 0.0  ;;  %v674_v46 = vsel %vm654_vm1, %v9225_v26, 0.0  ;;  %v676_v47 = vsel %vm654_vm1, %v9230_v28, 0.0 }
  0x19   : > { %v9242_v33 = vld [vmem:[%s9181_s16 + $0x78] sm:$0xff]  ;;  %v9245_v34 = vld [vmem:[%s9181_s16 + $0x80] sm:$0xff]  ;;  %v9250_v36 = vld [vmem:[%s9181_s16 + $0x88] sm:$0xff]  ;;  %v678_v48 = vsel %vm654_vm1, %v9233_v29, 0.0  ;;  %v680_v52 = vsel %vm654_vm1, %v9236_v30, 0.0  ;;  %v682_v53 = vsel %vm654_vm1, %v9239_v32, 0.0 }
  0x1a   : > { %v661_v23 = vadd.f32 %v660_v17, %v659_v19  ;;  %v9253_v37 = vld [vmem:[%s9181_s16 + $0x90] sm:$0xff]  ;;  %v9256_v38 = vld [vmem:[%s9181_s16 + $0x98] sm:$0xff]  ;;  %v9265_v43 = vld [vmem:[%s9181_s16 + $0xa0] sm:$0xff]  ;;  %v684_v54 = vsel %vm654_vm1, %v9242_v33, 0.0  ;;  %v686_v55 = vsel %vm654_vm1, %v9245_v34, 0.0  ;;  %v688_v56 = vsel %vm654_vm1, %v9250_v36, 0.0 }
  0x1b   : > { %v9268_v44 = vld [vmem:[%s9181_s16 + $0xa8] sm:$0xff]  ;;  %v9271_v45 = vld [vmem:[%s9181_s16 + $0xb0] sm:$0xff]  ;;  %v9280_v49 = vld [vmem:[%s9181_s16 + $0xb8] sm:$0xff]  ;;  %v690_v57 = vsel %vm654_vm1, %v9253_v37, 0.0  ;;  %v692_v58 = vsel %vm654_vm1, %v9256_v38, 0.0  ;;  %v694_v60 = vsel %vm654_vm1, %v9265_v43, 0.0 }
  0x1c   : > { %v663_v31 = vadd.f32 %v662_v20, %v661_v23  ;;  %v9283_v50 = vld [vmem:[%s9181_s16 + $0xc0] sm:$0xff]  ;;  %v696_v61 = vsel %vm654_vm1, %v9268_v44, 0.0  ;;  %v698_v62 = vsel %vm654_vm1, %v9271_v45, 0.0  ;;  %v700_v63 = vsel %vm654_vm1, %v9280_v49, 0.0 }
  0x1d   : > { %v702_v0 = vsel %vm654_vm1, %v9283_v50, 0.0 }
  0x1e   : > { %v665_v39 = vadd.f32 %v664_v27, %v663_v31 }
  0x20   : > { %v667_v51 = vadd.f32 %v666_v35, %v665_v39  ;;  %v9310_v35 = vld [vmem:[%s9181_s16 + $0xc8] sm:$0xff] }
  0x22   : > { %v669_v59 = vadd.f32 %v668_v40, %v667_v51  ;;  %v9313_v40 = vld [vmem:[%s9181_s16 + $0xd0] sm:$0xff] }
  0x23   : > { %v706_v51 = vsel %vm654_vm1, %v9313_v40, 0.0 }
  0x24   : > { %v671_v1 = vadd.f32 %v670_v41, %v669_v59 }
  0x26   : > { %v673_v2 = vadd.f32 %v672_v42, %v671_v1 }
  0x28   : > { %v675_v5 = vadd.f32 %v674_v46, %v673_v2  ;;  %v704_v46 = vsel %vm654_vm1, %v9310_v35, 0.0 }
  0x2a   : > { %v677_v12 = vadd.f32 %v676_v47, %v675_v5  ;;  %v9318_v47 = vld [vmem:[%s9181_s16 + $0xd8] sm:$0xff]  ;;  %v9348_v5 = vld [vmem:[%s9181_s16 + $0x108] sm:$0xff] }
  0x2c   : > { %v679_v13 = vadd.f32 %v678_v48, %v677_v12 }
  0x2e   : > { %v681_v14 = vadd.f32 %v680_v52, %v679_v13  ;;  %v9323_v52 = vld [vmem:[%s9181_s16 + $0xe0] sm:$0xff] }
  0x30   : > { %v683_v16 = vadd.f32 %v682_v53, %v681_v14  ;;  %v9353_v14 = vld [vmem:[%s9181_s16 + $0x110] sm:$0xff] }
  0x32   : > { %v685_v17 = vadd.f32 %v684_v54, %v683_v16  ;;  %v708_v54 = vsel %vm654_vm1, %v9318_v47, 0.0 }
  0x34   : > { %v687_v19 = vadd.f32 %v686_v55, %v685_v17  ;;  %v9328_v55 = vld [vmem:[%s9181_s16 + $0xe8] sm:$0xff]  ;;  %v720_v17 = vsel %vm654_vm1, %v9348_v5, 0.0 }
  0x36   : > { %v689_v20 = vadd.f32 %v688_v56, %v687_v19  ;;  %v9358_v19 = vld [vmem:[%s9181_s16 + $0x118] sm:$0xff] }
  0x38   : > { %v691_v23 = vadd.f32 %v690_v57, %v689_v20  ;;  %v710_v57 = vsel %vm654_vm1, %v9323_v52, 0.0 }
  0x3a   : > { %v693_v27 = vadd.f32 %v692_v58, %v691_v23  ;;  %v9333_v58 = vld [vmem:[%s9181_s16 + $0xf0] sm:$0xff]  ;;  %v722_v23 = vsel %vm654_vm1, %v9353_v14, 0.0 }
  0x3c   : > { %v695_v31 = vadd.f32 %v694_v60, %v693_v27  ;;  %v712_v60 = vsel %vm654_vm1, %v9328_v55, 0.0  ;;  %v9363_v27 = vld [vmem:[%s9181_s16 + $0x120] sm:$0xff] }
  0x3e   : > { %v697_v39 = vadd.f32 %v696_v61, %v695_v31  ;;  %v9338_v61 = vld [vmem:[%s9181_s16 + $0xf8] sm:$0xff] }
  0x3f   : > { %v716_v2 = vsel %vm654_vm1, %v9338_v61, 0.0 }
  0x40   : > { %v699_v41 = vadd.f32 %v698_v62, %v697_v39  ;;  %v724_v39 = vsel %vm654_vm1, %v9358_v19, 0.0 }
  0x42   : > { %v701_v42 = vadd.f32 %v700_v63, %v699_v41  ;;  %v714_v63 = vsel %vm654_vm1, %v9333_v58, 0.0  ;;  %v9368_v41 = vld [vmem:[%s9181_s16 + $0x128] sm:$0xff] }
  0x44   : > { %v703_v48 = vadd.f32 %v702_v0, %v701_v42  ;;  %v9343_v0 = vld [vmem:[%s9181_s16 + $0x100] sm:$0xff] }
  0x45   : > { %v718_v13 = vsel %vm654_vm1, %v9343_v0, 0.0 }
  0x46   : > { %v705_v53 = vadd.f32 %v704_v46, %v703_v48  ;;  %v726_v46 = vsel %vm654_vm1, %v9363_v27, 0.0  ;;  %v9373_v48 = vld [vmem:[%s9181_s16 + $0x130] sm:$0xff] }
  0x48   : > { %v707_v56 = vadd.f32 %v706_v51, %v705_v53  ;;  %v728_v53 = vsel %vm654_vm1, %v9368_v41, 0.0 }
  0x4a   : > { %v709_v59 = vadd.f32 %v708_v54, %v707_v56  ;;  %v9378_v54 = vld [vmem:[%s9181_s16 + $0x138] sm:$0xff] }
  0x4b   : > { %15202 = vst [vmem:[#allocation3_spill] sm:$0xff] %v9378_v54 }
  0x4c   : > { %v711_v62 = vadd.f32 %v710_v57, %v709_v59  ;;  %v730_v57 = vsel %vm654_vm1, %v9373_v48, 0.0  ;;  %v9383_v59 = vld [vmem:[%s9181_s16 + $0x140] sm:$0xff] }
  0x4d   : > { %15203 = vst [vmem:[#allocation4_spill] sm:$0xff] %v9383_v59 }
  0x4e   : > { %v713_v1 = vadd.f32 %v712_v60, %v711_v62  ;;  %v732_v62 = vsel %vm654_vm1, %v9378_v54, 0.0 }
  0x50   : > { %v715_v12 = vadd.f32 %v714_v63, %v713_v1  ;;  %v9388_v63 = vld [vmem:[%s9181_s16 + $0x148] sm:$0xff] }
  0x51   : > { %15204 = vst [vmem:[#allocation5_spill] sm:$0xff] %v9388_v63 }
  0x52   : > { %v717_v16 = vadd.f32 %v716_v2, %v715_v12  ;;  %v734_v2 = vsel %vm654_vm1, %v9383_v59, 0.0  ;;  %v9393_v12 = vld [vmem:[%s9181_s16 + $0x150] sm:$0x3f] }
  0x53   : > { %15205 = vst [vmem:[#allocation6_spill] sm:$0xff] %v9393_v12 }
  0x54   : > { %v719_v20 = vadd.f32 %v718_v13, %v717_v16  ;;  %v736_v16 = vsel %vm654_vm1, %v9388_v63, 0.0 }
  0x56   : > { %v721_v31 = vadd.f32 %v720_v17, %v719_v20  ;;  %v739_v20 = vsel %vm738_vm2, %v9393_v12, 0.0 }
  0x58   : > { %v723_v42 = vadd.f32 %v722_v23, %v721_v31 }
  0x5a   : > { %v725_v51 = vadd.f32 %v724_v39, %v723_v42 }
  0x5c   : > { %v727_v56 = vadd.f32 %v726_v46, %v725_v51 }
  0x5e   : > { %v729_v60 = vadd.f32 %v728_v53, %v727_v56 }
  0x60   : > { %v731_v1 = vadd.f32 %v730_v57, %v729_v60  ;;  %v653_v57 = vld [vmem:[%s14927_s7] sm:$0xff] }
  0x61   : > { %v553_v60 = vld [vmem:[%s14922_s2] sm:$0xff]  ;;  %8248 = vmatpush3.msra.mxu1 %v653_v57 }
  0x62   : > { %v733_v13 = vadd.f32 %v732_v62, %v731_v1  ;;  %v14938_v62 = vmov 0   ;;  %v555_v1 = vld [vmem:[%s14922_s2 + $0x10] sm:$0xff]  ;;  %8410 = vmatprep.subr.bf16.mxu1 %v14940_v3 }
  0x63   : > { %8575 = vset.pattern.permute.xlu0 %v14938_v62  ;;  %8576 = vset.pattern.permute.xlu1 %v14938_v62 }
  0x64   : > { %v735_v17 = vadd.f32 %v734_v2, %v733_v13  ;;  %944 = vperm.xlu0 %8575, %v553_v60   ;;  %v554_v2 = vld [vmem:[%s14922_s2 + $0x8] sm:$0xff]  ;;  %954 = vperm.xlu1 %8576, %v555_v1   ;;  %v556_v13 = vld [vmem:[%s14922_s2 + $0x18] sm:$0xff]  ;;  %v569_v60 = vld [vmem:[%s14922_s2 + $0x80] sm:$0xff] }
  0x65   : > { %v570_v1 = vld [vmem:[%s14922_s2 + $0x88] sm:$0xff] }
  0x66   : > { %v737_v23 = vadd.f32 %v736_v16, %v735_v17  ;;  %v557_v16 = vld [vmem:[%s14922_s2 + $0x20] sm:$0xff]  ;;  %v558_v17 = vld [vmem:[%s14922_s2 + $0x28] sm:$0xff] }
  0x68   : > { %v740_v31 = vadd.f32 %v739_v20, %v737_v23  ;;  %949 = vperm.xlu0 %8575, %v554_v2   ;;  %959 = vperm.xlu1 %8576, %v556_v13   ;;  %v559_v20 = vld [vmem:[%s14922_s2 + $0x30] sm:$0xff]  ;;  %v560_v23 = vld [vmem:[%s14922_s2 + $0x38] sm:$0xff] }
  0x69   : > { %v571_v2 = vld [vmem:[%s14922_s2 + $0x90] sm:$0xff]  ;;  %v572_v13 = vld [vmem:[%s14922_s2 + $0x98] sm:$0xff] }
  0x6a   : > { %v741_v39 = vrot.slane %v740_v31, 4 }
  0x6c   : > { %v742_v42 = vadd.f32 %v741_v39, %v740_v31  ;;  %964 = vperm.xlu0 %8575, %v557_v16   ;;  %969 = vperm.xlu1 %8576, %v558_v17   ;;  %v561_v31 = vld [vmem:[%s14922_s2 + $0x40] sm:$0xff]  ;;  %v562_v39 = vld [vmem:[%s14922_s2 + $0x48] sm:$0xff] }
  0x6d   : > { %v573_v16 = vld [vmem:[%s14922_s2 + $0xa0] sm:$0xff]  ;;  %v574_v17 = vld [vmem:[%s14922_s2 + $0xa8] sm:$0xff] }
  0x6e   : > { %v743_v46 = vrot.slane %v742_v42, 2 }
  0x70   : > { %v744_v51 = vadd.f32 %v743_v46, %v742_v42  ;;  %974 = vperm.xlu0 %8575, %v559_v20   ;;  %979 = vperm.xlu1 %8576, %v560_v23   ;;  %v563_v42 = vld [vmem:[%s14922_s2 + $0x50] sm:$0xff]  ;;  %v564_v46 = vld [vmem:[%s14922_s2 + $0x58] sm:$0xff] }
  0x71   : > { %v575_v20 = vld [vmem:[%s14922_s2 + $0xb0] sm:$0xff]  ;;  %v576_v23 = vld [vmem:[%s14922_s2 + $0xb8] sm:$0xff] }
  0x72   : > { %v745_v53 = vrot.slane %v744_v51, 1 }
  0x74   : > { %v746_v56 = vadd.f32 %v745_v53, %v744_v51  ;;  %984 = vperm.xlu0 %8575, %v561_v31   ;;  %989 = vperm.xlu1 %8576, %v562_v39   ;;  %v565_v51 = vld [vmem:[%s14922_s2 + $0x60] sm:$0xff]  ;;  %v566_v53 = vld [vmem:[%s14922_s2 + $0x68] sm:$0xff] }
  0x75   : > { %v577_v31 = vld [vmem:[%s14922_s2 + $0xc0] sm:$0xff]  ;;  %v578_v39 = vld [vmem:[%s14922_s2 + $0xc8] sm:$0xff] }
  0x76   : > { %8245 = vmatmul.mubr.msk.f32.vlgmr.msra.gmra.mrb[0].mxu0 %vm654_vm1, %v746_v56  ;;  %v567_v56 = vld [vmem:[%s14922_s2 + $0x70] sm:$0xff] }
  0x77   : > { %8265 = vmatprep.mubr.msk.f32.mxu0 %vm9056_vm0, %v14936_v6  ;;  %8264 = vmatpush3.msra.mxu0 %v653_v57  ;;  %v568_v57 = vld [vmem:[%s14922_s2 + $0x78] sm:$0xff] }
  0x78   : > { %994 = vperm.xlu0 %8575, %v563_v42   ;;  %999 = vperm.xlu1 %8576, %v564_v46   ;;  %v579_v42 = vld [vmem:[%s14922_s2 + $0xd0] sm:$0xff]  ;;  %v580_v46 = vld [vmem:[%s14922_s2 + $0xd8] sm:$0xff] }
  0x7c   : > { %1004 = vperm.xlu0 %8575, %v565_v51   ;;  %1009 = vperm.xlu1 %8576, %v566_v53   ;;  %v581_v51 = vld [vmem:[%s14922_s2 + $0xe0] sm:$0xff]  ;;  %v582_v53 = vld [vmem:[%s14922_s2 + $0xe8] sm:$0xff] }
  0x80   : > { %1014 = vperm.xlu0 %8575, %v567_v56   ;;  %1019 = vperm.xlu1 %8576, %v568_v57   ;;  %v583_v56 = vld [vmem:[%s14922_s2 + $0xf0] sm:$0xff]  ;;  %v584_v57 = vld [vmem:[%s14922_s2 + $0xf8] sm:$0xff] }
  0x84   : > { %1024 = vperm.xlu0 %8575, %v569_v60   ;;  %1029 = vperm.xlu1 %8576, %v570_v1   ;;  %v585_v60 = vld [vmem:[%s14922_s2 + $0x100] sm:$0xff]  ;;  %v586_v1 = vld [vmem:[%s14922_s2 + $0x108] sm:$0xff] }
  0x88   : > { %1034 = vperm.xlu0 %8575, %v571_v2   ;;  %1039 = vperm.xlu1 %8576, %v572_v13   ;;  %v587_v2 = vld [vmem:[%s14922_s2 + $0x110] sm:$0xff]  ;;  %v588_v13 = vld [vmem:[%s14922_s2 + $0x118] sm:$0xff] }
  0x8c   : > { %1044 = vperm.xlu0 %8575, %v573_v16   ;;  %1049 = vperm.xlu1 %8576, %v574_v17   ;;  %v589_v16 = vld [vmem:[%s14922_s2 + $0x120] sm:$0xff]  ;;  %v590_v17 = vld [vmem:[%s14922_s2 + $0x128] sm:$0xff] }
  0x90   : > { %1054 = vperm.xlu0 %8575, %v575_v20   ;;  %1059 = vperm.xlu1 %8576, %v576_v23   ;;  %v591_v20 = vld [vmem:[%s14922_s2 + $0x130] sm:$0xff]  ;;  %v592_v23 = vld [vmem:[%s14922_s2 + $0x138] sm:$0xff] }
  0x94   : > { %1064 = vperm.xlu0 %8575, %v577_v31   ;;  %1069 = vperm.xlu1 %8576, %v578_v39   ;;  %v593_v31 = vld [vmem:[%s14922_s2 + $0x140] sm:$0xff]  ;;  %v594_v39 = vld [vmem:[%s14922_s2 + $0x148] sm:$0xff] }
  0x98   : > { %1074 = vperm.xlu0 %8575, %v579_v42   ;;  %1079 = vperm.xlu1 %8576, %v580_v46   ;;  %v595_v42 = vld [vmem:[%s14922_s2 + $0x150] sm:$0x3f] }
  0x9c   : > { %1084 = vperm.xlu0 %8575, %v581_v51   ;;  %1089 = vperm.xlu1 %8576, %v582_v53  }
  0xa0   : > { %1094 = vperm.xlu0 %8575, %v583_v56   ;;  %1099 = vperm.xlu1 %8576, %v584_v57  }
  0xa4   : > { %1104 = vperm.xlu0 %8575, %v585_v60   ;;  %1109 = vperm.xlu1 %8576, %v586_v1  }
  0xa8   : > { %1114 = vperm.xlu0 %8575, %v587_v2   ;;  %1119 = vperm.xlu1 %8576, %v588_v13  }
  0xac   : > { %1124 = vperm.xlu0 %8575, %v589_v16   ;;  %1129 = vperm.xlu1 %8576, %v590_v17  }
  0xb0   : > { %1134 = vperm.xlu0 %8575, %v591_v20   ;;  %1139 = vperm.xlu1 %8576, %v592_v23   ;;  %v895_v23 = vlaneseq }
  0xb4   : > { %1144 = vperm.xlu0 %8575, %v593_v31   ;;  %1149 = vperm.xlu1 %8576, %v594_v39   ;;  %v896_v39 = vshrl.u32 %v895_v23, 7 }
  0xb8   : > { %1154 = vperm.xlu0 %8575, %v595_v42  }
  0xe3   : > { %v9544_v56 = vpop.permute.xlu0 %944  ;;  %v9546_v57 = vpop.permute.xlu1 %954 }
  0xe4   : > { %15206 = vst [vmem:[#allocation7_spill] sm:$0xff] %v9544_v56  ;;  %15207 = vst [vmem:[#allocation8_spill] sm:$0xff] %v9546_v57 }
  0xe7   : > { %v9548_v60 = vpop.permute.xlu0 %949  ;;  %v9550_v1 = vpop.permute.xlu1 %959 }
  0xe8   : > { %15208 = vst [vmem:[#allocation9_spill] sm:$0xff] %v9548_v60  ;;  %15209 = vst [vmem:[#allocation10_spill] sm:$0xff] %v9550_v1 }
  0xeb   : > { %v9552_v2 = vpop.permute.xlu0 %964 }
  0xec   : > { %15210 = vst [vmem:[#allocation11_spill] sm:$0xff] %v9552_v2 }
  0xef   : > { %v9556_v13 = vpop.permute.xlu0 %974 }
  0xf0   : > { %15211 = vst [vmem:[#allocation12_spill] sm:$0xff] %v9556_v13 }
 0x149   : > { %v816_v46 = vpop.f32.mrb[0].mxu0 }
 0x14a   : > { %v820_v51 = vmul.f32 0.0009765625, %v816_v46  ;;  %v8246_v53 = vpop.f32.mrb[1].mxu0 }
 0x14c   : > { %8250 = vmatmul.mubr.msk.f32.vlgmr.msra.gmra.mrb[0].mxu1 %vm821_vm3, %v820_v51  ;;  %v9568_v51 = vsub.s32 0, %v896_v39 }
 0x14d   : > { %8412 = vmatpush3.bf16.msra.mxu1 %v9160_v4  ;;  %8260 = vmatprep.mubr.msk.f32.mxu1 %vm9056_vm0, %v14936_v6  ;;  %v9554_v4 = vpop.permute.xlu1 %969 }
 0x14e   : > { %8413 = vmatprep.subr.bf16.mxu1 %v14940_v3  ;;  %15215 = vst [vmem:[#allocation16_spill] sm:$0xff] %v9568_v51 }
 0x151   : > { %8415 = vmatpush3.bf16.msra.mxu1 %v9171_v7  ;;  %v9558_v20 = vpop.permute.xlu1 %979  ;;  %v9560_v7 = vpop.permute.xlu0 %984 }
 0x152   : > { %3080 = vmatprep.subr.bf16.mxu1 %v14938_v62  ;;  %15212 = vst [vmem:[#allocation13_spill] sm:$0xff] %v9558_v20 }
 0x155   : > { %v9562_v31 = vpop.permute.xlu1 %989  ;;  %v9564_v42 = vpop.permute.xlu0 %994 }
 0x156   : > { %15213 = vst [vmem:[#allocation14_spill] sm:$0xff] %v9562_v31  ;;  %15214 = vst [vmem:[#allocation15_spill] sm:$0xff] %v9564_v42 }
 0x159   : > { %v9566_v46 = vpop.permute.xlu1 %999  ;;  %v9570_v53 = vpop.permute.xlu0 %1004 }
 0x15a   : > { %15216 = vst [vmem:[#allocation17_spill] sm:$0xff] %v9570_v53 }
 0x15d   : > { %v9585_v3 = vpop.permute.xlu0 %1014 }
 0x15e   : > { %15220 = vst [vmem:[#allocation21_spill] sm:$0xff] %v9585_v3 }
 0x161   : > { %v9607_v63 = vpop.permute.xlu0 %1024 }
 0x162   : > { %15225 = vst [vmem:[#allocation26_spill] sm:$0xff] %v9607_v63 }
 0x21f   : > { %v891_v16 = vpop.f32.mrb[0].mxu1 }
 0x220   : > { %v8251_v17 = vpop.f32.mrb[1].mxu1  ;;  %v9573_v6 = vrot.slane %v891_v16, %v9568_v51 }
 0x221   : > { %v9575_v17 = vpop.permute.xlu1 %1009 }
 0x222   : > { %15217 = vst [vmem:[#allocation18_spill] sm:$0xff] %v9575_v17  ;;  %v9579_v62 = vsub.f32 %v9184_v8, %v9573_v6  ;;  %v9583_v23 = vsub.f32 %v9187_v9, %v9573_v6  ;;  %v9589_v39 = vsub.f32 %v9190_v10, %v9573_v6  ;;  %v9595_v16 = vsub.f32 %v9194_v11, %v9573_v6 }
 0x223   : > { %v9603_v9 = vsub.f32 %v9203_v15, %v9573_v6  ;;  %v9611_v59 = vsub.f32 %v9208_v18, %v9573_v6  ;;  %v9619_v15 = vsub.f32 %v9213_v21, %v9573_v6 }
 0x224   : > { %15218 = vst [vmem:[#allocation19_spill] sm:$0xff] %v9579_v62  ;;  %15219 = vst [vmem:[#allocation20_spill] sm:$0xff] %v9583_v23  ;;  %v1157_v8 = vmul.f32 %v9544_v56, %v9579_v62  ;;  %v1158_v51 = vmul.f32 %v9548_v60, %v9583_v23  ;;  %v1159_v10 = vmul.f32 %v9546_v57, %v9589_v39 }
 0x225   : > { %15221 = vst [vmem:[#allocation22_spill] sm:$0xff] %v9589_v39  ;;  %v9591_v12 = vpop.permute.xlu1 %1019  ;;  %15223 = vst [vmem:[#allocation24_spill] sm:$0xff] %v9595_v16  ;;  %v1160_v11 = vmul.f32 %v9550_v1, %v9595_v16  ;;  %v1161_v60 = vmul.f32 %v9552_v2, %v9603_v9  ;;  %v9625_v39 = vsub.f32 %v9216_v22, %v9573_v6  ;;  %v9631_v16 = vpop.permute.xlu0 %1034 }
 0x226   : > { %15222 = vst [vmem:[#allocation23_spill] sm:$0xff] %v9591_v12  ;;  %15224 = vst [vmem:[#allocation25_spill] sm:$0xff] %v9603_v9  ;;  %v1200_v56 = vmul.f32 %v1157_v8, %v1157_v8  ;;  %v1201_v62 = vmul.f32 %v1158_v51, %v1158_v51  ;;  %v1202_v57 = vmul.f32 %v1159_v10, %v1159_v10 }
 0x227   : > { %v1162_v18 = vmul.f32 %v9554_v4, %v9611_v59  ;;  %v1203_v1 = vmul.f32 %v1160_v11, %v1160_v11  ;;  %15227 = vst [vmem:[#allocation28_spill] sm:$0xff] %v9631_v16  ;;  %v9635_v23 = vsub.f32 %v9219_v24, %v9573_v6  ;;  %v1163_v10 = vmul.f32 %v9556_v13, %v9619_v15 }
 0x228   : > { %v1243_v51 = vsel %vm654_vm1, %v1200_v56, 0.0  ;;  %v1244_v8 = vsel %vm654_vm1, %v1201_v62, 0.0  ;;  %v1204_v22 = vmul.f32 %v1161_v60, %v1161_v60  ;;  %v1246_v2 = vsel %vm654_vm1, %v1202_v57, 0.0 }
 0x229   : > { %v9615_v54 = vpop.permute.xlu1 %1029  ;;  %v1245_v21 = vadd.f32 %v1244_v8, %v1243_v51  ;;  %v9644_v56 = vsub.f32 %v9222_v25, %v9573_v6  ;;  %v1164_v62 = vmul.f32 %v9558_v20, %v9625_v39  ;;  %v1205_v51 = vmul.f32 %v1162_v18, %v1162_v18 }
 0x22a   : > { %15226 = vst [vmem:[#allocation27_spill] sm:$0xff] %v9615_v54  ;;  %v1248_v24 = vsel %vm654_vm1, %v1203_v1, 0.0  ;;  %v9651_v13 = vsub.f32 %v9225_v26, %v9573_v6  ;;  %v1165_v57 = vmul.f32 %v9560_v7, %v9635_v23  ;;  %v1206_v60 = vmul.f32 %v1163_v10, %v1163_v10 }
 0x22b   : > { %v1247_v11 = vadd.f32 %v1246_v2, %v1245_v21  ;;  %v1250_v2 = vsel %vm654_vm1, %v1204_v22, 0.0  ;;  %v9656_v21 = vpop.permute.xlu0 %1044  ;;  %v9660_v20 = vsub.f32 %v9230_v28, %v9573_v6  ;;  %v1166_v1 = vmul.f32 %v9562_v31, %v9644_v56 }
 0x22c   : > { %15229 = vst [vmem:[#allocation30_spill] sm:$0xff] %v9656_v21  ;;  %v1207_v18 = vmul.f32 %v1164_v62, %v1164_v62  ;;  %v1252_v26 = vsel %vm654_vm1, %v1205_v51, 0.0  ;;  %v9669_v10 = vsub.f32 %v9233_v29, %v9573_v6  ;;  %v1167_v22 = vmul.f32 %v9564_v42, %v9651_v13 }
 0x22d   : > { %v9640_v9 = vpop.permute.xlu1 %1039  ;;  %v1249_v8 = vadd.f32 %v1248_v24, %v1247_v11  ;;  %v1254_v28 = vsel %vm654_vm1, %v1206_v60, 0.0  ;;  %v9676_v31 = vsub.f32 %v9236_v30, %v9573_v6  ;;  %v1168_v62 = vmul.f32 %v9566_v46, %v9660_v20 }
 0x22e   : > { %15228 = vst [vmem:[#allocation29_spill] sm:$0xff] %v9640_v9  ;;  %v1209_v51 = vmul.f32 %v1166_v1, %v1166_v1  ;;  %v9685_v42 = vsub.f32 %v9239_v32, %v9573_v6  ;;  %v1210_v60 = vmul.f32 %v1167_v22, %v1167_v22  ;;  %v9694_v1 = vsub.f32 %v9242_v33, %v9573_v6 }
 0x22f   : > { %v1251_v25 = vadd.f32 %v1250_v2, %v1249_v8  ;;  %v1208_v8 = vmul.f32 %v1165_v57, %v1165_v57  ;;  %v1169_v57 = vmul.f32 %v9570_v53, %v9669_v10  ;;  %v9701_v53 = vsub.f32 %v9245_v34, %v9573_v6 }
 0x230   : > { %v1260_v32 = vsel %vm654_vm1, %v1209_v51, 0.0  ;;  %v1171_v22 = vmul.f32 %v9585_v3, %v9685_v42 }
 0x231   : > { %v9665_v11 = vpop.permute.xlu1 %1049  ;;  %v1253_v24 = vadd.f32 %v1252_v26, %v1251_v25  ;;  %v1256_v25 = vsel %vm654_vm1, %v1207_v18, 0.0  ;;  %v9681_v26 = vpop.permute.xlu0 %1054  ;;  %v1258_v30 = vsel %vm654_vm1, %v1208_v8, 0.0  ;;  %v1170_v18 = vmul.f32 %v9575_v17, %v9676_v31 }
 0x232   : > { %15230 = vst [vmem:[#allocation31_spill] sm:$0xff] %v9665_v11  ;;  %15231 = vst [vmem:[#allocation32_spill] sm:$0xff] %v9681_v26  ;;  %v1212_v8 = vmul.f32 %v1169_v57, %v1169_v57  ;;  %v9710_v17 = vsub.f32 %v9250_v36, %v9573_v6  ;;  %v9719_v57 = vsub.f32 %v9253_v37, %v9573_v6 }
 0x233   : > { %v1255_v2 = vadd.f32 %v1254_v28, %v1253_v24  ;;  %v1213_v51 = vmul.f32 %v1170_v18, %v1170_v18 }
 0x234   : > { %v1266_v36 = vsel %vm654_vm1, %v1212_v8, 0.0  ;;  %v1174_v18 = vmul.f32 %v9615_v54, %v9710_v17 }
 0x235   : > { %v1257_v29 = vadd.f32 %v1256_v25, %v1255_v2  ;;  %v9690_v24 = vpop.permute.xlu1 %1059  ;;  %v1211_v2 = vmul.f32 %v1168_v62, %v1168_v62  ;;  %v1172_v62 = vmul.f32 %v9591_v12, %v9694_v1  ;;  %v9726_v12 = vsub.f32 %v9256_v38, %v9573_v6 }
 0x236   : > { %15232 = vst [vmem:[#allocation33_spill] sm:$0xff] %v9690_v24 }
 0x237   : > { %v1259_v28 = vadd.f32 %v1258_v30, %v1257_v29  ;;  %v1262_v29 = vsel %vm654_vm1, %v1210_v60, 0.0  ;;  %v9706_v30 = vpop.permute.xlu0 %1064  ;;  %v1264_v34 = vsel %vm654_vm1, %v1211_v2, 0.0  ;;  %v1173_v60 = vmul.f32 %v9607_v63, %v9701_v53 }
 0x238   : > { %15233 = vst [vmem:[#allocation34_spill] sm:$0xff] %v9706_v30  ;;  %v1215_v2 = vmul.f32 %v1172_v62, %v1172_v62  ;;  %v9735_v63 = vsub.f32 %v9265_v43, %v9573_v6  ;;  %v9744_v62 = vsub.f32 %v9268_v44, %v9573_v6 }
 0x239   : > { %v1261_v25 = vadd.f32 %v1260_v32, %v1259_v28  ;;  %v9715_v28 = vpop.permute.xlu1 %1069  ;;  %v1216_v8 = vmul.f32 %v1173_v60, %v1173_v60 }
 0x23a   : > { %15234 = vst [vmem:[#allocation35_spill] sm:$0xff] %v9715_v28  ;;  %v1272_v43 = vsel %vm654_vm1, %v1215_v2, 0.0  ;;  %v1177_v60 = vmul.f32 %v9656_v21, %v9735_v63 }
 0x23b   : > { %v1263_v33 = vadd.f32 %v1262_v29, %v1261_v25  ;;  %v1214_v25 = vmul.f32 %v1171_v22, %v1171_v22  ;;  %v1175_v22 = vmul.f32 %v9631_v16, %v9719_v57  ;;  %v9751_v16 = vsub.f32 %v9271_v45, %v9573_v6 }
 0x23d   : > { %v1265_v32 = vadd.f32 %v1264_v34, %v1263_v33  ;;  %v1268_v33 = vsel %vm654_vm1, %v1213_v51, 0.0  ;;  %v9731_v34 = vpop.permute.xlu0 %1074  ;;  %v1270_v38 = vsel %vm654_vm1, %v1214_v25, 0.0  ;;  %v1176_v51 = vmul.f32 %v9640_v9, %v9726_v12 }
 0x23e   : > { %15235 = vst [vmem:[#allocation36_spill] sm:$0xff] %v9731_v34  ;;  %v1218_v25 = vmul.f32 %v1175_v22, %v1175_v22  ;;  %v9760_v9 = vsub.f32 %v9280_v49, %v9573_v6  ;;  %v9769_v22 = vsub.f32 %v9283_v50, %v9573_v6 }
 0x23f   : > { %v1267_v29 = vadd.f32 %v1266_v36, %v1265_v32  ;;  %v9740_v32 = vpop.permute.xlu1 %1079  ;;  %v1219_v2 = vmul.f32 %v1176_v51, %v1176_v51 }
 0x240   : > { %15236 = vst [vmem:[#allocation37_spill] sm:$0xff] %v9740_v32  ;;  %v1278_v49 = vsel %vm654_vm1, %v1218_v25, 0.0  ;;  %v1180_v51 = vmul.f32 %v9690_v24, %v9760_v9 }
 0x241   : > { %v1269_v37 = vadd.f32 %v1268_v33, %v1267_v29  ;;  %v1217_v29 = vmul.f32 %v1174_v18, %v1174_v18  ;;  %v1178_v18 = vmul.f32 %v9665_v11, %v9744_v62  ;;  %v9776_v11 = vsub.f32 %v9310_v35, %v9573_v6 }
 0x243   : > { %v1271_v36 = vadd.f32 %v1270_v38, %v1269_v37  ;;  %v1274_v37 = vsel %vm654_vm1, %v1216_v8, 0.0  ;;  %v9756_v38 = vpop.permute.xlu0 %1084  ;;  %v1276_v45 = vsel %vm654_vm1, %v1217_v29, 0.0  ;;  %v1179_v8 = vmul.f32 %v9681_v26, %v9751_v16 }
 0x244   : > { %15237 = vst [vmem:[#allocation38_spill] sm:$0xff] %v9756_v38  ;;  %v1221_v29 = vmul.f32 %v1178_v18, %v1178_v18  ;;  %v9785_v26 = vsub.f32 %v9313_v40, %v9573_v6  ;;  %v9794_v18 = vsub.f32 %v9318_v47, %v9573_v6 }
 0x245   : > { %v1273_v33 = vadd.f32 %v1272_v43, %v1271_v36  ;;  %v9765_v36 = vpop.permute.xlu1 %1089  ;;  %v1222_v25 = vmul.f32 %v1179_v8, %v1179_v8 }
 0x246   : > { %15238 = vst [vmem:[#allocation39_spill] sm:$0xff] %v9765_v36  ;;  %v1284_v40 = vsel %vm654_vm1, %v1221_v29, 0.0  ;;  %v1183_v8 = vmul.f32 %v9731_v34, %v9785_v26  ;;  %v15250_v34 = vld [vmem:[#allocation4_spill] sm:$0xff] }
 0x247   : > { %v1275_v44 = vadd.f32 %v1274_v37, %v1273_v33  ;;  %v1220_v33 = vmul.f32 %v1177_v60, %v1177_v60  ;;  %v1181_v60 = vmul.f32 %v9706_v30, %v9769_v22  ;;  %v9801_v30 = vsub.f32 %v9323_v52, %v9573_v6 }
 0x249   : > { %v1277_v43 = vadd.f32 %v1276_v45, %v1275_v44  ;;  %v1280_v44 = vsel %vm654_vm1, %v1219_v2, 0.0  ;;  %v9781_v45 = vpop.permute.xlu0 %1094  ;;  %v1282_v35 = vsel %vm654_vm1, %v1220_v33, 0.0  ;;  %v1182_v2 = vmul.f32 %v9715_v28, %v9776_v11 }
 0x24a   : > { %15239 = vst [vmem:[#allocation40_spill] sm:$0xff] %v9781_v45  ;;  %v1224_v33 = vmul.f32 %v1181_v60, %v1181_v60  ;;  %v9810_v28 = vsub.f32 %v9328_v55, %v9573_v6  ;;  %v9819_v60 = vsub.f32 %v9333_v58, %v9573_v6 }
 0x24b   : > { %v1279_v37 = vadd.f32 %v1278_v49, %v1277_v43  ;;  %v9790_v43 = vpop.permute.xlu1 %1099  ;;  %v1225_v29 = vmul.f32 %v1182_v2, %v1182_v2 }
 0x24c   : > { %15240 = vst [vmem:[#allocation41_spill] sm:$0xff] %v9790_v43  ;;  %v1290_v55 = vsel %vm654_vm1, %v1224_v33, 0.0  ;;  %v1186_v2 = vmul.f32 %v9765_v36, %v9810_v28 }
 0x24d   : > { %v1281_v50 = vadd.f32 %v1280_v44, %v1279_v37  ;;  %v1223_v37 = vmul.f32 %v1180_v51, %v1180_v51  ;;  %v1184_v51 = vmul.f32 %v9740_v32, %v9794_v18  ;;  %v9826_v32 = vsub.f32 %v9338_v61, %v9573_v6 }
 0x24f   : > { %v1283_v49 = vadd.f32 %v1282_v35, %v1281_v50  ;;  %v1286_v50 = vsel %vm654_vm1, %v1222_v25, 0.0  ;;  %v9806_v35 = vpop.permute.xlu0 %1104  ;;  %v1288_v52 = vsel %vm654_vm1, %v1223_v37, 0.0  ;;  %v1185_v25 = vmul.f32 %v9756_v38, %v9801_v30 }
 0x250   : > { %15241 = vst [vmem:[#allocation42_spill] sm:$0xff] %v9806_v35  ;;  %v1227_v37 = vmul.f32 %v1184_v51, %v1184_v51  ;;  %v9835_v38 = vsub.f32 %v9343_v0, %v9573_v6  ;;  %v9844_v51 = vsub.f32 %v9348_v5, %v9573_v6 }
 0x251   : > { %v1285_v44 = vadd.f32 %v1284_v40, %v1283_v49  ;;  %v9815_v49 = vpop.permute.xlu1 %1109  ;;  %v1228_v33 = vmul.f32 %v1185_v25, %v1185_v25 }
 0x252   : > { %15242 = vst [vmem:[#allocation43_spill] sm:$0xff] %v9815_v49  ;;  %v1296_v0 = vsel %vm654_vm1, %v1227_v37, 0.0  ;;  %v1189_v25 = vmul.f32 %v9806_v35, %v9835_v38  ;;  %v9885_v35 = vsub.f32 %v9373_v48, %v9573_v6 }
 0x253   : > { %v1287_v47 = vadd.f32 %v1286_v50, %v1285_v44  ;;  %v1226_v44 = vmul.f32 %v1183_v8, %v1183_v8  ;;  %v1187_v8 = vmul.f32 %v9781_v45, %v9819_v60  ;;  %v9851_v45 = vsub.f32 %v9353_v14, %v9573_v6 }
 0x255   : > { %v1289_v40 = vadd.f32 %v1288_v52, %v1287_v47  ;;  %v1292_v47 = vsel %vm654_vm1, %v1225_v29, 0.0  ;;  %v9831_v52 = vpop.permute.xlu0 %1114  ;;  %v1294_v61 = vsel %vm654_vm1, %v1226_v44, 0.0  ;;  %v1188_v29 = vmul.f32 %v9790_v43, %v9826_v32 }
 0x256   : > { %15243 = vst [vmem:[#allocation44_spill] sm:$0xff] %v9831_v52  ;;  %v1230_v44 = vmul.f32 %v1187_v8, %v1187_v8  ;;  %v9860_v43 = vsub.f32 %v9358_v19, %v9573_v6  ;;  %v9869_v8 = vsub.f32 %v9363_v27, %v9573_v6 }
 0x257   : > { %v1291_v50 = vadd.f32 %v1290_v55, %v1289_v40  ;;  %v9840_v40 = vpop.permute.xlu1 %1119  ;;  %v1231_v37 = vmul.f32 %v1188_v29, %v1188_v29 }
 0x258   : > { %15244 = vst [vmem:[#allocation45_spill] sm:$0xff] %v9840_v40  ;;  %v1302_v19 = vsel %vm654_vm1, %v1230_v44, 0.0  ;;  %v1192_v29 = vmul.f32 %v9840_v40, %v9860_v43  ;;  %v9901_v40 = vsub.f32 %v15250_v34, %v9573_v6 }
 0x259   : > { %v1293_v58 = vadd.f32 %v1292_v47, %v1291_v50  ;;  %v1229_v50 = vmul.f32 %v1186_v2, %v1186_v2  ;;  %v1190_v2 = vmul.f32 %v9815_v49, %v9844_v51  ;;  %v9876_v49 = vsub.f32 %v9368_v41, %v9573_v6 }
 0x25b   : > { %v1295_v55 = vadd.f32 %v1294_v61, %v1293_v58  ;;  %v1298_v58 = vsel %vm654_vm1, %v1228_v33, 0.0  ;;  %v9856_v61 = vpop.permute.xlu0 %1124  ;;  %v1300_v14 = vsel %vm654_vm1, %v1229_v50, 0.0  ;;  %v1191_v33 = vmul.f32 %v9831_v52, %v9851_v45 }
 0x25c   : > { %15245 = vst [vmem:[#allocation46_spill] sm:$0xff] %v9856_v61  ;;  %v1233_v50 = vmul.f32 %v1190_v2, %v1190_v2  ;;  %v15249_v2 = vld [vmem:[#allocation3_spill] sm:$0xff] }
 0x25d   : > { %v1297_v47 = vadd.f32 %v1296_v0, %v1295_v55  ;;  %v9865_v55 = vpop.permute.xlu1 %1129  ;;  %v1234_v44 = vmul.f32 %v1191_v33, %v1191_v33  ;;  %v9894_v36 = vsub.f32 %v15249_v2, %v9573_v6 }
 0x25e   : > { %15246 = vst [vmem:[#allocation47_spill] sm:$0xff] %v9865_v55  ;;  %v1308_v48 = vsel %vm654_vm1, %v1233_v50, 0.0 }
 0x25f   : > { %v1299_v5 = vadd.f32 %v1298_v58, %v1297_v47  ;;  %v1232_v47 = vmul.f32 %v1189_v25, %v1189_v25  ;;  %v1193_v25 = vmul.f32 %v9856_v61, %v9869_v8 }
 0x261   : > { %v1301_v0 = vadd.f32 %v1300_v14, %v1299_v5  ;;  %v1304_v5 = vsel %vm654_vm1, %v1231_v37, 0.0  ;;  %v9881_v14 = vpop.permute.xlu0 %1134  ;;  %v1306_v41 = vsel %vm654_vm1, %v1232_v47, 0.0  ;;  %v1194_v37 = vmul.f32 %v9865_v55, %v9876_v49 }
 0x262   : > { %15247 = vst [vmem:[#allocation48_spill] sm:$0xff] %v9881_v14  ;;  %v1195_v33 = vmul.f32 %v9881_v14, %v9885_v35  ;;  %v1236_v47 = vmul.f32 %v1193_v25, %v1193_v25  ;;  %v15254_v25 = vld [vmem:[#allocation6_spill] sm:$0xff] }
 0x263   : > { %v1303_v58 = vadd.f32 %v1302_v19, %v1301_v0  ;;  %v9890_v0 = vpop.permute.xlu1 %1139  ;;  %v941_v14 = vsub.f32 %v15254_v25, %v9573_v6 }
 0x264   : > { %15248 = vst [vmem:[#allocation49_spill] sm:$0xff] %v9890_v0  ;;  %v1196_v52 = vmul.f32 %v9890_v0, %v9894_v36 }
 0x265   : > { %v1305_v27 = vadd.f32 %v1304_v5, %v1303_v58  ;;  %v1235_v58 = vmul.f32 %v1192_v29, %v1192_v29  ;;  %v15252_v29 = vld [vmem:[#allocation5_spill] sm:$0xff] }
 0x266   : > { %v9912_v50 = vsub.f32 %v15252_v29, %v9573_v6  ;;  %v1239_v24 = vmul.f32 %v1196_v52, %v1196_v52 }
 0x267   : > { %v1307_v19 = vadd.f32 %v1306_v41, %v1305_v27  ;;  %v1310_v27 = vsel %vm654_vm1, %v1234_v44, 0.0  ;;  %v9906_v41 = vpop.permute.xlu0 %1144  ;;  %v1312_v34 = vsel %vm654_vm1, %v1235_v58, 0.0 }
 0x268   : > { %15251 = vst [vmem:[#allocation3_spill] sm:$0xff] %v9906_v41  ;;  %v1197_v44 = vmul.f32 %v9906_v41, %v9901_v40  ;;  %v1320_v41 = vsel %vm654_vm1, %v1239_v24, 0.0 }
 0x269   : > { %v1309_v5 = vadd.f32 %v1308_v48, %v1307_v19  ;;  %v1237_v19 = vmul.f32 %v1194_v37, %v1194_v37  ;;  %v9915_v48 = vpop.permute.xlu1 %1149 }
 0x26a   : > { %15253 = vst [vmem:[#allocation4_spill] sm:$0xff] %v9915_v48  ;;  %v1198_v29 = vmul.f32 %v9915_v48, %v9912_v50 }
 0x26b   : > { %v1311_v2 = vadd.f32 %v1310_v27, %v1309_v5  ;;  %v1238_v5 = vmul.f32 %v1195_v33, %v1195_v33  ;;  %v1314_v27 = vsel %vm654_vm1, %v1236_v47, 0.0  ;;  %v1316_v37 = vsel %vm654_vm1, %v1237_v19, 0.0  ;;  %v1155_v58 = vpop.permute.xlu0 %1154 }
 0x26c   : > { %v1199_v21 = vmul.f32 %v1155_v58, %v941_v14  ;;  %v1241_v25 = vmul.f32 %v1198_v29, %v1198_v29 }
 0x26d   : > { %v1313_v55 = vadd.f32 %v1312_v34, %v1311_v2  ;;  %v1240_v2 = vmul.f32 %v1197_v44, %v1197_v44  ;;  %v1318_v34 = vsel %vm654_vm1, %v1238_v5, 0.0 }
 0x26e   : > { %v1242_v54 = vmul.f32 %v1199_v21, %v1199_v21 }
 0x26f   : > { %v1315_v0 = vadd.f32 %v1314_v27, %v1313_v55  ;;  %v1322_v55 = vsel %vm654_vm1, %v1240_v2, 0.0  ;;  %v1324_v27 = vsel %vm654_vm1, %v1241_v25, 0.0  ;;  %v15255_v2 = vmov 0.0|0.0   ;;  %v647_v25 = vld [vmem:[%s14924_s4] sm:$0x1] }
 0x270   : > { %v1326_v19 = vsel %vm738_vm2, %v1242_v54, 0.0  ;;  %v8577_v54 = vld [vmem:[%s14928_s8 + $0x80] sm:$0xff]   ;;  %vm5624_vm2 = vcmask 1040384  }
 0x271   : > { %v1317_v61 = vadd.f32 %v1316_v37, %v1315_v0  ;;  %8268 = vmatprep.subr.bf16.mxu0 %v8577_v54 }
 0x273   : > { %v1319_v6 = vadd.f32 %v1318_v34, %v1317_v61 }
 0x275   : > { %v1321_v33 = vadd.f32 %v1320_v41, %v1319_v6 }
 0x277   : > { %v1323_v47 = vadd.f32 %v1322_v55, %v1321_v33  ;;  %v15256_v55 = vld [vmem:[#allocation16_spill] sm:$0xff] }
 0x279   : > { %v1325_v52 = vadd.f32 %v1324_v27, %v1323_v47  ;;  %v15257_v27 = vld [vmem:[#allocation19_spill] sm:$0xff] }
 0x27b   : > { %v1327_v48 = vadd.f32 %v1326_v19, %v1325_v52  ;;  %v15258_v19 = vld [vmem:[#allocation20_spill] sm:$0xff] }
 0x27d   : > { %v1328_v0 = vrot.slane %v1327_v48, 4 }
 0x27f   : > { %v1329_v14 = vadd.f32 %v1328_v0, %v1327_v48  ;;  %v8578_v48 = vld [vmem:[%s14928_s8 + $0x88] sm:$0xff]  }
 0x281   : > { %v1330_v44 = vrot.slane %v1329_v14, 2 }
 0x283   : > { %v1331_v37 = vadd.f32 %v1330_v44, %v1329_v14 }
 0x285   : > { %v1332_v5 = vrot.slane %v1331_v37, 1 }
 0x287   : > { %v1333_v61 = vadd.f32 %v1332_v5, %v1331_v37  ;;  %v9956_v37 = vld [vmem:[%s14925_s5] ss:$0 sm:$0xff] }
 0x289   : > { %8261 = vmatmul.mubr.msk.f32.vlgmr.msra.gmra.mrb[2].mxu1 %vm654_vm1, %v1333_v61 }
 0x35c   : > { %v1403_v24 = vpop.f32.mrb[2].mxu1 }
 0x35d   : > { %v1407_v41 = vmul.f32 0.0009765625, %v1403_v24  ;;  %v8262_v21 = vpop.f32.mrb[3].mxu1 }
 0x35e   : > { %v15260_v21 = vld [vmem:[#allocation24_spill] sm:$0xff] }
 0x35f   : > { %v1408_v29 = vadd.f32 1e-05, %v1407_v41  ;;  %v15259_v41 = vld [vmem:[#allocation22_spill] sm:$0xff] }
 0x361   : > { %8673 = vrsqrt.f32 %v1408_v29 }
 0x36b   : > { %v8674_v58 = vpop.eup %8673 }
 0x36c   : > { %8266 = vmatmul.mubr.msk.f32.vlgmr.msra.gmra.mrb[2].mxu0 %vm821_vm3, %v8674_v58  ;;  %v15261_v58 = vld [vmem:[#allocation25_spill] sm:$0xff] }
 0x36d   : > { %8269 = vmatpush3.bf16.msra.mxu0 %v8577_v54 }
 0x36e   : > { %8270 = vmatprep.subr.bf16.mxu0 %v8578_v48 }
 0x371   : > { %8271 = vmatpush3.bf16.msra.mxu0 %v8578_v48 }
 0x372   : > { %8416 = vmatprep.subr.bf16.mxu0 %v15255_v2 }
 0x43f   : > { %v1479_v34 = vpop.f32.mrb[2].mxu0 }
 0x440   : > { %v8267_v6 = vpop.f32.mrb[3].mxu0  ;;  %v1483_v33 = vmul.f32 %v1479_v34, %v647_v25 }
 0x442   : > { %v9943_v47 = vrot.slane %v1483_v33, %v15256_v55 }
 0x444   : > { %v1488_v52 = vmul.f32 %v9943_v47, %v15257_v27  ;;  %v1489_v0 = vmul.f32 %v9943_v47, %v15258_v19  ;;  %v1524_v14 = vmul.f32 %v9943_v47, %v9869_v8  ;;  %v1525_v44 = vmul.f32 %v9943_v47, %v9876_v49 }
 0x445   : > { %v1526_v5 = vmul.f32 %v9943_v47, %v9885_v35  ;;  %v1527_v61 = vmul.f32 %v9943_v47, %v9894_v36  ;;  %v1528_v24 = vmul.f32 %v9943_v47, %v9901_v40  ;;  %v1529_v8 = vmul.f32 %v9943_v47, %v9912_v50 }
 0x446   : > { %v1490_v49 = vmul.f32 %v9943_v47, %v15259_v41  ;;  %v1491_v29 = vmul.f32 %v9943_v47, %v15260_v21  ;;  %v1492_v54 = vmul.f32 %v9943_v47, %v15261_v58  ;;  %v1493_v35 = vmul.f32 %v9943_v47, %v9611_v59 }
 0x447   : > { %v9975_v36 = vadd.f32 %v9956_v37, %v1488_v52  ;;  %v9978_v40 = vadd.f32 %v9956_v37, %v1489_v0  ;;  %v9981_v50 = vadd.f32 %v9956_v37, %v1524_v14  ;;  %v9984_v48 = vadd.f32 %v9956_v37, %v1525_v44 }
 0x448   : > { %v9987_v34 = vadd.f32 %v9956_v37, %v1526_v5  ;;  %v9990_v6 = vadd.f32 %v9956_v37, %v1527_v61  ;;  %v9993_v59 = vadd.f32 %v9956_v37, %v1528_v24  ;;  %v9996_v25 = vadd.f32 %v9956_v37, %v1529_v8 }
 0x449   : > { %15262 = vst [vmem:[#allocation5_spill] sm:$0xff] %v9981_v50  ;;  %15263 = vst [vmem:[#allocation6_spill] sm:$0xff] %v9984_v48  ;;  %v1494_v33 = vmul.f32 %v9943_v47, %v9619_v15  ;;  %v10001_v27 = vadd.f32 %v9956_v37, %v1490_v49  ;;  %v1495_v52 = vmul.f32 %v9943_v47, %v9625_v39  ;;  %v7858_v44 = vmul.f32 -1.442695, %v9975_v36 }
 0x44a   : > { %15264 = vst [vmem:[#allocation19_spill] sm:$0xff] %v9987_v34  ;;  %15265 = vst [vmem:[#allocation20_spill] sm:$0xff] %v9990_v6  ;;  %v10006_v19 = vadd.f32 %v9956_v37, %v1491_v29  ;;  %v1496_v0 = vmul.f32 %v9943_v47, %v9635_v23  ;;  %v10011_v14 = vadd.f32 %v9956_v37, %v1492_v54  ;;  %v7859_v61 = vmul.f32 -1.442695, %v9978_v40 }
 0x44b   : > { %15266 = vst [vmem:[#allocation22_spill] sm:$0xff] %v9993_v59  ;;  %15267 = vst [vmem:[#allocation24_spill] sm:$0xff] %v9996_v25  ;;  %v1497_v15 = vmul.f32 %v9943_v47, %v9644_v56  ;;  %v10017_v5 = vadd.f32 %v9956_v37, %v1493_v35  ;;  %v1498_v39 = vmul.f32 %v9943_v47, %v9651_v13  ;;  %v7860_v23 = vmul.f32 -1.442695, %v10001_v27 }
 0x44c   : > { %v10023_v24 = vadd.f32 %v9956_v37, %v1494_v33  ;;  %v1499_v8 = vmul.f32 %v9943_v47, %v9660_v20  ;;  %v10029_v41 = vadd.f32 %v9956_v37, %v1495_v52  ;;  %v7861_v56 = vmul.f32 -1.442695, %v10006_v19 }
 0x44d   : > { %v1500_v49 = vmul.f32 %v9943_v47, %v9669_v10  ;;  %v10035_v21 = vadd.f32 %v9956_v37, %v1496_v0  ;;  %v7862_v13 = vmul.f32 -1.442695, %v10011_v14  ;;  %8675 = vpow2.f32 %v7858_v44 }
 0x44e   : > { %v1501_v29 = vmul.f32 %v9943_v47, %v9676_v31  ;;  %v10041_v58 = vadd.f32 %v9956_v37, %v1497_v15  ;;  %v7863_v20 = vmul.f32 -1.442695, %v10017_v5  ;;  %8677 = vpow2.f32 %v7859_v61 }
 0x44f   : > { %v1502_v54 = vmul.f32 %v9943_v47, %v9685_v42  ;;  %v10047_v10 = vadd.f32 %v9956_v37, %v1498_v39  ;;  %v7864_v35 = vmul.f32 -1.442695, %v10023_v24  ;;  %8679 = vpow2.f32 %v7860_v23 }
 0x450   : > { %v1503_v33 = vmul.f32 %v9943_v47, %v9694_v1  ;;  %v10053_v31 = vadd.f32 %v9956_v37, %v1499_v8  ;;  %v7865_v52 = vmul.f32 -1.442695, %v10029_v41  ;;  %8681 = vpow2.f32 %v7861_v56 }
 0x451   : > { %v1504_v0 = vmul.f32 %v9943_v47, %v9701_v53  ;;  %v10059_v42 = vadd.f32 %v9956_v37, %v1500_v49  ;;  %v7866_v44 = vmul.f32 -1.442695, %v10035_v21  ;;  %8683 = vpow2.f32 %v7862_v13 }
 0x452   : > { %v1505_v15 = vmul.f32 %v9943_v47, %v9710_v17  ;;  %v10065_v1 = vadd.f32 %v9956_v37, %v1501_v29  ;;  %v7867_v61 = vmul.f32 -1.442695, %v10041_v58  ;;  %8685 = vpow2.f32 %v7863_v20 }
 0x453   : > { %v1506_v39 = vmul.f32 %v9943_v47, %v9719_v57  ;;  %v10071_v53 = vadd.f32 %v9956_v37, %v1502_v54  ;;  %v7868_v23 = vmul.f32 -1.442695, %v10047_v10  ;;  %8687 = vpow2.f32 %v7864_v35 }
 0x454   : > { %v1507_v8 = vmul.f32 %v9943_v47, %v9726_v12  ;;  %v10077_v17 = vadd.f32 %v9956_v37, %v1503_v33  ;;  %v7869_v56 = vmul.f32 -1.442695, %v10053_v31  ;;  %8689 = vpow2.f32 %v7865_v52 }
 0x455   : > { %v1508_v49 = vmul.f32 %v9943_v47, %v9735_v63  ;;  %v10083_v57 = vadd.f32 %v9956_v37, %v1504_v0  ;;  %v7870_v13 = vmul.f32 -1.442695, %v10059_v42  ;;  %8691 = vpow2.f32 %v7866_v44 }
 0x456   : > { %v1509_v29 = vmul.f32 %v9943_v47, %v9744_v62  ;;  %v10089_v12 = vadd.f32 %v9956_v37, %v1505_v15  ;;  %v7871_v20 = vmul.f32 -1.442695, %v10065_v1  ;;  %8693 = vpow2.f32 %v7867_v61 }
 0x457   : > { %v10092_v54 = vpop.eup %8675  ;;  %v1510_v63 = vmul.f32 %v9943_v47, %v9751_v16  ;;  %v10097_v35 = vadd.f32 %v9956_v37, %v1506_v39  ;;  %v7872_v33 = vmul.f32 -1.442695, %v10071_v53  ;;  %8695 = vpow2.f32 %v7868_v23 }
 0x458   : > { %v10100_v52 = vpop.eup %8677  ;;  %v1511_v62 = vmul.f32 %v9943_v47, %v9760_v9  ;;  %v10105_v0 = vadd.f32 %v9956_v37, %v1507_v8  ;;  %v7873_v44 = vmul.f32 -1.442695, %v10077_v17  ;;  %8697 = vpow2.f32 %v7869_v56 }
 0x459   : > { %15268 = vst [vmem:[#allocation25_spill] sm:$0xff] %v10097_v35  ;;  %v10108_v15 = vpop.eup %8679  ;;  %v1512_v16 = vmul.f32 %v9943_v47, %v9769_v22  ;;  %v10113_v61 = vadd.f32 %v9956_v37, %v1508_v49  ;;  %v7874_v39 = vmul.f32 -1.442695, %v10083_v57  ;;  %8699 = vpow2.f32 %v7870_v13 }
 0x45a   : > { %15269 = vst [vmem:[#allocation50_spill] sm:$0xff] %v10105_v0  ;;  %v10116_v23 = vpop.eup %8681  ;;  %v1513_v9 = vmul.f32 %v9943_v47, %v9776_v11  ;;  %v10121_v8 = vadd.f32 %v9956_v37, %v1509_v29  ;;  %v7875_v56 = vmul.f32 -1.442695, %v10089_v12  ;;  %8701 = vpow2.f32 %v7871_v20 }
 0x45b   : > { %15270 = vst [vmem:[#allocation51_spill] sm:$0xff] %v10113_v61  ;;  %v10124_v55 = vpop.eup %8683  ;;  %v1514_v22 = vmul.f32 %v9943_v47, %v9785_v26  ;;  %v10129_v49 = vadd.f32 %v9956_v37, %v1510_v63  ;;  %v7876_v13 = vmul.f32 -1.442695, %v10097_v35  ;;  %8703 = vpow2.f32 %v7872_v33 }
 0x45c   : > { %15271 = vst [vmem:[#allocation52_spill] sm:$0xff] %v10121_v8  ;;  %v10132_v2 = vpop.eup %8685  ;;  %v1515_v11 = vmul.f32 %v9943_v47, %v9794_v18  ;;  %v10137_v29 = vadd.f32 %v9956_v37, %v1511_v62  ;;  %v7877_v20 = vmul.f32 -1.442695, %v10105_v0  ;;  %8705 = vpow2.f32 %v7873_v44 }
 0x45d   : > { %15272 = vst [vmem:[#allocation53_spill] sm:$0xff] %v10129_v49  ;;  %v10140_v3 = vpop.eup %8687  ;;  %v1516_v26 = vmul.f32 %v9943_v47, %v9801_v30  ;;  %v10145_v63 = vadd.f32 %v9956_v37, %v1512_v16  ;;  %v7878_v33 = vmul.f32 -1.442695, %v10113_v61  ;;  %8707 = vpow2.f32 %v7874_v39 }
 0x45e   : > { %15273 = vst [vmem:[#allocation54_spill] sm:$0xff] %v10137_v29  ;;  %v10148_v35 = vpop.eup %8689  ;;  %v1517_v18 = vmul.f32 %v9943_v47, %v9810_v28  ;;  %v10153_v62 = vadd.f32 %v9956_v37, %v1513_v9  ;;  %v7879_v44 = vmul.f32 -1.442695, %v10121_v8  ;;  %8709 = vpow2.f32 %v7875_v56 }
 0x45f   : > { %15274 = vst [vmem:[#allocation55_spill] sm:$0xff] %v10145_v63  ;;  %v10156_v0 = vpop.eup %8691  ;;  %v1518_v30 = vmul.f32 %v9943_v47, %v9819_v60  ;;  %v10161_v16 = vadd.f32 %v9956_v37, %v1514_v22  ;;  %v7880_v39 = vmul.f32 -1.442695, %v10129_v49  ;;  %8711 = vpow2.f32 %v7876_v13 }
 0x460   : > { %15275 = vst [vmem:[#allocation56_spill] sm:$0xff] %v10153_v62  ;;  %v10164_v61 = vpop.eup %8693  ;;  %v1519_v28 = vmul.f32 %v9943_v47, %v9826_v32  ;;  %v10169_v9 = vadd.f32 %v9956_v37, %v1515_v11  ;;  %v7881_v56 = vmul.f32 -1.442695, %v10137_v29  ;;  %8713 = vpow2.f32 %v7877_v20 }
 0x461   : > { %15276 = vst [vmem:[#allocation57_spill] sm:$0xff] %v10161_v16  ;;  %v10172_v8 = vpop.eup %8695  ;;  %v1520_v60 = vmul.f32 %v9943_v47, %v9835_v38  ;;  %v10177_v22 = vadd.f32 %v9956_v37, %v1516_v26  ;;  %v7882_v13 = vmul.f32 -1.442695, %v10145_v63  ;;  %8715 = vpow2.f32 %v7878_v33 }
 0x462   : > { %15277 = vst [vmem:[#allocation58_spill] sm:$0xff] %v10169_v9  ;;  %v10180_v49 = vpop.eup %8697  ;;  %v1521_v32 = vmul.f32 %v9943_v47, %v9844_v51  ;;  %v10185_v11 = vadd.f32 %v9956_v37, %v1517_v18  ;;  %v7883_v20 = vmul.f32 -1.442695, %v10153_v62  ;;  %8717 = vpow2.f32 %v7879_v44 }
 0x463   : > { %15278 = vst [vmem:[#allocation59_spill] sm:$0xff] %v10177_v22  ;;  %v10188_v29 = vpop.eup %8699  ;;  %v1522_v38 = vmul.f32 %v9943_v47, %v9851_v45  ;;  %v10193_v26 = vadd.f32 %v9956_v37, %v1518_v30  ;;  %v7884_v33 = vmul.f32 -1.442695, %v10161_v16  ;;  %8719 = vpow2.f32 %v7880_v39 }
 0x464   : > { %15279 = vst [vmem:[#allocation60_spill] sm:$0xff] %v10185_v11  ;;  %v10196_v63 = vpop.eup %8701  ;;  %v1523_v51 = vmul.f32 %v9943_v47, %v9860_v43  ;;  %v10201_v18 = vadd.f32 %v9956_v37, %v1519_v28  ;;  %v7885_v44 = vmul.f32 -1.442695, %v10169_v9  ;;  %8721 = vpow2.f32 %v7881_v56 }
 0x465   : > { %15280 = vst [vmem:[#allocation61_spill] sm:$0xff] %v10193_v26  ;;  %v10204_v62 = vpop.eup %8703  ;;  %v10207_v45 = vadd.f32 %v9956_v37, %v1520_v60  ;;  %v7886_v30 = vmul.f32 -1.442695, %v10177_v22  ;;  %8723 = vpow2.f32 %v7882_v13  ;;  %v10213_v16 = vadd.f32 %v9956_v37, %v1521_v32 }
 0x466   : > { %15281 = vst [vmem:[#allocation62_spill] sm:$0xff] %v10201_v18  ;;  %v10210_v39 = vpop.eup %8705  ;;  %v7887_v43 = vmul.f32 -1.442695, %v10185_v11  ;;  %8725 = vpow2.f32 %v7883_v20  ;;  %v10219_v28 = vadd.f32 %v9956_v37, %v1522_v38  ;;  %v7888_v56 = vmul.f32 -1.442695, %v10193_v26 }
 0x467   : > { %15282 = vst [vmem:[#allocation63_spill] sm:$0xff] %v10207_v45  ;;  %15283 = vst [vmem:[#allocation64_spill] sm:$0xff] %v10213_v16  ;;  %v10216_v47 = vpop.eup %8707  ;;  %8727 = vpow2.f32 %v7884_v33  ;;  %v10225_v13 = vadd.f32 %v9956_v37, %v1523_v51  ;;  %v7889_v22 = vmul.f32 -1.442695, %v10201_v18  ;;  %v7890_v20 = vmul.f32 -1.442695, %v10207_v45 }
 0x468   : > { %15284 = vst [vmem:[#allocation65_spill] sm:$0xff] %v10219_v28  ;;  %v10222_v60 = vpop.eup %8709  ;;  %8729 = vpow2.f32 %v7885_v44  ;;  %v7891_v38 = vmul.f32 -1.442695, %v10213_v16  ;;  %v7892_v33 = vmul.f32 -1.442695, %v10219_v28  ;;  %v1715_v28 = vadd.f32 1.0, %v10180_v49 }
 0x469   : > { %15285 = vst [vmem:[#allocation66_spill] sm:$0xff] %v10225_v13  ;;  %v10228_v32 = vpop.eup %8711  ;;  %8731 = vpow2.f32 %v7886_v30  ;;  %v7893_v51 = vmul.f32 -1.442695, %v10225_v13  ;;  %v7894_v45 = vmul.f32 -1.442695, %v9981_v50  ;;  %v1718_v50 = vadd.f32 1.0, %v10204_v62 }
 0x46a   : > { %v10231_v11 = vpop.eup %8713  ;;  %8733 = vpow2.f32 %v7887_v43  ;;  %v7895_v16 = vmul.f32 -1.442695, %v9984_v48 }
 0x46b   : > { %v10234_v26 = vpop.eup %8715  ;;  %8735 = vpow2.f32 %v7888_v56  ;;  %v1704_v56 = vadd.f32 1.0, %v10092_v54 }
 0x46c   : > { %v10237_v37 = vpop.eup %8717  ;;  %8737 = vpow2.f32 %v7889_v22  ;;  %v1705_v22 = vadd.f32 1.0, %v10100_v52 }
 0x46d   : > { %v10240_v44 = vpop.eup %8719  ;;  %8739 = vpow2.f32 %v7890_v20  ;;  %v1706_v20 = vadd.f32 1.0, %v10108_v15 }
 0x46e   : > { %v10243_v30 = vpop.eup %8721  ;;  %8741 = vpow2.f32 %v7891_v38  ;;  %v1707_v38 = vadd.f32 1.0, %v10116_v23 }
 0x46f   : > { %v10246_v43 = vpop.eup %8723  ;;  %8743 = vpow2.f32 %v7892_v33  ;;  %v1708_v33 = vadd.f32 1.0, %v10124_v55  ;;  %v7896_v55 = vmul.f32 -1.442695, %v9987_v34 }
 0x470   : > { %v10249_v18 = vpop.eup %8725  ;;  %8745 = vpow2.f32 %v7893_v51  ;;  %v1709_v51 = vadd.f32 1.0, %v10132_v2  ;;  %v7897_v2 = vmul.f32 -1.442695, %v9990_v6  ;;  %v7899_v6 = vmul.f32 -1.442695, %v9996_v25 }
 0x471   : > { %v10252_v9 = vpop.eup %8727  ;;  %8747 = vpow2.f32 %v7894_v45  ;;  %v1710_v45 = vadd.f32 1.0, %v10140_v3  ;;  %v7898_v3 = vmul.f32 -1.442695, %v9993_v59  ;;  %v1714_v59 = vadd.f32 1.0, %v10172_v8 }
 0x472   : > { %v10255_v13 = vpop.eup %8729  ;;  %8749 = vpow2.f32 %v7895_v16  ;;  %v1711_v16 = vadd.f32 1.0, %v10148_v35  ;;  %v1712_v35 = vadd.f32 1.0, %v10156_v0  ;;  %v1719_v8 = vadd.f32 1.0, %v10210_v39  ;;  %v15288_v39 = vld [vmem:[#allocation10_spill] sm:$0xff] }
 0x473   : > { %v10258_v48 = vpop.eup %8731  ;;  %8751 = vrcp.f32 %v1704_v56 }
 0x474   : > { %v10261_v54 = vpop.eup %8733  ;;  %8753 = vrcp.f32 %v1705_v22 }
 0x475   : > { %v10264_v52 = vpop.eup %8735  ;;  %8755 = vrcp.f32 %v1706_v20 }
 0x476   : > { %v10267_v15 = vpop.eup %8737  ;;  %8757 = vrcp.f32 %v1707_v38 }
 0x477   : > { %v10270_v23 = vpop.eup %8739  ;;  %8759 = vrcp.f32 %v1708_v33  ;;  %v1713_v33 = vadd.f32 1.0, %v10164_v61 }
 0x478   : > { %v10273_v56 = vpop.eup %8741  ;;  %8761 = vrcp.f32 %v1709_v51 }
 0x479   : > { %15286 = vst [vmem:[#allocation67_spill] sm:$0xff] %v10273_v56  ;;  %v10276_v22 = vpop.eup %8743  ;;  %8763 = vrcp.f32 %v1710_v45 }
 0x47a   : > { %v10279_v20 = vpop.eup %8745  ;;  %8765 = vrcp.f32 %v1711_v16  ;;  %v1716_v16 = vadd.f32 1.0, %v10188_v29 }
 0x47b   : > { %v10282_v38 = vpop.eup %8747  ;;  %8767 = vpow2.f32 %v7896_v55  ;;  %v1717_v55 = vadd.f32 1.0, %v10196_v63  ;;  %v1720_v63 = vadd.f32 1.0, %v10216_v47  ;;  %v15290_v47 = vld [vmem:[#allocation7_spill] sm:$0xff] }
 0x47c   : > { %v10285_v34 = vpop.eup %8749  ;;  %8769 = vpow2.f32 %v7897_v2 }
 0x47d   : > { %v8752_v51 = vpop.eup %8751  ;;  %8771 = vpow2.f32 %v7898_v3 }
 0x47e   : > { %v8754_v45 = vpop.eup %8753  ;;  %8773 = vrcp.f32 %v1712_v35  ;;  %v1830_v2 = vmul.f32 %v8752_v51, %v9975_v36  ;;  %v1721_v36 = vadd.f32 1.0, %v10222_v60 }
 0x47f   : > { %v8756_v0 = vpop.eup %8755  ;;  %8775 = vrcp.f32 %v1713_v33  ;;  %v1831_v49 = vmul.f32 %v8754_v45, %v9978_v40  ;;  %v15287_v33 = vld [vmem:[#allocation8_spill] sm:$0xff] }
 0x480   : > { %v8758_v61 = vpop.eup %8757  ;;  %8777 = vpow2.f32 %v7899_v6  ;;  %v1832_v3 = vmul.f32 %v8756_v0, %v10001_v27 }
 0x481   : > { %v8760_v25 = vpop.eup %8759  ;;  %8779 = vrcp.f32 %v1714_v59  ;;  %v1833_v35 = vmul.f32 %v8758_v61, %v10006_v19  ;;  %v15289_v19 = vld [vmem:[#allocation11_spill] sm:$0xff] }
 0x482   : > { %v8762_v29 = vpop.eup %8761  ;;  %8781 = vrcp.f32 %v1715_v28  ;;  %v1834_v6 = vmul.f32 %v8760_v25, %v10011_v14  ;;  %v1874_v62 = vmul.f32 %v1832_v3, %v15287_v33  ;;  %v1872_v28 = vmul.f32 %v1830_v2, %v15290_v47 }
 0x483   : > { %v8764_v56 = vpop.eup %8763  ;;  %8783 = vrcp.f32 %v1716_v16  ;;  %v1835_v27 = vmul.f32 %v8762_v29, %v10017_v5  ;;  %v1875_v59 = vmul.f32 %v1833_v35, %v15288_v39  ;;  %v15292_v16 = vld [vmem:[#allocation9_spill] sm:$0xff]  ;;  %v1723_v2 = vadd.f32 1.0, %v10231_v11 }
 0x484   : > { %v8766_v51 = vpop.eup %8765  ;;  %8785 = vrcp.f32 %v1717_v55  ;;  %v1836_v40 = vmul.f32 %v8764_v56, %v10023_v24  ;;  %v1876_v45 = vmul.f32 %v1834_v6, %v15289_v19  ;;  %v1873_v5 = vmul.f32 %v1831_v49, %v15292_v16  ;;  %v15293_v24 = vld [vmem:[#allocation12_spill] sm:$0xff] }
 0x485   : > { %v10307_v0 = vpop.eup %8767  ;;  %v1837_v25 = vmul.f32 %v8766_v51, %v10029_v41  ;;  %v1877_v14 = vmul.f32 %v1835_v27, %v9554_v4  ;;  %v10311_v60 = vpack.c.bf16 %v1875_v59, %v1874_v62  ;;  %v1722_v55 = vadd.f32 1.0, %v10228_v32  ;;  %v15294_v41 = vld [vmem:[#allocation13_spill] sm:$0xff] }
 0x486   : > { %v10314_v61 = vpop.eup %8769  ;;  %8787 = vrcp.f32 %v1718_v50  ;;  %v1878_v56 = vmul.f32 %v1836_v40, %v15293_v24  ;;  %v1724_v49 = vadd.f32 1.0, %v10234_v26  ;;  %v1725_v6 = vadd.f32 1.0, %v10237_v37 }
 0x487   : > { %15291 = vst [vmem:[#allocation8_spill] sm:$0xff] %v10311_v60  ;;  %v10318_v3 = vpop.eup %8771  ;;  %8789 = vrcp.f32 %v1719_v8  ;;  %v1879_v35 = vmul.f32 %v1837_v25, %v15294_v41  ;;  %v10322_v4 = vpack.c.bf16 %v1877_v14, %v1876_v45  ;;  %v2336_v50 = vrot.slane %v10311_v60, 2 }
 0x488   : > { %v8774_v29 = vpop.eup %8773  ;;  %8791 = vrcp.f32 %v1720_v63  ;;  %v10330_v11 = vpack.c.bf16 %v1873_v5, %v1872_v28  ;;  %v1726_v27 = vadd.f32 1.0, %v10240_v44  ;;  %v1727_v63 = vadd.f32 1.0, %v10243_v30 }
 0x489   : > { %15295 = vst [vmem:[#allocation10_spill] sm:$0xff] %v10322_v4  ;;  %v8776_v32 = vpop.eup %8775  ;;  %8793 = vrcp.f32 %v1721_v36  ;;  %v10327_v33 = vpack.c.bf16 %v1879_v35, %v1878_v56  ;;  %v2566_v62 = vrot.slane %v10322_v4, 3  ;;  %v2337_v26 = vrot.slane %v10322_v4, 2 }
 0x48a   : > { %v10332_v8 = vpop.eup %8777  ;;  %8795 = vrcp.f32 %v1722_v55  ;;  %v1728_v39 = vadd.f32 1.0, %v10246_v43  ;;  %v1838_v51 = vmul.f32 %v8774_v29, %v10035_v21  ;;  %v1839_v40 = vmul.f32 %v8776_v32, %v10041_v58 }
 0x48b   : > { %15296 = vst [vmem:[#allocation11_spill] sm:$0xff] %v10327_v33  ;;  %v8780_v37 = vpop.eup %8779  ;;  %8797 = vrcp.f32 %v1723_v2  ;;  %v2567_v36 = vrot.slane %v10327_v33, 3  ;;  %v2338_v44 = vsel %vm2335_vm4, %v2336_v50, %v2337_v26  ;;  %v1729_v45 = vadd.f32 1.0, %v10249_v18 }
 0x48c   : > { %v8782_v59 = vpop.eup %8781  ;;  %8799 = vrcp.f32 %v1724_v49  ;;  %2373 = vrot.lane.b32.xlu1 %v2338_v44, %s9059_s17  ;;  %v2140_v43 = vrot.slane %v10330_v11, 1  ;;  %v1730_v58 = vadd.f32 1.0, %v10252_v9  ;;  %v1731_v47 = vadd.f32 1.0, %v10255_v13  ;;  %v15297_v9 = vld [vmem:[#allocation14_spill] sm:$0xff] }
 0x48d   : > { %v8784_v19 = vpop.eup %8783  ;;  %8801 = vrcp.f32 %v1725_v6  ;;  %v2568_v30 = vsel %vm2565_vm5, %v2566_v62, %v2567_v36  ;;  %v1732_v18 = vadd.f32 1.0, %v10258_v48  ;;  %v1840_v28 = vmul.f32 %v8780_v37, %v10047_v10 }
 0x48e   : > { %v8786_v21 = vpop.eup %8785  ;;  %8803 = vrcp.f32 %v1726_v27  ;;  %8272 = vmatprep.mubr.msk.bf16.mxu0 %vm654_vm1, %v2568_v30  ;;  %v2141_v25 = vrot.slane %v10311_v60, 1  ;;  %v1841_v16 = vmul.f32 %v8782_v59, %v10053_v31  ;;  %v1880_v5 = vmul.f32 %v1838_v51, %v9560_v7  ;;  %v15305_v30 = vld [vmem:[#allocation67_spill] sm:$0xff] }
 0x48f   : > { %8805 = vrcp.f32 %v1727_v63  ;;  %v1881_v55 = vmul.f32 %v1839_v40, %v15297_v9  ;;  %v10360_v24 = vadd.f32 1.0, %v10261_v54  ;;  %v1738_v56 = vadd.f32 1.0, %v10276_v22  ;;  %v15300_v63 = vld [vmem:[#allocation17_spill] sm:$0xff] }
 0x490   : > { %v8788_v14 = vpop.eup %8787  ;;  %8807 = vrcp.f32 %v1728_v39  ;;  %v2142_v48 = vsel %vm2139_vm6, %v2140_v43, %v2141_v25  ;;  %v10367_v2 = vadd.f32 1.0, %v10264_v52  ;;  %v1739_v31 = vadd.f32 1.0, %v10279_v20  ;;  %v15298_v52 = vld [vmem:[#allocation15_spill] sm:$0xff]  ;;  %v15303_v40 = vld [vmem:[#allocation21_spill] sm:$0xff] }
 0x491   : > { %v8790_v13 = vpop.eup %8789  ;;  %8809 = vrcp.f32 %v1729_v45  ;;  %v1740_v7 = vadd.f32 1.0, %v10282_v38  ;;  %2177 = vrot.lane.b32.xlu0 %v2142_v48, %s9060_s20  ;;  %v1741_v22 = vadd.f32 1.0, %v10285_v34  ;;  %v1842_v41 = vmul.f32 %v8784_v19, %v10059_v42 }
 0x492   : > { %v8792_v10 = vpop.eup %8791  ;;  %8811 = vrcp.f32 %v1730_v58  ;;  %v1843_v35 = vmul.f32 %v8786_v21, %v10065_v1  ;;  %v1882_v49 = vmul.f32 %v1840_v28, %v15298_v52  ;;  %v1883_v20 = vmul.f32 %v1841_v16, %v9566_v46 }
 0x493   : > { %v8794_v54 = vpop.eup %8793  ;;  %8813 = vrcp.f32 %v1731_v47  ;;  %v10377_v6 = vpack.c.bf16 %v1881_v55, %v1880_v5  ;;  %v1742_v50 = vadd.f32 1.0, %v10307_v0  ;;  %v1844_v32 = vmul.f32 %v8788_v14, %v10071_v53  ;;  %v15308_v14 = vld [vmem:[#allocation26_spill] sm:$0xff]  ;;  %v15309_v5 = vld [vmem:[#allocation51_spill] sm:$0xff] }
 0x494   : > { %v8796_v29 = vpop.eup %8795  ;;  %8815 = vrcp.f32 %v1732_v18  ;;  %v1845_v34 = vmul.f32 %v8790_v13, %v10077_v17  ;;  %v10383_v42 = vadd.f32 1.0, %v10267_v15  ;;  %v1743_v1 = vadd.f32 1.0, %v10314_v61  ;;  %v15301_v17 = vld [vmem:[#allocation18_spill] sm:$0xff] }
 0x495   : > { %15299 = vst [vmem:[#allocation7_spill] sm:$0xff] %v10377_v6  ;;  %v8798_v38 = vpop.eup %8797  ;;  %8817 = vrcp.f32 %v1738_v56  ;;  %v1744_v27 = vadd.f32 1.0, %v10318_v3  ;;  %v1745_v37 = vadd.f32 1.0, %v10332_v8  ;;  %v1846_v0 = vmul.f32 %v8792_v10, %v10083_v57  ;;  %v15304_v8 = vld [vmem:[#allocation23_spill] sm:$0xff]  ;;  %v15307_v18 = vld [vmem:[#allocation50_spill] sm:$0xff]  ;;  %v15311_v56 = vld [vmem:[#allocation52_spill] sm:$0xff] }
 0x496   : > { %v8800_v62 = vpop.eup %8799  ;;  %8819 = vrcp.f32 %v1739_v31  ;;  %v1884_v39 = vmul.f32 %v1842_v41, %v15300_v63  ;;  %v1885_v59 = vmul.f32 %v1843_v35, %v15301_v17  ;;  %v10391_v51 = vpack.c.bf16 %v1883_v20, %v1882_v49  ;;  %v15312_v10 = vld [vmem:[#allocation27_spill] sm:$0xff]  ;;  %v15314_v35 = vld [vmem:[#allocation53_spill] sm:$0xff] }
 0x497   : > { %v8802_v46 = vpop.eup %8801  ;;  %8821 = vrcp.f32 %v1740_v7  ;;  %v2569_v15 = vrot.slane %v10377_v6, 3  ;;  %v1847_v3 = vmul.f32 %v8794_v54, %v10089_v12  ;;  %v1886_v44 = vmul.f32 %v1844_v32, %v15303_v40  ;;  %v15306_v12 = vld [vmem:[#allocation25_spill] sm:$0xff] }
 0x498   : > { %v8804_v53 = vpop.eup %8803  ;;  %8823 = vrcp.f32 %v1741_v22  ;;  %15302 = vst [vmem:[#allocation9_spill] sm:$0xff] %v10391_v51  ;;  %v1887_v19 = vmul.f32 %v1845_v34, %v15304_v8  ;;  %v10398_v57 = vadd.f32 1.0, %v10270_v23  ;;  %v10401_v43 = vadd.f32 1.0, %v15305_v30  ;;  %v8579_v22 = vld [vmem:[%s14928_s8] sm:$0xff]  }
 0x499   : > { %v8806_v61 = vpop.eup %8805  ;;  %8825 = vrcp.f32 %v1742_v50  ;;  %v2570_v21 = vsel %vm2565_vm5, %v2567_v36, %v2569_v15  ;;  %v1848_v47 = vmul.f32 %v8796_v29, %v15306_v12  ;;  %v1849_v28 = vmul.f32 %v8798_v38, %v15307_v18  ;;  %v15315_v38 = vld [vmem:[#allocation28_spill] sm:$0xff]  ;;  %v15316_v32 = vld [vmem:[#allocation29_spill] sm:$0xff]  ;;  %3081 = vmatpush1.bf16.msra.mxu1 %v8579_v22  ;;  %v15326_v18 = vld [vmem:[#allocation6_spill] sm:$0xff] }
 0x49a   : > { %v8808_v45 = vpop.eup %8807  ;;  %8827 = vrcp.f32 %v1743_v1  ;;  %v1888_v16 = vmul.f32 %v1846_v0, %v15308_v14  ;;  %8273 = vmatmul.mubr.msk.bf16.vlgmr.msra.gmra.mrb[4].mxu0 %vm654_vm1, %v2570_v21  ;;  %v1850_v9 = vmul.f32 %v8800_v62, %v15309_v5  ;;  %v10415_v55 = vpack.c.bf16 %v1885_v59, %v1884_v39  ;;  %v15317_v1 = vld [vmem:[#allocation54_spill] sm:$0xff]  ;;  %v15319_v39 = vld [vmem:[#allocation55_spill] sm:$0xff]  ;;  %v15323_v40 = vld [vmem:[#allocation5_spill] sm:$0xff] }
 0x49b   : > { %v10406_v58 = vpop.eup %8809  ;;  %8829 = vrcp.f32 %v1744_v27  ;;  %v2571_v36 = vrot.slane %v10391_v51, 3  ;;  %v1851_v48 = vmul.f32 %v8802_v46, %v15311_v56  ;;  %v1889_v31 = vmul.f32 %v1847_v3, %v15312_v10  ;;  %v15318_v46 = vld [vmem:[#allocation30_spill] sm:$0xff]  ;;  %v15324_v8 = vld [vmem:[#allocation32_spill] sm:$0xff]  ;;  %v15325_v12 = vld [vmem:[#allocation65_spill] sm:$0xff] }
 0x49c   : > { %v10412_v23 = vpop.eup %8811  ;;  %8831 = vrcp.f32 %v1745_v37  ;;  %15310 = vst [vmem:[#allocation12_spill] sm:$0xff] %v10415_v55  ;;  %v10422_v7 = vpack.c.bf16 %v1887_v19, %v1886_v44  ;;  %v2339_v54 = vrot.slane %v10327_v33, 2  ;;  %v1852_v29 = vmul.f32 %v8804_v53, %v15314_v35  ;;  %v15320_v53 = vld [vmem:[#allocation31_spill] sm:$0xff] }
 0x49d   : > { %v10418_v13 = vpop.eup %8813  ;;  %8833 = vrcp.f32 %v10360_v24  ;;  %v2572_v52 = vsel %vm2565_vm5, %v2569_v15, %v2571_v36  ;;  %v2143_v49 = vrot.slane %v10322_v4, 1  ;;  %v1890_v50 = vmul.f32 %v1848_v47, %v15315_v38 }
 0x49e   : > { %15313 = vst [vmem:[#allocation13_spill] sm:$0xff] %v10422_v7  ;;  %v10428_v41 = vpop.eup %8815  ;;  %8835 = vrcp.f32 %v10367_v2  ;;  %v1891_v34 = vmul.f32 %v1849_v28, %v15316_v32  ;;  %8276 = vmatprep.mubr.msk.bf16.mxu0 %vm654_vm1, %v2572_v52  ;;  %v2340_v62 = vsel %vm2335_vm4, %v2337_v26, %v2339_v54  ;;  %v1853_v27 = vmul.f32 %v8806_v61, %v15317_v1 }
 0x49f   : > { %v8818_v20 = vpop.eup %8817  ;;  %v10443_v37 = vmul.f32 %v1850_v9, %v15318_v46  ;;  %2412 = vrot.lane.b32.xlu1 %v2340_v62, %s9060_s20  ;;  %v2144_v2 = vsel %vm2139_vm6, %v2141_v25, %v2143_v49  ;;  %v2573_v0 = vrot.slane %v10415_v55, 3  ;;  %v10453_v26 = vmul.f32 %v8808_v45, %v15319_v39  ;;  %v8580_v25 = vld [vmem:[%s14928_s8 + $0x8] sm:$0xff]   ;;  %v15335_v46 = vld [vmem:[#allocation48_spill] sm:$0xff] }
 0x4a0   : > { %v8820_v24 = vpop.eup %8819  ;;  %v1893_v17 = vmul.f32 %v1851_v48, %v15320_v53  ;;  %v10456_v59 = vpack.c.bf16 %v1889_v31, %v1888_v16  ;;  %2216 = vrot.lane.b32.xlu0 %v2144_v2, %s9061_s23  ;;  %v2575_v15 = vrot.slane %v10422_v7, 3  ;;  %v15322_v61 = vmov 0   ;;  %v15328_v9 = vld [vmem:[#allocation66_spill] sm:$0xff]  ;;  %v15329_v48 = vld [vmem:[#allocation19_spill] sm:$0xff]  ;;  %v15337_v39 = vld [vmem:[#allocation49_spill] sm:$0xff] }
 0x4a1   : > { %v8822_v63 = vpop.eup %8821  ;;  %3082 = vmatprep.subr.bf16.mxu1 %v15322_v61  ;;  %v1894_v19 = vmul.f32 %v1852_v29, %v15324_v8  ;;  %v2574_v45 = vsel %vm2565_vm5, %v2571_v36, %v2573_v0  ;;  %v2341_v30 = vrot.slane %v10377_v6, 2  ;;  %v1864_v47 = vmul.f32 %v8818_v20, %v15325_v12  ;;  %v15330_v31 = vld [vmem:[#allocation46_spill] sm:$0xff]  ;;  %v15331_v29 = vld [vmem:[#allocation20_spill] sm:$0xff]  ;;  %v15332_v20 = vld [vmem:[#allocation33_spill] sm:$0xff] }
 0x4a2   : > { %15321 = vst [vmem:[#allocation14_spill] sm:$0xff] %v10456_v59  ;;  %v8824_v3 = vpop.eup %8823  ;;  %v1866_v44 = vmul.f32 %v8822_v63, %v15323_v40  ;;  %v10470_v14 = vpack.c.bf16 %v1891_v34, %v1890_v50  ;;  %8277 = vmatmul.mubr.msk.bf16.gmra.mrb[8].mxu0 %vm654_vm1, %v2574_v45  ;;  %v2576_v16 = vsel %vm2565_vm5, %v2573_v0, %v2575_v15  ;;  %v2145_v22 = vrot.slane %v10327_v33, 1  ;;  %v15333_v50 = vld [vmem:[#allocation47_spill] sm:$0xff]  ;;  %v15336_v63 = vld [vmem:[#allocation24_spill] sm:$0xff]  ;;  %v15339_v45 = vld [vmem:[#allocation45_spill] sm:$0xff] }
 0x4a3   : > { %v8826_v21 = vpop.eup %8825  ;;  %v1867_v28 = vmul.f32 %v8824_v3, %v15326_v18  ;;  %v1865_v56 = vmul.f32 %v8820_v24, %v15328_v9  ;;  %2375 = vrot.lane.b32.xlu1 %v2340_v62, %s9059_s17  ;;  %8280 = vmatprep.mubr.msk.bf16.mxu0 %vm654_vm1, %v2576_v16  ;;  %8837 = vrcp.f32 %v10383_v42  ;;  %v1895_v38 = vmul.f32 %v1853_v27, %v15332_v20  ;;  %v8581_v34 = vld [vmem:[%s14928_s8 + $0x10] sm:$0xff]   ;;  %v15341_v16 = vld [vmem:[#allocation56_spill] sm:$0xff] }
 0x4a4   : > { %15327 = vst [vmem:[#allocation15_spill] sm:$0xff] %v10470_v14  ;;  %v8828_v5 = vpop.eup %8827  ;;  %v1868_v10 = vmul.f32 %v8826_v21, %v15329_v48  ;;  %v1908_v36 = vmul.f32 %v1866_v44, %v15330_v31  ;;  %2179 = vrot.lane.b32.xlu0 %v2144_v2, %s9060_s20  ;;  %3083 = vmatpush1.bf16.msra.mxu1 %v8580_v25  ;;  %v15334_v24 = vld [vmem:[#allocation22_spill] sm:$0xff]  ;;  %v2577_v27 = vrot.slane %v10456_v59, 3  ;;  %v2579_v3 = vrot.slane %v10470_v14, 3  ;;  %v15338_v44 = vld [vmem:[#allocation44_spill] sm:$0xff]  ;;  %v15340_v12 = vld [vmem:[#allocation3_spill] sm:$0xff] }
 0x4a5   : > { %v8830_v35 = vpop.eup %8829  ;;  %v1869_v52 = vmul.f32 %v8828_v5, %v15331_v29  ;;  %v1909_v32 = vmul.f32 %v1867_v28, %v15333_v50  ;;  %v2342_v42 = vsel %vm2335_vm4, %v2339_v54, %v2341_v30  ;;  %3084 = vmatprep.subr.bf16.mxu1 %v15322_v61  ;;  %v1906_v8 = vmul.f32 %v1864_v47, %v15338_v44  ;;  %v15342_v9 = vld [vmem:[#allocation4_spill] sm:$0xff]  ;;  %v15344_v31 = vld [vmem:[#allocation58_spill] sm:$0xff] }
 0x4a6   : > { %v8832_v62 = vpop.eup %8831  ;;  %v1870_v1 = vmul.f32 %v8830_v35, %v15334_v24  ;;  %v1910_v0 = vmul.f32 %v1868_v10, %v15335_v46  ;;  %v1907_v21 = vmul.f32 %v1865_v56, %v15339_v45  ;;  %v2146_v54 = vsel %vm2139_vm6, %v2143_v49, %v2145_v22  ;;  %v8582_v56 = vld [vmem:[%s14928_s8 + $0x18] sm:$0xff]   ;;  %v15343_v10 = vld [vmem:[#allocation57_spill] sm:$0xff] }
 0x4a7   : > { %v1871_v2 = vmul.f32 %v8832_v62, %v15336_v63  ;;  %v1911_v53 = vmul.f32 %v1869_v52, %v15337_v39  ;;  %v10497_v25 = vpack.c.bf16 %v1909_v32, %v1908_v36  ;;  %v8834_v40 = vpop.eup %8833  ;;  %2414 = vrot.lane.b32.xlu1 %v2342_v42, %s9060_s20  ;;  %8839 = vrcp.f32 %v10398_v57  ;;  %v15352_v32 = vld [vmem:[#allocation37_spill] sm:$0xff]  ;;  %v15353_v46 = vld [vmem:[#allocation59_spill] sm:$0xff] }
 0x4a8   : > { %v1912_v18 = vmul.f32 %v1870_v1, %v15340_v12  ;;  %v8836_v28 = vpop.eup %8835  ;;  %v1855_v5 = vmul.f32 %v10406_v58, %v15341_v16  ;;  %2218 = vrot.lane.b32.xlu0 %v2146_v54, %s9061_s23  ;;  %3085 = vmatpush1.bf16.msra.mxu1 %v8581_v34  ;;  %v1856_v49 = vmul.f32 %v10412_v23, %v15343_v10  ;;  %v2343_v23 = vrot.slane %v10391_v51, 2  ;;  %v15355_v39 = vld [vmem:[#allocation61_spill] sm:$0xff] }
 0x4a9   : > { %v1913_v47 = vmul.f32 %v1871_v2, %v15342_v9  ;;  %v10513_v48 = vpack.c.bf16 %v1911_v53, %v1910_v0  ;;  %v1857_v57 = vmul.f32 %v10418_v13, %v15344_v31  ;;  %v10524_v36 = vpack.c.bf16 %v1893_v17, %v10443_v37  ;;  %3086 = vmatprep.subr.bf16.mxu1 %v15322_v61  ;;  %v15349_v17 = vld [vmem:[#allocation34_spill] sm:$0xff] }
 0x4aa   : > { %v2578_v58 = vsel %vm2565_vm5, %v2575_v15, %v2577_v27  ;;  %v10528_v35 = vpack.c.bf16 %v1895_v38, %v1894_v19  ;;  %v2580_v52 = vsel %vm2565_vm5, %v2577_v27, %v2579_v3  ;;  %8841 = vrcp.f32 %v10401_v43  ;;  %v15350_v19 = vld [vmem:[#allocation35_spill] sm:$0xff]  ;;  %v8583_v43 = vld [vmem:[%s14928_s8 + $0x20] sm:$0xff]   ;;  %v15359_v9 = vld [vmem:[#allocation38_spill] sm:$0xff] }
 0x4ab   : > { %15345 = vst [vmem:[#allocation17_spill] sm:$0xff] %v10524_v36  ;;  %v10530_v29 = vpack.c.bf16 %v1913_v47, %v1912_v18  ;;  %8281 = vmatmul.mubr.msk.bf16.gmra.mrb[12].mxu0 %vm654_vm1, %v2578_v58  ;;  %v10536_v13 = vpack.c.bf16 %v1907_v21, %v1906_v8  ;;  %2377 = vrot.lane.b32.xlu1 %v2342_v42, %s9059_s17  ;;  %v2147_v37 = vrot.slane %v10377_v6, 1  ;;  %v15351_v38 = vld [vmem:[#allocation36_spill] sm:$0xff]  ;;  %v2581_v62 = vrot.slane %v10524_v36, 3  ;;  %v15357_v8 = vld [vmem:[#allocation62_spill] sm:$0xff] }
 0x4ac   : > { %15346 = vst [vmem:[#allocation18_spill] sm:$0xff] %v10528_v35  ;;  %8284 = vmatprep.mubr.msk.bf16.mxu0 %vm654_vm1, %v2580_v52  ;;  %v1896_v15 = vmul.f32 %v10453_v26, %v15349_v17  ;;  %v1897_v20 = vmul.f32 %v1855_v5, %v15350_v19  ;;  %2181 = vrot.lane.b32.xlu0 %v2146_v54, %s9060_s20  ;;  %v2583_v1 = vrot.slane %v10528_v35, 3  ;;  %v15354_v42 = vld [vmem:[#allocation60_spill] sm:$0xff]  ;;  %v2345_v12 = vrot.slane %v10415_v55, 2  ;;  %v8585_v31 = vld [vmem:[%s14928_s8 + $0x30] sm:$0xff]  }
 0x4ad   : > { %15347 = vst [vmem:[#allocation21_spill] sm:$0xff] %v10530_v29  ;;  %15348 = vst [vmem:[#allocation23_spill] sm:$0xff] %v10536_v13  ;;  %3087 = vmatpush1.bf16.msra.mxu1 %v8582_v56  ;;  %v1898_v50 = vmul.f32 %v1856_v49, %v15351_v38  ;;  %v1899_v34 = vmul.f32 %v1857_v57, %v15352_v32  ;;  %v8838_v24 = vpop.eup %8837  ;;  %v2344_v26 = vsel %vm2335_vm4, %v2341_v30, %v2343_v23  ;;  %v15360_v56 = vld [vmem:[#allocation39_spill] sm:$0xff]  ;;  %v15361_v52 = vld [vmem:[#allocation40_spill] sm:$0xff] }
 0x4ae   : > { %3088 = vmatprep.subr.bf16.mxu1 %v15322_v61  ;;  %v1858_v0 = vmul.f32 %v10428_v41, %v15353_v46  ;;  %v1859_v27 = vmul.f32 %v8834_v40, %v15354_v42  ;;  %v2148_v63 = vsel %vm2139_vm6, %v2145_v22, %v2147_v37  ;;  %v2595_v2 = vrot.slane %v10536_v13, 3  ;;  %v8584_v40 = vld [vmem:[%s14928_s8 + $0x28] sm:$0xff]  }
 0x4af   : > { %2416 = vrot.lane.b32.xlu1 %v2344_v26, %s9060_s20  ;;  %v1860_v53 = vmul.f32 %v8836_v28, %v15355_v39  ;;  %v10565_v44 = vpack.c.bf16 %v1897_v20, %v1896_v15  ;;  %v2597_v30 = vrot.slane %v10497_v25, 3  ;;  %v2599_v41 = vrot.slane %v10513_v48, 3  ;;  %v15362_v15 = vld [vmem:[#allocation41_spill] sm:$0xff]  ;;  %v15368_v39 = vld [vmem:[#allocation43_spill] sm:$0xff] }
 0x4b0   : > { %2220 = vrot.lane.b32.xlu0 %v2148_v63, %s9061_s23  ;;  %v1861_v45 = vmul.f32 %v8838_v24, %v15357_v8  ;;  %v10574_v22 = vpack.c.bf16 %v1899_v34, %v1898_v50  ;;  %v2582_v21 = vsel %vm2565_vm5, %v2579_v3, %v2581_v62  ;;  %v2584_v54 = vsel %vm2565_vm5, %v2581_v62, %v2583_v1  ;;  %v15363_v50 = vld [vmem:[#allocation63_spill] sm:$0xff]  ;;  %v15364_v34 = vld [vmem:[#allocation64_spill] sm:$0xff] }
 0x4b1   : > { %15356 = vst [vmem:[#allocation67_spill] sm:$0xff] %v10565_v44  ;;  %3089 = vmatpush1.bf16.msra.mxu1 %v8583_v43  ;;  %v8840_v18 = vpop.eup %8839  ;;  %v10584_v28 = vsel %vm2565_vm5, %v2595_v2, %v2597_v30  ;;  %v10587_v16 = vsel %vm2565_vm5, %v2597_v30, %v2599_v41  ;;  %v2601_v5 = vrot.slane %v10530_v29, 3  ;;  %v2149_v3 = vrot.slane %v10391_v51, 1  ;;  %v8587_v30 = vld [vmem:[%s14928_s8 + $0x40] sm:$0xff]  }
 0x4b2   : > { %15358 = vst [vmem:[#allocation25_spill] sm:$0xff] %v10574_v22  ;;  %3090 = vmatprep.subr.bf16.mxu1 %v15322_v61  ;;  %v1900_v47 = vmul.f32 %v1858_v0, %v15359_v9  ;;  %v1901_v10 = vmul.f32 %v1859_v27, %v15360_v56  ;;  %v2585_v58 = vrot.slane %v10565_v44, 3  ;;  %v1902_v17 = vmul.f32 %v1860_v53, %v15361_v52  ;;  %v15367_v27 = vld [vmem:[#allocation42_spill] sm:$0xff] }
 0x4b3   : > { %8285 = vmatmul.mubr.msk.bf16.gmra.mrb[16].mxu0 %vm654_vm1, %v2582_v21  ;;  %2379 = vrot.lane.b32.xlu1 %v2344_v26, %s9059_s17  ;;  %v10597_v49 = vsel %vm2565_vm5, %v2599_v41, %v2601_v5  ;;  %v1903_v19 = vmul.f32 %v1861_v45, %v15362_v15  ;;  %v2346_v20 = vsel %vm2335_vm4, %v2343_v23, %v2345_v12  ;;  %v2587_v43 = vrot.slane %v10574_v22, 3  ;;  %v8586_v26 = vld [vmem:[%s14928_s8 + $0x38] sm:$0xff]   ;;  %v8588_v5 = vld [vmem:[%s14928_s8 + $0x48] sm:$0xff]  }
 0x4b4   : > { %8288 = vmatprep.mubr.msk.bf16.mxu0 %vm654_vm1, %v2584_v54  ;;  %2183 = vrot.lane.b32.xlu0 %v2148_v63, %s9060_s20  ;;  %v8842_v57 = vpop.eup %8841  ;;  %v2150_v38 = vsel %vm2139_vm6, %v2147_v37, %v2149_v3  ;;  %v1862_v32 = vmul.f32 %v8840_v18, %v15363_v50  ;;  %v10612_v24 = vpack.c.bf16 %v1901_v10, %v1900_v47  ;;  %v2347_v0 = vrot.slane %v10422_v7, 2 }
 0x4b5   : > { %3091 = vmatpush1.bf16.msra.mxu1 %v8584_v40  ;;  %v1863_v62 = vmul.f32 %v8842_v57, %v15364_v34  ;;  %v2586_v23 = vsel %vm2565_vm5, %v2583_v1, %v2585_v58  ;;  %v10620_v46 = vpack.c.bf16 %v1903_v19, %v1902_v17  ;;  %v2588_v37 = vsel %vm2565_vm5, %v2585_v58, %v2587_v43  ;;  %v8589_v58 = vld [vmem:[%s14928_s8 + $0x50] sm:$0xff]   ;;  %v8590_v34 = vld [vmem:[%s14928_s8 + $0x58] sm:$0xff]  }
 0x4b6   : > { %3092 = vmatprep.subr.bf16.mxu1 %v15322_v61  ;;  %15365 = vst [vmem:[#allocation50_spill] sm:$0xff] %v10612_v24  ;;  %v2151_v42 = vrot.slane %v10415_v55, 1  ;;  %v1904_v63 = vmul.f32 %v1862_v32, %v15367_v27  ;;  %v2589_v53 = vrot.slane %v10612_v24, 3  ;;  %v15017_v41 = vshll.u32 %v10311_v60, 16 }
 0x4b7   : > { %2418 = vrot.lane.b32.xlu1 %v2346_v20, %s9060_s20  ;;  %15366 = vst [vmem:[#allocation26_spill] sm:$0xff] %v10620_v46  ;;  %v1905_v1 = vmul.f32 %v1863_v62, %v15368_v39  ;;  %v15016_v40 = vshrl.u32 %v10311_v60, 16  ;;  %v2348_v8 = vsel %vm2335_vm4, %v2345_v12, %v2347_v0  ;;  %v2591_v45 = vrot.slane %v10620_v46, 3 }
 0x4b8   : > { %2222 = vrot.lane.b32.xlu0 %v2150_v38, %s9061_s23  ;;  %v2152_v21 = vsel %vm2139_vm6, %v2149_v3, %v2151_v42  ;;  %v2590_v54 = vsel %vm2565_vm5, %v2587_v43, %v2589_v53  ;;  %v2254_v12 = vrot.slane %v15017_v41, 2  ;;  %v10652_v9 = vshll.u32 %v10322_v4, 16 }
 0x4b9   : > { %3093 = vmatpush1.bf16.msra.mxu1 %v8585_v31  ;;  %v10642_v18 = vpack.c.bf16 %v1905_v1, %v1904_v63  ;;  %v10655_v47 = vshrl.u32 %v10322_v4, 16  ;;  %v2253_v3 = vrot.slane %v15016_v40, 1  ;;  %v2592_v56 = vsel %vm2565_vm5, %v2589_v53, %v2591_v45 }
 0x4ba   : > { %3094 = vmatprep.subr.bf16.mxu1 %v15322_v61  ;;  %v2349_v10 = vrot.slane %v10456_v59, 2  ;;  %v2153_v31 = vrot.slane %v10422_v7, 1  ;;  %v10672_v52 = vshrl.u32 %v10327_v33, 16  ;;  %v2257_v15 = vrot.slane %v10652_v9, 2 }
 0x4bb   : > { %8289 = vmatmul.mubr.msk.bf16.gmra.mrb[20].mxu0 %vm654_vm1, %v2586_v23  ;;  %2381 = vrot.lane.b32.xlu1 %v2346_v20, %s9059_s17  ;;  %15369 = vst [vmem:[#allocation51_spill] sm:$0xff] %v10642_v18  ;;  %v2593_v57 = vrot.slane %v10642_v18, 3  ;;  %v2256_v17 = vrot.slane %v10655_v47, 1  ;;  %v2255_v19 = vor.u32 %v2254_v12, %v2253_v3  ;;  %v10679_v43 = vshll.u32 %v10327_v33, 16 }
 0x4bc   : > { %8292 = vmatprep.mubr.msk.bf16.mxu0 %vm654_vm1, %v2588_v37  ;;  %2185 = vrot.lane.b32.xlu0 %v2150_v38, %s9060_s20  ;;  %v2350_v20 = vsel %vm2335_vm4, %v2347_v0, %v2349_v10  ;;  %v2154_v38 = vsel %vm2139_vm6, %v2151_v42, %v2153_v31  ;;  %v10685_v32 = vshrl.u32 %v10377_v6, 16  ;;  %v2260_v37 = vrot.slane %v10672_v52, 1 }
 0x4bd   : > { %3095 = vmatpush1.bf16.msra.mxu1 %v8586_v26  ;;  %v2258_v50 = vor.u32 %v2257_v15, %v2256_v17  ;;  %v2594_v62 = vsel %vm2565_vm5, %v2591_v45, %v2593_v57  ;;  %v10692_v26 = vshll.u32 %v10377_v6, 16  ;;  %v2596_v0 = vsel %vm2565_vm5, %v2593_v57, %v2595_v2  ;;  %v8591_v2 = vld [vmem:[%s14928_s8 + $0x60] sm:$0xff]  }
 0x4be   : > { %3096 = vmatprep.subr.bf16.mxu1 %v15322_v61  ;;  %v2351_v42 = vrot.slane %v10470_v14, 2  ;;  %v2261_v27 = vrot.slane %v10679_v43, 2  ;;  %v2155_v63 = vrot.slane %v10456_v59, 1  ;;  %v10710_v39 = vshrl.u32 %v10391_v51, 16 }
 0x4bf   : > { %2420 = vrot.lane.b32.xlu1 %v2348_v8, %s9060_s20  ;;  %v10695_v23 = vsel %vm2252_vm7, %v2255_v19, %v2258_v50  ;;  %v2264_v53 = vrot.slane %v10685_v32, 1  ;;  %v2157_v17 = vrot.slane %v10470_v14, 1  ;;  %v10751_v15 = vshrl.u32 %v10422_v7, 16 }
 0x4c0   : > { %2224 = vrot.lane.b32.xlu0 %v2152_v21, %s9061_s23  ;;  %v2262_v1 = vor.u32 %v2261_v27, %v2260_v37  ;;  %v2352_v45 = vsel %vm2335_vm4, %v2349_v10, %v2351_v42  ;;  %v2268_v3 = vrot.slane %v10710_v39, 1  ;;  %v10736_v10 = vshll.u32 %v10415_v55, 16 }
 0x4c1   : > { %3097 = vmatpush1.bf16.msra.mxu1 %v8587_v30  ;;  %v10717_v30 = vshll.u32 %v10391_v51, 16  ;;  %v1939_v37 = vshll.u32 %v10330_v11, 16  ;;  %v10822_v41 = vshll.u32 %v10524_v36, 16  ;;  %v1970_v51 = vrot.slane %v10692_v26, 1 }
 0x4c2   : > { %3098 = vmatprep.subr.bf16.mxu1 %v15322_v61 }
 0x4c3   : > { %8293 = vmatmul.mubr.msk.bf16.gmra.mrb[24].mxu0 %vm654_vm1, %v2590_v54  ;;  %2383 = vrot.lane.b32.xlu1 %v2348_v8, %s9059_s17  ;;  %v2265_v8 = vrot.slane %v10692_v26, 2  ;;  %v2156_v54 = vsel %vm2139_vm6, %v2153_v31, %v2155_v63  ;;  %v2269_v31 = vrot.slane %v10717_v30, 2 }
 0x4c4   : > { %8296 = vmatprep.mubr.msk.bf16.mxu0 %vm654_vm1, %v2592_v56  ;;  %2187 = vrot.lane.b32.xlu0 %v2152_v21, %s9060_s20  ;;  %v10723_v21 = vsel %vm2252_vm7, %v2258_v50, %v2262_v1  ;;  %v8592_v56 = vld [vmem:[%s14928_s8 + $0x68] sm:$0xff]  }
 0x4c5   : > { %3099 = vmatpush1.bf16.msra.mxu1 %v8588_v5  ;;  %15370 = vst [vmem:[#allocation52_spill] sm:$0xff] %v10723_v21  ;;  %v10728_v5 = vshrl.u32 %v10415_v55, 16  ;;  %v2266_v12 = vor.u32 %v2265_v8, %v2264_v53  ;;  %v2270_v19 = vor.u32 %v2269_v31, %v2268_v3  ;;  %v10776_v53 = vshll.u32 %v10456_v59, 16 }
 0x4c6   : > { %3100 = vmatprep.subr.bf16.mxu1 %v15322_v61  ;;  %v10792_v3 = vshrl.u32 %v10470_v14, 16  ;;  %v15374_v31 = vmov 0.0  }
 0x4c7   : > { %2422 = vrot.lane.b32.xlu1 %v2350_v20, %s9060_s20  ;;  %v10739_v57 = vsel %vm2252_vm7, %v2262_v1, %v2266_v12  ;;  %v10762_v50 = vsel %vm2252_vm7, %v2266_v12, %v2270_v19  ;;  %v2276_v1 = vrot.slane %v10751_v15, 1  ;;  %v1941_v12 = vrot.slane %v1939_v37, 1 }
 0x4c8   : > { %2226 = vrot.lane.b32.xlu0 %v2154_v38, %s9061_s23  ;;  %15371 = vst [vmem:[#allocation27_spill] sm:$0xff] %v10739_v57  ;;  %15372 = vst [vmem:[#allocation53_spill] sm:$0xff] %v10762_v50  ;;  %v2450_v37 = vrot.slane %v10652_v9, 3  ;;  %v2284_v40 = vrot.slane %v10792_v3, 1 }
 0x4c9   : > { %3101 = vmatpush1.bf16.msra.mxu1 %v8589_v58  ;;  %v2353_v58 = vrot.slane %v10524_v36, 2 }
 0x4ca   : > { %3102 = vmatprep.subr.bf16.mxu1 %v15322_v61 }
 0x4cb   : > { %8297 = vmatmul.mubr.msk.bf16.gmra.mrb[28].mxu0 %vm654_vm1, %v2594_v62  ;;  %2385 = vrot.lane.b32.xlu1 %v2350_v20, %s9059_s17  ;;  %v2272_v20 = vrot.slane %v10728_v5, 1  ;;  %v2158_v62 = vsel %vm2139_vm6, %v2155_v63, %v2157_v17  ;;  %v2355_v63 = vrot.slane %v10528_v35, 2 }
 0x4cc   : > { %8300 = vmatprep.mubr.msk.bf16.mxu0 %vm654_vm1, %v2596_v0  ;;  %2189 = vrot.lane.b32.xlu0 %v2154_v38, %s9060_s20  ;;  %v10756_v38 = vshll.u32 %v10422_v7, 16  ;;  %v10771_v0 = vshrl.u32 %v10456_v59, 16 }
 0x4cd   : > { %3103 = vmatpush1.bf16.msra.mxu1 %v8590_v34  ;;  %v2354_v34 = vsel %vm2335_vm4, %v2351_v42, %v2353_v58  ;;  %v8594_v42 = vld [vmem:[%s14928_s8 + $0x78] sm:$0xff]  }
 0x4ce   : > { %3104 = vmatprep.subr.bf16.mxu1 %v15322_v61 }
 0x4cf   : > { %2424 = vrot.lane.b32.xlu1 %v2352_v45, %s9060_s20 }
 0x4d0   : > { %2228 = vrot.lane.b32.xlu0 %v2156_v54, %s9061_s23 }
 0x4d1   : > { %3105 = vmatpush1.bf16.msra.mxu1 %v8591_v2  ;;  %v2277_v2 = vrot.slane %v10756_v38, 2 }
 0x4d2   : > { %3106 = vmatprep.subr.bf16.mxu1 %v15322_v61 }
 0x4d3   : > { %8301 = vmatmul.mubr.msk.bf16.gmra.mrb[32].mxu0 %vm654_vm1, %v10584_v28  ;;  %2387 = vrot.lane.b32.xlu1 %v2352_v45, %s9059_s17  ;;  %v8593_v28 = vld [vmem:[%s14928_s8 + $0x70] sm:$0xff]   ;;  %v2278_v45 = vor.u32 %v2277_v2, %v2276_v1  ;;  %v2453_v1 = vrot.slane %v10679_v43, 3 }
 0x4d4   : > { %8304 = vmatprep.mubr.msk.bf16.mxu0 %vm654_vm1, %v10587_v16  ;;  %2191 = vrot.lane.b32.xlu0 %v2156_v54, %s9060_s20  ;;  %v2273_v16 = vrot.slane %v10736_v10, 2  ;;  %v15021_v54 = vrot.slane %v10524_v36, 1 }
 0x4d5   : > { %3107 = vmatpush1.bf16.msra.mxu1 %v8592_v56  ;;  %v2280_v56 = vrot.slane %v10771_v0, 1 }
 0x4d6   : > { %3108 = vmatprep.subr.bf16.mxu1 %v15322_v61  ;;  %v2274_v27 = vor.u32 %v2273_v16, %v2272_v20  ;;  %v2281_v20 = vrot.slane %v10776_v53, 2  ;;  %v1937_v16 = vshrl.u32 %v10330_v11, 16 }
 0x4d7   : > { %2426 = vrot.lane.b32.xlu1 %v2354_v34, %s9060_s20 }
 0x4d8   : > { %2230 = vrot.lane.b32.xlu0 %v2158_v62, %s9061_s23  ;;  %v10784_v8 = vsel %vm2252_vm7, %v2270_v19, %v2274_v27  ;;  %v10799_v19 = vshll.u32 %v10470_v14, 16  ;;  %v2282_v2 = vor.u32 %v2281_v20, %v2280_v56  ;;  %v15377_v20 = vshll.u32 %v10311_v60, 16 }
 0x4d9   : > { %3109 = vmatpush1.bf16.msra.mxu1 %v8593_v28  ;;  %15373 = vst [vmem:[#allocation28_spill] sm:$0xff] %v10784_v8  ;;  %v2356_v28 = vsel %vm2335_vm4, %v2353_v58, %v2355_v63  ;;  %v2160_v58 = vsel %vm2139_vm6, %v2157_v17, %v15021_v54  ;;  %v10831_v17 = vshrl.u32 %v10528_v35, 16 }
 0x4da   : > { %3110 = vmatprep.subr.bf16.mxu1 %v15322_v61  ;;  %v2285_v56 = vrot.slane %v10799_v19, 2 }
 0x4db   : > { %8305 = vmatmul.mubr.msk.bf16.gmra.mrb[36].mxu0 %vm654_vm1, %v10597_v49  ;;  %2389 = vrot.lane.b32.xlu1 %v2354_v34, %s9059_s17  ;;  %v10802_v49 = vsel %vm2252_vm7, %v2274_v27, %v2278_v45  ;;  %v2449_v34 = vrot.slane %v10655_v47, 2  ;;  %v10813_v27 = vshrl.u32 %v10524_v36, 16 }
 0x4dc   : > { %8324 = vmatprep.mubr.msk.f32.mxu0 %vm9056_vm0, %v15374_v31  ;;  %2193 = vrot.lane.b32.xlu0 %v2158_v62, %s9060_s20  ;;  %15375 = vst [vmem:[#allocation29_spill] sm:$0xff] %v10802_v49  ;;  %v2452_v62 = vrot.slane %v10672_v52, 2  ;;  %v10825_v31 = vsel %vm2252_vm7, %v2278_v45, %v2282_v2  ;;  %v10837_v45 = vshll.u32 %v10528_v35, 16  ;;  %v10939_v49 = vshll.u32 %v10497_v25, 16 }
 0x4dd   : > { %3111 = vmatpush1.bf16.msra.mxu1 %v8594_v42  ;;  %v1942_v42 = vor.u32 %v1941_v12, %v1937_v16  ;;  %15376 = vst [vmem:[#allocation54_spill] sm:$0xff] %v10825_v31  ;;  %v2451_v14 = vor.u32 %v2450_v37, %v2449_v34  ;;  %v2286_v12 = vor.u32 %v2285_v56, %v2284_v40  ;;  %v2288_v16 = vrot.slane %v10813_v27, 1 }
 0x4de   : > { %8440 = vmatprep.subr.bf16.mxu1 %v15322_v61  ;;  %v1946_v61 = vrot.slane %v15377_v20, 1  ;;  %v2454_v59 = vor.u32 %v2453_v1, %v2452_v62  ;;  %v2289_v34 = vrot.slane %v10822_v41, 2  ;;  %v2357_v37 = vrot.slane %v10565_v44, 2 }
 0x4df   : > { %2428 = vrot.lane.b32.xlu1 %v2356_v28, %s9060_s20  ;;  %v10841_v20 = vsel %vm2252_vm7, %v2282_v2, %v2286_v12  ;;  %v2457_v40 = vrot.slane %v10692_v26, 3  ;;  %v1954_v2 = vrot.slane %v10652_v9, 1  ;;  %v2461_v9 = vrot.slane %v10717_v30, 3 }
 0x4e0   : > { %2232 = vrot.lane.b32.xlu0 %v2160_v58, %s9061_s23  ;;  %v1947_v54 = vsel %vm1935_vm8, %v1942_v42, %v1946_v61  ;;  %15378 = vst [vmem:[#allocation30_spill] sm:$0xff] %v10841_v20  ;;  %v2455_v62 = vsel %vm2448_vm9, %v2451_v14, %v2454_v59  ;;  %v2290_v1 = vor.u32 %v2289_v34, %v2288_v16  ;;  %v2292_v42 = vrot.slane %v10831_v17, 1 }
 0x4e1   : > { %v2293_v20 = vrot.slane %v10837_v45, 2  ;;  %v2358_v14 = vsel %vm2335_vm4, %v2355_v63, %v2357_v37  ;;  %v10861_v34 = vshrl.u32 %v10565_v44, 16  ;;  %v1958_v63 = vor.u32 %v10655_v47, %v1954_v2 }
 0x4e2   : > { %v10856_v7 = vsel %vm2252_vm7, %v2286_v12, %v2290_v1  ;;  %v1962_v12 = vrot.slane %v10679_v43, 1  ;;  %v15382_v47 = vrot.slane %v10528_v35, 1  ;;  %v15383_v43 = vrot.slane %v10524_v36, 1 }
 0x4e3   : > { %2391 = vrot.lane.b32.xlu1 %v2356_v28, %s9059_s17  ;;  %v2456_v28 = vrot.slane %v10685_v32, 2  ;;  %15380 = vst [vmem:[#allocation55_spill] sm:$0xff] %v10856_v7  ;;  %v2464_v36 = vrot.slane %v10728_v5, 2  ;;  %v15389_v26 = vshrl.u32 %v10513_v48, 16 }
 0x4e4   : > { %2084 = vrot.lane.b32.xlu0 %v1947_v54, %s9059_s17  ;;  %v15379_v54 = vshrl.u32 %v10311_v60, 16 }
 0x4e5   : > { %v2458_v31 = vor.u32 %v2457_v40, %v2456_v28  ;;  %v2296_v40 = vrot.slane %v10861_v34, 1 }
 0x4e6   : > { %v1950_v56 = vor.u32 %v15379_v54, %v1946_v61  ;;  %v2460_v61 = vrot.slane %v10710_v39, 2  ;;  %v10866_v54 = vshll.u32 %v10565_v44, 16 }
 0x4e7   : > { %2529 = vrot.lane.b32.xlu1 %v2455_v62, %s9061_s23  ;;  %v2294_v62 = vor.u32 %v2293_v20, %v2292_v42  ;;  %v15024_v20 = vrot.slane %v10574_v22, 2  ;;  %v2459_v28 = vsel %vm2448_vm9, %v2454_v59, %v2458_v31  ;;  %v10895_v59 = vshll.u32 %v10574_v22, 16 }
 0x4e8   : > { %2195 = vrot.lane.b32.xlu0 %v2160_v58, %s9060_s20  ;;  %v1955_v58 = vsel %vm1935_vm8, %v1950_v56, %v1954_v2  ;;  %v10879_v42 = vor.u32 %v2461_v9, %v2460_v61  ;;  %v2297_v7 = vrot.slane %v10866_v54, 2  ;;  %v1963_v56 = vsel %vm1935_vm8, %v1958_v63, %v1962_v12 }
 0x4e9   : > { %v10873_v16 = vsel %vm2252_vm7, %v2290_v1, %v2294_v62  ;;  %v2162_v1 = vsel %vm2139_vm6, %v15383_v43, %v15382_v47  ;;  %v1966_v2 = vor.u32 %v10672_v52, %v1962_v12  ;;  %v10898_v61 = vshll.u32 %v10612_v24, 16 }
 0x4ea   : > { %15381 = vst [vmem:[#allocation31_spill] sm:$0xff] %v10873_v16  ;;  %v10901_v9 = vshrl.u32 %v10612_v24, 16  ;;  %v2360_v63 = vsel %vm2335_vm4, %v2357_v37, %v15024_v20  ;;  %v2465_v52 = vrot.slane %v10736_v10, 3  ;;  %v10908_v12 = vshll.u32 %v10620_v46, 16 }
 0x4eb   : > { %2430 = vrot.lane.b32.xlu1 %v2358_v14, %s9060_s20  ;;  %v10911_v47 = vshrl.u32 %v10620_v46, 16  ;;  %v2463_v43 = vsel %vm2448_vm9, %v2458_v31, %v10879_v42  ;;  %v10917_v16 = vshrl.u32 %v10642_v18, 16  ;;  %v10924_v37 = vshll.u32 %v10642_v18, 16 }
 0x4ec   : > { %2086 = vrot.lane.b32.xlu0 %v1955_v58, %s9059_s17  ;;  %v10891_v58 = vshrl.u32 %v10574_v22, 16  ;;  %v10930_v20 = vshrl.u32 %v10536_v13, 16  ;;  %v2309_v6 = vrot.slane %v10908_v12, 2  ;;  %v2466_v50 = vor.u32 %v2465_v52, %v2464_v36 }
 0x4ed   : > { %v2308_v8 = vrot.slane %v10911_v47, 1  ;;  %v2312_v55 = vrot.slane %v10917_v16, 1  ;;  %v2313_v4 = vrot.slane %v10924_v37, 2  ;;  %v15395_v52 = vrot.slane %v10528_v35, 1 }
 0x4ee   : > { %v2300_v31 = vrot.slane %v10891_v58, 1  ;;  %v2316_v29 = vrot.slane %v10930_v20, 1  ;;  %v2513_v35 = vrot.slane %v10939_v49, 3 }
 0x4ef   : > { %2531 = vrot.lane.b32.xlu1 %v2459_v28, %s9061_s23  ;;  %v2298_v28 = vor.u32 %v2297_v7, %v2296_v40  ;;  %v10927_v40 = vshll.u32 %v10536_v13, 16  ;;  %v2310_v57 = vor.u32 %v2309_v6, %v2308_v8  ;;  %v2314_v8 = vor.u32 %v2313_v4, %v2312_v55 }
 0x4f0   : > { %2234 = vrot.lane.b32.xlu0 %v2162_v1, %s9061_s23 }
 0x4f1   : > { %v10920_v7 = vsel %vm2252_vm7, %v2294_v62, %v2298_v28  ;;  %v2301_v62 = vrot.slane %v10895_v59, 2  ;;  %v2317_v21 = vrot.slane %v10927_v40, 2 }
 0x4f2   : > { %15384 = vst [vmem:[#allocation5_spill] sm:$0xff] %v10920_v7  ;;  %v2304_v7 = vrot.slane %v10901_v9, 1 }
 0x4f3   : > { %2393 = vrot.lane.b32.xlu1 %v2358_v14, %s9059_s17  ;;  %v2305_v14 = vrot.slane %v10898_v61, 2 }
 0x4f4   : > { %2088 = vrot.lane.b32.xlu0 %v1963_v56, %s9059_s17  ;;  %v2302_v56 = vor.u32 %v2301_v62, %v2300_v31  ;;  %v15387_v31 = vshrl.u32 %v10497_v25, 16  ;;  %v2318_v62 = vor.u32 %v2317_v21, %v2316_v29  ;;  %v2468_v21 = vrot.slane %v10751_v15, 2 }
 0x4f5   : > { %v2306_v33 = vor.u32 %v2305_v14, %v2304_v7  ;;  %v2323_v14 = vrot.slane %v10939_v49, 2 }
 0x4f6   : > { %v10953_v60 = vsel %vm2252_vm7, %v2298_v28, %v2302_v56  ;;  %v2329_v28 = vrot.slane %v15389_v26, 1  ;;  %v10975_v4 = vsel %vm2252_vm7, %v2314_v8, %v2318_v62 }
 0x4f7   : > { %2533 = vrot.lane.b32.xlu1 %v2463_v43, %s9061_s23  ;;  %15385 = vst [vmem:[#allocation32_spill] sm:$0xff] %v10953_v60  ;;  %v10956_v7 = vsel %vm2252_vm7, %v2302_v56, %v2306_v33  ;;  %v2322_v43 = vrot.slane %v15387_v31, 1  ;;  %v10961_v6 = vsel %vm2252_vm7, %v2306_v33, %v2310_v57  ;;  %v15390_v60 = vshll.u32 %v10513_v48, 16  ;;  %15392 = vst [vmem:[#allocation19_spill] sm:$0xff] %v10975_v4 }
 0x4f8   : > { %2197 = vrot.lane.b32.xlu0 %v2162_v1, %s9060_s20  ;;  %15386 = vst [vmem:[#allocation65_spill] sm:$0xff] %v10956_v7  ;;  %15388 = vst [vmem:[#allocation6_spill] sm:$0xff] %v10961_v6  ;;  %v2163_v1 = vrot.slane %v10565_v44, 1  ;;  %v1971_v31 = vsel %vm1935_vm8, %v1966_v2, %v1970_v51  ;;  %v10972_v33 = vsel %vm2252_vm7, %v2310_v57, %v2314_v8  ;;  %v2469_v2 = vrot.slane %v10756_v38, 3 }
 0x4f9   : > { %v2332_v56 = vrot.slane %v15390_v60, 2  ;;  %15391 = vst [vmem:[#allocation66_spill] sm:$0xff] %v10972_v33  ;;  %v2324_v55 = vor.u32 %v2323_v14, %v2322_v43  ;;  %v2467_v60 = vsel %vm2448_vm9, %v10879_v42, %v2466_v50  ;;  %v1974_v8 = vor.u32 %v10685_v32, %v1970_v51 }
 0x4fa   : > { %v2164_v43 = vsel %vm2139_vm6, %v15395_v52, %v2163_v1  ;;  %v2470_v42 = vor.u32 %v2469_v2, %v2468_v21  ;;  %v1986_v32 = vrot.slane %v10736_v10, 1  ;;  %v2476_v10 = vrot.slane %v10792_v3, 2 }
 0x4fb   : > { %2432 = vrot.lane.b32.xlu1 %v2360_v63, %s9060_s20  ;;  %v2333_v36 = vor.u32 %v2332_v56, %v2329_v28  ;;  %v10979_v29 = vsel %vm2252_vm7, %v2318_v62, %v2324_v55  ;;  %v1978_v62 = vrot.slane %v10717_v30, 1  ;;  %v2361_v28 = vrot.slane %v10612_v24, 2 }
 0x4fc   : > { %2090 = vrot.lane.b32.xlu0 %v1971_v31, %s9059_s17  ;;  %15393 = vst [vmem:[#allocation46_spill] sm:$0xff] %v10979_v29  ;;  %v2471_v26 = vsel %vm2448_vm9, %v2466_v50, %v2470_v42  ;;  %v2472_v56 = vrot.slane %v10771_v0, 2  ;;  %v2473_v31 = vrot.slane %v10776_v53, 3  ;;  %v15396_v30 = vrot.slane %v10574_v22, 2 }
 0x4fd   : > { %v10986_v57 = vsel %vm2252_vm7, %v2324_v55, %v2333_v36  ;;  %v1979_v14 = vsel %vm1935_vm8, %v1974_v8, %v1978_v62  ;;  %v1982_v51 = vor.u32 %v10710_v39, %v1978_v62  ;;  %v2477_v2 = vrot.slane %v10799_v19, 3 }
 0x4fe   : > { %15394 = vst [vmem:[#allocation20_spill] sm:$0xff] %v10986_v57  ;;  %v2474_v55 = vor.u32 %v2473_v31, %v2472_v56  ;;  %v11011_v36 = vpop.permute.xlu1 %2373  ;;  %v1994_v62 = vrot.slane %v10756_v38, 1  ;;  %v2363_v31 = vrot.slane %v10620_v46, 2  ;;  %v2481_v38 = vrot.slane %v10822_v41, 3 }
 0x4ff   : > { %2535 = vrot.lane.b32.xlu1 %v2467_v60, %s9061_s23  ;;  %v1987_v50 = vsel %vm1935_vm8, %v1982_v51, %v1986_v32  ;;  %v2165_v60 = vrot.slane %v10574_v22, 1  ;;  %v2480_v51 = vrot.slane %v10813_v27, 2  ;;  %v2169_v29 = vrot.slane %v10620_v46, 1 }
 0x500   : > { %2236 = vrot.lane.b32.xlu0 %v2164_v43, %s9061_s23  ;;  %v2475_v21 = vsel %vm2448_vm9, %v2470_v42, %v2474_v55  ;;  %v2496_v46 = vrot.slane %v10901_v9, 2  ;;  %v2504_v6 = vrot.slane %v10917_v16, 2  ;;  %v2173_v7 = vrot.slane %v10536_v13, 1 }
 0x501   : > { %v2166_v52 = vsel %vm2139_vm6, %v2163_v1, %v2165_v60  ;;  %v15397_v44 = vshrl.u32 %v10497_v25, 16 }
 0x503   : > { %2395 = vrot.lane.b32.xlu1 %v2360_v63, %s9059_s17  ;;  %v2362_v63 = vsel %vm2335_vm4, %v15396_v30, %v2361_v28  ;;  %v11015_v39 = vpop.permute.xlu0 %2177 }
 0x504   : > { %2092 = vrot.lane.b32.xlu0 %v1979_v14, %s9059_s17 }
 0x507   : > { %2537 = vrot.lane.b32.xlu1 %v2471_v26, %s9061_s23  ;;  %v2478_v26 = vor.u32 %v2477_v2, %v2476_v10  ;;  %v2167_v2 = vrot.slane %v10612_v24, 1  ;;  %v2171_v24 = vrot.slane %v10642_v18, 1 }
 0x508   : > { %2199 = vrot.lane.b32.xlu0 %v2164_v43, %s9060_s20  ;;  %v1990_v43 = vor.u32 %v10728_v5, %v1986_v32  ;;  %v1998_v32 = vor.u32 %v10751_v15, %v1994_v62 }
 0x509   : > { %v2479_v5 = vsel %vm2448_vm9, %v2474_v55, %v2478_v26  ;;  %v2364_v55 = vsel %vm2335_vm4, %v2361_v28, %v2363_v31  ;;  %v2168_v28 = vsel %vm2139_vm6, %v2165_v60, %v2167_v2 }
 0x50a   : > { %v1995_v42 = vsel %vm1935_vm8, %v1990_v43, %v1994_v62  ;;  %v2485_v62 = vrot.slane %v10837_v45, 3 }
 0x50b   : > { %2434 = vrot.lane.b32.xlu1 %v2362_v63, %s9060_s20 }
 0x50c   : > { %2094 = vrot.lane.b32.xlu0 %v1987_v50, %s9059_s17 }
 0x50f   : > { %2539 = vrot.lane.b32.xlu1 %v2475_v21, %s9061_s23  ;;  %v2482_v21 = vor.u32 %v2481_v38, %v2480_v51  ;;  %v2010_v51 = vrot.slane %v10799_v19, 1  ;;  %v2489_v19 = vrot.slane %v10866_v54, 3 }
 0x510   : > { %2238 = vrot.lane.b32.xlu0 %v2166_v52, %s9061_s23 }
 0x511   : > { %v11024_v8 = vpop.permute.xlu1 %2412  ;;  %v2483_v43 = vsel %vm2448_vm9, %v2478_v26, %v2482_v21 }
 0x512   : > { %v11027_v14 = vpop.permute.xlu0 %2216 }
 0x513   : > { %2397 = vrot.lane.b32.xlu1 %v2362_v63, %s9059_s17  ;;  %v2002_v63 = vrot.slane %v10776_v53, 1  ;;  %v2484_v53 = vrot.slane %v10831_v17, 2 }
 0x514   : > { %2096 = vrot.lane.b32.xlu0 %v1995_v42, %s9059_s17 }
 0x515   : > { %v11032_v56 = vpop.permute.xlu1 %2375  ;;  %v2003_v10 = vsel %vm1935_vm8, %v1998_v32, %v2002_v63  ;;  %v2006_v42 = vor.u32 %v10771_v0, %v2002_v63  ;;  %v2486_v32 = vor.u32 %v2485_v62, %v2484_v53  ;;  %v2365_v63 = vrot.slane %v10642_v18, 2 }
 0x516   : > { %v11034_v1 = vpop.permute.xlu0 %2179  ;;  %v2018_v62 = vrot.slane %v10822_v41, 1  ;;  %v2492_v41 = vrot.slane %v10891_v58, 2 }
 0x517   : > { %2541 = vrot.lane.b32.xlu1 %v2479_v5, %s9061_s23  ;;  %v2011_v26 = vsel %vm1935_vm8, %v2006_v42, %v2010_v51  ;;  %v2487_v0 = vsel %vm2448_vm9, %v2482_v21, %v2486_v32  ;;  %v2366_v21 = vsel %vm2335_vm4, %v2363_v31, %v2365_v63  ;;  %v2170_v31 = vsel %vm2139_vm6, %v2167_v2, %v2169_v29 }
 0x518   : > { %2201 = vrot.lane.b32.xlu0 %v2166_v52, %s9060_s20 }
 0x519   : > { %v11043_v30 = vpop.permute.xlu1 %2414 }
 0x51a   : > { %v11046_v50 = vpop.permute.xlu0 %2218 }
 0x51b   : > { %2436 = vrot.lane.b32.xlu1 %v2364_v55, %s9060_s20 }
 0x51c   : > { %2098 = vrot.lane.b32.xlu0 %v2003_v10, %s9059_s17 }
 0x51d   : > { %v11053_v15 = vpop.permute.xlu1 %2377 }
 0x51e   : > { %v11055_v52 = vpop.permute.xlu0 %2181 }
 0x51f   : > { %2543 = vrot.lane.b32.xlu1 %v2483_v43, %s9061_s23  ;;  %v2488_v43 = vrot.slane %v10861_v34, 2 }
 0x520   : > { %2240 = vrot.lane.b32.xlu0 %v2168_v28, %s9061_s23 }
 0x521   : > { %v11064_v5 = vpop.permute.xlu1 %2416 }
 0x522   : > { %v11067_v38 = vpop.permute.xlu0 %2220 }
 0x523   : > { %2399 = vrot.lane.b32.xlu1 %v2364_v55, %s9059_s17  ;;  %v2014_v55 = vor.u32 %v10792_v3, %v2010_v51 }
 0x524   : > { %2100 = vrot.lane.b32.xlu0 %v2011_v26, %s9059_s17  ;;  %v2490_v26 = vor.u32 %v2489_v19, %v2488_v43  ;;  %v2022_v43 = vor.u32 %v10813_v27, %v2018_v62 }
 0x525   : > { %v11072_v10 = vpop.permute.xlu1 %2379  ;;  %v2019_v57 = vsel %vm1935_vm8, %v2014_v55, %v2018_v62  ;;  %v2367_v62 = vrot.slane %v10536_v13, 2 }
 0x526   : > { %v11074_v60 = vpop.permute.xlu0 %2183  ;;  %v2491_v51 = vsel %vm2448_vm9, %v2486_v32, %v2490_v26 }
 0x527   : > { %2545 = vrot.lane.b32.xlu1 %v2487_v0, %s9061_s23  ;;  %v2493_v0 = vrot.slane %v10895_v59, 3 }
 0x528   : > { %2203 = vrot.lane.b32.xlu0 %v2168_v28, %s9060_s20 }
 0x529   : > { %v11083_v53 = vpop.permute.xlu1 %2418  ;;  %v2494_v4 = vor.u32 %v2493_v0, %v2492_v41  ;;  %v2034_v0 = vrot.slane %v10866_v54, 1  ;;  %v2500_v54 = vrot.slane %v10911_v47, 2 }
 0x52a   : > { %v11086_v42 = vpop.permute.xlu0 %2222 }
 0x52b   : > { %2438 = vrot.lane.b32.xlu1 %v2366_v21, %s9060_s20  ;;  %v2495_v27 = vsel %vm2448_vm9, %v2490_v26, %v2494_v4  ;;  %v2368_v26 = vsel %vm2335_vm4, %v2365_v63, %v2367_v62  ;;  %v2038_v63 = vor.u32 %v10861_v34, %v2034_v0 }
 0x52c   : > { %2102 = vrot.lane.b32.xlu0 %v2019_v57, %s9059_s17  ;;  %v2026_v57 = vrot.slane %v10837_v45, 1  ;;  %v2497_v45 = vrot.slane %v10898_v61, 3 }
 0x52d   : > { %v11093_v3 = vpop.permute.xlu1 %2381 }
 0x52e   : > { %v11095_v28 = vpop.permute.xlu0 %2185  ;;  %v2027_v32 = vsel %vm1935_vm8, %v2022_v43, %v2026_v57 }
 0x52f   : > { %2547 = vrot.lane.b32.xlu1 %v2491_v51, %s9061_s23 }
 0x530   : > { %2242 = vrot.lane.b32.xlu0 %v2170_v31, %s9061_s23 }
 0x531   : > { %v11104_v19 = vpop.permute.xlu1 %2420 }
 0x532   : > { %v11107_v55 = vpop.permute.xlu0 %2224 }
 0x533   : > { %2401 = vrot.lane.b32.xlu1 %v2366_v21, %s9059_s17  ;;  %v2030_v21 = vor.u32 %v10831_v17, %v2026_v57 }
 0x534   : > { %2104 = vrot.lane.b32.xlu0 %v2027_v32, %s9059_s17  ;;  %v2498_v32 = vor.u32 %v2497_v45, %v2496_v46  ;;  %v2172_v46 = vsel %vm2139_vm6, %v2169_v29, %v2171_v24 }
 0x535   : > { %v11112_v51 = vpop.permute.xlu1 %2383  ;;  %v2035_v33 = vsel %vm1935_vm8, %v2030_v21, %v2034_v0  ;;  %v2369_v0 = vrot.slane %v10497_v25, 2 }
 0x536   : > { %v11114_v2 = vpop.permute.xlu0 %2187  ;;  %v2499_v57 = vsel %vm2448_vm9, %v2494_v4, %v2498_v32 }
 0x537   : > { %2549 = vrot.lane.b32.xlu1 %v2495_v27, %s9061_s23  ;;  %v2501_v27 = vrot.slane %v10908_v12, 3 }
 0x538   : > { %2205 = vrot.lane.b32.xlu0 %v2170_v31, %s9060_s20 }
 0x539   : > { %v11123_v41 = vpop.permute.xlu1 %2422  ;;  %v2502_v18 = vor.u32 %v2501_v27, %v2500_v54  ;;  %v2050_v27 = vrot.slane %v10898_v61, 1  ;;  %v2508_v61 = vrot.slane %v10930_v20, 2 }
 0x53a   : > { %v11126_v43 = vpop.permute.xlu0 %2226 }
 0x53b   : > { %2440 = vrot.lane.b32.xlu1 %v2368_v26, %s9060_s20  ;;  %v2503_v34 = vsel %vm2448_vm9, %v2498_v32, %v2502_v18  ;;  %v2370_v32 = vsel %vm2335_vm4, %v2367_v62, %v2369_v0  ;;  %v2054_v62 = vor.u32 %v10901_v9, %v2050_v27 }
 0x53c   : > { %2106 = vrot.lane.b32.xlu0 %v2035_v33, %s9059_s17  ;;  %v2042_v33 = vrot.slane %v10895_v59, 1  ;;  %v2505_v59 = vrot.slane %v10924_v37, 3 }
 0x53d   : > { %v11133_v17 = vpop.permute.xlu1 %2385 }
 0x53e   : > { %v11135_v31 = vpop.permute.xlu0 %2189  ;;  %v2043_v4 = vsel %vm1935_vm8, %v2038_v63, %v2042_v33 }
 0x53f   : > { %2551 = vrot.lane.b32.xlu1 %v2499_v57, %s9061_s23 }
 0x540   : > { %2244 = vrot.lane.b32.xlu0 %v2172_v46, %s9061_s23 }
 0x541   : > { %v11144_v45 = vpop.permute.xlu1 %2424 }
 0x542   : > { %v11147_v21 = vpop.permute.xlu0 %2228 }
 0x543   : > { %2403 = vrot.lane.b32.xlu1 %v2368_v26, %s9059_s17  ;;  %v2046_v26 = vor.u32 %v10891_v58, %v2042_v33 }
 0x544   : > { %2108 = vrot.lane.b32.xlu0 %v2043_v4, %s9059_s17  ;;  %v2506_v4 = vor.u32 %v2505_v59, %v2504_v6  ;;  %v2174_v6 = vsel %vm2139_vm6, %v2171_v24, %v2173_v7 }
 0x545   : > { %v11152_v57 = vpop.permute.xlu1 %2387  ;;  %v2051_v22 = vsel %vm1935_vm8, %v2046_v26, %v2050_v27  ;;  %v2371_v27 = vrot.slane %v10513_v48, 2 }
 0x546   : > { %v11154_v29 = vpop.permute.xlu0 %2191  ;;  %v2507_v33 = vsel %vm2448_vm9, %v2502_v18, %v2506_v4 }
 0x547   : > { %2553 = vrot.lane.b32.xlu1 %v2503_v34, %s9061_s23  ;;  %v2509_v34 = vrot.slane %v10927_v40, 3 }
 0x548   : > { %2207 = vrot.lane.b32.xlu0 %v2172_v46, %s9060_s20 }
 0x549   : > { %v11163_v54 = vpop.permute.xlu1 %2426  ;;  %v2510_v13 = vor.u32 %v2509_v34, %v2508_v61  ;;  %v2733_v34 = vsel %vm654_vm1, %v10695_v23, %v11011_v36 }
 0x54a   : > { %v11166_v63 = vpop.permute.xlu0 %2230 }
 0x54b   : > { %2442 = vrot.lane.b32.xlu1 %v2370_v32, %s9060_s20  ;;  %v2511_v9 = vsel %vm2448_vm9, %v2506_v4, %v2510_v13 }
 0x54c   : > { %2110 = vrot.lane.b32.xlu0 %v2051_v22, %s9059_s17  ;;  %v2058_v22 = vrot.slane %v10908_v12, 1  ;;  %v2512_v12 = vrot.slane %v15397_v44, 2  ;;  %v2786_v44 = vsel %vm2639_vm10, %v2733_v34, %v11024_v8 }
 0x54d   : > { %v11173_v58 = vpop.permute.xlu1 %2389 }
 0x54e   : > { %v11175_v46 = vpop.permute.xlu0 %2193  ;;  %v2059_v18 = vsel %vm1935_vm8, %v2054_v62, %v2058_v22  ;;  %v2062_v61 = vor.u32 %v10911_v47, %v2058_v22  ;;  %v2372_v47 = vsel %vm2335_vm4, %v2369_v0, %v2371_v27  ;;  %v2514_v36 = vor.u32 %v2513_v35, %v2512_v12 }
 0x54f   : > { %2555 = vrot.lane.b32.xlu1 %v2507_v33, %s9061_s23  ;;  %v15398_v35 = vshrl.u32 %v10513_v48, 16 }
 0x550   : > { %2246 = vrot.lane.b32.xlu0 %v2174_v6, %s9061_s23  ;;  %v2515_v0 = vsel %vm2448_vm9, %v2510_v13, %v2514_v36 }
 0x551   : > { %v11184_v59 = vpop.permute.xlu1 %2428 }
 0x552   : > { %v11187_v26 = vpop.permute.xlu0 %2232 }
 0x553   : > { %2405 = vrot.lane.b32.xlu1 %v2370_v32, %s9059_s17 }
 0x554   : > { %2112 = vrot.lane.b32.xlu0 %v2059_v18, %s9059_s17 }
 0x555   : > { %v11192_v33 = vpop.permute.xlu1 %2391 }
 0x556   : > { %v2085_v24 = vpop.permute.xlu0 %2084 }
 0x557   : > { %v2604_v32 = vsel %vm654_vm1, %v10330_v11, %v2085_v24  ;;  %2557 = vrot.lane.b32.xlu1 %v2511_v9, %s9061_s23  ;;  %v2066_v11 = vrot.slane %v10924_v37, 1  ;;  %v2516_v24 = vrot.slane %v15398_v35, 2  ;;  %v15399_v9 = vshll.u32 %v10513_v48, 16 }
 0x558   : > { %v2641_v4 = vsel %vm2639_vm10, %v2604_v32, %v11015_v39  ;;  %2209 = vrot.lane.b32.xlu0 %v2174_v6, %s9060_s20  ;;  %v2175_v6 = vrot.slane %v10497_v25, 1  ;;  %v15400_v32 = vld [vmem:[#allocation8_spill] sm:$0xff] }
 0x559   : > { %v2530_v62 = vpop.permute.xlu1 %2529  ;;  %v2067_v39 = vsel %vm1935_vm8, %v2062_v61, %v2066_v11  ;;  %v2678_v8 = vsel %vm2676_vm11, %v2641_v4, %v11027_v14  ;;  %v2517_v12 = vrot.slane %v15399_v9, 3  ;;  %v2070_v34 = vor.u32 %v10917_v16, %v2066_v11  ;;  %v15401_v4 = vld [vmem:[#allocation52_spill] sm:$0xff]  ;;  %v15402_v11 = vld [vmem:[#allocation21_spill] sm:$0xff] }
 0x55a   : > { %v11212_v18 = vpop.permute.xlu0 %2195  ;;  %v2822_v23 = vsel %vm2676_vm11, %v2786_v44, %v2530_v62  ;;  %v2176_v14 = vsel %vm2139_vm6, %v2173_v7, %v2175_v6  ;;  %v2736_v13 = vsel %vm654_vm1, %v15401_v4, %v11032_v56  ;;  %v2524_v56 = vshll.u32 %v15402_v11, 16 }
 0x55b   : > { %2444 = vrot.lane.b32.xlu1 %v2372_v47, %s9060_s20  ;;  %3112 = vmatprep.mubr.bf16.mxu1 %v2822_v23  ;;  %v2788_v62 = vsel %vm2639_vm10, %v2736_v13, %v11043_v30  ;;  %v2518_v16 = vor.u32 %v2517_v12, %v2516_v24  ;;  %v2410_v24 = vrot.slane %v15402_v11, 2 }
 0x55c   : > { %2114 = vrot.lane.b32.xlu0 %v2067_v39, %s9059_s17  ;;  %3113 = vmatmul.mubr.bf16.vlgmr.msra.gmra.mrb[4].mxu1 %v2678_v8  ;;  %v2074_v39 = vrot.slane %v10927_v40, 1  ;;  %v2526_v12 = vrot.slane %v2524_v56, 3 }
 0x55d   : > { %v11224_v37 = vpop.permute.xlu1 %2430  ;;  %v2519_v35 = vsel %vm2448_vm9, %v2514_v36, %v2518_v16 }
 0x55e   : > { %v2087_v22 = vpop.permute.xlu0 %2086 }
 0x55f   : > { %v2606_v61 = vsel %vm654_vm1, %v15400_v32, %v2087_v22  ;;  %2559 = vrot.lane.b32.xlu1 %v2515_v0, %s9061_s23  ;;  %v2521_v22 = vshrl.u32 %v15402_v11, 16  ;;  %v2075_v0 = vsel %vm1935_vm8, %v2070_v34, %v2074_v39  ;;  %v15403_v32 = vld [vmem:[#allocation10_spill] sm:$0xff] }
 0x560   : > { %2248 = vrot.lane.b32.xlu0 %v2176_v14, %s9061_s23  ;;  %v2643_v44 = vsel %vm2639_vm10, %v2606_v61, %v11034_v1  ;;  %v2078_v61 = vor.u32 %v10930_v20, %v2074_v39  ;;  %v2411_v20 = vsel %vm2335_vm4, %v2371_v27, %v2410_v24  ;;  %v597_v24 = vld [vmem:[%s14923_s3 + $0x8] sm:$0xff] }
 0x561   : > { %v2532_v23 = vpop.permute.xlu1 %2531  ;;  %v2681_v1 = vsel %vm2676_vm11, %v2643_v44, %v11046_v50  ;;  %v2523_v9 = vrot.slane %v2521_v22, 2  ;;  %v15404_v50 = vld [vmem:[#allocation27_spill] sm:$0xff]  ;;  %v2082_v44 = vrot.slane %v10939_v49, 1 }
 0x562   : > { %v11247_v8 = vpop.permute.xlu0 %2234  ;;  %v2825_v7 = vsel %vm2676_vm11, %v2788_v62, %v2532_v23  ;;  %v2739_v34 = vsel %vm654_vm1, %v15404_v50, %v11053_v15  ;;  %v15405_v22 = vld [vmem:[#allocation11_spill] sm:$0xff] }
 0x563   : > { %2407 = vrot.lane.b32.xlu1 %v2372_v47, %s9059_s17  ;;  %3120 = vmatprep.mubr.bf16.mxu1 %v2825_v7  ;;  %v2790_v4 = vsel %vm2639_vm10, %v2739_v34, %v11064_v5  ;;  %v2527_v15 = vor.u32 %v2526_v12, %v2523_v9  ;;  %v2214_v5 = vrot.slane %v10513_v48, 1  ;;  %v15407_v34 = vld [vmem:[#allocation7_spill] sm:$0xff] }
 0x564   : > { %2116 = vrot.lane.b32.xlu0 %v2075_v0, %s9059_s17  ;;  %3121 = vmatmul.mubr.bf16.gmra.mrb[8].mxu1 %v2681_v1  ;;  %v15406_v0 = vld [vmem:[#allocation53_spill] sm:$0xff] }
 0x565   : > { %v11257_v40 = vpop.permute.xlu1 %2393  ;;  %v2528_v7 = vsel %vm2448_vm9, %v2518_v16, %v2527_v15  ;;  %v2215_v48 = vsel %vm2139_vm6, %v2175_v6, %v2214_v5  ;;  %v2742_v1 = vsel %vm654_vm1, %v15406_v0, %v11072_v10  ;;  %v15409_v0 = vld [vmem:[#allocation9_spill] sm:$0xff] }
 0x566   : > { %v2089_v30 = vpop.permute.xlu0 %2088  ;;  %v2792_v25 = vsel %vm2639_vm10, %v2742_v1, %v11083_v53 }
 0x567   : > { %v2608_v47 = vsel %vm654_vm1, %v15403_v32, %v2089_v30  ;;  %2561 = vrot.lane.b32.xlu1 %v2519_v35, %s9061_s23  ;;  %v596_v30 = vld [vmem:[%s14923_s3] sm:$0xff]  ;;  %v599_v32 = vld [vmem:[%s14923_s3 + $0x18] sm:$0xff] }
 0x568   : > { %2211 = vrot.lane.b32.xlu0 %v2176_v14, %s9060_s20  ;;  %v2645_v36 = vsel %vm2639_vm10, %v2608_v47, %v11055_v52  ;;  %v2083_v14 = vsel %vm1935_vm8, %v2078_v61, %v2082_v44 }
 0x569   : > { %v2534_v13 = vpop.permute.xlu1 %2533  ;;  %v2684_v52 = vsel %vm2676_vm11, %v2645_v36, %v11067_v38 }
 0x56a   : > { %v11274_v62 = vpop.permute.xlu0 %2197  ;;  %v2828_v23 = vsel %vm2676_vm11, %v2790_v4, %v2534_v13  ;;  %v15408_v4 = vld [vmem:[#allocation28_spill] sm:$0xff] }
 0x56b   : > { %2446 = vrot.lane.b32.xlu1 %v2411_v20, %s9060_s20  ;;  %3128 = vmatprep.mubr.bf16.mxu1 %v2828_v23  ;;  %v2745_v13 = vsel %vm654_vm1, %v15408_v4, %v11093_v3  ;;  %v600_v20 = vld [vmem:[%s14923_s3 + $0x20] sm:$0xff] }
 0x56c   : > { %2118 = vrot.lane.b32.xlu0 %v2083_v14, %s9059_s17  ;;  %3129 = vmatmul.mubr.bf16.gmra.mrb[12].mxu1 %v2684_v52  ;;  %v2794_v15 = vsel %vm2639_vm10, %v2745_v13, %v11104_v19  ;;  %v601_v52 = vld [vmem:[%s14923_s3 + $0x28] sm:$0xff] }
 0x56d   : > { %v11286_v49 = vpop.permute.xlu1 %2432  ;;  %v11288_v39 = vpop.f32.mrb[4].mxu0 }
 0x56e   : > { %v2091_v27 = vpop.permute.xlu0 %2090  ;;  %v11291_v11 = vpop.f32.mrb[5].mxu0 }
 0x56f   : > { %v2610_v56 = vsel %vm654_vm1, %v15405_v22, %v2091_v27  ;;  %2563 = vrot.lane.b32.xlu1 %v2528_v7, %s9061_s23  ;;  %v11299_v38 = vpop.f32.mrb[6].mxu0  ;;  %v603_v7 = vld [vmem:[%s14923_s3 + $0x38] sm:$0xff] }
 0x570   : > { %2250 = vrot.lane.b32.xlu0 %v2215_v48, %s9061_s23  ;;  %v11305_v16 = vpop.f32.mrb[7].mxu0  ;;  %v2647_v35 = vsel %vm2639_vm10, %v2610_v56, %v11074_v60  ;;  %v598_v60 = vld [vmem:[%s14923_s3 + $0x10] sm:$0xff] }
 0x571   : > { %v2536_v6 = vpop.permute.xlu1 %2535  ;;  %v2687_v12 = vsel %vm2676_vm11, %v2647_v35, %v11086_v42 }
 0x572   : > { %v11317_v10 = vpop.permute.xlu0 %2236  ;;  %v2831_v9 = vsel %vm2676_vm11, %v2792_v25, %v2536_v6  ;;  %v604_v6 = vld [vmem:[%s14923_s3 + $0x40] sm:$0xff] }
 0x573   : > { %3447 = vperm.xlu1 %8576, %v596_v30   ;;  %3136 = vmatprep.mubr.bf16.mxu1 %v2831_v9  ;;  %v15410_v30 = vld [vmem:[#allocation29_spill] sm:$0xff] }
 0x574   : > { %3452 = vperm.xlu0 %8575, %v597_v24   ;;  %3137 = vmatmul.mubr.bf16.gmra.mrb[16].mxu1 %v2687_v12  ;;  %v2748_v35 = vsel %vm654_vm1, %v15410_v30, %v11112_v51  ;;  %v611_v30 = vld [vmem:[%s14923_s3 + $0x78] sm:$0xff] }
 0x575   : > { %v11325_v53 = vpop.permute.xlu1 %2395  ;;  %v11330_v47 = vpop.f32.mrb[8].mxu0  ;;  %v2796_v9 = vsel %vm2639_vm10, %v2748_v35, %v11123_v41 }
 0x576   : > { %v2093_v61 = vpop.permute.xlu0 %2092  ;;  %v11332_v50 = vpop.f32.mrb[9].mxu0 }
 0x577   : > { %v2612_v42 = vsel %vm654_vm1, %v15407_v34, %v2093_v61  ;;  %3457 = vperm.xlu1 %8576, %v598_v60   ;;  %v11336_v36 = vpop.f32.mrb[10].mxu0  ;;  %v605_v60 = vld [vmem:[%s14923_s3 + $0x48] sm:$0xff]  ;;  %v607_v34 = vld [vmem:[%s14923_s3 + $0x58] sm:$0xff] }
 0x578   : > { %3462 = vperm.xlu0 %8575, %v599_v32   ;;  %v11341_v44 = vpop.f32.mrb[11].mxu0  ;;  %v2649_v23 = vsel %vm2639_vm10, %v2612_v42, %v11095_v28  ;;  %v602_v28 = vld [vmem:[%s14923_s3 + $0x30] sm:$0xff] }
 0x579   : > { %v2538_v14 = vpop.permute.xlu1 %2537  ;;  %v2690_v27 = vsel %vm2676_vm11, %v2649_v23, %v11107_v55 }
 0x57a   : > { %v11353_v5 = vpop.permute.xlu0 %2199  ;;  %v2834_v3 = vsel %vm2676_vm11, %v2794_v15, %v2538_v14  ;;  %v15412_v15 = vld [vmem:[#allocation54_spill] sm:$0xff] }
 0x57b   : > { %3467 = vperm.xlu1 %8576, %v600_v20   ;;  %3144 = vmatprep.mubr.bf16.mxu1 %v2834_v3  ;;  %v15411_v20 = vld [vmem:[#allocation12_spill] sm:$0xff]  ;;  %v2751_v14 = vsel %vm654_vm1, %v15412_v15, %v11133_v17 }
 0x57c   : > { %3472 = vperm.xlu0 %8575, %v601_v52   ;;  %3145 = vmatmul.mubr.bf16.gmra.mrb[20].mxu1 %v2690_v27  ;;  %v608_v3 = vld [vmem:[%s14923_s3 + $0x60] sm:$0xff] }
 0x57d   : > { %v11361_v19 = vpop.permute.xlu1 %2434 }
 0x57e   : > { %v11366_v22 = vpop.f32.mrb[12].mxu0  ;;  %v2095_v56 = vpop.permute.xlu0 %2094 }
 0x57f   : > { %v11368_v48 = vpop.f32.mrb[13].mxu0  ;;  %v2614_v55 = vsel %vm654_vm1, %v15409_v0, %v2095_v56  ;;  %3477 = vperm.xlu1 %8576, %v602_v28   ;;  %v2798_v28 = vsel %vm2639_vm10, %v2751_v14, %v11144_v45  ;;  %v609_v56 = vld [vmem:[%s14923_s3 + $0x68] sm:$0xff] }
 0x580   : > { %v11372_v1 = vpop.f32.mrb[14].mxu0  ;;  %3482 = vperm.xlu0 %8575, %v603_v7   ;;  %v2651_v24 = vsel %vm2639_vm10, %v2614_v55, %v11114_v2  ;;  %v606_v2 = vld [vmem:[%s14923_s3 + $0x50] sm:$0xff] }
 0x581   : > { %v11377_v25 = vpop.f32.mrb[15].mxu0  ;;  %v2540_v12 = vpop.permute.xlu1 %2539  ;;  %v2693_v61 = vsel %vm2676_vm11, %v2651_v24, %v11126_v43 }
 0x582   : > { %v11389_v32 = vpop.permute.xlu0 %2238  ;;  %v2837_v51 = vsel %vm2676_vm11, %v2796_v9, %v2540_v12  ;;  %v15413_v9 = vld [vmem:[#allocation13_spill] sm:$0xff] }
 0x583   : > { %3487 = vperm.xlu1 %8576, %v604_v6   ;;  %3152 = vmatprep.mubr.bf16.mxu1 %v2837_v51 }
 0x584   : > { %3492 = vperm.xlu0 %8575, %v605_v60   ;;  %3153 = vmatmul.mubr.bf16.gmra.mrb[24].mxu1 %v2693_v61  ;;  %v15414_v60 = vld [vmem:[#allocation30_spill] sm:$0xff] }
 0x585   : > { %v11397_v41 = vpop.permute.xlu1 %2397  ;;  %v2754_v51 = vsel %vm654_vm1, %v15414_v60, %v11152_v57 }
 0x586   : > { %v11402_v42 = vpop.f32.mrb[16].mxu0  ;;  %v2097_v4 = vpop.permute.xlu0 %2096 }
 0x587   : > { %v11404_v13 = vpop.f32.mrb[17].mxu0  ;;  %v2616_v43 = vsel %vm654_vm1, %v15411_v20, %v2097_v4  ;;  %3497 = vperm.xlu1 %8576, %v606_v2   ;;  %v612_v2 = vld [vmem:[%s14923_s3 + $0x80] sm:$0xff]  ;;  %v2800_v4 = vsel %vm2639_vm10, %v2754_v51, %v11163_v54  ;;  %v617_v51 = vld [vmem:[%s14923_s3 + $0xa8] sm:$0xff] }
 0x588   : > { %v11408_v23 = vpop.f32.mrb[18].mxu0  ;;  %3502 = vperm.xlu0 %8575, %v607_v34   ;;  %v2653_v27 = vsel %vm2639_vm10, %v2616_v43, %v11135_v31  ;;  %v610_v31 = vld [vmem:[%s14923_s3 + $0x70] sm:$0xff]  ;;  %v613_v43 = vld [vmem:[%s14923_s3 + $0x88] sm:$0xff] }
 0x589   : > { %v11413_v52 = vpop.f32.mrb[19].mxu0  ;;  %v2542_v7 = vpop.permute.xlu1 %2541  ;;  %v2696_v55 = vsel %vm2676_vm11, %v2653_v27, %v11147_v21 }
 0x58a   : > { %v11425_v0 = vpop.permute.xlu0 %2201  ;;  %v2840_v17 = vsel %vm2676_vm11, %v2798_v28, %v2542_v7 }
 0x58b   : > { %3507 = vperm.xlu1 %8576, %v608_v3   ;;  %3160 = vmatprep.mubr.bf16.mxu1 %v2840_v17  ;;  %v615_v3 = vld [vmem:[%s14923_s3 + $0x98] sm:$0xff] }
 0x58c   : > { %3512 = vperm.xlu0 %8575, %v609_v56   ;;  %3161 = vmatmul.mubr.bf16.gmra.mrb[28].mxu1 %v2696_v55  ;;  %v15415_v56 = vld [vmem:[#allocation14_spill] sm:$0xff]  ;;  %v15416_v55 = vld [vmem:[#allocation55_spill] sm:$0xff] }
 0x58d   : > { %v11433_v45 = vpop.permute.xlu1 %2436 }
 0x58e   : > { %v11438_v35 = vpop.f32.mrb[20].mxu0  ;;  %v2099_v6 = vpop.permute.xlu0 %2098 }
 0x58f   : > { %v11440_v24 = vpop.f32.mrb[21].mxu0  ;;  %v2618_v21 = vsel %vm654_vm1, %v15413_v9, %v2099_v6  ;;  %3517 = vperm.xlu1 %8576, %v610_v31   ;;  %v2757_v31 = vsel %vm654_vm1, %v15416_v55, %v11173_v58  ;;  %v616_v6 = vld [vmem:[%s14923_s3 + $0xa0] sm:$0xff] }
 0x590   : > { %v11444_v12 = vpop.f32.mrb[22].mxu0  ;;  %3522 = vperm.xlu0 %8575, %v611_v30   ;;  %v2655_v34 = vsel %vm2639_vm10, %v2618_v21, %v11154_v29  ;;  %v614_v29 = vld [vmem:[%s14923_s3 + $0x90] sm:$0xff]  ;;  %v2802_v21 = vsel %vm2639_vm10, %v2757_v31, %v11184_v59 }
 0x591   : > { %v11449_v61 = vpop.f32.mrb[23].mxu0  ;;  %v2544_v20 = vpop.permute.xlu1 %2543  ;;  %v2699_v14 = vsel %vm2676_vm11, %v2655_v34, %v11166_v63 }
 0x592   : > { %v11461_v15 = vpop.permute.xlu0 %2240  ;;  %v2843_v57 = vsel %vm2676_vm11, %v2800_v4, %v2544_v20  ;;  %v619_v4 = vld [vmem:[%s14923_s3 + $0xb8] sm:$0xff] }
 0x593   : > { %3527 = vperm.xlu1 %8576, %v612_v2   ;;  %3168 = vmatprep.mubr.bf16.mxu1 %v2843_v57 }
 0x594   : > { %3532 = vperm.xlu0 %8575, %v613_v43   ;;  %3169 = vmatmul.mubr.bf16.gmra.mrb[32].mxu1 %v2699_v14  ;;  %v15417_v14 = vld [vmem:[#allocation15_spill] sm:$0xff] }
 0x595   : > { %v11469_v54 = vpop.permute.xlu1 %2399 }
 0x596   : > { %v11474_v27 = vpop.f32.mrb[24].mxu0  ;;  %v2101_v28 = vpop.permute.xlu0 %2100 }
 0x597   : > { %v11476_v7 = vpop.f32.mrb[25].mxu0  ;;  %v2620_v63 = vsel %vm654_vm1, %v15415_v56, %v2101_v28  ;;  %3537 = vperm.xlu1 %8576, %v614_v29  }
 0x598   : > { %v11480_v17 = vpop.f32.mrb[26].mxu0  ;;  %3542 = vperm.xlu0 %8575, %v615_v3   ;;  %v2657_v9 = vsel %vm2639_vm10, %v2620_v63, %v11175_v46  ;;  %v618_v46 = vld [vmem:[%s14923_s3 + $0xb0] sm:$0xff]  ;;  %v620_v63 = vld [vmem:[%s14923_s3 + $0xc0] sm:$0xff] }
 0x599   : > { %v11485_v30 = vpop.f32.mrb[27].mxu0  ;;  %v2546_v60 = vpop.permute.xlu1 %2545  ;;  %v2702_v34 = vsel %vm2676_vm11, %v2657_v9, %v11187_v26  ;;  %v15418_v3 = vld [vmem:[#allocation31_spill] sm:$0xff]  ;;  %v621_v9 = vld [vmem:[%s14923_s3 + $0xc8] sm:$0xff] }
 0x59a   : > { %v11497_v2 = vpop.permute.xlu0 %2203  ;;  %v2846_v58 = vsel %vm2676_vm11, %v2802_v21, %v2546_v60  ;;  %v2760_v28 = vsel %vm654_vm1, %v15418_v3, %v11192_v33 }
 0x59b   : > { %3547 = vperm.xlu1 %8576, %v616_v6   ;;  %3176 = vmatprep.mubr.bf16.mxu1 %v2846_v58  ;;  %v2804_v31 = vsel %vm2639_vm10, %v2760_v28, %v11224_v37  ;;  %v624_v28 = vld [vmem:[%s14923_s3 + $0xe0] sm:$0xff] }
 0x59c   : > { %3552 = vperm.xlu0 %8575, %v617_v51   ;;  %3177 = vmatmul.mubr.bf16.gmra.mrb[36].mxu1 %v2702_v34  ;;  %v623_v51 = vld [vmem:[%s14923_s3 + $0xd8] sm:$0xff] }
 0x59d   : > { %v11505_v59 = vpop.permute.xlu1 %2438 }
 0x59e   : > { %v11510_v20 = vpop.f32.mrb[28].mxu0  ;;  %v2103_v43 = vpop.permute.xlu0 %2102 }
 0x59f   : > { %v11512_v57 = vpop.f32.mrb[29].mxu0  ;;  %v2622_v26 = vsel %vm654_vm1, %v15417_v14, %v2103_v43  ;;  %3557 = vperm.xlu1 %8576, %v618_v46   ;;  %v15420_v14 = vld [vmem:[#allocation5_spill] sm:$0xff] }
 0x5a0   : > { %v11516_v29 = vpop.f32.mrb[30].mxu0  ;;  %3562 = vperm.xlu0 %8575, %v619_v4   ;;  %v2659_v55 = vsel %vm2639_vm10, %v2622_v26, %v11212_v18  ;;  %v622_v18 = vld [vmem:[%s14923_s3 + $0xd0] sm:$0xff]  ;;  %v15419_v4 = vld [vmem:[#allocation17_spill] sm:$0xff]  ;;  %v2763_v26 = vsel %vm654_vm1, %v15420_v14, %v11257_v40  ;;  %v15422_v14 = vld [vmem:[#allocation32_spill] sm:$0xff] }
 0x5a1   : > { %v11521_v56 = vpop.f32.mrb[31].mxu0  ;;  %v2548_v6 = vpop.permute.xlu1 %2547  ;;  %v2705_v60 = vsel %vm2676_vm11, %v2659_v55, %v11247_v8  ;;  %v2806_v55 = vsel %vm2639_vm10, %v2763_v26, %v11286_v49  ;;  %v2766_v26 = vsel %vm654_vm1, %v15422_v14, %v11325_v53 }
 0x5a2   : > { %v11533_v21 = vpop.permute.xlu0 %2242  ;;  %v2849_v33 = vsel %vm2676_vm11, %v2804_v31, %v2548_v6  ;;  %v625_v6 = vld [vmem:[%s14923_s3 + $0xe8] sm:$0xff]  ;;  %v2808_v53 = vsel %vm2639_vm10, %v2766_v26, %v11361_v19 }
 0x5a3   : > { %3567 = vperm.xlu1 %8576, %v620_v63   ;;  %3184 = vmatprep.mubr.bf16.mxu1 %v2849_v33  ;;  %v15425_v26 = vld [vmem:[#allocation65_spill] sm:$0xff] }
 0x5a4   : > { %3572 = vperm.xlu0 %8575, %v621_v9   ;;  %3185 = vmatmul.mubr.bf16.gmra.mrb[40].mxu1 %v2705_v60  ;;  %v627_v60 = vld [vmem:[%s14923_s3 + $0xf8] sm:$0xff] }
 0x5a5   : > { %v11541_v37 = vpop.permute.xlu1 %2401 }
 0x5a6   : > { %v11546_v58 = vpop.f32.mrb[32].mxu0  ;;  %v2105_v34 = vpop.permute.xlu0 %2104 }
 0x5a7   : > { %v11548_v46 = vpop.f32.mrb[33].mxu0  ;;  %v2624_v8 = vsel %vm654_vm1, %v15419_v4, %v2105_v34  ;;  %3577 = vperm.xlu1 %8576, %v622_v18   ;;  %v15421_v4 = vld [vmem:[#allocation18_spill] sm:$0xff] }
 0x5a8   : > { %v11552_v43 = vpop.f32.mrb[34].mxu0  ;;  %3582 = vperm.xlu0 %8575, %v623_v51   ;;  %v2661_v63 = vsel %vm2639_vm10, %v2624_v8, %v11274_v62  ;;  %v626_v62 = vld [vmem:[%s14923_s3 + $0xf0] sm:$0xff] }
 0x5a9   : > { %v11557_v3 = vpop.f32.mrb[35].mxu0  ;;  %v2550_v31 = vpop.permute.xlu1 %2549  ;;  %v2708_v33 = vsel %vm2676_vm11, %v2661_v63, %v11317_v10  ;;  %v628_v63 = vld [vmem:[%s14923_s3 + $0x100] sm:$0xff] }
 0x5aa   : > { %v11569_v9 = vpop.permute.xlu0 %2205  ;;  %v2852_v40 = vsel %vm2676_vm11, %v2806_v55, %v2550_v31  ;;  %v15423_v31 = vmov 0  }
 0x5ab   : > { %3587 = vperm.xlu1 %8576, %v624_v28   ;;  %3192 = vmatprep.mubr.bf16.mxu1 %v2852_v40  ;;  %634 = vst.msk [vmem:[#allocation2 + $0x4] sm:$0xf] %vm632_vm12, %v15423_v31  ;;  %635 = vst.msk [vmem:[#allocation2 + $0x8] sm:$0xf] %vm632_vm12, %v15423_v31 }
 0x5ac   : > { %3592 = vperm.xlu0 %8575, %v625_v6   ;;  %3193 = vmatmul.mubr.bf16.gmra.mrb[44].mxu1 %v2708_v33  ;;  %636 = vst.msk [vmem:[#allocation2 + $0xc] sm:$0xf] %vm632_vm12, %v15423_v31  ;;  %637 = vst.msk [vmem:[#allocation2 + $0xa0] sm:$0xf] %vm632_vm12, %v15423_v31  ;;  %v629_v6 = vld [vmem:[%s14923_s3 + $0x108] sm:$0xff] }
 0x5ad   : > { %v11577_v49 = vpop.permute.xlu1 %2440  ;;  %638 = vst.msk [vmem:[#allocation2 + $0xa4] sm:$0xf] %vm632_vm12, %v15423_v31  ;;  %639 = vst.msk [vmem:[#allocation2 + $0xa8] sm:$0xf] %vm632_vm12, %v15423_v31 }
 0x5ae   : > { %v11582_v18 = vpop.f32.mrb[36].mxu0  ;;  %v2107_v51 = vpop.permute.xlu0 %2106 }
 0x5af   : > { %v11584_v34 = vpop.f32.mrb[37].mxu0  ;;  %v2626_v10 = vsel %vm654_vm1, %v15421_v4, %v2107_v51  ;;  %3597 = vperm.xlu1 %8576, %v626_v62   ;;  %v631_v51 = vld [vmem:[%s14923_s3 + $0x118] sm:$0xff] }
 0x5b0   : > { %v11588_v8 = vpop.f32.mrb[38].mxu0  ;;  %3602 = vperm.xlu0 %8575, %v627_v60   ;;  %v2663_v55 = vsel %vm2639_vm10, %v2626_v10, %v11353_v5  ;;  %v630_v60 = vld [vmem:[%s14923_s3 + $0x110] sm:$0xff] }
 0x5b1   : > { %v11593_v28 = vpop.f32.mrb[39].mxu0  ;;  %v2552_v5 = vpop.permute.xlu1 %2551  ;;  %v2711_v62 = vsel %vm2676_vm11, %v2663_v55, %v11389_v32  ;;  %v15424_v10 = vld [vmem:[#allocation67_spill] sm:$0xff]  ;;  %v2769_v32 = vsel %vm654_vm1, %v15425_v26, %v11397_v41 }
 0x5b2   : > { %v2245_v40 = vpop.permute.xlu0 %2244  ;;  %v2855_v33 = vsel %vm2676_vm11, %v2808_v53, %v2552_v5  ;;  %v2810_v55 = vsel %vm2639_vm10, %v2769_v32, %v11433_v45 }
 0x5b3   : > { %3607 = vperm.xlu1 %8576, %v628_v63   ;;  %3200 = vmatprep.mubr.bf16.mxu1 %v2855_v33 }
 0x5b4   : > { %3612 = vperm.xlu0 %8575, %v629_v6   ;;  %3201 = vmatmul.mubr.bf16.gmra.mrb[48].mxu1 %v2711_v62 }
 0x5b5   : > { %v2404_v19 = vpop.permute.xlu1 %2403 }
 0x5b6   : > { %v2109_v4 = vpop.permute.xlu0 %2108 }
 0x5b7   : > { %v2628_v14 = vsel %vm654_vm1, %v15424_v10, %v2109_v4  ;;  %3617 = vperm.xlu1 %8576, %v630_v60   ;;  %v15426_v4 = vld [vmem:[#allocation25_spill] sm:$0xff] }
 0x5b8   : > { %3622 = vperm.xlu0 %8575, %v631_v51   ;;  %v2665_v63 = vsel %vm2639_vm10, %v2628_v14, %v11425_v0  ;;  %v15427_v51 = vld [vmem:[#allocation6_spill] sm:$0xff] }
 0x5b9   : > { %v2554_v53 = vpop.permute.xlu1 %2553  ;;  %v2714_v33 = vsel %vm2676_vm11, %v2665_v63, %v11461_v15  ;;  %v2772_v0 = vsel %vm654_vm1, %v15427_v51, %v11469_v54 }
 0x5ba   : > { %v2208_v5 = vpop.permute.xlu0 %2207  ;;  %v2858_v6 = vsel %vm2676_vm11, %v2810_v55, %v2554_v53  ;;  %v2812_v10 = vsel %vm2639_vm10, %v2772_v0, %v11505_v59  ;;  %v15428_v53 = vld [vmem:[#allocation50_spill] sm:$0xff] }
 0x5bb   : > { %3208 = vmatprep.mubr.bf16.mxu1 %v2858_v6  ;;  %v15429_v6 = vld [vmem:[#allocation66_spill] sm:$0xff] }
 0x5bc   : > { %3209 = vmatmul.mubr.bf16.gmra.mrb[52].mxu1 %v2714_v33 }
 0x5bd   : > { %v2443_v62 = vpop.permute.xlu1 %2442 }
 0x5be   : > { %v2111_v60 = vpop.permute.xlu0 %2110 }
 0x5bf   : > { %v2630_v41 = vsel %vm654_vm1, %v15426_v4, %v2111_v60 }
 0x5c0   : > { %v2667_v45 = vsel %vm2639_vm10, %v2630_v41, %v11497_v2  ;;  %v2775_v2 = vsel %vm654_vm1, %v15429_v6, %v11541_v37  ;;  %v15431_v37 = vld [vmem:[#allocation19_spill] sm:$0xff] }
 0x5c1   : > { %v2556_v14 = vpop.permute.xlu1 %2555  ;;  %v2717_v32 = vsel %vm2676_vm11, %v2667_v45, %v11533_v21  ;;  %v2814_v33 = vsel %vm2639_vm10, %v2775_v2, %v11577_v49  ;;  %v15430_v45 = vld [vmem:[#allocation26_spill] sm:$0xff]  ;;  %v15432_v6 = vld [vmem:[#allocation51_spill] sm:$0xff] }
 0x5c2   : > { %v2247_v26 = vpop.permute.xlu0 %2246  ;;  %v2861_v15 = vsel %vm2676_vm11, %v2812_v10, %v2556_v14  ;;  %v2778_v14 = vsel %vm654_vm1, %v15431_v37, %v2404_v19  ;;  %v15435_v37 = vld [vmem:[#allocation20_spill] sm:$0xff] }
 0x5c3   : > { %3216 = vmatprep.mubr.bf16.mxu1 %v2861_v15  ;;  %v2816_v49 = vsel %vm2639_vm10, %v2778_v14, %v2443_v62 }
 0x5c4   : > { %3217 = vmatmul.mubr.bf16.gmra.mrb[56].mxu1 %v2717_v32 }
 0x5c5   : > { %v2406_v63 = vpop.permute.xlu1 %2405 }
 0x5c6   : > { %v2113_v55 = vpop.permute.xlu0 %2112 }
 0x5c7   : > { %v2632_v54 = vsel %vm654_vm1, %v15428_v53, %v2113_v55 }
 0x5c8   : > { %v2669_v59 = vsel %vm2639_vm10, %v2632_v54, %v11569_v9 }
 0x5c9   : > { %v2558_v60 = vpop.permute.xlu1 %2557  ;;  %v2720_v41 = vsel %vm2676_vm11, %v2669_v59, %v2245_v40  ;;  %v15433_v59 = vld [vmem:[#allocation46_spill] sm:$0xff] }
 0x5ca   : > { %v2210_v4 = vpop.permute.xlu0 %2209  ;;  %v2864_v21 = vsel %vm2676_vm11, %v2814_v33, %v2558_v60  ;;  %v2781_v19 = vsel %vm654_vm1, %v15433_v59, %v2406_v63  ;;  %v11709_v59 = vld [vmem:[%s503_s30] ss:$0 sm:$0xff] }
 0x5cb   : > { %3224 = vmatprep.mubr.bf16.mxu1 %v2864_v21 }
 0x5cc   : > { %3225 = vmatmul.mubr.bf16.gmra.mrb[60].mxu1 %v2720_v41 }
 0x5cd   : > { %v2445_v51 = vpop.permute.xlu1 %2444 }
 0x5ce   : > { %v2115_v0 = vpop.permute.xlu0 %2114  ;;  %v2818_v62 = vsel %vm2639_vm10, %v2781_v19, %v2445_v51 }
 0x5cf   : > { %v2634_v10 = vsel %vm654_vm1, %v15430_v45, %v2115_v0  ;;  %v15434_v45 = vld [vmem:[#allocation23_spill] sm:$0xff] }
 0x5d0   : > { %v2671_v9 = vsel %vm2639_vm10, %v2634_v10, %v2208_v5 }
 0x5d1   : > { %v2560_v15 = vpop.permute.xlu1 %2559  ;;  %v2723_v40 = vsel %vm2676_vm11, %v2671_v9, %v2247_v26 }
 0x5d2   : > { %v2249_v32 = vpop.permute.xlu0 %2248  ;;  %v2867_v55 = vsel %vm2676_vm11, %v2816_v49, %v2560_v15 }
 0x5d3   : > { %3232 = vmatprep.mubr.bf16.mxu1 %v2867_v55  ;;  %v3437_v55 = vld [vmem:[%s14931_s11 + $0x8] sm:$0xff] }
 0x5d4   : > { %3233 = vmatmul.mubr.bf16.gmra.mrb[64].mxu1 %v2723_v40 }
 0x5d5   : > { %v2408_v53 = vpop.permute.xlu1 %2407 }
 0x5d6   : > { %v2117_v54 = vpop.permute.xlu0 %2116  ;;  %v2784_v63 = vsel %vm654_vm1, %v15435_v37, %v2408_v53  ;;  %v15436_v53 = vmov 0.0|0.0  }
 0x5d7   : > { %v2636_v2 = vsel %vm654_vm1, %v15432_v6, %v2117_v54  ;;  %v3438_v54 = vld [vmem:[%s14931_s11 + $0x10] sm:$0xff]  ;;  %v3439_v6 = vld [vmem:[%s14931_s11 + $0x18] sm:$0xff] }
 0x5d8   : > { %v2673_v5 = vsel %vm2639_vm10, %v2636_v2, %v2210_v4  ;;  %v11701_v2 = vpack.c.bf16 %v3439_v6, %v3438_v54 }
 0x5d9   : > { %v2562_v33 = vpop.permute.xlu1 %2561  ;;  %v2726_v26 = vsel %vm2676_vm11, %v2673_v5, %v2249_v32  ;;  %v3436_v32 = vld [vmem:[%s14931_s11] sm:$0xff] }
 0x5da   : > { %v2212_v60 = vpop.permute.xlu0 %2211  ;;  %v2870_v21 = vsel %vm2676_vm11, %v2818_v62, %v2562_v33  ;;  %v11691_v40 = vpack.c.bf16 %v3437_v55, %v3436_v32 }
 0x5db   : > { %3240 = vmatprep.mubr.bf16.mxu1 %v2870_v21  ;;  %v3441_v21 = vld [vmem:[%s14931_s11 + $0x28] sm:$0xff] }
 0x5dc   : > { %3241 = vmatmul.mubr.bf16.gmra.mrb[68].mxu1 %v2726_v26  ;;  %8418 = vmatpush3.bf16.msra.mxu0 %v11691_v40 }
 0x5dd   : > { %v2447_v41 = vpop.permute.xlu1 %2446  ;;  %8419 = vmatprep.subr.bf16.mxu0 %v15436_v53 }
 0x5de   : > { %v2119_v0 = vpop.permute.xlu0 %2118  ;;  %v2820_v4 = vsel %vm2639_vm10, %v2784_v63, %v2447_v41 }
 0x5df   : > { %v2638_v10 = vsel %vm654_vm1, %v15434_v45, %v2119_v0  ;;  %vm5237_vm1 = vsmask.f32 2304 }
 0x5e0   : > { %v2675_v49 = vsel %vm2639_vm10, %v2638_v10, %v2212_v60  ;;  %8421 = vmatpush3.bf16.msra.mxu0 %v11701_v2  ;;  %v3440_v60 = vld [vmem:[%s14931_s11 + $0x20] sm:$0xff] }
 0x5e1   : > { %v2564_v14 = vpop.permute.xlu1 %2563  ;;  %8422 = vmatprep.subr.bf16.mxu0 %v15436_v53  ;;  %v11722_v45 = vpack.c.bf16 %v3441_v21, %v3440_v60 }
 0x5e2   : > { %v2251_v51 = vpop.permute.xlu0 %2250  ;;  %v2873_v9 = vsel %vm2676_vm11, %v2820_v4, %v2564_v14 }
 0x5e3   : > { %3248 = vmatprep.mubr.bf16.mxu1 %v2873_v9  ;;  %v2729_v15 = vsel %vm2676_vm11, %v2675_v49, %v2251_v51 }
 0x5e4   : > { %3249 = vmatmul.mubr.bf16.gmra.mrb[72].mxu1 %v2729_v15  ;;  %8424 = vmatpush3.bf16.msra.mxu0 %v11722_v45 }
 0x5e5   : > { %8425 = vmatprep.subr.bf16.mxu0 %v15436_v53 }
 0x62f   : > { %v3114_v19 = vpop.f32.mrb[4].mxu1 }
 0x630   : > { %v3115_v5 = vadd.f32 %v11709_v59, %v3114_v19  ;;  %v3116_v62 = vpop.f32.mrb[5].mxu1 }
 0x631   : > { %v3117_v33 = vpop.f32.mrb[6].mxu1 }
 0x632   : > { %v11719_v26 = vadd.f32 %v11291_v11, %v3115_v5  ;;  %v3118_v41 = vadd.f32 %v11709_v59, %v3117_v33  ;;  %v3119_v0 = vpop.f32.mrb[7].mxu1 }
 0x633   : > { %v3442_v0 = vld [vmem:[%s14931_s11 + $0x30] sm:$0xff] }
 0x634   : > { %v11725_v10 = vadd.f32 %v11305_v16, %v3118_v41 }
 0x637   : > { %v3122_v37 = vpop.f32.mrb[8].mxu1 }
 0x638   : > { %v3123_v63 = vadd.f32 %v11709_v59, %v3122_v37  ;;  %v3124_v4 = vpop.f32.mrb[9].mxu1 }
 0x639   : > { %v3125_v14 = vpop.f32.mrb[10].mxu1 }
 0x63a   : > { %v11731_v11 = vadd.f32 %v11288_v39, %v3123_v63  ;;  %v3126_v51 = vadd.f32 %v11709_v59, %v3125_v14  ;;  %v3127_v9 = vpop.f32.mrb[11].mxu1  ;;  %v11763_v14 = vpop.permute.xlu1 %3447 }
 0x63b   : > { %15437 = vst [vmem:[#allocation33_spill] sm:$0xff] %v11763_v14 }
 0x63c   : > { %v11735_v49 = vadd.f32 %v11299_v38, %v3126_v51  ;;  %v15438_v51 = vmov 0.0  }
 0x63f   : > { %v3130_v16 = vpop.f32.mrb[12].mxu1 }
 0x640   : > { %v3131_v15 = vadd.f32 %v11709_v59, %v3130_v16  ;;  %v3132_v32 = vpop.f32.mrb[13].mxu1 }
 0x641   : > { %v3133_v55 = vpop.f32.mrb[14].mxu1 }
 0x642   : > { %v11739_v54 = vadd.f32 %v11332_v50, %v3131_v15  ;;  %v3134_v6 = vadd.f32 %v11709_v59, %v3133_v55  ;;  %v3135_v19 = vpop.f32.mrb[15].mxu1  ;;  %v11773_v55 = vpop.permute.xlu0 %3452 }
 0x643   : > { %v11777_v19 = vpop.permute.xlu1 %3457 }
 0x644   : > { %v11743_v39 = vadd.f32 %v11341_v44, %v3134_v6  ;;  %v3443_v44 = vld [vmem:[%s14931_s11 + $0x38] sm:$0xff]  ;;  %v3626_v6 = vmul.f32 %v11773_v55, %v11725_v10 }
 0x645   : > { %v11759_v37 = vpack.c.bf16 %v3443_v44, %v3442_v0 }
 0x647   : > { %v3138_v5 = vpop.f32.mrb[16].mxu1  ;;  %8427 = vmatpush3.bf16.msra.mxu0 %v11759_v37 }
 0x648   : > { %v3139_v62 = vadd.f32 %v11709_v59, %v3138_v5  ;;  %v3140_v33 = vpop.f32.mrb[17].mxu1  ;;  %8327 = vmatprep.subr.mxu0 %v15438_v51 }
 0x649   : > { %v3141_v38 = vpop.f32.mrb[18].mxu1 }
 0x64a   : > { %v11747_v60 = vadd.f32 %v11330_v47, %v3139_v62  ;;  %v3142_v21 = vadd.f32 %v11709_v59, %v3141_v38  ;;  %v3143_v41 = vpop.f32.mrb[19].mxu1  ;;  %v3625_v62 = vmul.f32 %v11763_v14, %v11719_v26 }
 0x64c   : > { %v11751_v50 = vadd.f32 %v11336_v36, %v3142_v21 }
 0x64f   : > { %v3146_v63 = vpop.f32.mrb[20].mxu1 }
 0x650   : > { %v3147_v47 = vadd.f32 %v11709_v59, %v3146_v63  ;;  %v3148_v4 = vpop.f32.mrb[21].mxu1  ;;  %v11789_v63 = vpop.permute.xlu0 %3462 }
 0x651   : > { %v3149_v36 = vpop.f32.mrb[22].mxu1 }
 0x652   : > { %v11767_v9 = vadd.f32 %v11368_v48, %v3147_v47  ;;  %v3150_v16 = vadd.f32 %v11709_v59, %v3149_v36  ;;  %v3151_v15 = vpop.f32.mrb[23].mxu1  ;;  %v3627_v48 = vmul.f32 %v11777_v19, %v11731_v11  ;;  %v3661_v47 = vsel %vm2639_vm10, %v3625_v62, 0.0 }
 0x653   : > { %v3628_v36 = vmul.f32 %v11789_v63, %v11735_v49  ;;  %v11798_v15 = vpop.permute.xlu1 %3467 }
 0x654   : > { %v11771_v32 = vadd.f32 %v11377_v25, %v3150_v16  ;;  %v3662_v25 = vsel %vm2639_vm10, %v3626_v6, 0.0  ;;  %v3664_v4 = vsel %vm2639_vm10, %v3627_v48, 0.0  ;;  %15439 = vst [vmem:[#allocation47_spill] sm:$0xff] %v11798_v15  ;;  %v11804_v48 = vpop.permute.xlu0 %3472 }
 0x655   : > { %v3663_v6 = vadd.f32 %v3662_v25, %v3661_v47  ;;  %15440 = vst [vmem:[#allocation22_spill] sm:$0xff] %v11804_v48 }
 0x657   : > { %v3154_v5 = vpop.f32.mrb[24].mxu1 }
 0x658   : > { %v3155_v33 = vadd.f32 %v11709_v59, %v3154_v5  ;;  %v3156_v38 = vpop.f32.mrb[25].mxu1  ;;  %v3665_v5 = vadd.f32 %v3664_v4, %v3663_v6  ;;  %v11813_v4 = vpop.permute.xlu1 %3477 }
 0x659   : > { %v3157_v21 = vpop.f32.mrb[26].mxu1  ;;  %v3666_v38 = vsel %vm2639_vm10, %v3628_v36, 0.0  ;;  %15441 = vst [vmem:[#allocation48_spill] sm:$0xff] %v11813_v4  ;;  %v3631_v6 = vmul.f32 %v11813_v4, %v11747_v60 }
 0x65a   : > { %v11786_v41 = vadd.f32 %v11366_v22, %v3155_v33  ;;  %v3158_v0 = vadd.f32 %v11709_v59, %v3157_v21  ;;  %v3159_v44 = vpop.f32.mrb[27].mxu1  ;;  %v3629_v22 = vmul.f32 %v11798_v15, %v11739_v54  ;;  %v3667_v36 = vadd.f32 %v3666_v38, %v3665_v5  ;;  %v11821_v15 = vpop.permute.xlu0 %3482 }
 0x65b   : > { %15442 = vst [vmem:[#allocation24_spill] sm:$0xff] %v11821_v15 }
 0x65c   : > { %v11796_v16 = vadd.f32 %v11372_v1, %v3158_v0  ;;  %v3668_v31 = vsel %vm2639_vm10, %v3629_v22, 0.0  ;;  %v3630_v1 = vmul.f32 %v11804_v48, %v11743_v39  ;;  %v11827_v38 = vpop.permute.xlu1 %3487 }
 0x65d   : > { %15443 = vst [vmem:[#allocation49_spill] sm:$0xff] %v11827_v38 }
 0x65e   : > { %v3670_v22 = vsel %vm2639_vm10, %v3630_v1, 0.0 }
 0x65f   : > { %v3162_v33 = vpop.f32.mrb[28].mxu1 }
 0x660   : > { %v3163_v62 = vadd.f32 %v11709_v59, %v3162_v33  ;;  %v3164_v21 = vpop.f32.mrb[29].mxu1 }
 0x661   : > { %v3165_v44 = vpop.f32.mrb[30].mxu1  ;;  %v3669_v21 = vadd.f32 %v3668_v31, %v3667_v36 }
 0x662   : > { %v11810_v25 = vadd.f32 %v11404_v13, %v3163_v62  ;;  %v3166_v0 = vadd.f32 %v11709_v59, %v3165_v44  ;;  %v3167_v47 = vpop.f32.mrb[31].mxu1  ;;  %v3672_v13 = vsel %vm2639_vm10, %v3631_v6, 0.0  ;;  %v3632_v62 = vmul.f32 %v11821_v15, %v11751_v50 }
 0x663   : > { %v3671_v47 = vadd.f32 %v3670_v22, %v3669_v21 }
 0x664   : > { %v11818_v33 = vadd.f32 %v11413_v52, %v3166_v0  ;;  %v3633_v52 = vmul.f32 %v11827_v38, %v11767_v9  ;;  %v3674_v6 = vsel %vm2639_vm10, %v3632_v62, 0.0 }
 0x665   : > { %v3673_v36 = vadd.f32 %v3672_v13, %v3671_v47 }
 0x666   : > { %v3676_v21 = vsel %vm2639_vm10, %v3633_v52, 0.0 }
 0x667   : > { %v3170_v48 = vpop.f32.mrb[32].mxu1 }
 0x668   : > { %v3171_v44 = vadd.f32 %v11709_v59, %v3170_v48  ;;  %v3172_v5 = vpop.f32.mrb[33].mxu1  ;;  %v11839_v48 = vpop.permute.xlu0 %3492 }
 0x669   : > { %v3173_v4 = vpop.f32.mrb[34].mxu1  ;;  %15444 = vst [vmem:[#allocation44_spill] sm:$0xff] %v11839_v48  ;;  %v3634_v22 = vmul.f32 %v11839_v48, %v11771_v32  ;;  %v11844_v5 = vpop.permute.xlu1 %3497 }
 0x66a   : > { %v11832_v31 = vadd.f32 %v11402_v42, %v3171_v44  ;;  %v3174_v1 = vadd.f32 %v11709_v59, %v3173_v4  ;;  %v3175_v0 = vpop.f32.mrb[35].mxu1  ;;  %15445 = vst [vmem:[#allocation45_spill] sm:$0xff] %v11844_v5  ;;  %v3675_v42 = vadd.f32 %v3674_v6, %v3673_v36  ;;  %v3635_v4 = vmul.f32 %v11844_v5, %v11786_v41 }
 0x66c   : > { %v11837_v15 = vadd.f32 %v11408_v23, %v3174_v1  ;;  %v3677_v47 = vadd.f32 %v3676_v21, %v3675_v42  ;;  %v3678_v1 = vsel %vm2639_vm10, %v3634_v22, 0.0  ;;  %v11854_v38 = vpop.permute.xlu0 %3502  ;;  %v3680_v36 = vsel %vm2639_vm10, %v3635_v4, 0.0 }
 0x66d   : > { %15446 = vst [vmem:[#allocation3_spill] sm:$0xff] %v11854_v38  ;;  %v3636_v6 = vmul.f32 %v11854_v38, %v11796_v16  ;;  %v11862_v21 = vpop.permute.xlu1 %3507 }
 0x66e   : > { %15447 = vst [vmem:[#allocation56_spill] sm:$0xff] %v11862_v21  ;;  %v3679_v42 = vadd.f32 %v3678_v1, %v3677_v47 }
 0x66f   : > { %v3178_v44 = vpop.f32.mrb[36].mxu1 }
 0x670   : > { %v3179_v13 = vadd.f32 %v11709_v59, %v3178_v44  ;;  %v3180_v62 = vpop.f32.mrb[37].mxu1  ;;  %v3681_v22 = vadd.f32 %v3680_v36, %v3679_v42  ;;  %v11868_v4 = vpop.permute.xlu0 %3512 }
 0x671   : > { %v3181_v23 = vpop.f32.mrb[38].mxu1  ;;  %15448 = vst [vmem:[#allocation4_spill] sm:$0xff] %v11868_v4  ;;  %v11877_v36 = vpop.permute.xlu1 %3517 }
 0x672   : > { %v11851_v0 = vadd.f32 %v11440_v24, %v3179_v13  ;;  %v3182_v52 = vadd.f32 %v11709_v59, %v3181_v23  ;;  %v3183_v48 = vpop.f32.mrb[39].mxu1  ;;  %v3637_v24 = vmul.f32 %v11862_v21, %v11810_v25  ;;  %15449 = vst [vmem:[#allocation57_spill] sm:$0xff] %v11877_v36  ;;  %v3639_v42 = vmul.f32 %v11877_v36, %v11832_v31 }
 0x673   : > { %v3682_v48 = vsel %vm2639_vm10, %v3636_v6, 0.0 }
 0x674   : > { %v11860_v44 = vadd.f32 %v11449_v61, %v3182_v52  ;;  %v3684_v38 = vsel %vm2639_vm10, %v3637_v24, 0.0  ;;  %v3638_v61 = vmul.f32 %v11868_v4, %v11818_v33  ;;  %v3683_v6 = vadd.f32 %v3682_v48, %v3681_v22  ;;  %v11885_v21 = vpop.permute.xlu0 %3522 }
 0x675   : > { %15450 = vst [vmem:[#allocation58_spill] sm:$0xff] %v11885_v21  ;;  %v11891_v48 = vpop.permute.xlu1 %3527 }
 0x676   : > { %v3686_v24 = vsel %vm2639_vm10, %v3638_v61, 0.0  ;;  %15451 = vst [vmem:[#allocation34_spill] sm:$0xff] %v11891_v48 }
 0x677   : > { %v3186_v13 = vpop.f32.mrb[40].mxu1 }
 0x678   : > { %v3187_v62 = vadd.f32 %v11709_v59, %v3186_v13  ;;  %v3188_v23 = vpop.f32.mrb[41].mxu1 }
 0x679   : > { %v3189_v5 = vpop.f32.mrb[42].mxu1  ;;  %v3685_v23 = vadd.f32 %v3684_v38, %v3683_v6 }
 0x67a   : > { %v11874_v47 = vadd.f32 %v11438_v35, %v3187_v62  ;;  %v3190_v1 = vadd.f32 %v11709_v59, %v3189_v5  ;;  %v3191_v52 = vpop.f32.mrb[43].mxu1  ;;  %v3688_v35 = vsel %vm2639_vm10, %v3639_v42, 0.0  ;;  %v3640_v5 = vmul.f32 %v11885_v21, %v11837_v15 }
 0x67b   : > { %v3687_v52 = vadd.f32 %v3686_v24, %v3685_v23 }
 0x67c   : > { %v11882_v13 = vadd.f32 %v11444_v12, %v3190_v1  ;;  %v3641_v12 = vmul.f32 %v11891_v48, %v11851_v0  ;;  %v3690_v42 = vsel %vm2639_vm10, %v3640_v5, 0.0 }
 0x67d   : > { %v3689_v6 = vadd.f32 %v3688_v35, %v3687_v52 }
 0x67e   : > { %v3692_v23 = vsel %vm2639_vm10, %v3641_v12, 0.0 }
 0x67f   : > { %v3194_v4 = vpop.f32.mrb[44].mxu1 }
 0x680   : > { %v3195_v62 = vadd.f32 %v11709_v59, %v3194_v4  ;;  %v3196_v22 = vpop.f32.mrb[45].mxu1  ;;  %v11903_v4 = vpop.permute.xlu0 %3532 }
 0x681   : > { %v3197_v36 = vpop.f32.mrb[46].mxu1  ;;  %15452 = vst [vmem:[#allocation35_spill] sm:$0xff] %v11903_v4  ;;  %v3642_v24 = vmul.f32 %v11903_v4, %v11860_v44  ;;  %v11908_v22 = vpop.permute.xlu1 %3537 }
 0x682   : > { %v11896_v38 = vadd.f32 %v11476_v7, %v3195_v62  ;;  %v3198_v61 = vadd.f32 %v11709_v59, %v3197_v36  ;;  %v3199_v1 = vpop.f32.mrb[47].mxu1  ;;  %15453 = vst [vmem:[#allocation36_spill] sm:$0xff] %v11908_v22  ;;  %v3691_v7 = vadd.f32 %v3690_v42, %v3689_v6  ;;  %v3643_v36 = vmul.f32 %v11908_v22, %v11874_v47 }
 0x684   : > { %v11901_v21 = vadd.f32 %v11485_v30, %v3198_v61  ;;  %v3693_v52 = vadd.f32 %v3692_v23, %v3691_v7  ;;  %v3694_v61 = vsel %vm2639_vm10, %v3642_v24, 0.0  ;;  %v11918_v48 = vpop.permute.xlu0 %3542  ;;  %v3696_v6 = vsel %vm2639_vm10, %v3643_v36, 0.0 }
 0x685   : > { %15454 = vst [vmem:[#allocation37_spill] sm:$0xff] %v11918_v48  ;;  %v3644_v42 = vmul.f32 %v11918_v48, %v11882_v13  ;;  %v11926_v23 = vpop.permute.xlu1 %3547 }
 0x686   : > { %15455 = vst [vmem:[#allocation59_spill] sm:$0xff] %v11926_v23  ;;  %v3695_v7 = vadd.f32 %v3694_v61, %v3693_v52 }
 0x687   : > { %v3202_v62 = vpop.f32.mrb[48].mxu1 }
 0x688   : > { %v3203_v35 = vadd.f32 %v11709_v59, %v3202_v62  ;;  %v3204_v5 = vpop.f32.mrb[49].mxu1  ;;  %v3697_v24 = vadd.f32 %v3696_v6, %v3695_v7  ;;  %v11932_v36 = vpop.permute.xlu0 %3552 }
 0x689   : > { %v3205_v30 = vpop.f32.mrb[50].mxu1  ;;  %15456 = vst [vmem:[#allocation60_spill] sm:$0xff] %v11932_v36  ;;  %v11941_v6 = vpop.permute.xlu1 %3557 }
 0x68a   : > { %v11915_v1 = vadd.f32 %v11474_v27, %v3203_v35  ;;  %v3206_v12 = vadd.f32 %v11709_v59, %v3205_v30  ;;  %v3207_v4 = vpop.f32.mrb[51].mxu1  ;;  %v3645_v27 = vmul.f32 %v11926_v23, %v11896_v38  ;;  %15457 = vst [vmem:[#allocation61_spill] sm:$0xff] %v11941_v6 }
 0x68b   : > { %v3698_v4 = vsel %vm2639_vm10, %v3644_v42, 0.0 }
 0x68c   : > { %v11924_v62 = vadd.f32 %v11480_v17, %v3206_v12  ;;  %v3700_v48 = vsel %vm2639_vm10, %v3645_v27, 0.0  ;;  %v3646_v17 = vmul.f32 %v11932_v36, %v11901_v21  ;;  %v3699_v42 = vadd.f32 %v3698_v4, %v3697_v24  ;;  %v11949_v23 = vpop.permute.xlu0 %3562 }
 0x68d   : > { %v3647_v7 = vmul.f32 %v11941_v6, %v11915_v1  ;;  %15458 = vst [vmem:[#allocation62_spill] sm:$0xff] %v11949_v23  ;;  %v11955_v4 = vpop.permute.xlu1 %3567 }
 0x68e   : > { %v3702_v27 = vsel %vm2639_vm10, %v3646_v17, 0.0  ;;  %15459 = vst [vmem:[#allocation38_spill] sm:$0xff] %v11955_v4 }
 0x68f   : > { %v3210_v35 = vpop.f32.mrb[52].mxu1 }
 0x690   : > { %v3211_v5 = vadd.f32 %v11709_v59, %v3210_v35  ;;  %v3212_v30 = vpop.f32.mrb[53].mxu1 }
 0x691   : > { %v3213_v22 = vpop.f32.mrb[54].mxu1  ;;  %v3701_v30 = vadd.f32 %v3700_v48, %v3699_v42 }
 0x692   : > { %v11938_v52 = vadd.f32 %v11512_v57, %v3211_v5  ;;  %v3214_v61 = vadd.f32 %v11709_v59, %v3213_v22  ;;  %v3215_v12 = vpop.f32.mrb[55].mxu1  ;;  %v3704_v57 = vsel %vm2639_vm10, %v3647_v7, 0.0  ;;  %v3648_v22 = vmul.f32 %v11949_v23, %v11924_v62 }
 0x693   : > { %v3703_v12 = vadd.f32 %v3702_v27, %v3701_v30 }
 0x694   : > { %v11946_v35 = vadd.f32 %v11521_v56, %v3214_v61  ;;  %v3649_v56 = vmul.f32 %v11955_v4, %v11938_v52  ;;  %v3706_v7 = vsel %vm2639_vm10, %v3648_v22, 0.0 }
 0x695   : > { %v3705_v42 = vadd.f32 %v3704_v57, %v3703_v12 }
 0x696   : > { %v3708_v30 = vsel %vm2639_vm10, %v3649_v56, 0.0 }
 0x697   : > { %v3218_v36 = vpop.f32.mrb[56].mxu1 }
 0x698   : > { %v3219_v5 = vadd.f32 %v11709_v59, %v3218_v36  ;;  %v3220_v24 = vpop.f32.mrb[57].mxu1  ;;  %v11967_v36 = vpop.permute.xlu0 %3572 }
 0x699   : > { %v3221_v6 = vpop.f32.mrb[58].mxu1  ;;  %15460 = vst [vmem:[#allocation39_spill] sm:$0xff] %v11967_v36  ;;  %v3650_v27 = vmul.f32 %v11967_v36, %v11946_v35  ;;  %v11972_v24 = vpop.permute.xlu1 %3577 }
 0x69a   : > { %v11960_v48 = vadd.f32 %v11510_v20, %v3219_v5  ;;  %v3222_v17 = vadd.f32 %v11709_v59, %v3221_v6  ;;  %v3223_v61 = vpop.f32.mrb[59].mxu1  ;;  %15461 = vst [vmem:[#allocation40_spill] sm:$0xff] %v11972_v24  ;;  %v3707_v20 = vadd.f32 %v3706_v7, %v3705_v42 }
 0x69c   : > { %v11965_v23 = vadd.f32 %v11516_v29, %v3222_v17  ;;  %v3651_v6 = vmul.f32 %v11972_v24, %v11960_v48  ;;  %v3709_v12 = vadd.f32 %v3708_v30, %v3707_v20  ;;  %v3710_v17 = vsel %vm2639_vm10, %v3650_v27, 0.0  ;;  %v11982_v4 = vpop.permute.xlu0 %3582 }
 0x69d   : > { %15462 = vst [vmem:[#allocation41_spill] sm:$0xff] %v11982_v4  ;;  %v11990_v30 = vpop.permute.xlu1 %3587 }
 0x69e   : > { %v3712_v42 = vsel %vm2639_vm10, %v3651_v6, 0.0  ;;  %v3652_v7 = vmul.f32 %v11982_v4, %v11965_v23  ;;  %15463 = vst [vmem:[#allocation63_spill] sm:$0xff] %v11990_v30  ;;  %v3711_v20 = vadd.f32 %v3710_v17, %v3709_v12 }
 0x69f   : > { %v3226_v5 = vpop.f32.mrb[60].mxu1 }
 0x6a0   : > { %v3227_v57 = vadd.f32 %v11709_v59, %v3226_v5  ;;  %v3228_v22 = vpop.f32.mrb[61].mxu1  ;;  %v3713_v27 = vadd.f32 %v3712_v42, %v3711_v20  ;;  %v11996_v6 = vpop.permute.xlu0 %3592 }
 0x6a1   : > { %v3229_v29 = vpop.f32.mrb[62].mxu1  ;;  %15464 = vst [vmem:[#allocation64_spill] sm:$0xff] %v11996_v6  ;;  %v12005_v42 = vpop.permute.xlu1 %3597 }
 0x6a2   : > { %v11979_v61 = vadd.f32 %v11548_v46, %v3227_v57  ;;  %v3230_v56 = vadd.f32 %v11709_v59, %v3229_v29  ;;  %v3231_v36 = vpop.f32.mrb[63].mxu1  ;;  %15465 = vst [vmem:[#allocation42_spill] sm:$0xff] %v12005_v42 }
 0x6a3   : > { %v3714_v36 = vsel %vm2639_vm10, %v3652_v7, 0.0 }
 0x6a4   : > { %v11988_v5 = vadd.f32 %v11557_v3, %v3230_v56  ;;  %v3653_v46 = vmul.f32 %v11990_v30, %v11979_v61  ;;  %v3715_v7 = vadd.f32 %v3714_v36, %v3713_v27  ;;  %v12013_v30 = vpop.permute.xlu0 %3602 }
 0x6a5   : > { %15466 = vst [vmem:[#allocation43_spill] sm:$0xff] %v12013_v30 }
 0x6a6   : > { %v3716_v4 = vsel %vm2639_vm10, %v3653_v46, 0.0  ;;  %v3654_v3 = vmul.f32 %v11996_v6, %v11988_v5 }
 0x6a7   : > { %v3234_v57 = vpop.f32.mrb[64].mxu1 }
 0x6a8   : > { %v3235_v22 = vadd.f32 %v11709_v59, %v3234_v57  ;;  %v3236_v29 = vpop.f32.mrb[65].mxu1  ;;  %v3718_v46 = vsel %vm2639_vm10, %v3654_v3, 0.0  ;;  %v12023_v3 = vpop.permute.xlu1 %3607 }
 0x6a9   : > { %v3237_v24 = vpop.f32.mrb[66].mxu1  ;;  %v3717_v29 = vadd.f32 %v3716_v4, %v3715_v7  ;;  %15467 = vst [vmem:[#allocation8_spill] sm:$0xff] %v12023_v3 }
 0x6aa   : > { %v12002_v12 = vadd.f32 %v11546_v58, %v3235_v22  ;;  %v3238_v17 = vadd.f32 %v11709_v59, %v3237_v24  ;;  %v3239_v56 = vpop.f32.mrb[67].mxu1 }
 0x6ab   : > { %v3719_v36 = vadd.f32 %v3718_v46, %v3717_v29 }
 0x6ac   : > { %v3655_v20 = vmul.f32 %v12005_v42, %v12002_v12  ;;  %v12010_v57 = vadd.f32 %v11552_v43, %v3238_v17 }
 0x6ae   : > { %v3720_v58 = vsel %vm2639_vm10, %v3655_v20, 0.0  ;;  %v3656_v24 = vmul.f32 %v12013_v30, %v12010_v57 }
 0x6af   : > { %v3242_v6 = vpop.f32.mrb[68].mxu1  ;;  %v3721_v17 = vadd.f32 %v3720_v58, %v3719_v36 }
 0x6b0   : > { %v3243_v22 = vadd.f32 %v11709_v59, %v3242_v6  ;;  %v3244_v27 = vpop.f32.mrb[69].mxu1  ;;  %v3722_v7 = vsel %vm2639_vm10, %v3656_v24, 0.0  ;;  %v12031_v6 = vpop.permute.xlu0 %3612 }
 0x6b1   : > { %v3245_v56 = vpop.f32.mrb[70].mxu1  ;;  %15468 = vst [vmem:[#allocation52_spill] sm:$0xff] %v12031_v6  ;;  %v3723_v46 = vadd.f32 %v3722_v7, %v3721_v17 }
 0x6b2   : > { %v12020_v42 = vadd.f32 %v11584_v34, %v3243_v22  ;;  %v3246_v43 = vadd.f32 %v11709_v59, %v3245_v56  ;;  %v3247_v4 = vpop.f32.mrb[71].mxu1 }
 0x6b4   : > { %v3657_v20 = vmul.f32 %v12023_v3, %v12020_v42  ;;  %v12029_v30 = vadd.f32 %v11593_v28, %v3246_v43  ;;  %v12042_v3 = vpop.permute.xlu1 %3617  ;;  %v12049_v7 = vpop.permute.xlu0 %3622 }
 0x6b5   : > { %15469 = vst [vmem:[#allocation21_spill] sm:$0xff] %v12042_v3  ;;  %15470 = vst [vmem:[#allocation10_spill] sm:$0xff] %v12049_v7 }
 0x6b6   : > { %v3724_v29 = vsel %vm2639_vm10, %v3657_v20, 0.0  ;;  %v3658_v34 = vmul.f32 %v12031_v6, %v12029_v30 }
 0x6b7   : > { %v3250_v22 = vpop.f32.mrb[72].mxu1  ;;  %v3725_v36 = vadd.f32 %v3724_v29, %v3723_v46 }
 0x6b8   : > { %v3251_v27 = vadd.f32 %v11709_v59, %v3250_v22  ;;  %v3252_v58 = vpop.f32.mrb[73].mxu1  ;;  %v3726_v56 = vsel %vm2639_vm10, %v3658_v34, 0.0 }
 0x6b9   : > { %v3253_v24 = vpop.f32.mrb[74].mxu1  ;;  %v3727_v29 = vadd.f32 %v3726_v56, %v3725_v36 }
 0x6ba   : > { %v12039_v4 = vadd.f32 %v11582_v18, %v3251_v27  ;;  %v3254_v28 = vadd.f32 %v11709_v59, %v3253_v24  ;;  %v3255_v43 = vpop.f32.mrb[75].mxu1 }
 0x6bc   : > { %v3659_v20 = vmul.f32 %v12042_v3, %v12039_v4  ;;  %v12047_v17 = vadd.f32 %v11588_v8, %v3254_v28  ;;  %v12058_v8 = vld [vmem:[%s14932_s12] sm:$0xff] }
 0x6be   : > { %v3728_v46 = vsel %vm2639_vm10, %v3659_v20, 0.0  ;;  %v3660_v18 = vmul.f32 %v12049_v7, %v12047_v17 }
 0x6bf   : > { %v3729_v34 = vadd.f32 %v3728_v46, %v3727_v29 }
 0x6c0   : > { %v3730_v59 = vsel %vm2639_vm10, %v3660_v18, 0.0 }
 0x6c1   : > { %v3731_v22 = vadd.f32 %v3730_v59, %v3729_v34 }
 0x6c3   : > { %v3732_v27 = vrot.slane %v3731_v22, 4 }
 0x6c5   : > { %v3733_v58 = vadd.f32 %v3732_v27, %v3731_v22  ;;  %v15472_v22 = vld [vmem:[#allocation47_spill] sm:$0xff] }
 0x6c7   : > { %v3734_v24 = vrot.slane %v3733_v58, 2 }
 0x6c9   : > { %v3735_v43 = vadd.f32 %v3734_v24, %v3733_v58  ;;  %v15473_v24 = vld [vmem:[#allocation22_spill] sm:$0xff] }
 0x6cb   : > { %v3736_v3 = vrot.slane %v3735_v43, 1 }
 0x6cd   : > { %v3737_v6 = vadd.f32 %v3736_v3, %v3735_v43 }
 0x6cf   : > { %8325 = vmatmul.mubr.msk.f32.vlgmr.msra.gmra.mrb[40].mxu0 %vm2639_vm10, %v3737_v6 }
 0x6d0   : > { %8328 = vmatpush3.msra.mxu0 %v12058_v8  ;;  %8329 = vmatprep.mubr.msk.f32.mxu0 %vm9056_vm0, %v15438_v51 }
 0x6d1   : > { %8428 = vmatprep.subr.bf16.mxu0 %v15436_v53 }
 0x7a2   : > { %v3807_v36 = vpop.f32.mrb[40].mxu0 }
 0x7a3   : > { %v3811_v56 = vmul.f32 0.00048828125, %v3807_v36  ;;  %v8326_v28 = vpop.f32.mrb[41].mxu0 }
 0x7a5   : > { %8330 = vmatmul.mubr.msk.f32.vlgmr.msra.gmra.mrb[42].mxu0 %vm821_vm3, %v3811_v56 }
 0x7a6   : > { %8430 = vmatpush3.bf16.msra.mxu0 %v11691_v40  ;;  %8348 = vmatprep.mubr.msk.f32.mxu0 %vm9056_vm0, %v15438_v51  ;;  %v15471_v40 = vld [vmem:[#allocation16_spill] sm:$0xff] }
 0x7a7   : > { %8431 = vmatprep.subr.bf16.mxu0 %v15436_v53 }
 0x7aa   : > { %8433 = vmatpush3.bf16.msra.mxu0 %v11701_v2 }
 0x7ab   : > { %8434 = vmatprep.subr.bf16.mxu0 %v15436_v53 }
 0x7ae   : > { %8436 = vmatpush3.bf16.msra.mxu0 %v11722_v45 }
 0x7af   : > { %8437 = vmatprep.subr.bf16.mxu0 %v15436_v53 }
 0x7b2   : > { %8439 = vmatpush3.bf16.msra.mxu0 %v11759_v37 }
 0x7b3   : > { %8351 = vmatprep.subr.mxu0 %v15438_v51 }
 0x878   : > { %v3881_v3 = vpop.f32.mrb[42].mxu0 }
 0x879   : > { %v8331_v6 = vpop.f32.mrb[43].mxu0  ;;  %v12077_v20 = vrot.slane %v3881_v3, %v15471_v40  ;;  %v15474_v3 = vld [vmem:[#allocation48_spill] sm:$0xff] }
 0x87b   : > { %v12081_v29 = vsub.f32 %v11719_v26, %v12077_v20  ;;  %v12085_v2 = vsub.f32 %v11725_v10, %v12077_v20  ;;  %v12089_v53 = vsub.f32 %v11731_v11, %v12077_v20  ;;  %v12093_v45 = vsub.f32 %v11735_v49, %v12077_v20 }
 0x87c   : > { %v12101_v26 = vsub.f32 %v11739_v54, %v12077_v20  ;;  %v12107_v11 = vsub.f32 %v11743_v39, %v12077_v20  ;;  %v12113_v59 = vsub.f32 %v11747_v60, %v12077_v20  ;;  %v12119_v58 = vsub.f32 %v11751_v50, %v12077_v20 }
 0x87d   : > { %v3925_v37 = vmul.f32 %v12081_v29, %v11763_v14  ;;  %v3926_v46 = vmul.f32 %v12085_v2, %v11773_v55  ;;  %v3927_v10 = vmul.f32 %v12089_v53, %v11777_v19  ;;  %v3928_v49 = vmul.f32 %v12093_v45, %v11789_v63 }
 0x87e   : > { %v3929_v54 = vmul.f32 %v12101_v26, %v15472_v22  ;;  %v3930_v39 = vmul.f32 %v12107_v11, %v15473_v24  ;;  %v12127_v60 = vsub.f32 %v11767_v9, %v12077_v20  ;;  %v3931_v6 = vmul.f32 %v12113_v59, %v15474_v3  ;;  %v15476_v3 = vld [vmem:[#allocation49_spill] sm:$0xff] }
 0x87f   : > { %v3961_v18 = vmul.f32 %v3925_v37, %v3925_v37  ;;  %v3962_v34 = vmul.f32 %v3926_v46, %v3926_v46  ;;  %v3963_v27 = vmul.f32 %v3927_v10, %v3927_v10  ;;  %v3964_v43 = vmul.f32 %v3928_v49, %v3928_v49  ;;  %v15475_v49 = vld [vmem:[#allocation24_spill] sm:$0xff] }
 0x880   : > { %v3965_v37 = vmul.f32 %v3929_v54, %v3929_v54  ;;  %v12134_v10 = vsub.f32 %v11771_v32, %v12077_v20  ;;  %v12141_v9 = vsub.f32 %v11786_v41, %v12077_v20  ;;  %v3933_v54 = vmul.f32 %v12127_v60, %v15476_v3  ;;  %v15478_v3 = vld [vmem:[#allocation45_spill] sm:$0xff] }
 0x881   : > { %v3997_v36 = vsel %vm2639_vm10, %v3961_v18, 0.0  ;;  %v3998_v56 = vsel %vm2639_vm10, %v3962_v34, 0.0  ;;  %v4000_v50 = vsel %vm2639_vm10, %v3963_v27, 0.0  ;;  %v3932_v18 = vmul.f32 %v12119_v58, %v15475_v49  ;;  %v15477_v49 = vld [vmem:[#allocation44_spill] sm:$0xff] }
 0x882   : > { %v3999_v28 = vadd.f32 %v3998_v56, %v3997_v36  ;;  %v3966_v34 = vmul.f32 %v3930_v39, %v3930_v39  ;;  %v4002_v36 = vsel %vm2639_vm10, %v3964_v43, 0.0  ;;  %v3967_v27 = vmul.f32 %v3931_v6, %v3931_v6 }
 0x883   : > { %v12148_v32 = vsub.f32 %v11796_v16, %v12077_v20  ;;  %v3934_v39 = vmul.f32 %v12134_v10, %v15477_v49  ;;  %v3968_v43 = vmul.f32 %v3932_v18, %v3932_v18  ;;  %v12155_v41 = vsub.f32 %v11810_v25, %v12077_v20  ;;  %v15479_v49 = vld [vmem:[#allocation3_spill] sm:$0xff] }
 0x884   : > { %v4001_v46 = vadd.f32 %v4000_v50, %v3999_v28  ;;  %v4004_v28 = vsel %vm2639_vm10, %v3965_v37, 0.0  ;;  %v3935_v6 = vmul.f32 %v12141_v9, %v15478_v3  ;;  %v3969_v37 = vmul.f32 %v3933_v54, %v3933_v54  ;;  %v15480_v3 = vld [vmem:[#allocation56_spill] sm:$0xff] }
 0x885   : > { %v12162_v16 = vsub.f32 %v11818_v33, %v12077_v20  ;;  %v3936_v18 = vmul.f32 %v12148_v32, %v15479_v49  ;;  %v12169_v25 = vsub.f32 %v11832_v31, %v12077_v20  ;;  %v3937_v54 = vmul.f32 %v12155_v41, %v15480_v3  ;;  %v15481_v49 = vld [vmem:[#allocation4_spill] sm:$0xff]  ;;  %v15482_v3 = vld [vmem:[#allocation57_spill] sm:$0xff] }
 0x886   : > { %v4003_v56 = vadd.f32 %v4002_v36, %v4001_v46  ;;  %v4006_v46 = vsel %vm2639_vm10, %v3966_v34, 0.0  ;;  %v3970_v34 = vmul.f32 %v3934_v39, %v3934_v39  ;;  %v12176_v33 = vsub.f32 %v11837_v15, %v12077_v20 }
 0x887   : > { %v3938_v39 = vmul.f32 %v12162_v16, %v15481_v49  ;;  %v12183_v31 = vsub.f32 %v11851_v0, %v12077_v20  ;;  %v12190_v15 = vsub.f32 %v11860_v44, %v12077_v20  ;;  %v15483_v49 = vld [vmem:[#allocation58_spill] sm:$0xff]  ;;  %v12197_v0 = vsub.f32 %v11874_v47, %v12077_v20 }
 0x888   : > { %v4005_v50 = vadd.f32 %v4004_v28, %v4003_v56  ;;  %v4008_v56 = vsel %vm2639_vm10, %v3967_v27, 0.0  ;;  %v3971_v27 = vmul.f32 %v3935_v6, %v3935_v6  ;;  %v3939_v6 = vmul.f32 %v12169_v25, %v15482_v3  ;;  %v15484_v3 = vld [vmem:[#allocation34_spill] sm:$0xff] }
 0x889   : > { %v12204_v44 = vsub.f32 %v11882_v13, %v12077_v20  ;;  %v12211_v47 = vsub.f32 %v11896_v38, %v12077_v20  ;;  %v12218_v13 = vsub.f32 %v11901_v21, %v12077_v20  ;;  %v12225_v38 = vsub.f32 %v11915_v1, %v12077_v20 }
 0x88a   : > { %v4007_v36 = vadd.f32 %v4006_v46, %v4005_v50  ;;  %v4010_v50 = vsel %vm2639_vm10, %v3968_v43, 0.0  ;;  %v3972_v43 = vmul.f32 %v3936_v18, %v3936_v18  ;;  %v3940_v18 = vmul.f32 %v12176_v33, %v15483_v49  ;;  %v15485_v49 = vld [vmem:[#allocation35_spill] sm:$0xff] }
 0x88b   : > { %v12232_v21 = vsub.f32 %v11924_v62, %v12077_v20  ;;  %v12239_v1 = vsub.f32 %v11938_v52, %v12077_v20  ;;  %v12246_v62 = vsub.f32 %v11946_v35, %v12077_v20  ;;  %v12253_v52 = vsub.f32 %v11960_v48, %v12077_v20 }
 0x88c   : > { %v4009_v28 = vadd.f32 %v4008_v56, %v4007_v36  ;;  %v4012_v36 = vsel %vm2639_vm10, %v3969_v37, 0.0  ;;  %v3973_v37 = vmul.f32 %v3937_v54, %v3937_v54  ;;  %v3941_v54 = vmul.f32 %v12183_v31, %v15484_v3  ;;  %v15486_v3 = vld [vmem:[#allocation36_spill] sm:$0xff] }
 0x88d   : > { %v12260_v35 = vsub.f32 %v11965_v23, %v12077_v20  ;;  %v12267_v48 = vsub.f32 %v11979_v61, %v12077_v20  ;;  %v12274_v23 = vsub.f32 %v11988_v5, %v12077_v20  ;;  %v12281_v61 = vsub.f32 %v12002_v12, %v12077_v20 }
 0x88e   : > { %v4011_v46 = vadd.f32 %v4010_v50, %v4009_v28  ;;  %v4014_v28 = vsel %vm2639_vm10, %v3970_v34, 0.0  ;;  %v3974_v34 = vmul.f32 %v3938_v39, %v3938_v39  ;;  %v3942_v39 = vmul.f32 %v12190_v15, %v15485_v49  ;;  %v15487_v49 = vld [vmem:[#allocation37_spill] sm:$0xff] }
 0x88f   : > { %v12288_v5 = vsub.f32 %v12010_v57, %v12077_v20  ;;  %v12295_v12 = vsub.f32 %v12020_v42, %v12077_v20  ;;  %v12302_v57 = vsub.f32 %v12029_v30, %v12077_v20  ;;  %v12309_v42 = vsub.f32 %v12039_v4, %v12077_v20  ;;  %v15502_v4 = vld [vmem:[#allocation21_spill] sm:$0xff] }
 0x890   : > { %v4013_v56 = vadd.f32 %v4012_v36, %v4011_v46  ;;  %v4016_v46 = vsel %vm2639_vm10, %v3971_v27, 0.0  ;;  %v3975_v27 = vmul.f32 %v3939_v6, %v3939_v6  ;;  %v3943_v6 = vmul.f32 %v12197_v0, %v15486_v3  ;;  %v15488_v3 = vld [vmem:[#allocation59_spill] sm:$0xff] }
 0x891   : > { %v12316_v30 = vsub.f32 %v12047_v17, %v12077_v20  ;;  %v3959_v24 = vmul.f32 %v12309_v42, %v15502_v4 }
 0x892   : > { %v4015_v50 = vadd.f32 %v4014_v28, %v4013_v56  ;;  %v4018_v56 = vsel %vm2639_vm10, %v3972_v43, 0.0  ;;  %v3976_v43 = vmul.f32 %v3940_v18, %v3940_v18  ;;  %v3944_v18 = vmul.f32 %v12204_v44, %v15487_v49  ;;  %v15489_v49 = vld [vmem:[#allocation60_spill] sm:$0xff] }
 0x894   : > { %v4017_v36 = vadd.f32 %v4016_v46, %v4015_v50  ;;  %v4020_v50 = vsel %vm2639_vm10, %v3973_v37, 0.0  ;;  %v3977_v37 = vmul.f32 %v3941_v54, %v3941_v54  ;;  %v3945_v54 = vmul.f32 %v12211_v47, %v15488_v3  ;;  %v15490_v3 = vld [vmem:[#allocation61_spill] sm:$0xff] }
 0x896   : > { %v4019_v28 = vadd.f32 %v4018_v56, %v4017_v36  ;;  %v4022_v36 = vsel %vm2639_vm10, %v3974_v34, 0.0  ;;  %v3978_v34 = vmul.f32 %v3942_v39, %v3942_v39  ;;  %v3946_v39 = vmul.f32 %v12218_v13, %v15489_v49  ;;  %v15491_v49 = vld [vmem:[#allocation62_spill] sm:$0xff] }
 0x898   : > { %v4021_v46 = vadd.f32 %v4020_v50, %v4019_v28  ;;  %v4024_v28 = vsel %vm2639_vm10, %v3975_v27, 0.0  ;;  %v3979_v27 = vmul.f32 %v3943_v6, %v3943_v6  ;;  %v3947_v6 = vmul.f32 %v12225_v38, %v15490_v3  ;;  %v15492_v3 = vld [vmem:[#allocation38_spill] sm:$0xff] }
 0x89a   : > { %v4023_v56 = vadd.f32 %v4022_v36, %v4021_v46  ;;  %v4026_v46 = vsel %vm2639_vm10, %v3976_v43, 0.0  ;;  %v3980_v43 = vmul.f32 %v3944_v18, %v3944_v18  ;;  %v3948_v18 = vmul.f32 %v12232_v21, %v15491_v49  ;;  %v15493_v49 = vld [vmem:[#allocation39_spill] sm:$0xff] }
 0x89c   : > { %v4025_v50 = vadd.f32 %v4024_v28, %v4023_v56  ;;  %v4028_v56 = vsel %vm2639_vm10, %v3977_v37, 0.0  ;;  %v3981_v37 = vmul.f32 %v3945_v54, %v3945_v54  ;;  %v3949_v54 = vmul.f32 %v12239_v1, %v15492_v3  ;;  %v15494_v3 = vld [vmem:[#allocation40_spill] sm:$0xff] }
 0x89e   : > { %v4027_v36 = vadd.f32 %v4026_v46, %v4025_v50  ;;  %v4030_v50 = vsel %vm2639_vm10, %v3978_v34, 0.0  ;;  %v3982_v34 = vmul.f32 %v3946_v39, %v3946_v39  ;;  %v3950_v39 = vmul.f32 %v12246_v62, %v15493_v49  ;;  %v15495_v49 = vld [vmem:[#allocation41_spill] sm:$0xff] }
 0x8a0   : > { %v4029_v28 = vadd.f32 %v4028_v56, %v4027_v36  ;;  %v4032_v36 = vsel %vm2639_vm10, %v3979_v27, 0.0  ;;  %v3983_v27 = vmul.f32 %v3947_v6, %v3947_v6  ;;  %v3951_v6 = vmul.f32 %v12253_v52, %v15494_v3  ;;  %v15496_v3 = vld [vmem:[#allocation63_spill] sm:$0xff] }
 0x8a2   : > { %v4031_v46 = vadd.f32 %v4030_v50, %v4029_v28  ;;  %v4034_v28 = vsel %vm2639_vm10, %v3980_v43, 0.0  ;;  %v3984_v43 = vmul.f32 %v3948_v18, %v3948_v18  ;;  %v3952_v18 = vmul.f32 %v12260_v35, %v15495_v49  ;;  %v15497_v49 = vld [vmem:[#allocation64_spill] sm:$0xff] }
 0x8a4   : > { %v4033_v56 = vadd.f32 %v4032_v36, %v4031_v46  ;;  %v4036_v46 = vsel %vm2639_vm10, %v3981_v37, 0.0  ;;  %v3985_v37 = vmul.f32 %v3949_v54, %v3949_v54  ;;  %v3953_v54 = vmul.f32 %v12267_v48, %v15496_v3  ;;  %v15498_v3 = vld [vmem:[#allocation42_spill] sm:$0xff] }
 0x8a6   : > { %v4035_v50 = vadd.f32 %v4034_v28, %v4033_v56  ;;  %v4038_v56 = vsel %vm2639_vm10, %v3982_v34, 0.0  ;;  %v3986_v34 = vmul.f32 %v3950_v39, %v3950_v39  ;;  %v3954_v39 = vmul.f32 %v12274_v23, %v15497_v49  ;;  %v15499_v49 = vld [vmem:[#allocation43_spill] sm:$0xff] }
 0x8a8   : > { %v4037_v36 = vadd.f32 %v4036_v46, %v4035_v50  ;;  %v4040_v50 = vsel %vm2639_vm10, %v3983_v27, 0.0  ;;  %v3987_v27 = vmul.f32 %v3951_v6, %v3951_v6  ;;  %v3955_v6 = vmul.f32 %v12281_v61, %v15498_v3  ;;  %v15500_v3 = vld [vmem:[#allocation8_spill] sm:$0xff] }
 0x8aa   : > { %v4039_v28 = vadd.f32 %v4038_v56, %v4037_v36  ;;  %v4042_v36 = vsel %vm2639_vm10, %v3984_v43, 0.0  ;;  %v3988_v43 = vmul.f32 %v3952_v18, %v3952_v18  ;;  %v3956_v18 = vmul.f32 %v12288_v5, %v15499_v49  ;;  %v15501_v49 = vld [vmem:[#allocation52_spill] sm:$0xff] }
 0x8ac   : > { %v4041_v46 = vadd.f32 %v4040_v50, %v4039_v28  ;;  %v4044_v28 = vsel %vm2639_vm10, %v3985_v37, 0.0  ;;  %v3989_v37 = vmul.f32 %v3953_v54, %v3953_v54  ;;  %v3957_v54 = vmul.f32 %v12295_v12, %v15500_v3 }
 0x8ae   : > { %v4043_v56 = vadd.f32 %v4042_v36, %v4041_v46  ;;  %v4046_v46 = vsel %vm2639_vm10, %v3986_v34, 0.0  ;;  %v3990_v34 = vmul.f32 %v3954_v39, %v3954_v39  ;;  %v3958_v39 = vmul.f32 %v12302_v57, %v15501_v49 }
 0x8af   : > { %v3993_v14 = vmul.f32 %v3957_v54, %v3957_v54 }
 0x8b0   : > { %v4045_v50 = vadd.f32 %v4044_v28, %v4043_v56  ;;  %v4048_v56 = vsel %vm2639_vm10, %v3987_v27, 0.0  ;;  %v3991_v27 = vmul.f32 %v3955_v6, %v3955_v6 }
 0x8b2   : > { %v4047_v36 = vadd.f32 %v4046_v46, %v4045_v50  ;;  %v4050_v50 = vsel %vm2639_vm10, %v3988_v43, 0.0  ;;  %v3992_v43 = vmul.f32 %v3956_v18, %v3956_v18  ;;  %v4056_v6 = vsel %vm2639_vm10, %v3991_v27, 0.0 }
 0x8b3   : > { %v4060_v18 = vsel %vm2639_vm10, %v3993_v14, 0.0  ;;  %v15503_v14 = vmov 0  }
 0x8b4   : > { %v4049_v28 = vadd.f32 %v4048_v56, %v4047_v36  ;;  %v4052_v36 = vsel %vm2639_vm10, %v3989_v37, 0.0  ;;  %v3960_v37 = vmul.f32 %v12316_v30, %v12049_v7  ;;  %v4058_v17 = vsel %vm2639_vm10, %v3992_v43, 0.0 }
 0x8b6   : > { %v4051_v46 = vadd.f32 %v4050_v50, %v4049_v28  ;;  %v4054_v28 = vsel %vm2639_vm10, %v3990_v34, 0.0  ;;  %v3996_v34 = vmul.f32 %v3960_v37, %v3960_v37 }
 0x8b8   : > { %v4053_v56 = vadd.f32 %v4052_v36, %v4051_v46  ;;  %v3994_v46 = vmul.f32 %v3958_v39, %v3958_v39  ;;  %v3995_v36 = vmul.f32 %v3959_v24, %v3959_v24  ;;  %v4066_v27 = vsel %vm2639_vm10, %v3996_v34, 0.0  ;;  %v4830_v34 = vld [vmem:[#allocation2 + $0x4] sm:$0x8] }
 0x8ba   : > { %v4055_v50 = vadd.f32 %v4054_v28, %v4053_v56  ;;  %v4062_v56 = vsel %vm2639_vm10, %v3994_v46, 0.0  ;;  %v4064_v54 = vsel %vm2639_vm10, %v3995_v36, 0.0 }
 0x8bc   : > { %v4057_v3 = vadd.f32 %v4056_v6, %v4055_v50 }
 0x8be   : > { %v4059_v20 = vadd.f32 %v4058_v17, %v4057_v3  ;;  %v8612_v17 = vld [vmem:[%s14933_s13 + $0x88] sm:$0xff]  }
 0x8c0   : > { %v4061_v49 = vadd.f32 %v4060_v18, %v4059_v20  ;;  %v4794_v18 = vld [vmem:[#allocation2 + $0x8] sm:$0xf] }
 0x8c2   : > { %v4063_v28 = vadd.f32 %v4062_v56, %v4061_v49  ;;  %v8615_v56 = vld [vmem:[%s14933_s13 + $0x90] sm:$0xff]  }
 0x8c4   : > { %v4065_v4 = vadd.f32 %v4064_v54, %v4063_v28  ;;  %v12354_v28 = vcombine.low %v4830_v34, %v4794_v18 }
 0x8c6   : > { %v4067_v50 = vadd.f32 %v4066_v27, %v4065_v4  ;;  %15504 = vst [vmem:[#allocation27_spill] sm:$0xff] %v12354_v28 }
 0x8c8   : > { %v4068_v6 = vrot.slane %v4067_v50, 4 }
 0x8ca   : > { %v4069_v7 = vadd.f32 %v4068_v6, %v4067_v50 }
 0x8cc   : > { %v4070_v39 = vrot.slane %v4069_v7, 2 }
 0x8ce   : > { %v4071_v22 = vadd.f32 %v4070_v39, %v4069_v7  ;;  %v8607_v7 = vld [vmem:[%s14933_s13 + $0x80] sm:$0xff]  }
 0x8cf   : > { %8456 = vmatpush1.bf16.msra.mxu1 %v8607_v7 }
 0x8d0   : > { %v4072_v43 = vrot.slane %v4071_v22, 1  ;;  %8441 = vmatprep.subr.bf16.mxu1 %v15503_v14 }
 0x8d2   : > { %v4073_v3 = vadd.f32 %v4072_v43, %v4071_v22 }
 0x8d3   : > { %8457 = vmatpush1.bf16.msra.mxu1 %v8612_v17 }
 0x8d4   : > { %8349 = vmatmul.mubr.msk.f32.vlgmr.msra.gmra.mrb[44].mxu0 %vm2639_vm10, %v4073_v3  ;;  %8442 = vmatprep.subr.bf16.mxu1 %v15503_v14 }
 0x8d5   : > { %8352 = vmatpush3.msra.mxu0 %v12058_v8  ;;  %8353 = vmatprep.mubr.msk.f32.mxu0 %vm9056_vm0, %v15438_v51  ;;  %v3434_v51 = vld [vmem:[%s14929_s9] sm:$0x1]  ;;  %vm5402_vm0 = vcmask 1041408  }
 0x8d6   : > { %7215 = vmatprep.subr.bf16.mxu0 %v15503_v14 }
 0x8d7   : > { %8458 = vmatpush1.bf16.msra.mxu1 %v8615_v56 }
 0x8d8   : > { %8443 = vmatprep.subr.bf16.mxu1 %v15503_v14 }
 0x9a7   : > { %v4143_v24 = vpop.f32.mrb[44].mxu0 }
 0x9a8   : > { %v4147_v49 = vmul.f32 0.00048828125, %v4143_v24  ;;  %v8350_v37 = vpop.f32.mrb[45].mxu0 }
 0x9aa   : > { %v4148_v46 = vadd.f32 1e-05, %v4147_v49 }
 0x9ac   : > { %8843 = vrsqrt.f32 %v4148_v46 }
 0x9b6   : > { %v8844_v4 = vpop.eup %8843 }
 0x9b7   : > { %8354 = vmatmul.mubr.msk.f32.vlgmr.msra.gmra.mrb[46].mxu0 %vm821_vm3, %v8844_v4 }
 0xa8a   : > { %v4219_v8 = vpop.f32.mrb[46].mxu0 }
 0xa8b   : > { %v8355_v22 = vpop.f32.mrb[47].mxu0  ;;  %v4223_v20 = vmul.f32 %v4219_v8, %v3434_v51 }
 0xa8d   : > { %v12349_v36 = vrot.slane %v4223_v20, %v15471_v40  ;;  %v12366_v40 = vld [vmem:[%s14930_s10] ss:$0 sm:$0xff] }
 0xa8f   : > { %v4229_v54 = vmul.f32 %v12349_v36, %v12085_v2  ;;  %v4230_v27 = vmul.f32 %v12349_v36, %v12089_v53  ;;  %v4231_v50 = vmul.f32 %v12349_v36, %v12093_v45  ;;  %v4232_v6 = vmul.f32 %v12349_v36, %v12101_v26 }
 0xa90   : > { %v4228_v39 = vmul.f32 %v12349_v36, %v12081_v29  ;;  %v4940_v2 = vshll.u32 %v12354_v28, 16  ;;  %v4233_v3 = vmul.f32 %v12349_v36, %v12107_v11  ;;  %v8618_v29 = vld [vmem:[%s14933_s13 + $0x98] sm:$0xff]   ;;  %v4234_v26 = vmul.f32 %v12349_v36, %v12113_v59 }
 0xa91   : > { %v12374_v53 = vadd.f32 %v12366_v40, %v4229_v54  ;;  %v12377_v45 = vadd.f32 %v12366_v40, %v4230_v27  ;;  %v12380_v43 = vadd.f32 %v12366_v40, %v4231_v50  ;;  %v12385_v24 = vadd.f32 %v12366_v40, %v4232_v6  ;;  %8459 = vmatpush1.bf16.msra.mxu1 %v8618_v29 }
 0xa92   : > { %v12393_v49 = vadd.f32 %v12366_v40, %v4228_v39  ;;  %v4235_v46 = vmul.f32 %v12349_v36, %v12119_v58  ;;  %v4236_v11 = vmul.f32 %v12349_v36, %v12127_v60  ;;  %v12400_v4 = vrot.slane %v4940_v2, 1  ;;  %8444 = vmatprep.subr.bf16.mxu1 %v15503_v14 }
 0xa93   : > { %v4237_v7 = vmul.f32 %v12349_v36, %v12134_v10  ;;  %v7943_v59 = vmul.f32 -1.442695, %v12374_v53  ;;  %v7944_v8 = vmul.f32 -1.442695, %v12377_v45  ;;  %v7945_v22 = vmul.f32 -1.442695, %v12380_v43 }
 0xa94   : > { %v4238_v58 = vmul.f32 %v12349_v36, %v12141_v9  ;;  %v4239_v60 = vmul.f32 %v12349_v36, %v12148_v32  ;;  %v12413_v51 = vadd.f32 %v12366_v40, %v4233_v3  ;;  %v7946_v10 = vmul.f32 -1.442695, %v12385_v24 }
 0xa95   : > { %v4240_v17 = vmul.f32 %v12349_v36, %v12155_v41  ;;  %v12419_v20 = vadd.f32 %v12366_v40, %v4234_v26  ;;  %8845 = vpow2.f32 %v7943_v59  ;;  %v7942_v18 = vmul.f32 -1.442695, %v12393_v49 }
 0xa96   : > { %v4241_v9 = vmul.f32 %v12349_v36, %v12162_v16  ;;  %v4242_v32 = vmul.f32 %v12349_v36, %v12169_v25  ;;  %v12427_v34 = vadd.f32 %v12366_v40, %v4235_v46  ;;  %8847 = vpow2.f32 %v7944_v8 }
 0xa97   : > { %v12431_v56 = vmul.f32 %v12349_v36, %v12176_v33  ;;  %v12435_v41 = vmul.f32 %v12349_v36, %v12183_v31  ;;  %v12438_v54 = vadd.f32 %v12366_v40, %v4236_v11  ;;  %8849 = vpow2.f32 %v7945_v22 }
 0xa98   : > { %v12442_v16 = vmul.f32 %v12349_v36, %v12190_v15  ;;  %v12445_v25 = vadd.f32 %v12366_v40, %v4237_v7  ;;  %8851 = vpow2.f32 %v7946_v10  ;;  %v7947_v27 = vmul.f32 -1.442695, %v12413_v51 }
 0xa99   : > { %v12450_v33 = vmul.f32 %v12349_v36, %v12197_v0  ;;  %v12453_v31 = vadd.f32 %v12366_v40, %v4238_v58  ;;  %v7948_v50 = vmul.f32 -1.442695, %v12419_v20  ;;  %8853 = vpow2.f32 %v7942_v18 }
 0xa9a   : > { %v12458_v15 = vmul.f32 %v12349_v36, %v12204_v44  ;;  %v12462_v6 = vmul.f32 %v12349_v36, %v12211_v47  ;;  %v12466_v39 = vmul.f32 %v12349_v36, %v12218_v13  ;;  %v7949_v0 = vmul.f32 -1.442695, %v12427_v34 }
 0xa9b   : > { %v12471_v2 = vmul.f32 %v12349_v36, %v12225_v38  ;;  %v12475_v3 = vmul.f32 %v12349_v36, %v12232_v21  ;;  %v12479_v44 = vmul.f32 %v12349_v36, %v12239_v1  ;;  %v7950_v47 = vmul.f32 -1.442695, %v12438_v54  ;;  %v644_v1 = vld [vmem:[#allocation2 + $0xb0] sm:$0x3] }
 0xa9c   : > { %v12484_v13 = vmul.f32 %v12349_v36, %v12246_v62  ;;  %v12488_v29 = vmul.f32 %v12349_v36, %v12253_v52  ;;  %v7951_v38 = vmul.f32 -1.442695, %v12445_v25  ;;  %8855 = vpow2.f32 %v7947_v27 }
 0xa9d   : > { %v12499_v26 = vmul.f32 %v12349_v36, %v12260_v35  ;;  %v12503_v62 = vmul.f32 %v12349_v36, %v12267_v48  ;;  %v7952_v52 = vmul.f32 -1.442695, %v12453_v31  ;;  %8857 = vpow2.f32 %v7948_v50 }
 0xa9e   : > { %v12508_v46 = vmul.f32 %v12349_v36, %v12274_v23  ;;  %v12512_v11 = vmul.f32 %v12349_v36, %v12281_v61  ;;  %v12516_v7 = vmul.f32 %v12349_v36, %v12288_v5  ;;  %8859 = vpow2.f32 %v7949_v0  ;;  %v8621_v61 = vld [vmem:[%s14933_s13 + $0xa0] sm:$0xff]  }
 0xa9f   : > { %v8846_v35 = vpop.eup %8845  ;;  %v12520_v48 = vmul.f32 %v12349_v36, %v12295_v12  ;;  %v12523_v59 = vadd.f32 %v12366_v40, %v4239_v60  ;;  %8861 = vpow2.f32 %v7950_v47  ;;  %v645_v23 = vsel %vm12493_vm15, 0, %v644_v1  ;;  %v8622_v5 = vld [vmem:[%s14933_s13] sm:$0xff]   ;;  %8460 = vmatpush1.bf16.msra.mxu1 %v8621_v61  ;;  %v8626_v1 = vld [vmem:[%s14933_s13 + $0xa8] sm:$0xff]  }
 0xaa0   : > { %v8848_v8 = vpop.eup %8847  ;;  %v12535_v12 = vmul.f32 %v12349_v36, %v12302_v57  ;;  %v12538_v22 = vadd.f32 %v12366_v40, %v4240_v17  ;;  %v4415_v58 = vadd.f32 1.0, %v8846_v35  ;;  %8863 = vpow2.f32 %v7951_v38  ;;  %646 = vst [vmem:[#allocation2 + $0xb0] sm:$0x3] %v645_v23  ;;  %7216 = vmatpush1.bf16.msra.mxu0 %v8622_v5  ;;  %v8625_v57 = vld [vmem:[%s14933_s13 + $0x8] sm:$0xff]   ;;  %8445 = vmatprep.subr.bf16.mxu1 %v15503_v14  ;;  %v8627_v35 = vld [vmem:[%s14933_s13 + $0x10] sm:$0xff]  }
 0xaa1   : > { %v8850_v60 = vpop.eup %8849  ;;  %v12542_v10 = vmul.f32 %v12349_v36, %v12309_v42  ;;  %v12545_v18 = vadd.f32 %v12366_v40, %v4241_v9  ;;  %v4416_v27 = vadd.f32 1.0, %v8848_v8  ;;  %8865 = vpow2.f32 %v7952_v52  ;;  %7217 = vmatprep.subr.bf16.mxu0 %v15503_v14 }
 0xaa2   : > { %v8852_v17 = vpop.eup %8851  ;;  %v12552_v50 = vmul.f32 %v12349_v36, %v12316_v30  ;;  %v12555_v0 = vadd.f32 %v12366_v40, %v4242_v32  ;;  %v4417_v42 = vadd.f32 1.0, %v8850_v60  ;;  %8867 = vrcp.f32 %v4415_v58 }
 0xaa3   : > { %v8854_v9 = vpop.eup %8853  ;;  %v12561_v47 = vadd.f32 %v12366_v40, %v12431_v56  ;;  %v4418_v38 = vadd.f32 1.0, %v8852_v17  ;;  %8869 = vrcp.f32 %v4416_v27  ;;  %v7953_v21 = vmul.f32 -1.442695, %v12523_v59  ;;  %8461 = vmatpush1.bf16.msra.mxu1 %v8626_v1 }
 0xaa4   : > { %v12566_v30 = vadd.f32 %v12366_v40, %v12435_v41  ;;  %8871 = vrcp.f32 %v4417_v42  ;;  %v7954_v36 = vmul.f32 -1.442695, %v12538_v22  ;;  %v4414_v32 = vadd.f32 1.0, %v8854_v9  ;;  %7218 = vmatpush1.bf16.msra.mxu0 %v8625_v57  ;;  %8446 = vmatprep.subr.bf16.mxu1 %v15503_v14 }
 0xaa5   : > { %v12574_v56 = vadd.f32 %v12366_v40, %v12442_v16  ;;  %v12578_v52 = vadd.f32 %v12366_v40, %v12450_v33  ;;  %8873 = vrcp.f32 %v4418_v38  ;;  %v7955_v41 = vmul.f32 -1.442695, %v12545_v18  ;;  %7219 = vmatprep.subr.bf16.mxu0 %v15503_v14 }
 0xaa6   : > { %v12584_v23 = vpop.eup %8855  ;;  %v12588_v61 = vadd.f32 %v12366_v40, %v12458_v15  ;;  %v12592_v16 = vadd.f32 %v12366_v40, %v12462_v6  ;;  %v7956_v33 = vmul.f32 -1.442695, %v12555_v0  ;;  %8875 = vrcp.f32 %v4414_v32 }
 0xaa7   : > { %v12596_v5 = vpop.eup %8857  ;;  %v12600_v8 = vadd.f32 %v12366_v40, %v12466_v39  ;;  %v12604_v15 = vadd.f32 %v12366_v40, %v12471_v2  ;;  %v7957_v58 = vmul.f32 -1.442695, %v12561_v47  ;;  %8877 = vpow2.f32 %v7953_v21 }
 0xaa8   : > { %15507 = vst [vmem:[#allocation11_spill] sm:$0xff] %v12592_v16  ;;  %v12608_v6 = vpop.eup %8859  ;;  %v12612_v60 = vadd.f32 %v12366_v40, %v12475_v3  ;;  %v12616_v27 = vadd.f32 %v12366_v40, %v12479_v44  ;;  %v7958_v39 = vmul.f32 -1.442695, %v12566_v30  ;;  %8879 = vpow2.f32 %v7954_v36  ;;  %7220 = vmatpush1.bf16.msra.mxu0 %v8627_v35  ;;  %v8630_v44 = vld [vmem:[%s14933_s13 + $0x18] sm:$0xff]  }
 0xaa9   : > { %v12619_v2 = vpop.eup %8861  ;;  %v12623_v57 = vadd.f32 %v12366_v40, %v12484_v13  ;;  %v12627_v17 = vadd.f32 %v12366_v40, %v12488_v29  ;;  %v7959_v3 = vmul.f32 -1.442695, %v12574_v56  ;;  %8881 = vpow2.f32 %v7955_v41  ;;  %7221 = vmatprep.subr.bf16.mxu0 %v15503_v14 }
 0xaaa   : > { %15508 = vst [vmem:[#allocation53_spill] sm:$0xff] %v12612_v60  ;;  %v12633_v42 = vpop.eup %8863  ;;  %v12637_v9 = vadd.f32 %v12366_v40, %v12499_v26  ;;  %v12641_v13 = vadd.f32 %v12366_v40, %v12503_v62  ;;  %v7960_v29 = vmul.f32 -1.442695, %v12578_v52  ;;  %8883 = vpow2.f32 %v7956_v33 }
 0xaab   : > { %v12645_v38 = vpop.eup %8865  ;;  %v12649_v21 = vadd.f32 %v12366_v40, %v12508_v46  ;;  %v12653_v36 = vadd.f32 %v12366_v40, %v12512_v11  ;;  %v7961_v26 = vmul.f32 -1.442695, %v12588_v61  ;;  %8885 = vpow2.f32 %v7957_v58  ;;  %v8631_v46 = vld [vmem:[%s14933_s13 + $0xb0] sm:$0xff]  }
 0xaac   : > { %15509 = vst [vmem:[#allocation7_spill] sm:$0xff] %v12637_v9  ;;  %15510 = vst [vmem:[#allocation28_spill] sm:$0xff] %v12641_v13  ;;  %v8868_v62 = vpop.eup %8867  ;;  %v12658_v32 = vadd.f32 %v12366_v40, %v12516_v7  ;;  %v12662_v1 = vadd.f32 %v12366_v40, %v12520_v48  ;;  %v7962_v41 = vmul.f32 -1.442695, %v12592_v16  ;;  %8887 = vpow2.f32 %v7958_v39  ;;  %7222 = vmatpush1.bf16.msra.mxu0 %v8630_v44  ;;  %v8632_v48 = vld [vmem:[%s14933_s13 + $0x20] sm:$0xff]  }
 0xaad   : > { %15511 = vst [vmem:[#allocation9_spill] sm:$0xff] %v12649_v21  ;;  %15512 = vst [vmem:[#allocation29_spill] sm:$0xff] %v12653_v36  ;;  %v8870_v11 = vpop.eup %8869  ;;  %v12670_v35 = vadd.f32 %v12366_v40, %v12535_v12  ;;  %v4523_v33 = vmul.f32 %v8868_v62, %v12374_v53  ;;  %v7963_v7 = vmul.f32 -1.442695, %v12600_v8  ;;  %8889 = vpow2.f32 %v7959_v3  ;;  %7223 = vmatprep.subr.bf16.mxu0 %v15503_v14 }
 0xaae   : > { %15513 = vst [vmem:[#allocation12_spill] sm:$0xff] %v12658_v32  ;;  %15514 = vst [vmem:[#allocation54_spill] sm:$0xff] %v12662_v1  ;;  %v8872_v58 = vpop.eup %8871  ;;  %v4524_v39 = vmul.f32 %v8870_v11, %v12377_v45  ;;  %v7964_v37 = vmul.f32 -1.442695, %v12604_v15  ;;  %v7965_v16 = vmul.f32 -1.442695, %v12612_v60  ;;  %8891 = vpow2.f32 %v7960_v29  ;;  %8462 = vmatpush1.bf16.msra.mxu1 %v8631_v46 }
 0xaaf   : > { %15515 = vst [vmem:[#allocation13_spill] sm:$0xff] %v12670_v35  ;;  %v8874_v53 = vpop.eup %8873  ;;  %v4525_v12 = vmul.f32 %v8872_v58, %v12380_v43  ;;  %v4559_v3 = vmul.f32 %v4523_v33, %v11773_v55  ;;  %v7966_v44 = vmul.f32 -1.442695, %v12616_v27  ;;  %8893 = vpow2.f32 %v7961_v26  ;;  %8447 = vmatprep.subr.bf16.mxu1 %v15503_v14  ;;  %v8635_v26 = vld [vmem:[%s14933_s13 + $0x28] sm:$0xff]  }
 0xab0   : > { %v8876_v62 = vpop.eup %8875  ;;  %v4526_v45 = vmul.f32 %v8874_v53, %v12385_v24  ;;  %v4560_v11 = vmul.f32 %v4524_v39, %v11777_v19  ;;  %v7967_v29 = vmul.f32 -1.442695, %v12623_v57  ;;  %8895 = vpow2.f32 %v7962_v41  ;;  %7224 = vmatpush1.bf16.msra.mxu0 %v8632_v48  ;;  %v15516_v24 = vld [vmem:[#allocation47_spill] sm:$0xff] }
 0xab1   : > { %v12688_v60 = vpop.eup %8877  ;;  %v4561_v46 = vmul.f32 %v4525_v12, %v11789_v63  ;;  %v8121_v43 = vpack.c.bf16 %v4559_v3, %v4559_v3  ;;  %v4522_v55 = vmul.f32 %v8876_v62, %v12393_v49  ;;  %8897 = vpow2.f32 %v7963_v7  ;;  %7225 = vmatprep.subr.bf16.mxu0 %v15503_v14  ;;  %v15517_v7 = vld [vmem:[#allocation33_spill] sm:$0xff]  ;;  %v8637_v62 = vld [vmem:[%s14933_s13 + $0xb8] sm:$0xff]  }
 0xab2   : > { %v12695_v33 = vpop.eup %8879  ;;  %v4562_v19 = vmul.f32 %v4526_v45, %v15516_v24  ;;  %v8122_v58 = vpack.c.bf16 %v4560_v11, %v4560_v11  ;;  %v7968_v41 = vmul.f32 -1.442695, %v12627_v17  ;;  %8899 = vpow2.f32 %v7964_v37  ;;  %8463 = vmatpush1.bf16.msra.mxu1 %v8637_v62 }
 0xab3   : > { %v12700_v63 = vpop.eup %8881  ;;  %v8123_v39 = vpack.c.bf16 %v4561_v46, %v4561_v46  ;;  %4739 = vst.msk [vmem:[#allocation2 + $0x14] sm:$0xf] %vm632_vm12, %v8121_v43  ;;  %v7969_v49 = vmul.f32 -1.442695, %v12637_v9  ;;  %v4558_v48 = vmul.f32 %v4522_v55, %v15517_v7  ;;  %8901 = vpow2.f32 %v7965_v16  ;;  %8448 = vmatprep.subr.bf16.mxu1 %v15503_v14 }
 0xab4   : > { %v8884_v53 = vpop.eup %8883  ;;  %v12707_v12 = vadd.f32 %v12366_v40, %v12542_v10  ;;  %v8124_v3 = vpack.c.bf16 %v4562_v19, %v4562_v19  ;;  %4740 = vst.msk [vmem:[#allocation2 + $0x18] sm:$0xf] %vm632_vm12, %v8122_v58  ;;  %v7970_v37 = vmul.f32 -1.442695, %v12641_v13  ;;  %8903 = vpow2.f32 %v7966_v44  ;;  %7226 = vmatpush1.bf16.msra.mxu0 %v8635_v26  ;;  %v8636_v44 = vld [vmem:[%s14933_s13 + $0x30] sm:$0xff]  }
 0xab5   : > { %v12714_v45 = vpop.eup %8885  ;;  %v12718_v16 = vadd.f32 %v12366_v40, %v12552_v50  ;;  %4741 = vst.msk [vmem:[#allocation2 + $0x1c] sm:$0xf] %vm632_vm12, %v8123_v39  ;;  %v7971_v10 = vmul.f32 -1.442695, %v12649_v21  ;;  %v8120_v11 = vpack.c.bf16 %v4558_v48, %v4558_v48  ;;  %8905 = vpow2.f32 %v7967_v29  ;;  %7227 = vmatprep.subr.bf16.mxu0 %v15503_v14 }
 0xab6   : > { %15518 = vst [vmem:[#allocation30_spill] sm:$0xff] %v12707_v12  ;;  %v12725_v46 = vpop.eup %8887  ;;  %4742 = vst.msk [vmem:[#allocation2 + $0x20] sm:$0xf] %vm632_vm12, %v8124_v3  ;;  %v7972_v43 = vmul.f32 -1.442695, %v12653_v36  ;;  %8907 = vpow2.f32 %v7968_v41  ;;  %v15520_v41 = vshrl.u32 %v12354_v28, 16 }
 0xab7   : > { %15519 = vst [vmem:[#allocation14_spill] sm:$0xff] %v12718_v16  ;;  %v8890_v40 = vpop.eup %8889  ;;  %v7973_v50 = vmul.f32 -1.442695, %v12658_v32  ;;  %4738 = vst.msk [vmem:[#allocation2 + $0x10] sm:$0xf] %vm632_vm12, %v8120_v11  ;;  %8909 = vpow2.f32 %v7969_v49  ;;  %v8640_v49 = vld [vmem:[%s14933_s13 + $0x38] sm:$0xff]  }
 0xab8   : > { %v12733_v29 = vpop.eup %8891  ;;  %v7974_v55 = vmul.f32 -1.442695, %v12662_v1  ;;  %v7975_v26 = vmul.f32 -1.442695, %v12670_v35  ;;  %8911 = vpow2.f32 %v7970_v37  ;;  %v7976_v19 = vmul.f32 -1.442695, %v12707_v12  ;;  %7228 = vmatpush1.bf16.msra.mxu0 %v8636_v44 }
 0xab9   : > { %v12737_v24 = vpop.eup %8893  ;;  %v7977_v58 = vmul.f32 -1.442695, %v12718_v16  ;;  %8913 = vpow2.f32 %v7971_v10  ;;  %v12744_v39 = vor.u32 %v12400_v4, %v15520_v41  ;;  %v4795_v3 = vld [vmem:[#allocation2 + $0xc] sm:$0xf]  ;;  %v4419_v62 = vadd.f32 1.0, %v12584_v23  ;;  %7229 = vmatprep.subr.bf16.mxu0 %v15503_v14 }
 0xaba   : > { %v12749_v7 = vpop.eup %8895  ;;  %v12751_v48 = vld [vmem:[#allocation2 + $0x14] sm:$0xf]  ;;  %v4832_v37 = vld [vmem:[#allocation2 + $0xc] sm:$0x8]  ;;  %8915 = vpow2.f32 %v7972_v43  ;;  %v4420_v10 = vadd.f32 1.0, %v12596_v5  ;;  %v4421_v11 = vadd.f32 1.0, %v12608_v6 }
 0xabb   : > { %v8898_v4 = vpop.eup %8897  ;;  %v4798_v44 = vld [vmem:[#allocation2 + $0x18] sm:$0xf]  ;;  %8917 = vpow2.f32 %v7973_v50  ;;  %v4422_v41 = vadd.f32 1.0, %v12619_v2  ;;  %v4423_v28 = vadd.f32 1.0, %v12633_v42  ;;  %v4424_v16 = vadd.f32 1.0, %v12645_v38  ;;  %v8642_v2 = vld [vmem:[%s14933_s13 + $0xc0] sm:$0xff]  }
 0xabc   : > { %v8900_v12 = vpop.eup %8899  ;;  %v12760_v35 = vld [vmem:[#allocation2 + $0x1c] sm:$0xf]  ;;  %v12763_v23 = vcombine.low %v12751_v48, %v4798_v44  ;;  %8919 = vpow2.f32 %v7974_v55  ;;  %v12766_v5 = vadd.f32 1.0, %v12688_v60  ;;  %v12769_v6 = vadd.f32 1.0, %v12695_v33  ;;  %7230 = vmatpush1.bf16.msra.mxu0 %v8640_v49  ;;  %v8641_v60 = vld [vmem:[%s14933_s13 + $0x40] sm:$0xff]   ;;  %8464 = vmatpush1.bf16.msra.mxu1 %v8642_v2 }
 0xabd   : > { %15521 = vst [vmem:[#allocation55_spill] sm:$0xff] %v12760_v35  ;;  %v8902_v42 = vpop.eup %8901  ;;  %v12774_v43 = vld [vmem:[#allocation2 + $0x20] sm:$0xf]  ;;  %8921 = vpow2.f32 %v7975_v26  ;;  %v12777_v38 = vadd.f32 1.0, %v12700_v63  ;;  %v12779_v50 = vadd.f32 1.0, %v8884_v53  ;;  %v12785_v33 = vcombine.low %v4798_v44, %v12760_v35  ;;  %7231 = vmatprep.subr.bf16.mxu0 %v15503_v14  ;;  %8449 = vmatprep.subr.bf16.mxu1 %v15503_v14 }
 0xabe   : > { %15522 = vst [vmem:[#allocation15_spill] sm:$0xff] %v12763_v23  ;;  %v8904_v55 = vpop.eup %8903  ;;  %v12789_v1 = vcombine.low %v12760_v35, %v12774_v43  ;;  %v12792_v26 = vrot.slane %v12763_v23, 1  ;;  %v12794_v63 = vld [vmem:[#allocation2 + $0x10] sm:$0xf]  ;;  %8923 = vpow2.f32 %v7976_v19  ;;  %v4953_v53 = vshll.u32 %v12763_v23, 16 }
 0xabf   : > { %15523 = vst [vmem:[#allocation31_spill] sm:$0xff] %v12785_v33  ;;  %v8906_v49 = vpop.eup %8905  ;;  %v8035_v44 = vcombine.low %v4832_v37, %v12794_v63  ;;  %v12800_v33 = vcombine.low %v4795_v3, %v12794_v63  ;;  %v12803_v35 = vadd.f32 1.0, %v12714_v45  ;;  %8925 = vrcp.f32 %v4419_v62  ;;  %v8645_v62 = vld [vmem:[%s14933_s13 + $0x48] sm:$0xff]  }
 0xac0   : > { %15524 = vst [vmem:[#allocation17_spill] sm:$0xff] %v12789_v1  ;;  %v8908_v32 = vpop.eup %8907  ;;  %v12808_v36 = vadd.f32 1.0, %v12725_v46  ;;  %v12810_v21 = vadd.f32 1.0, %v8890_v40  ;;  %8927 = vrcp.f32 %v4420_v10  ;;  %v12814_v45 = vadd.f32 1.0, %v12733_v29  ;;  %7232 = vmatpush1.bf16.msra.mxu0 %v8641_v60 }
 0xac1   : > { %v8910_v2 = vpop.eup %8909  ;;  %v5175_v37 = vrot.slane %v8035_v44, 1  ;;  %8929 = vpow2.f32 %v7977_v58  ;;  %v4945_v3 = vshll.u32 %v12800_v33, 16  ;;  %v15525_v46 = vrot.slane %v12789_v1, 1  ;;  %7233 = vmatprep.subr.bf16.mxu0 %v15503_v14 }
 0xac2   : > { %v8912_v19 = vpop.eup %8911  ;;  %v4955_v10 = vrot.slane %v4953_v53, 1  ;;  %v12826_v58 = vadd.f32 1.0, %v12737_v24  ;;  %8931 = vrcp.f32 %v4421_v11  ;;  %v4949_v13 = vshrl.u32 %v12800_v33, 16 }
 0xac3   : > { %v12823_v40 = vsel %vm2139_vm6, %v12792_v26, %v15525_v46  ;;  %v8914_v29 = vpop.eup %8913  ;;  %v5176_v60 = vsel %vm2139_vm6, %v5175_v37, %v12792_v26  ;;  %v4947_v44 = vrot.slane %v4945_v3, 1  ;;  %8933 = vrcp.f32 %v4422_v41  ;;  %v8646_v41 = vld [vmem:[%s14933_s13 + $0x50] sm:$0xff]  }
 0xac4   : > { %15526 = vst [vmem:[#allocation5_spill] sm:$0xff] %v12823_v40  ;;  %5183 = vrot.lane.b32.xlu0 %v12823_v40, %s9060_s20  ;;  %v8916_v46 = vpop.eup %8915  ;;  %5181 = vrot.lane.b32.xlu1 %v5176_v60, %s9060_s20  ;;  %v12836_v24 = vadd.f32 1.0, %v12749_v7  ;;  %v12838_v11 = vadd.f32 1.0, %v8898_v4  ;;  %v12840_v53 = vadd.f32 1.0, %v8900_v12  ;;  %8935 = vrcp.f32 %v4423_v28 }
 0xac5   : > { %v8918_v9 = vpop.eup %8917  ;;  %v4951_v40 = vor.u32 %v4949_v13, %v4947_v44  ;;  %8937 = vrcp.f32 %v4424_v16  ;;  %v4957_v37 = vshrl.u32 %v12763_v23, 16  ;;  %v4961_v3 = vshll.u32 %v12789_v1, 16  ;;  %7234 = vmatpush1.bf16.msra.mxu0 %v8645_v62 }
 0xac6   : > { %v8920_v60 = vpop.eup %8919  ;;  %v12847_v7 = vadd.f32 1.0, %v8902_v42  ;;  %v12849_v4 = vadd.f32 1.0, %v8904_v55  ;;  %v12851_v12 = vadd.f32 1.0, %v8906_v49  ;;  %8939 = vrcp.f32 %v12766_v5  ;;  %7235 = vmatprep.subr.bf16.mxu0 %v15503_v14 }
 0xac7   : > { %v8922_v28 = vpop.eup %8921  ;;  %v4956_v13 = vsel %vm1935_vm8, %v4951_v40, %v4955_v10  ;;  %v4948_v16 = vsel %vm1935_vm8, %v12744_v39, %v4947_v44  ;;  %8941 = vrcp.f32 %v12769_v6  ;;  %v4959_v62 = vor.u32 %v4957_v37, %v4955_v10  ;;  %v8648_v39 = vld [vmem:[%s14933_s13 + $0xc8] sm:$0xff]  }
 0xac8   : > { %v8924_v23 = vpop.eup %8923  ;;  %5090 = vrot.lane.b32.xlu0 %v4956_v13, %s9060_s20  ;;  %v12860_v42 = vadd.f32 1.0, %v8908_v32  ;;  %v12862_v55 = vadd.f32 1.0, %v8910_v2  ;;  %v12864_v49 = vadd.f32 1.0, %v8912_v19  ;;  %5088 = vrot.lane.b32.xlu1 %v4948_v16, %s9060_s20  ;;  %8943 = vrcp.f32 %v12777_v38  ;;  %v8649_v19 = vld [vmem:[%s14933_s13 + $0x58] sm:$0xff]  }
 0xac9   : > { %v8926_v5 = vpop.eup %8925  ;;  %v12871_v6 = vadd.f32 1.0, %v8914_v29  ;;  %v12873_v40 = vadd.f32 1.0, %v8916_v46  ;;  %8945 = vrcp.f32 %v12779_v50  ;;  %v4963_v32 = vrot.slane %v4961_v3, 1  ;;  %7236 = vmatpush1.bf16.msra.mxu0 %v8646_v41  ;;  %8465 = vmatpush1.bf16.msra.mxu1 %v8648_v39  ;;  %v15529_v39 = vld [vmem:[#allocation24_spill] sm:$0xff] }
 0xaca   : > { %v8928_v2 = vpop.eup %8927  ;;  %v12879_v10 = vadd.f32 1.0, %v8918_v9  ;;  %8947 = vrcp.f32 %v12803_v35  ;;  %v4527_v38 = vmul.f32 %v8926_v5, %v12413_v51  ;;  %7237 = vmatprep.subr.bf16.mxu0 %v15503_v14  ;;  %v12886_v29 = vcombine.low %v12794_v63, %v12751_v48  ;;  %8450 = vmatprep.subr.bf16.mxu1 %v15503_v14  ;;  %v15527_v48 = vld [vmem:[#allocation22_spill] sm:$0xff] }
 0xacb   : > { %v8930_v50 = vpop.eup %8929  ;;  %v12888_v44 = vadd.f32 1.0, %v8920_v60  ;;  %8949 = vrcp.f32 %v12808_v36  ;;  %v4964_v46 = vsel %vm1935_vm8, %v4959_v62, %v4963_v32  ;;  %v4528_v9 = vmul.f32 %v8928_v2, %v12419_v20  ;;  %v15528_v36 = vld [vmem:[#allocation48_spill] sm:$0xff] }
 0xacc   : > { %v8932_v35 = vpop.eup %8931  ;;  %v12894_v51 = vadd.f32 1.0, %v8922_v28  ;;  %8951 = vrcp.f32 %v12810_v21  ;;  %5092 = vrot.lane.b32.xlu0 %v4964_v46, %s9060_s20  ;;  %v4563_v63 = vmul.f32 %v4527_v38, %v15527_v48  ;;  %v4965_v37 = vshrl.u32 %v12789_v1, 16  ;;  %v8652_v21 = vld [vmem:[%s14933_s13 + $0x60] sm:$0xff]  }
 0xacd   : > { %v8934_v3 = vpop.eup %8933  ;;  %v12900_v41 = vadd.f32 1.0, %v8924_v23  ;;  %8953 = vrcp.f32 %v12814_v45  ;;  %v4529_v20 = vmul.f32 %v8932_v35, %v12427_v34  ;;  %v4564_v60 = vmul.f32 %v4528_v9, %v15528_v36  ;;  %7238 = vmatpush1.bf16.msra.mxu0 %v8649_v19  ;;  %v15532_v48 = vld [vmem:[#allocation45_spill] sm:$0xff] }
 0xace   : > { %v8936_v28 = vpop.eup %8935  ;;  %v12908_v13 = vadd.f32 1.0, %v8930_v50  ;;  %8955 = vrcp.f32 %v12826_v58  ;;  %v4530_v16 = vmul.f32 %v8934_v3, %v12438_v54  ;;  %v8125_v23 = vpack.c.bf16 %v4563_v63, %v4563_v63  ;;  %7239 = vmatprep.subr.bf16.mxu0 %v15503_v14  ;;  %v15530_v58 = vld [vmem:[#allocation49_spill] sm:$0xff]  ;;  %v15533_v3 = vld [vmem:[#allocation3_spill] sm:$0xff] }
 0xacf   : > { %v8938_v45 = vpop.eup %8937  ;;  %8957 = vrcp.f32 %v12836_v24  ;;  %v4531_v34 = vmul.f32 %v8936_v28, %v12445_v25  ;;  %v8126_v62 = vpack.c.bf16 %v4564_v60, %v4564_v60  ;;  %v4565_v5 = vmul.f32 %v4529_v20, %v15529_v39  ;;  %v8654_v24 = vld [vmem:[%s14933_s13 + $0xd0] sm:$0xff]   ;;  %v15534_v60 = vld [vmem:[#allocation56_spill] sm:$0xff] }
 0xad0   : > { %v8940_v19 = vpop.eup %8939  ;;  %8959 = vrcp.f32 %v12838_v11  ;;  %v4532_v2 = vmul.f32 %v8938_v45, %v12453_v31  ;;  %4743 = vst.msk [vmem:[#allocation2 + $0x24] sm:$0xf] %vm632_vm12, %v8125_v23  ;;  %v4566_v54 = vmul.f32 %v4530_v16, %v15530_v58  ;;  %v12920_v38 = vor.u32 %v4965_v37, %v4963_v32  ;;  %v15531_v11 = vld [vmem:[#allocation44_spill] sm:$0xff]  ;;  %v8655_v32 = vld [vmem:[%s14933_s13 + $0x68] sm:$0xff]   ;;  %8466 = vmatpush1.bf16.msra.mxu1 %v8654_v24 }
 0xad1   : > { %v8942_v50 = vpop.eup %8941  ;;  %8961 = vrcp.f32 %v12840_v53  ;;  %v4533_v25 = vmul.f32 %v8940_v19, %v12523_v59  ;;  %4744 = vst.msk [vmem:[#allocation2 + $0x28] sm:$0xf] %vm632_vm12, %v8126_v62  ;;  %v4567_v46 = vmul.f32 %v4531_v34, %v15531_v11  ;;  %v8127_v31 = vpack.c.bf16 %v4565_v5, %v4565_v5  ;;  %7240 = vmatpush1.bf16.msra.mxu0 %v8652_v21  ;;  %v15535_v16 = vld [vmem:[#allocation4_spill] sm:$0xff]  ;;  %v15536_v62 = vld [vmem:[#allocation57_spill] sm:$0xff] }
 0xad2   : > { %v8944_v9 = vpop.eup %8943  ;;  %8963 = vrcp.f32 %v12847_v7  ;;  %v4534_v35 = vmul.f32 %v8942_v50, %v12538_v22  ;;  %v4568_v63 = vmul.f32 %v4532_v2, %v15532_v48  ;;  %v8128_v53 = vpack.c.bf16 %v4566_v54, %v4566_v54  ;;  %7241 = vmatprep.subr.bf16.mxu0 %v15503_v14  ;;  %8451 = vmatprep.subr.bf16.mxu1 %v15503_v14  ;;  %v15537_v2 = vld [vmem:[#allocation58_spill] sm:$0xff] }
 0xad3   : > { %v8946_v59 = vpop.eup %8945  ;;  %8965 = vrcp.f32 %v12849_v4  ;;  %v4535_v37 = vmul.f32 %v8944_v9, %v12545_v18  ;;  %v4569_v20 = vmul.f32 %v4533_v25, %v15533_v3  ;;  %v8129_v36 = vpack.c.bf16 %v4567_v46, %v4567_v46  ;;  %4745 = vst.msk [vmem:[#allocation2 + $0x2c] sm:$0xf] %vm632_vm12, %v8127_v31  ;;  %v15540_v46 = vld [vmem:[#allocation35_spill] sm:$0xff] }
 0xad4   : > { %v8948_v7 = vpop.eup %8947  ;;  %8967 = vrcp.f32 %v12851_v12  ;;  %v4536_v22 = vmul.f32 %v8946_v59, %v12555_v0  ;;  %v4570_v21 = vmul.f32 %v4534_v35, %v15534_v60  ;;  %v8130_v28 = vpack.c.bf16 %v4568_v63, %v4568_v63  ;;  %4746 = vst.msk [vmem:[#allocation2 + $0x30] sm:$0xf] %vm632_vm12, %v8128_v53  ;;  %v8657_v0 = vld [vmem:[%s14933_s13 + $0x70] sm:$0xff]  }
 0xad5   : > { %v8950_v4 = vpop.eup %8949  ;;  %8969 = vrcp.f32 %v12860_v42  ;;  %v4537_v18 = vmul.f32 %v8948_v7, %v12561_v47  ;;  %v4571_v23 = vmul.f32 %v4535_v37, %v15535_v16  ;;  %v8131_v45 = vpack.c.bf16 %v4569_v20, %v4569_v20  ;;  %4747 = vst.msk [vmem:[#allocation2 + $0x34] sm:$0xf] %vm632_vm12, %v8129_v36  ;;  %7242 = vmatpush1.bf16.msra.mxu0 %v8655_v32  ;;  %v15541_v9 = vld [vmem:[#allocation11_spill] sm:$0xff]  ;;  %v15543_v37 = vld [vmem:[#allocation37_spill] sm:$0xff] }
 0xad6   : > { %v8952_v12 = vpop.eup %8951  ;;  %8971 = vrcp.f32 %v12862_v55  ;;  %v4538_v34 = vmul.f32 %v8950_v4, %v12566_v30  ;;  %v4572_v39 = vmul.f32 %v4536_v22, %v15536_v62  ;;  %v8132_v42 = vpack.c.bf16 %v4570_v21, %v4570_v21  ;;  %4748 = vst.msk [vmem:[#allocation2 + $0x38] sm:$0xf] %vm632_vm12, %v8130_v28  ;;  %7243 = vmatprep.subr.bf16.mxu0 %v15503_v14  ;;  %v15544_v36 = vld [vmem:[#allocation59_spill] sm:$0xff] }
 0xad7   : > { %v8954_v47 = vpop.eup %8953  ;;  %8973 = vrcp.f32 %v12864_v49  ;;  %v4539_v5 = vmul.f32 %v8952_v12, %v12574_v56  ;;  %v4801_v19 = vld [vmem:[#allocation2 + $0x24] sm:$0xf]  ;;  %v12960_v58 = vmul.f32 %v4537_v18, %v15537_v2  ;;  %v8133_v54 = vpack.c.bf16 %v4571_v23, %v4571_v23  ;;  %4749 = vst.msk [vmem:[#allocation2 + $0x3c] sm:$0xf] %vm632_vm12, %v8131_v45  ;;  %v15538_v49 = vld [vmem:[#allocation34_spill] sm:$0xff]  ;;  %v8659_v56 = vld [vmem:[%s14933_s13 + $0xd8] sm:$0xff]  }
 0xad8   : > { %v8956_v30 = vpop.eup %8955  ;;  %8975 = vrcp.f32 %v12871_v6  ;;  %v4540_v55 = vmul.f32 %v8954_v47, %v12578_v52  ;;  %v12965_v24 = vld [vmem:[#allocation2 + $0x28] sm:$0xf]  ;;  %v12968_v50 = vcombine.low %v12774_v43, %v4801_v19  ;;  %v4574_v25 = vmul.f32 %v4538_v34, %v15538_v49  ;;  %4750 = vst.msk [vmem:[#allocation2 + $0x40] sm:$0xf] %vm632_vm12, %v8132_v42  ;;  %v8658_v43 = vld [vmem:[%s14933_s13 + $0x78] sm:$0xff]   ;;  %8467 = vmatpush1.bf16.msra.mxu1 %v8659_v56  ;;  %v15550_v12 = vld [vmem:[#allocation62_spill] sm:$0xff] }
 0xad9   : > { %v8958_v11 = vpop.eup %8957  ;;  %8977 = vrcp.f32 %v12873_v40  ;;  %v4541_v6 = vmul.f32 %v8956_v30, %v12588_v61  ;;  %v12978_v52 = vcombine.low %v4801_v19, %v12965_v24  ;;  %v4575_v31 = vmul.f32 %v4539_v5, %v15540_v46  ;;  %4751 = vst.msk [vmem:[#allocation2 + $0x44] sm:$0xf] %vm632_vm12, %v8133_v54  ;;  %7244 = vmatpush1.bf16.msra.mxu0 %v8657_v0  ;;  %v15542_v40 = vld [vmem:[#allocation36_spill] sm:$0xff]  ;;  %v15551_v42 = vld [vmem:[#allocation38_spill] sm:$0xff]  ;;  %v15552_v54 = vld [vmem:[#allocation7_spill] sm:$0xff] }
 0xada   : > { %v8960_v32 = vpop.eup %8959  ;;  %8979 = vrcp.f32 %v12879_v10  ;;  %v4542_v35 = vmul.f32 %v8958_v11, %v15541_v9  ;;  %v4576_v48 = vmul.f32 %v4540_v55, %v15542_v40  ;;  %v8134_v61 = vpack.c.bf16 %v4572_v39, %v4572_v39  ;;  %7245 = vmatprep.subr.bf16.mxu0 %v15503_v14  ;;  %8452 = vmatprep.subr.bf16.mxu1 %v15503_v14  ;;  %v15555_v11 = vld [vmem:[#allocation40_spill] sm:$0xff]  ;;  %v15557_v9 = vld [vmem:[#allocation41_spill] sm:$0xff] }
 0xadb   : > { %15539 = vst [vmem:[#allocation18_spill] sm:$0xff] %v12978_v52  ;;  %v8962_v63 = vpop.eup %8961  ;;  %8981 = vrcp.f32 %v12888_v44  ;;  %v4543_v53 = vmul.f32 %v8960_v32, %v12600_v8  ;;  %v5136_v59 = vrot.slane %v12978_v52, 1  ;;  %v4577_v3 = vmul.f32 %v4541_v6, %v15543_v37  ;;  %v15545_v8 = vld [vmem:[#allocation53_spill] sm:$0xff] }
 0xadc   : > { %v8964_v10 = vpop.eup %8963  ;;  %8983 = vrcp.f32 %v12894_v51  ;;  %v4544_v20 = vmul.f32 %v8962_v63, %v12604_v15  ;;  %v4578_v7 = vmul.f32 %v4542_v35, %v15544_v36  ;;  %v4969_v22 = vshll.u32 %v12978_v52, 16  ;;  %4752 = vst.msk [vmem:[#allocation2 + $0x48] sm:$0xf] %vm632_vm12, %v8134_v61  ;;  %v15548_v51 = vld [vmem:[#allocation60_spill] sm:$0xff]  ;;  %v4803_v61 = vld [vmem:[#allocation2 + $0x2c] sm:$0xf] }
 0xadd   : > { %v8966_v44 = vpop.eup %8965  ;;  %8985 = vrcp.f32 %v12900_v41  ;;  %v4545_v60 = vmul.f32 %v8964_v10, %v15545_v8  ;;  %v15546_v21 = vrot.slane %v12789_v1, 1  ;;  %v4579_v15 = vmul.f32 %v4543_v53, %v15548_v51  ;;  %7246 = vmatpush1.bf16.msra.mxu0 %v8658_v43  ;;  %v15549_v41 = vld [vmem:[#allocation61_spill] sm:$0xff]  ;;  %v13036_v63 = vld [vmem:[#allocation2 + $0x30] sm:$0xf]  ;;  %v15559_v10 = vld [vmem:[#allocation63_spill] sm:$0xff] }
 0xade   : > { %v8968_v4 = vpop.eup %8967  ;;  %8987 = vrcp.f32 %v12908_v13  ;;  %v4546_v18 = vmul.f32 %v8966_v44, %v12616_v27  ;;  %v4580_v16 = vmul.f32 %v4544_v20, %v15549_v41  ;;  %v13014_v23 = vrot.slane %v4969_v22, 1  ;;  %7392 = vmatprep.subr.bf16.mxu0 %v15503_v14  ;;  %v15556_v43 = vld [vmem:[#allocation9_spill] sm:$0xff]  ;;  %v15560_v44 = vld [vmem:[#allocation12_spill] sm:$0xff] }
 0xadf   : > { %v13006_v28 = vsel %vm2139_vm6, %v15546_v21, %v5136_v59  ;;  %v8970_v45 = vpop.eup %8969  ;;  %v4547_v0 = vmul.f32 %v8968_v4, %v12623_v57  ;;  %v4581_v34 = vmul.f32 %v4545_v60, %v15550_v12  ;;  %v8135_v62 = vpack.c.bf16 %v12960_v58, %v12960_v58  ;;  %v15553_v57 = vld [vmem:[#allocation39_spill] sm:$0xff]  ;;  %v15558_v37 = vld [vmem:[#allocation29_spill] sm:$0xff]  ;;  %v15561_v60 = vld [vmem:[#allocation64_spill] sm:$0xff] }
 0xae0   : > { %15547 = vst [vmem:[#allocation32_spill] sm:$0xff] %v13006_v28  ;;  %5185 = vrot.lane.b32.xlu1 %v13006_v28, %s9060_s20  ;;  %v8136_v13 = vpack.c.bf16 %v4574_v25, %v4574_v25  ;;  %v8972_v39 = vpop.eup %8971  ;;  %v4548_v27 = vmul.f32 %v8970_v45, %v12627_v17  ;;  %v4582_v47 = vmul.f32 %v4546_v18, %v15551_v42  ;;  %v15554_v25 = vld [vmem:[#allocation28_spill] sm:$0xff]  ;;  %v15562_v18 = vld [vmem:[#allocation54_spill] sm:$0xff] }
 0xae1   : > { %v4972_v5 = vsel %vm1935_vm8, %v12920_v38, %v13014_v23  ;;  %v8137_v19 = vpack.c.bf16 %v4575_v31, %v4575_v31  ;;  %v8974_v2 = vpop.eup %8973  ;;  %v4549_v30 = vmul.f32 %v8972_v39, %v15552_v54  ;;  %v4583_v55 = vmul.f32 %v4547_v0, %v15553_v57  ;;  %4753 = vst.msk [vmem:[#allocation2 + $0x4c] sm:$0xf] %vm632_vm12, %v8135_v62 }
 0xae2   : > { %5094 = vrot.lane.b32.xlu0 %v4972_v5, %s9060_s20  ;;  %v8138_v49 = vpack.c.bf16 %v4576_v48, %v4576_v48  ;;  %v8139_v58 = vpack.c.bf16 %v4577_v3, %v4577_v3  ;;  %4754 = vst.msk [vmem:[#allocation2 + $0x50] sm:$0xf] %vm632_vm12, %v8136_v13  ;;  %v8976_v17 = vpop.eup %8975  ;;  %v4550_v56 = vmul.f32 %v8974_v2, %v15554_v25  ;;  %v15565_v13 = vld [vmem:[#allocation13_spill] sm:$0xff]  ;;  %v4806_v2 = vld [vmem:[#allocation2 + $0x38] sm:$0xf] }
 0xae3   : > { %v4584_v6 = vmul.f32 %v4548_v27, %v15555_v11  ;;  %v8140_v38 = vpack.c.bf16 %v4578_v7, %v4578_v7  ;;  %v8141_v46 = vpack.c.bf16 %v4579_v15, %v4579_v15  ;;  %4755 = vst.msk [vmem:[#allocation2 + $0x54] sm:$0xf] %vm632_vm12, %v8137_v19  ;;  %v8978_v31 = vpop.eup %8977  ;;  %v4551_v32 = vmul.f32 %v8976_v17, %v15556_v43  ;;  %v15566_v27 = vld [vmem:[#allocation43_spill] sm:$0xff]  ;;  %v15569_v11 = vld [vmem:[#allocation14_spill] sm:$0xff] }
 0xae4   : > { %v4585_v35 = vmul.f32 %v4549_v30, %v15557_v9  ;;  %v8142_v40 = vpack.c.bf16 %v4580_v16, %v4580_v16  ;;  %v8143_v48 = vpack.c.bf16 %v4581_v34, %v4581_v34  ;;  %4756 = vst.msk [vmem:[#allocation2 + $0x58] sm:$0xf] %vm632_vm12, %v8138_v49  ;;  %4757 = vst.msk [vmem:[#allocation2 + $0x5c] sm:$0xf] %vm632_vm12, %v8139_v58  ;;  %v8980_v53 = vpop.eup %8979  ;;  %v15563_v16 = vld [vmem:[#allocation42_spill] sm:$0xff]  ;;  %v15572_v9 = vld [vmem:[#allocation21_spill] sm:$0xff] }
 0xae5   : > { %v4552_v3 = vmul.f32 %v8978_v31, %v15558_v37  ;;  %v4586_v20 = vmul.f32 %v4550_v56, %v15559_v10  ;;  %v8144_v36 = vpack.c.bf16 %v4582_v47, %v4582_v47  ;;  %v8145_v7 = vpack.c.bf16 %v4583_v55, %v4583_v55  ;;  %4758 = vst.msk [vmem:[#allocation2 + $0x60] sm:$0xf] %vm632_vm12, %v8140_v38  ;;  %v8982_v22 = vpop.eup %8981  ;;  %v4810_v34 = vld [vmem:[#allocation2 + $0x48] sm:$0xf]  ;;  %v4805_v19 = vld [vmem:[#allocation2 + $0x34] sm:$0xf] }
 0xae6   : > { %4759 = vst.msk [vmem:[#allocation2 + $0x64] sm:$0xf] %vm632_vm12, %v8141_v46  ;;  %v4553_v8 = vmul.f32 %v8980_v53, %v15560_v44  ;;  %v4587_v21 = vmul.f32 %v4551_v32, %v15561_v60  ;;  %v8146_v51 = vpack.c.bf16 %v4584_v6, %v4584_v6  ;;  %v8147_v15 = vpack.c.bf16 %v4585_v35, %v4585_v35  ;;  %v8984_v4 = vpop.eup %8983  ;;  %v15567_v30 = vld [vmem:[#allocation30_spill] sm:$0xff]  ;;  %v15568_v55 = vld [vmem:[#allocation8_spill] sm:$0xff] }
 0xae7   : > { %4760 = vst.msk [vmem:[#allocation2 + $0x68] sm:$0xf] %vm632_vm12, %v8142_v40  ;;  %4761 = vst.msk [vmem:[#allocation2 + $0x6c] sm:$0xf] %vm632_vm12, %v8143_v48  ;;  %v4554_v41 = vmul.f32 %v8982_v22, %v15562_v18  ;;  %v4588_v45 = vmul.f32 %v4552_v3, %v15563_v16  ;;  %v8148_v0 = vpack.c.bf16 %v4586_v20, %v4586_v20  ;;  %v8986_v62 = vpop.eup %8985  ;;  %v8661_v56 = vld [vmem:[%s14933_s13 + $0xe0] sm:$0xff]   ;;  %v15575_v3 = vld [vmem:[#allocation10_spill] sm:$0xff] }
 0xae8   : > { %v13051_v12 = vcombine.low %v4803_v61, %v13036_v63  ;;  %4762 = vst.msk [vmem:[#allocation2 + $0x70] sm:$0xf] %vm632_vm12, %v8144_v36  ;;  %4763 = vst.msk [vmem:[#allocation2 + $0x74] sm:$0xf] %vm632_vm12, %v8145_v7  ;;  %v4555_v39 = vmul.f32 %v8984_v4, %v15565_v13  ;;  %v4589_v42 = vmul.f32 %v4553_v8, %v15566_v27  ;;  %v8988_v54 = vpop.eup %8987  ;;  %v13066_v25 = vld [vmem:[#allocation2 + $0x4c] sm:$0xf]  ;;  %8468 = vmatpush1.bf16.msra.mxu1 %v8661_v56 }
 0xae9   : > { %v8149_v47 = vpack.c.bf16 %v4587_v21, %v4587_v21  ;;  %v13058_v5 = vcombine.low %v12965_v24, %v4803_v61  ;;  %4764 = vst.msk [vmem:[#allocation2 + $0x78] sm:$0xf] %vm632_vm12, %v8146_v51  ;;  %4765 = vst.msk [vmem:[#allocation2 + $0x7c] sm:$0xf] %vm632_vm12, %v8147_v15  ;;  %v4556_v57 = vmul.f32 %v8986_v62, %v15567_v30  ;;  %v13068_v24 = vld [vmem:[#allocation2 + $0x50] sm:$0xf]  ;;  %8453 = vmatprep.subr.bf16.mxu1 %v15503_v14 }
 0xaea   : > { %15564 = vst [vmem:[#allocation67_spill] sm:$0xff] %v13051_v12  ;;  %v4590_v49 = vmul.f32 %v4554_v41, %v15568_v55  ;;  %v8150_v58 = vpack.c.bf16 %v4588_v45, %v4588_v45  ;;  %v5138_v17 = vrot.slane %v13051_v12, 1  ;;  %4766 = vst.msk [vmem:[#allocation2 + $0x80] sm:$0xf] %vm632_vm12, %v8148_v0  ;;  %v4557_v6 = vmul.f32 %v8988_v54, %v15569_v11  ;;  %v15570_v38 = vld [vmem:[#allocation52_spill] sm:$0xff]  ;;  %v8662_v27 = vld [vmem:[%s14933_s13 + $0xe8] sm:$0xff]  }
 0xaeb   : > { %v4591_v46 = vmul.f32 %v4555_v39, %v15570_v38  ;;  %v8151_v31 = vpack.c.bf16 %v4589_v42, %v4589_v42  ;;  %4767 = vst.msk [vmem:[#allocation2 + $0x84] sm:$0xf] %vm632_vm12, %v8149_v47  ;;  %v13076_v43 = vld [vmem:[#allocation2 + $0x54] sm:$0xf]  ;;  %v13079_v32 = vcombine.low %v4810_v34, %v13066_v25  ;;  %v4592_v35 = vmul.f32 %v4556_v57, %v15572_v9  ;;  %v4807_v53 = vld [vmem:[#allocation2 + $0x3c] sm:$0xf] }
 0xaec   : > { %v8152_v40 = vpack.c.bf16 %v4590_v49, %v4590_v49  ;;  %v13085_v48 = vsel %vm2139_vm6, %v5136_v59, %v5138_v17  ;;  %4768 = vst.msk [vmem:[#allocation2 + $0x88] sm:$0xf] %vm632_vm12, %v8150_v58  ;;  %v13090_v61 = vcombine.low %v13068_v24, %v13076_v43  ;;  %v4808_v37 = vld [vmem:[#allocation2 + $0x40] sm:$0xf]  ;;  %v4593_v10 = vmul.f32 %v4557_v6, %v15575_v3  ;;  %v13099_v7 = vld [vmem:[#allocation2 + $0x58] sm:$0xf] }
 0xaed   : > { %15571 = vst [vmem:[#allocation65_spill] sm:$0xff] %v13079_v32  ;;  %15573 = vst [vmem:[#allocation25_spill] sm:$0xff] %v13085_v48  ;;  %v8153_v20 = vpack.c.bf16 %v4591_v46, %v4591_v46  ;;  %5187 = vrot.lane.b32.xlu1 %v13085_v48, %s9060_s20  ;;  %v5416_v59 = vrot.slane %v13079_v32, 6  ;;  %v13097_v36 = vcombine.low %v4805_v19, %v4806_v2  ;;  %v13101_v22 = vld [vmem:[#allocation2 + $0x5c] sm:$0xf]  ;;  %v4973_v21 = vshrl.u32 %v12978_v52, 16 }
 0xaee   : > { %15574 = vst [vmem:[#allocation6_spill] sm:$0xff] %v13090_v61  ;;  %4769 = vst.msk [vmem:[#allocation2 + $0x8c] sm:$0xf] %vm632_vm12, %v8151_v31  ;;  %v8154_v44 = vpack.c.bf16 %v4592_v35, %v4592_v35  ;;  %v5418_v8 = vrot.slane %v13090_v61, 6  ;;  %v13107_v60 = vcombine.low %v13036_v63, %v4805_v19  ;;  %v4809_v51 = vld [vmem:[#allocation2 + $0x44] sm:$0xf]  ;;  %v8155_v15 = vpack.c.bf16 %v4593_v10, %v4593_v10 }
 0xaef   : > { %15576 = vst [vmem:[#allocation50_spill] sm:$0xff] %v13097_v36  ;;  %4770 = vst.msk [vmem:[#allocation2 + $0x90] sm:$0xf] %vm632_vm12, %v8152_v40  ;;  %v5140_v4 = vrot.slane %v13097_v36, 1  ;;  %v4977_v18 = vshll.u32 %v13051_v12, 16  ;;  %v13113_v41 = vcombine.low %v4807_v53, %v4808_v37  ;;  %v4975_v63 = vor.u32 %v4973_v21, %v13014_v23  ;;  %8469 = vmatpush1.bf16.msra.mxu1 %v8662_v27  ;;  %v8663_v3 = vld [vmem:[%s14933_s13 + $0xf0] sm:$0xff]  }
 0xaf0   : > { %4771 = vst.msk [vmem:[#allocation2 + $0x94] sm:$0xf] %vm632_vm12, %v8153_v20  ;;  %4772 = vst.msk [vmem:[#allocation2 + $0x98] sm:$0xf] %vm632_vm12, %v8154_v44  ;;  %v13117_v16 = vsel %vm5402_vm0, %v5416_v59, %v5418_v8  ;;  %v13120_v45 = vcombine.low %v4806_v2, %v4807_v53  ;;  %v13124_v0 = vcombine.low %v13099_v7, %v13101_v22  ;;  %v4985_v47 = vshll.u32 %v13097_v36, 16 }
 0xaf1   : > { %15577 = vst [vmem:[#allocation66_spill] sm:$0xff] %v13113_v41  ;;  %15578 = vst [vmem:[#allocation26_spill] sm:$0xff] %v13117_v16  ;;  %5456 = vrot.lane.b32.xlu0 %v13117_v16, %s9060_s20  ;;  %v13130_v62 = vsel %vm2139_vm6, %v5138_v17, %v5140_v4  ;;  %v5142_v13 = vrot.slane %v13113_v41, 1  ;;  %v13133_v39 = vcombine.low %v4809_v51, %v4810_v34  ;;  %v4979_v23 = vrot.slane %v4977_v18, 1  ;;  %v4816_v53 = vld [vmem:[#allocation2 + $0x60] sm:$0xf] }
 0xaf2   : > { %15579 = vst [vmem:[#allocation19_spill] sm:$0xff] %v13124_v0  ;;  %4773 = vst.msk [vmem:[#allocation2 + $0x9c] sm:$0xf] %vm632_vm12, %v8155_v15  ;;  %5189 = vrot.lane.b32.xlu1 %v13130_v62, %s9060_s20  ;;  %v5420_v42 = vrot.slane %v13124_v0, 6  ;;  %v13142_v19 = vcombine.low %v4808_v37, %v4809_v51  ;;  %v4981_v30 = vshrl.u32 %v13051_v12, 16  ;;  %8454 = vmatprep.subr.bf16.mxu1 %v15503_v14  ;;  %v4989_v57 = vshrl.u32 %v13097_v36, 16 }
 0xaf3   : > { %15580 = vst [vmem:[#allocation51_spill] sm:$0xff] %v13130_v62  ;;  %15581 = vst [vmem:[#allocation46_spill] sm:$0xff] %v13133_v39  ;;  %v4980_v2 = vsel %vm1935_vm8, %v4975_v63, %v4979_v23  ;;  %v13147_v34 = vsel %vm2139_vm6, %v5140_v4, %v5142_v13  ;;  %v5144_v54 = vrot.slane %v13133_v39, 1  ;;  %v4987_v58 = vrot.slane %v4985_v47, 1  ;;  %v13179_v37 = vld [vmem:[#allocation2 + $0x64] sm:$0xf]  ;;  %8470 = vmatpush1.bf16.msra.mxu1 %v8663_v3 }
 0xaf4   : > { %15582 = vst [vmem:[#allocation23_spill] sm:$0xff] %v13147_v34  ;;  %v13158_v55 = vsel %vm5402_vm0, %v5418_v8, %v5420_v42  ;;  %v4983_v49 = vor.u32 %v4981_v30, %v4979_v23  ;;  %v15121_v17 = vrot.slane %v13142_v19, 6  ;;  %v15127_v56 = vshrl.u32 %v13090_v61, 16  ;;  %8455 = vmatprep.subr.bf16.mxu1 %v15503_v14  ;;  %v8651_v63 = vld [vmem:[#allocation2 + $0xa0] sm:$0xff]   ;;  %v4839_v3 = vld [vmem:[#allocation2 + $0x18] sm:$0xe] }
 0xaf5   : > { %5096 = vrot.lane.b32.xlu0 %v4980_v2, %s9060_s20  ;;  %15583 = vst [vmem:[#allocation20_spill] sm:$0xff] %v13158_v55  ;;  %v15126_v11 = vshll.u32 %v13090_v61, 16  ;;  %v15125_v6 = vshrl.u32 %v13124_v0, 16  ;;  %v15123_v38 = vshll.u32 %v13124_v0, 16  ;;  %v13168_v46 = vsel %vm2139_vm6, %v5142_v13, %v5144_v54 }
 0xaf6   : > { %5191 = vrot.lane.b32.xlu1 %v13147_v34, %s9060_s20  ;;  %15584 = vst [vmem:[#allocation16_spill] sm:$0xff] %v13168_v46  ;;  %v13172_v31 = vcombine.low %v13066_v25, %v13068_v24  ;;  %v15129_v9 = vshrl.u32 %v13079_v32, 16  ;;  %v15128_v35 = vshll.u32 %v13079_v32, 16  ;;  %v4993_v40 = vshll.u32 %v13113_v41, 16 }
 0xaf7   : > { %v4988_v10 = vsel %vm1935_vm8, %v4983_v49, %v4987_v58  ;;  %v13188_v25 = vsel %vm5402_vm0, %v15121_v17, %v5416_v59  ;;  %v4991_v24 = vor.u32 %v4989_v57, %v4987_v58  ;;  %v5525_v20 = vrot.slane %v15127_v56, 6  ;;  %v13225_v58 = vld [vmem:[#allocation2 + $0x68] sm:$0xf] }
 0xaf8   : > { %15585 = vst [vmem:[#allocation47_spill] sm:$0xff] %v13172_v31  ;;  %15586 = vst [vmem:[#allocation33_spill] sm:$0xff] %v13188_v25  ;;  %v5526_v44 = vrot.slane %v15126_v11, 7  ;;  %v5529_v8 = vrot.slane %v15125_v6, 6  ;;  %v5530_v21 = vrot.slane %v15123_v38, 7  ;;  %v5146_v51 = vrot.slane %v13172_v31, 1 }
 0xaf9   : > { %5458 = vrot.lane.b32.xlu0 %v13158_v55, %s9060_s20  ;;  %v5521_v59 = vrot.slane %v15129_v9, 6  ;;  %v5522_v15 = vrot.slane %v15128_v35, 7  ;;  %v13205_v4 = vcombine.low %v4816_v53, %v13179_v37  ;;  %v4995_v18 = vrot.slane %v4993_v40, 1  ;;  %v13227_v40 = vld [vmem:[#allocation2 + $0x6c] sm:$0xf] }
 0xafa   : > { %5193 = vrot.lane.b32.xlu1 %v13168_v46, %s9060_s20  ;;  %v5527_v23 = vor.u32 %v5526_v44, %v5525_v20  ;;  %v5531_v27 = vor.u32 %v5530_v21, %v5529_v8  ;;  %v13213_v47 = vcombine.low %v13076_v43, %v13099_v7  ;;  %v13217_v2 = vsel %vm2139_vm6, %v5144_v54, %v5146_v51  ;;  %v8664_v7 = vld [vmem:[%s14933_s13 + $0xf8] sm:$0xff]   ;;  %v13255_v38 = vld [vmem:[#allocation2 + $0x74] sm:$0xf] }
 0xafb   : > { %15587 = vst [vmem:[#allocation22_spill] sm:$0xff] %v13205_v4  ;;  %v4996_v13 = vsel %vm1935_vm8, %v4991_v24, %v4995_v18  ;;  %15589 = vst [vmem:[#allocation24_spill] sm:$0xff] %v13217_v2  ;;  %v13219_v30 = vor.u32 %v5522_v15, %v5521_v59  ;;  %v15122_v57 = vshrl.u32 %v13205_v4, 16  ;;  %v15124_v49 = vshll.u32 %v13205_v4, 16  ;;  %v15591_v44 = vld [vmem:[#allocation27_spill] sm:$0xff]  ;;  %8471 = vmatpush1.bf16.msra.mxu1 %v8664_v7 }
 0xafc   : > { %15588 = vst [vmem:[#allocation48_spill] sm:$0xff] %v13213_v47  ;;  %v5566_v43 = vshrl.u32 %v8651_v63, 16  ;;  %v5569_v54 = vshll.u32 %v8651_v63, 16  ;;  %v5422_v24 = vrot.slane %v13205_v4, 6  ;;  %v15130_v20 = vrot.slane %v13213_v47, 1 }
 0xafd   : > { %5098 = vrot.lane.b32.xlu0 %v4988_v10, %s9060_s20  ;;  %15590 = vst [vmem:[#allocation49_spill] sm:$0xff] %v13219_v30  ;;  %v5532_v10 = vsel %vm642_vm14, %v5527_v23, %v5531_v27  ;;  %v5129_v8 = vrot.slane %v15591_v44, 1  ;;  %v5528_v21 = vsel %vm642_vm14, %v13219_v30, %v5527_v23  ;;  %v5533_v59 = vrot.slane %v15122_v57, 6  ;;  %v15593_v23 = vld [vmem:[#allocation55_spill] sm:$0xff]  ;;  %v4820_v57 = vld [vmem:[#allocation2 + $0x70] sm:$0xf] }
 0xafe   : > { %5454 = vrot.lane.b32.xlu1 %v13188_v25, %s9060_s20  ;;  %v5534_v15 = vrot.slane %v15124_v49, 7  ;;  %v13245_v63 = vcombine.low %v13225_v58, %v13227_v40  ;;  %v5001_v7 = vshll.u32 %v13133_v39, 16  ;;  %v5568_v44 = vrot.slane %v5566_v43, 6  ;;  %v8665_v25 = vld [vmem:[%s14933_s13 + $0x100] sm:$0xff]  }
 0xaff   : > { %v13253_v17 = vcombine.low %v4839_v3, %v15593_v23  ;;  %v5571_v49 = vrot.slane %v5569_v54, 7  ;;  %v5130_v6 = vrot.slane %v12800_v33, 1  ;;  %v13266_v11 = vsel %vm2139_vm6, %v5146_v51, %v15130_v20  ;;  %8356 = vmatprep.subr.bf16.mxu1 %v8665_v25 }
 0xb00   : > { %15592 = vst [vmem:[#allocation44_spill] sm:$0xff] %v13245_v63  ;;  %15596 = vst [vmem:[#allocation56_spill] sm:$0xff] %v13266_v11  ;;  %v13270_v3 = vor.u32 %v5534_v15, %v5533_v59  ;;  %v13273_v54 = vcombine.low %v13101_v22, %v4816_v53  ;;  %v15132_v23 = vshrl.u32 %v13245_v63, 16  ;;  %v15135_v56 = vshll.u32 %v13245_v63, 16 }
 0xb01   : > { %5100 = vrot.lane.b32.xlu0 %v4996_v13, %s9060_s20  ;;  %v4997_v13 = vshrl.u32 %v13113_v41, 16  ;;  %15594 = vst [vmem:[#allocation45_spill] sm:$0xff] %v13253_v17  ;;  %v13280_v51 = vcombine.low %v4820_v57, %v13255_v38  ;;  %v13284_v59 = vor.u32 %v5571_v49, %v5568_v44  ;;  %v13288_v22 = vsel %vm2139_vm6, %v5130_v6, %v12792_v26  ;;  %v13307_v44 = vld [vmem:[#allocation2 + $0x7c] sm:$0xf]  ;;  %v8992_v41 = vld [vmem:[%s9181_s16 + $0x28] sm:$0xff] }
 0xb02   : > { %5195 = vrot.lane.b32.xlu1 %v13217_v2, %s9060_s20  ;;  %15597 = vst [vmem:[#allocation4_spill] sm:$0xff] %v13273_v54  ;;  %v13291_v53 = vsel %vm2139_vm6, %v5129_v8, %v5130_v6  ;;  %v5005_v35 = vshrl.u32 %v13133_v39, 16  ;;  %v5009_v9 = vshll.u32 %v13172_v31, 16  ;;  %v5536_v26 = vsel %vm642_vm14, %v5531_v27, %v13270_v3  ;;  %v8989_v39 = vld [vmem:[%s9181_s16 + $0x10] sm:$0xff] }
 0xb03   : > { %v4999_v43 = vor.u32 %v4997_v13, %v4995_v18  ;;  %15598 = vst [vmem:[#allocation57_spill] sm:$0xff] %v13280_v51  ;;  %v5494_v18 = vshrl.u32 %v13253_v17, 16  ;;  %v13297_v13 = vld [vmem:[#allocation2 + $0x78] sm:$0xf]  ;;  %v5150_v6 = vrot.slane %v13273_v54, 1  ;;  %v5537_v49 = vrot.slane %v15132_v23, 6 }
 0xb04   : > { %v5538_v8 = vrot.slane %v15135_v56, 7  ;;  %v5497_v27 = vshll.u32 %v13253_v17, 16  ;;  %v5426_v25 = vrot.slane %v13280_v51, 6  ;;  %v15606_v17 = vshrl.u32 %v13280_v51, 16 }
 0xb05   : > { %5599 = vrot.lane.b32.xlu0 %v5532_v10, %s9060_s20  ;;  %v13250_v10 = vld [vmem:[#allocation2 + $0xa0] ss:$0 sps:$4 sm:$0x11]   ;;  %v13312_v20 = vrot.slane %v5494_v18, 6  ;;  %v5011_v18 = vrot.slane %v5009_v9, 1 }
 0xb06   : > { %5597 = vrot.lane.b32.xlu1 %v5528_v21, %s9060_s20  ;;  %v13261_v21 = vsel %vm5402_vm0, %v5420_v42, %v5422_v24  ;;  %v5003_v42 = vrot.slane %v5001_v7, 1  ;;  %v5424_v7 = vrot.slane %v13245_v63, 6  ;;  %v5539_v9 = vor.u32 %v5538_v8, %v5537_v49  ;;  %v13357_v49 = vld [vmem:[#allocation2 + $0x8c] sm:$0xf] }
 0xb07   : > { %15595 = vst [vmem:[#allocation3_spill] sm:$0xff] %v13261_v21 }
 0xb08   : > { %v5004_v15 = vsel %vm1935_vm8, %v4999_v43, %v5003_v42  ;;  %v5007_v23 = vor.u32 %v5005_v35, %v5003_v42  ;;  %v13330_v43 = vcombine.low %v13179_v37, %v13225_v58  ;;  %v13334_v35 = vcombine.low %v13297_v13, %v13307_v44  ;;  %v4824_v42 = vld [vmem:[#allocation2 + $0x80] sm:$0xf] }
 0xb09   : > { %5460 = vrot.lane.b32.xlu0 %v13261_v21, %s9060_s20  ;;  %v8991_v21 = vld [vmem:[%s9181_s16 + $0x20] sm:$0xff]  ;;  %v5017_v37 = vshll.u32 %v13213_v47, 16  ;;  %v13347_v58 = vcombine.low %v13227_v40, %v4820_v57 }
 0xb0a   : > { %5197 = vrot.lane.b32.xlu1 %v13266_v11, %s9060_s20  ;;  %v8990_v11 = vld [vmem:[%s9181_s16 + $0x18] sm:$0xff]  ;;  %v4775_v2 = vpack.c.bf16 %v8992_v41, %v8991_v21  ;;  %15601 = vst [vmem:[#allocation34_spill] sm:$0xff] %v13330_v43  ;;  %15602 = vst [vmem:[#allocation35_spill] sm:$0xff] %v13334_v35  ;;  %v15603_v41 = vrot.slane %v13213_v47, 1  ;;  %v5013_v21 = vshrl.u32 %v13172_v31, 16  ;;  %v5012_v30 = vsel %vm1935_vm8, %v5007_v23, %v5011_v18 }
 0xb0b   : > { %v4774_v56 = vpack.c.bf16 %v8990_v11, %v8989_v39  ;;  %v13336_v39 = vld [vmem:[#allocation2 + $0x84] sm:$0xf]  ;;  %15605 = vst [vmem:[#allocation36_spill] sm:$0xff] %v13347_v58  ;;  %v5152_v31 = vrot.slane %v13330_v43, 1  ;;  %v5019_v36 = vrot.slane %v5017_v37, 1  ;;  %v13380_v23 = vsel %vm5402_vm0, %v5424_v7, %v5426_v25 }
 0xb0c   : > { %v13343_v11 = vsel %vm2139_vm6, %v15603_v41, %v5150_v6  ;;  %v15607_v41 = vshll.u32 %v13280_v51, 16  ;;  %v13360_v8 = vcombine.low %v4824_v42, %v13336_v39  ;;  %v13364_v40 = vrot.slane %v4775_v2, 7  ;;  %15611 = vst [vmem:[#allocation60_spill] sm:$0xff] %v13380_v23 }
 0xb0d   : > { %5102 = vrot.lane.b32.xlu0 %v5004_v15, %s9060_s20  ;;  %v13326_v15 = vsel %vm5402_vm0, %v5422_v24, %v5424_v7  ;;  %15604 = vst [vmem:[#allocation11_spill] sm:$0xff] %v13343_v11  ;;  %v4826_v24 = vld [vmem:[#allocation2 + $0x88] sm:$0xf]  ;;  %v13362_v57 = vrot.slane %v4774_v56, 7  ;;  %v5015_v46 = vor.u32 %v5013_v21, %v5011_v18  ;;  %v15613_v7 = vrot.slane %v13334_v35, 6 }
 0xb0e   : > { %5601 = vrot.lane.b32.xlu1 %v5536_v26, %s9060_s20  ;;  %v15599_v26 = vld [vmem:[#allocation31_spill] sm:$0xff]  ;;  %15600 = vst [vmem:[#allocation58_spill] sm:$0xff] %v13326_v15  ;;  %v5542_v55 = vrot.slane %v15607_v41, 7  ;;  %15608 = vst [vmem:[#allocation37_spill] sm:$0xff] %v13360_v8  ;;  %v5540_v41 = vsel %vm642_vm14, %v13270_v3, %v5539_v9  ;;  %v13376_v2 = vcombine.low %v4826_v24, %v13357_v49  ;;  %v5025_v3 = vshll.u32 %v13273_v54, 16 }
 0xb0f   : > { %v13323_v16 = vrot.slane %v15599_v26, 6  ;;  %15609 = vst [vmem:[#allocation59_spill] sm:$0xff] %v13362_v57  ;;  %v15615_v21 = vrot.slane %v13347_v58, 1  ;;  %v4828_v18 = vld [vmem:[#allocation2 + $0x90] sm:$0xf]  ;;  %v15618_v12 = vshll.u32 %v13334_v35, 16 }
 0xb10   : > { %15610 = vst [vmem:[#allocation53_spill] sm:$0xff] %v13376_v2  ;;  %v5432_v48 = vrot.slane %v13376_v2, 6  ;;  %v13446_v26 = vld [vmem:[#allocation2 + $0x98] sm:$0xf] }
 0xb11   : > { %5462 = vrot.lane.b32.xlu0 %v13326_v15, %s9060_s20  ;;  %v5541_v15 = vrot.slane %v15606_v17, 6  ;;  %v13389_v17 = vsel %vm2139_vm6, %v5150_v6, %v5152_v31  ;;  %v13403_v37 = vsel %vm2139_vm6, %v5152_v31, %v15615_v21  ;;  %v5546_v31 = vrot.slane %v15618_v12, 7 }
 0xb12   : > { %5199 = vrot.lane.b32.xlu1 %v13343_v11, %s9060_s20  ;;  %v13366_v11 = vrot.slane %v5497_v27, 7  ;;  %15612 = vst [vmem:[#allocation61_spill] sm:$0xff] %v13389_v17  ;;  %15616 = vst [vmem:[#allocation38_spill] sm:$0xff] %v13403_v37  ;;  %v5027_v21 = vrot.slane %v5025_v3, 1  ;;  %v15621_v6 = vshll.u32 %v13360_v8, 16  ;;  %v15624_v3 = vshrl.u32 %v13376_v2, 16 }
 0xb13   : > { %v5543_v27 = vor.u32 %v5542_v55, %v5541_v15  ;;  %v13395_v55 = vsel %vm5402_vm0, %v5426_v25, %v15613_v7  ;;  %v5033_v15 = vshll.u32 %v13330_v43, 16  ;;  %v15617_v7 = vshrl.u32 %v13334_v35, 16 }
 0xb14   : > { %15614 = vst [vmem:[#allocation62_spill] sm:$0xff] %v13395_v55  ;;  %v5550_v34 = vrot.slane %v15621_v6, 7  ;;  %v5553_v6 = vrot.slane %v15624_v3, 6 }
 0xb15   : > { %5104 = vrot.lane.b32.xlu0 %v5012_v30, %s9060_s20  ;;  %v5021_v30 = vshrl.u32 %v13213_v47, 16  ;;  %v13407_v47 = vld [vmem:[#allocation2 + $0x94] sm:$0xf]  ;;  %v5544_v25 = vsel %vm642_vm14, %v5539_v9, %v5543_v27  ;;  %v5029_v9 = vshrl.u32 %v13273_v54, 16  ;;  %v5035_v62 = vrot.slane %v5033_v15, 1 }
 0xb16   : > { %5603 = vrot.lane.b32.xlu1 %v5540_v41, %s9060_s20  ;;  %v5020_v41 = vsel %vm1935_vm8, %v5015_v46, %v5019_v36  ;;  %v13430_v12 = vcombine.low %v4828_v18, %v13407_v47  ;;  %v13443_v54 = vcombine.low %v13336_v39, %v4826_v24  ;;  %v5045_v24 = vshrl.u32 %v13347_v58, 16 }
 0xb17   : > { %v5023_v56 = vor.u32 %v5021_v30, %v5019_v36  ;;  %v13418_v36 = vcombine.low %v13255_v38, %v13297_v13  ;;  %v15620_v30 = vshrl.u32 %v13360_v8, 16  ;;  %v5430_v13 = vrot.slane %v13360_v8, 6 }
 0xb18   : > { %15623 = vst [vmem:[#allocation28_spill] sm:$0xff] %v13430_v12  ;;  %15626 = vst [vmem:[#allocation40_spill] sm:$0xff] %v13443_v54 }
 0xb19   : > { %5464 = vrot.lane.b32.xlu0 %v13380_v23, %s9060_s20  ;;  %v5545_v23 = vrot.slane %v15617_v7, 6  ;;  %15619 = vst [vmem:[#allocation7_spill] sm:$0xff] %v13418_v36  ;;  %v5549_v46 = vrot.slane %v15620_v30, 6  ;;  %v13427_v7 = vcombine.low %v13307_v44, %v4824_v42  ;;  %v5028_v38 = vsel %vm1935_vm8, %v5023_v56, %v5027_v21 }
 0xb1a   : > { %5201 = vrot.lane.b32.xlu1 %v13389_v17, %s9060_s20  ;;  %v5041_v17 = vshll.u32 %v13347_v58, 16  ;;  %v15625_v30 = vshll.u32 %v13376_v2, 16  ;;  %v5156_v44 = vrot.slane %v13418_v36, 1  ;;  %v5037_v42 = vshrl.u32 %v13330_v43, 16 }
 0xb1b   : > { %15622 = vst [vmem:[#allocation39_spill] sm:$0xff] %v13427_v7  ;;  %v5547_v15 = vor.u32 %v5546_v31, %v5545_v23  ;;  %v5551_v56 = vor.u32 %v5550_v34, %v5549_v46  ;;  %v5158_v3 = vrot.slane %v13427_v7, 1  ;;  %v13451_v31 = vld [vmem:[#allocation2 + $0x9c] sm:$0xf]  ;;  %v5434_v34 = vrot.slane %v13430_v12, 6 }
 0xb1c   : > { %v5554_v52 = vrot.slane %v15625_v30, 7  ;;  %v5043_v28 = vrot.slane %v5041_v17, 1  ;;  %v5039_v30 = vor.u32 %v5037_v42, %v5035_v62  ;;  %v5049_v17 = vshll.u32 %v13418_v36, 16 }
 0xb1d   : > { %5106 = vrot.lane.b32.xlu0 %v5020_v41, %s9060_s20  ;;  %v5031_v41 = vor.u32 %v5029_v9, %v5027_v21  ;;  %v5548_v46 = vsel %vm642_vm14, %v5543_v27, %v5547_v15  ;;  %v15627_v21 = vrot.slane %v13334_v35, 6  ;;  %v5160_v42 = vrot.slane %v13443_v54, 1 }
 0xb1e   : > { %5605 = vrot.lane.b32.xlu1 %v5544_v25, %s9060_s20  ;;  %v13455_v39 = vor.u32 %v5554_v52, %v5553_v6  ;;  %v15629_v52 = vrot.slane %v13347_v58, 1  ;;  %v5552_v25 = vsel %vm642_vm14, %v5547_v15, %v5551_v56  ;;  %v5047_v43 = vor.u32 %v5045_v24, %v5043_v28 }
 0xb1f   : > { %v13466_v9 = vsel %vm5402_vm0, %v15627_v21, %v5430_v13  ;;  %v5036_v23 = vsel %vm1935_vm8, %v5031_v41, %v5035_v62  ;;  %v13478_v27 = vcombine.low %v13446_v26, %v13451_v31  ;;  %v13484_v21 = vsel %vm2139_vm6, %v5156_v44, %v5158_v3 }
 0xb20   : > { %15628 = vst [vmem:[#allocation9_spill] sm:$0xff] %v13466_v9  ;;  %v13471_v6 = vsel %vm2139_vm6, %v15629_v52, %v5156_v44  ;;  %15633 = vst [vmem:[#allocation12_spill] sm:$0xff] %v13484_v21  ;;  %v15634_v52 = vshrl.u32 %v13430_v12, 16  ;;  %v13492_v62 = vsel %vm1935_vm8, %v5039_v30, %v5043_v28  ;;  %v13496_v15 = vsel %vm642_vm14, %v5551_v56, %v13455_v39 }
 0xb21   : > { %5466 = vrot.lane.b32.xlu0 %v13395_v55, %s9060_s20  ;;  %15630 = vst [vmem:[#allocation41_spill] sm:$0xff] %v13471_v6  ;;  %15631 = vst [vmem:[#allocation29_spill] sm:$0xff] %v13478_v27  ;;  %v15635_v55 = vshll.u32 %v13430_v12, 16  ;;  %v5051_v44 = vrot.slane %v5049_v17, 1  ;;  %v13503_v41 = vsel %vm2139_vm6, %v5158_v3, %v5160_v42  ;;  %v15639_v30 = vshll.u32 %v13079_v32, 16 }
 0xb22   : > { %5203 = vrot.lane.b32.xlu1 %v13403_v37, %s9060_s20  ;;  %v13481_v37 = vsel %vm5402_vm0, %v5430_v13, %v5432_v48  ;;  %v5557_v58 = vrot.slane %v15634_v52, 6  ;;  %v13499_v13 = vsel %vm5402_vm0, %v5432_v48, %v5434_v34  ;;  %v13516_v48 = vrot.slane %v13478_v27, 6 }
 0xb23   : > { %15632 = vst [vmem:[#allocation63_spill] sm:$0xff] %v13481_v37  ;;  %v5558_v1 = vrot.slane %v15635_v55, 7  ;;  %15636 = vst [vmem:[#allocation64_spill] sm:$0xff] %v13499_v13  ;;  %v13506_v55 = vcombine.low %v13357_v49, %v4828_v18  ;;  %v5306_v24 = vrot.slane %v15639_v30, 6  ;;  %v13513_v56 = vsel %vm1935_vm8, %v5047_v43, %v5051_v44 }
 0xb24   : > { %15640 = vst [vmem:[#allocation42_spill] sm:$0xff] %v13516_v48  ;;  %v5053_v17 = vshrl.u32 %v13418_v36, 16  ;;  %v15641_v3 = vshrl.u32 %v13090_v61, 16  ;;  %v5057_v49 = vshll.u32 %v13427_v7, 16  ;;  %v15644_v36 = vshrl.u32 %v13124_v0, 16 }
 0xb25   : > { %5108 = vrot.lane.b32.xlu0 %v5028_v38, %s9060_s20  ;;  %15637 = vst [vmem:[#allocation54_spill] sm:$0xff] %v13506_v55  ;;  %v15638_v38 = vshrl.u32 %v13079_v32, 16  ;;  %v13521_v52 = vor.u32 %v5558_v1, %v5557_v58  ;;  %v15645_v1 = vshll.u32 %v13124_v0, 16  ;;  %v13545_v32 = vsel %vm5402_vm0, %v5434_v34, %v13516_v48  ;;  %v13548_v0 = vld [vmem:[#allocation2 + $0xa8] ss:$0 sps:$4 sm:$0x11]  }
 0xb26   : > { %5607 = vrot.lane.b32.xlu1 %v5548_v46, %s9060_s20  ;;  %v5312_v46 = vrot.slane %v15641_v3, 5  ;;  %v5321_v3 = vrot.slane %v15644_v36, 5  ;;  %v5055_v43 = vor.u32 %v5053_v17, %v5051_v44  ;;  %v5061_v36 = vshrl.u32 %v13427_v7, 16 }
 0xb27   : > { %v5303_v28 = vrot.slane %v15638_v38, 5  ;;  %v15643_v38 = vshll.u32 %v13090_v61, 16  ;;  %v5324_v58 = vrot.slane %v15645_v1, 6  ;;  %v15172_v61 = vshll.u32 %v12968_v50, 16 }
 0xb28   : > { %v15648_v34 = vshrl.u32 %v13478_v27, 16  ;;  %v15649_v17 = vshll.u32 %v13478_v27, 16 }
 0xb29   : > { %v13524_v18 = vor.u32 %v5306_v24, %v5303_v28  ;;  %v5315_v30 = vrot.slane %v15643_v38, 6  ;;  %5468 = vrot.lane.b32.xlu0 %v13466_v9, %s9060_s20  ;;  %v13539_v28 = vrot.slane %v13506_v55, 1  ;;  %v15173_v38 = vshrl.u32 %v12968_v50, 16 }
 0xb2a   : > { %5205 = vrot.lane.b32.xlu1 %v13471_v6, %s9060_s20  ;;  %v5325_v1 = vor.u32 %v5324_v58, %v5321_v3  ;;  %v5059_v9 = vrot.slane %v5057_v49, 1  ;;  %v5561_v44 = vrot.slane %v15648_v34, 6  ;;  %v5562_v7 = vrot.slane %v15649_v17, 7 }
 0xb2b   : > { %15642 = vst [vmem:[#allocation13_spill] sm:$0xff] %v13524_v18  ;;  %15646 = vst [vmem:[#allocation43_spill] sm:$0xff] %v13539_v28  ;;  %v5316_v24 = vor.u32 %v5315_v30, %v5312_v46  ;;  %v5501_v46 = vrot.slane %v15173_v38, 6  ;;  %v5502_v30 = vrot.slane %v15172_v61, 7  ;;  %v5065_v49 = vshll.u32 %v13443_v54, 16 }
 0xb2c   : > { %v13571_v58 = vsel %vm642_vm14, %v13455_v39, %v13521_v52  ;;  %v15174_v34 = vshrl.u32 %v13058_v5, 16  ;;  %v13579_v17 = vsel %vm2139_vm6, %v5160_v42, %v13539_v28  ;;  %v5575_v38 = vshrl.u32 %v13548_v0, 16 }
 0xb2d   : > { %v13552_v6 = vsel %vm5237_vm1, %v13524_v18, %v5316_v24  ;;  %5110 = vrot.lane.b32.xlu0 %v5036_v23, %s9060_s20  ;;  %v13565_v3 = vsel %vm5237_vm1, %v5316_v24, %v5325_v1  ;;  %v8036_v23 = vcombine.low %v13407_v47, %v13446_v26  ;;  %15651 = vst [vmem:[#allocation14_spill] sm:$0xff] %v13579_v17 }
 0xb2e   : > { %15647 = vst [vmem:[#allocation30_spill] sm:$0xff] %v13552_v6  ;;  %15650 = vst [vmem:[#allocation8_spill] sm:$0xff] %v13565_v3  ;;  %5609 = vrot.lane.b32.xlu1 %v5552_v25, %s9060_s20  ;;  %v13582_v24 = vsel %vm1935_vm8, %v5055_v43, %v5059_v9  ;;  %v15652_v25 = vrot.slane %v13250_v10, 6  ;;  %v13591_v26 = vor.u32 %v5502_v30, %v5501_v46  ;;  %v5505_v61 = vrot.slane %v15174_v34, 6 }
 0xb2f   : > { %v15653_v3 = vshll.u32 %v13058_v5, 16  ;;  %v15177_v6 = vshrl.u32 %v13107_v60, 16  ;;  %v13600_v10 = vor.u32 %v5562_v7, %v5561_v44  ;;  %v5063_v43 = vor.u32 %v5061_v36, %v5059_v9 }
 0xb30   : > { %v13588_v39 = vsel %vm5402_vm0, %v13516_v48, %v15652_v25  ;;  %v13602_v25 = vrot.slane %v5065_v49, 1  ;;  %v13607_v46 = vsel %vm5624_vm2, %v13362_v57, %v13364_v40  ;;  %v13611_v30 = vrot.slane %v8036_v23, 1 }
 0xb31   : > { %v5506_v42 = vrot.slane %v15653_v3, 7  ;;  %5470 = vrot.lane.b32.xlu0 %v13481_v37, %s9060_s20  ;;  %v15178_v34 = vshll.u32 %v13107_v60, 16  ;;  %v5509_v7 = vrot.slane %v15177_v6, 6  ;;  %v13616_v44 = vrot.slane %v5575_v38, 6 }
 0xb32   : > { %5207 = vrot.lane.b32.xlu1 %v13484_v21, %s9060_s20  ;;  %v5578_v9 = vshll.u32 %v13548_v0, 16  ;;  %v15654_v49 = vshrl.u32 %v13205_v4, 16  ;;  %v5073_v0 = vshll.u32 %v13506_v55, 16  ;;  %v13648_v6 = vsel %vm1935_vm8, %v5063_v43, %v13602_v25 }
 0xb33   : > { %v5507_v3 = vor.u32 %v5506_v42, %v5505_v61  ;;  %v5510_v61 = vrot.slane %v15178_v34, 7  ;;  %v15656_v42 = vshll.u32 %v13205_v4, 16  ;;  %v13642_v34 = vsel %vm642_vm14, %v13521_v52, %v13600_v10 }
 0xb34   : > { %v5330_v48 = vrot.slane %v15654_v49, 5  ;;  %v15657_v37 = vrot.slane %v13058_v5, 6  ;;  %v15660_v52 = vshrl.u32 %v13120_v45, 16 }
 0xb35   : > { %v13625_v23 = vsel %vm642_vm14, %v13591_v26, %v5507_v3  ;;  %v5333_v38 = vrot.slane %v15656_v42, 6  ;;  %5112 = vrot.lane.b32.xlu0 %v13492_v62, %s9060_s20  ;;  %v4793_v62 = vld [vmem:[#allocation2 + $0x4] sm:$0xc]  ;;  %v5511_v36 = vor.u32 %v5510_v61, %v5509_v7  ;;  %v15661_v42 = vshll.u32 %v13120_v45, 16 }
 0xb36   : > { %15655 = vst [vmem:[#allocation52_spill] sm:$0xff] %v13625_v23  ;;  %5611 = vrot.lane.b32.xlu1 %v13496_v15, %s9060_s20  ;;  %v5184_v49 = vpop.permute.xlu0 %5183  ;;  %v15658_v15 = vrot.slane %v12968_v50, 6  ;;  %v5513_v23 = vrot.slane %v15660_v52, 6  ;;  %v5182_v7 = vpop.permute.xlu1 %5181  ;;  %v8993_v52 = vld [vmem:[#allocation2 + $0x8] sm:$0xf] }
 0xb37   : > { %v5334_v4 = vor.u32 %v5333_v38, %v5330_v48  ;;  %v5514_v18 = vrot.slane %v15661_v42, 7  ;;  %v13664_v48 = vsel %vm2139_vm6, %v13539_v28, %v13611_v30  ;;  %v5800_v43 = vsel %vm2639_vm10, %v13288_v22, %v5184_v49 }
 0xb38   : > { %v13655_v21 = vsel %vm5402_vm0, %v15658_v15, %v15657_v37  ;;  %v13669_v61 = vsel %vm642_vm14, %v5507_v3, %v5511_v36  ;;  %v6128_v38 = vshrl.u32 %v5800_v43, 16  ;;  %v6131_v42 = vshll.u32 %v5800_v43, 16 }
 0xb39   : > { %15659 = vst [vmem:[#allocation21_spill] sm:$0xff] %v13655_v21  ;;  %15662 = vst [vmem:[#allocation10_spill] sm:$0xff] %v13669_v61  ;;  %v13672_v37 = vsel %vm5237_vm1, %v5325_v1, %v5334_v4  ;;  %5472 = vrot.lane.b32.xlu0 %v13499_v13, %s9060_s20  ;;  %v5797_v15 = vsel %vm2639_vm10, %v13291_v53, %v5182_v7  ;;  %v8014_v21 = vcombine.low %v4793_v62, %v8993_v52 }
 0xb3a   : > { %15663 = vst [vmem:[#allocation27_spill] sm:$0xff] %v13672_v37  ;;  %5209 = vrot.lane.b32.xlu1 %v13503_v41, %s9060_s20  ;;  %v13680_v22 = vrot.slane %v5578_v9, 7  ;;  %v6121_v3 = vshrl.u32 %v5797_v15, 16  ;;  %v6124_v49 = vshll.u32 %v5797_v15, 16  ;;  %v13682_v61 = vor.u32 %v5514_v18, %v5513_v23  ;;  %v5091_v52 = vpop.permute.xlu0 %5090  ;;  %v5089_v9 = vpop.permute.xlu1 %5088 }
 0xb3b   : > { %v6130_v1 = vrot.slane %v6128_v38, 2  ;;  %v6133_v37 = vrot.slane %v6131_v42, 3  ;;  %v15664_v13 = vshrl.u32 %v13245_v63, 16  ;;  %v15665_v43 = vshll.u32 %v13245_v63, 16 }
 0xb3c   : > { %v6123_v53 = vrot.slane %v6121_v3, 2  ;;  %v6126_v7 = vrot.slane %v6124_v49, 3  ;;  %v5075_v62 = vrot.slane %v5073_v0, 1  ;;  %v13690_v15 = vsel %vm642_vm14, %v5511_v36, %v13682_v61  ;;  %v13699_v38 = vld [vmem:[#allocation2 + $0x94] ss:$0 sps:$4 sm:$0x77]  }
 0xb3d   : > { %v5339_v57 = vrot.slane %v15664_v13, 5  ;;  %v5342_v28 = vrot.slane %v15665_v43, 6  ;;  %5114 = vrot.lane.b32.xlu0 %v13513_v56, %s9060_s20  ;;  %v13694_v18 = vor.u32 %v6133_v37, %v6130_v1  ;;  %v5760_v13 = vsel %vm2639_vm10, %v12800_v33, %v5091_v52  ;;  %v8994_v56 = vld [vmem:[%s9181_s16 + $0x30] sm:$0xff]  ;;  %v8995_v37 = vld [vmem:[%s9181_s16 + $0x38] sm:$0xff] }
 0xb3e   : > { %v5758_v23 = vsel %vm2639_vm10, %v8014_v21, %v5089_v9  ;;  %5613 = vrot.lane.b32.xlu1 %v13571_v58, %s9060_s20  ;;  %v6127_v42 = vor.u32 %v6126_v7, %v6123_v53  ;;  %v6113_v36 = vshrl.u32 %v5760_v13, 16  ;;  %v6116_v3 = vshll.u32 %v5760_v13, 16 }
 0xb3f   : > { %v13701_v0 = vor.u32 %v5342_v28, %v5339_v57  ;;  %v6106_v49 = vshrl.u32 %v5758_v23, 16  ;;  %v6109_v43 = vshll.u32 %v5758_v23, 16  ;;  %v4776_v1 = vpack.c.bf16 %v8995_v37, %v8994_v56  ;;  %v8997_v56 = vld [vmem:[%s9181_s16 + $0x48] sm:$0xff] }
 0xb40   : > { %v5410_v21 = vrot.slane %v13107_v60, 6  ;;  %v6115_v57 = vrot.slane %v6113_v36, 2  ;;  %v6118_v28 = vrot.slane %v6116_v3, 3  ;;  %v6135_v58 = vsel %vm2448_vm9, %v6127_v42, %v13694_v18 }
 0xb41   : > { %v13709_v33 = vsel %vm5237_vm1, %v5334_v4, %v13701_v0  ;;  %v6108_v52 = vrot.slane %v6106_v49, 2  ;;  %5474 = vrot.lane.b32.xlu0 %v13545_v32, %s9060_s20  ;;  %v6111_v53 = vrot.slane %v6109_v43, 3  ;;  %7247 = vmatprep.mubr.bf16.mxu0 %v6135_v58  ;;  %v5077_v7 = vshrl.u32 %v13506_v55, 16  ;;  %v8996_v43 = vld [vmem:[%s9181_s16 + $0x40] sm:$0xff] }
 0xb42   : > { %v5081_v4 = vshll.u32 %v13699_v38, 16  ;;  %v15666_v9 = vrot.slane %v13058_v5, 6  ;;  %5211 = vrot.lane.b32.xlu1 %v13579_v17, %s9060_s20  ;;  %v15667_v23 = vshrl.u32 %v13443_v54, 16  ;;  %v15668_v36 = vcombine.low %v13451_v31, %v13451_v31 }
 0xb43   : > { %v13733_v49 = vor.u32 %v6118_v28, %v6115_v57  ;;  %v4777_v37 = vpack.c.bf16 %v8997_v56, %v8996_v43  ;;  %v5581_v58 = vor.u32 %v13680_v22, %v13616_v44  ;;  %v5079_v63 = vor.u32 %v5077_v7, %v5075_v62  ;;  %v8998_v57 = vld [vmem:[%s9181_s16 + $0x50] sm:$0xff]  ;;  %v8999_v28 = vld [vmem:[%s9181_s16 + $0x58] sm:$0xff] }
 0xb44   : > { %v13721_v13 = vsel %vm5402_vm0, %v15666_v9, %v5410_v21  ;;  %v5071_v42 = vor.u32 %v15667_v23, %v13602_v25  ;;  %v13731_v3 = vrot.slane %v15668_v36, 1  ;;  %v6112_v9 = vor.u32 %v6111_v53, %v6108_v52  ;;  %v9000_v52 = vld [vmem:[%s9181_s16 + $0x60] sm:$0xff] }
 0xb45   : > { %v15669_v55 = vshrl.u32 %v13280_v51, 16  ;;  %v5573_v31 = vsel %vm642_vm14, %v13600_v10, %v13284_v59  ;;  %v5684_v23 = vrot.slane %v4776_v1, 7  ;;  %v4778_v36 = vpack.c.bf16 %v8999_v28, %v8998_v57  ;;  %5116 = vrot.lane.b32.xlu0 %v13582_v24, %s9060_s20 }
 0xb46   : > { %v15670_v54 = vshll.u32 %v13280_v51, 16  ;;  %v5083_v44 = vrot.slane %v5081_v4, 1  ;;  %v6120_v22 = vsel %vm2448_vm9, %v6112_v9, %v13733_v49  ;;  %v15190_v7 = vrot.slane %v13120_v45, 6  ;;  %5615 = vrot.lane.b32.xlu1 %v13642_v34, %s9060_s20  ;;  %v9002_v34 = vld [vmem:[%s14933_s13 + $0x80] sm:$0xff]  }
 0xb47   : > { %v5348_v25 = vrot.slane %v15669_v55, 5  ;;  %v9001_v55 = vld [vmem:[%s9181_s16 + $0x68] sm:$0xff]  ;;  %v13758_v10 = vsel %vm1935_vm8, %v5071_v42, %v5075_v62  ;;  %7248 = vmatmul.mubr.bf16.vlgmr.msra.gmra.mrb[48].mxu0 %v6120_v22  ;;  %v5686_v24 = vrot.slane %v4777_v37, 7  ;;  %v13767_v4 = vsel %vm642_vm14, %v13284_v59, %v5581_v58 }
 0xb48   : > { %v5351_v17 = vrot.slane %v15670_v54, 6  ;;  %v4779_v53 = vpack.c.bf16 %v9001_v55, %v9000_v52  ;;  %v13763_v54 = vsel %vm2139_vm6, %v13611_v30, %v13731_v3  ;;  %v13770_v43 = vsel %vm1935_vm8, %v5079_v63, %v5083_v44  ;;  %7393 = vmatpush1.bf16.msra.mxu0 %v9002_v34 }
 0xb49   : > { %v5085_v62 = vshrl.u32 %v13699_v38, 16  ;;  %v13779_v30 = vsel %vm5402_vm0, %v5410_v21, %v15190_v7  ;;  %v13783_v59 = vsel %vm5624_vm2, %v13364_v40, %v5684_v23  ;;  %v5688_v42 = vrot.slane %v4778_v36, 7  ;;  %7394 = vmatprep.subr.bf16.mxu0 %v15503_v14  ;;  %5118 = vrot.lane.b32.xlu0 %v13648_v6, %s9060_s20  ;;  %v15674_v36 = vld [vmem:[#allocation15_spill] sm:$0xff]  ;;  %v13864_v7 = vld [vmem:[%s9181_s16 + $0x80] sm:$0xff] }
 0xb4a   : > { %v5352_v1 = vor.u32 %v5351_v17, %v5348_v25  ;;  %v5093_v17 = vpop.permute.xlu0 %5092  ;;  %v15191_v63 = vrot.slane %v12886_v29, 6  ;;  %v13793_v38 = vrot.slane %v4779_v53, 7  ;;  %v15193_v21 = vshrl.u32 %v13142_v19, 16  ;;  %5213 = vrot.lane.b32.xlu1 %v13664_v48, %s9060_s20  ;;  %v9003_v48 = vld [vmem:[%s14933_s13 + $0x88] sm:$0xff]  }
 0xb4b   : > { %v15671_v37 = vshrl.u32 %v13334_v35, 16  ;;  %v15672_v58 = vshll.u32 %v13334_v35, 16  ;;  %v13803_v25 = vsel %vm5624_vm2, %v5684_v23, %v5686_v24  ;;  %v15192_v6 = vshll.u32 %v13142_v19, 16 }
 0xb4c   : > { %v13789_v56 = vsel %vm5237_vm1, %v13701_v0, %v5352_v1  ;;  %v13805_v0 = vor.u32 %v5085_v62, %v5083_v44  ;;  %v15673_v57 = vshrl.u32 %v13360_v8, 16  ;;  %v5762_v22 = vsel %vm2639_vm10, %v15674_v36, %v5093_v17  ;;  %7395 = vmatpush1.bf16.msra.mxu0 %v9003_v48 }
 0xb4d   : > { %v5357_v40 = vrot.slane %v15671_v37, 5  ;;  %v5360_v9 = vrot.slane %v15672_v58, 6  ;;  %v13814_v52 = vor.u32 %v13366_v11, %v13312_v20  ;;  %v15675_v44 = vshll.u32 %v13360_v8, 16  ;;  %7396 = vmatprep.subr.bf16.mxu0 %v15503_v14  ;;  %5476 = vrot.lane.b32.xlu0 %v13588_v39, %s9060_s20 }
 0xb4e   : > { %v5366_v28 = vrot.slane %v15673_v57, 5  ;;  %v13822_v53 = vsel %vm5624_vm2, %v5686_v24, %v5688_v42  ;;  %v13828_v34 = vsel %vm5402_vm0, %v15191_v63, %v13323_v16  ;;  %v15676_v20 = vshrl.u32 %v13376_v2, 16  ;;  %5617 = vrot.lane.b32.xlu1 %v5573_v31, %s9060_s20 }
 0xb4f   : > { %v5361_v23 = vor.u32 %v5360_v9, %v5357_v40  ;;  %v5369_v55 = vrot.slane %v15675_v44, 6  ;;  %v15677_v62 = vshll.u32 %v13376_v2, 16  ;;  %v13839_v24 = vsel %vm5624_vm2, %v5688_v42, %v13793_v38  ;;  %v9004_v44 = vld [vmem:[%s14933_s13 + $0x90] sm:$0xff]  }
 0xb50   : > { %v5375_v11 = vrot.slane %v15676_v20, 5  ;;  %v5294_v37 = vrot.slane %v15193_v21, 5  ;;  %v6181_v9 = vshrl.u32 %v5762_v22, 16  ;;  %v5297_v39 = vrot.slane %v15192_v6, 6  ;;  %7397 = vmatpush1.bf16.msra.mxu0 %v9004_v44  ;;  %v15688_v2 = vld [vmem:[#allocation59_spill] sm:$0xff] }
 0xb51   : > { %v5378_v17 = vrot.slane %v15677_v62, 6  ;;  %v13844_v40 = vsel %vm5237_vm1, %v5352_v1, %v5361_v23  ;;  %v5370_v58 = vor.u32 %v5369_v55, %v5366_v28  ;;  %v15678_v42 = vshrl.u32 %v13430_v12, 16  ;;  %v9005_v62 = vld [vmem:[%s9181_s16 + $0x70] sm:$0xff]  ;;  %7398 = vmatprep.subr.bf16.mxu0 %v15503_v14  ;;  %5720 = vrot.lane.b32.xlu0 %v13607_v46, %s9060_s20 }
 0xb52   : > { %v6184_v48 = vshll.u32 %v5762_v22, 16  ;;  %v15679_v28 = vshll.u32 %v13430_v12, 16  ;;  %v15680_v55 = vshrl.u32 %v13478_v27, 16  ;;  %v13867_v22 = vld [vmem:[%s9181_s16 + $0x88] sm:$0xff]  ;;  %v15681_v44 = vshll.u32 %v13478_v27, 16  ;;  %5619 = vrot.lane.b32.xlu1 %v13767_v4, %s9060_s20  ;;  %v9011_v12 = vld [vmem:[%s9181_s16 + $0x90] sm:$0xff] }
 0xb53   : > { %v5379_v57 = vor.u32 %v5378_v17, %v5375_v11  ;;  %v5384_v36 = vrot.slane %v15678_v42, 5  ;;  %v13855_v1 = vsel %vm5237_vm1, %v5361_v23, %v5370_v58  ;;  %v9006_v11 = vld [vmem:[%s9181_s16 + $0x78] sm:$0xff]  ;;  %v8034_v63 = vcombine.low %v13407_v47, %v13407_v47 }
 0xb54   : > { %v5387_v31 = vrot.slane %v15679_v28, 6  ;;  %v5393_v20 = vrot.slane %v15680_v55, 5  ;;  %v4780_v17 = vpack.c.bf16 %v9006_v11, %v9005_v62  ;;  %v5396_v28 = vrot.slane %v15681_v44, 6  ;;  %v9009_v47 = vld [vmem:[%s14933_s13 + $0x98] sm:$0xff]  }
 0xb55   : > { %v13873_v23 = vsel %vm5237_vm1, %v5370_v58, %v5379_v57  ;;  %v13882_v55 = vsel %vm642_vm14, %v13814_v52, %v13591_v26  ;;  %v15194_v11 = vrot.slane %v12968_v50, 7  ;;  %v5186_v58 = vpop.permute.xlu1 %5185  ;;  %v13889_v6 = vor.u32 %v5297_v39, %v5294_v37  ;;  %7399 = vmatpush1.bf16.msra.mxu0 %v9009_v47  ;;  %5120 = vrot.lane.b32.xlu0 %v13758_v10, %s9060_s20  ;;  %v15684_v47 = vld [vmem:[#allocation43_spill] sm:$0xff] }
 0xb56   : > { %v5388_v62 = vor.u32 %v5387_v31, %v5384_v36  ;;  %v13891_v44 = vor.u32 %v5396_v28, %v5393_v20  ;;  %v5628_v46 = vrot.slane %v13058_v5, 7  ;;  %v5630_v21 = vrot.slane %v13107_v60, 7  ;;  %v15682_v36 = vld [vmem:[#allocation5_spill] sm:$0xff]  ;;  %7400 = vmatprep.subr.bf16.mxu0 %v15503_v14  ;;  %5215 = vrot.lane.b32.xlu1 %v13763_v54, %s9060_s20 }
 0xb57   : > { %v6183_v26 = vrot.slane %v6181_v9, 2  ;;  %v6186_v42 = vrot.slane %v6184_v48, 3  ;;  %v5803_v31 = vsel %vm2639_vm10, %v15682_v36, %v5186_v58  ;;  %v13908_v9 = vrot.slane %v8034_v63, 1  ;;  %v5095_v48 = vpop.permute.xlu0 %5094  ;;  %v9010_v54 = vld [vmem:[%s14933_s13 + $0xa0] sm:$0xff]  }
 0xb58   : > { %v13901_v4 = vsel %vm5237_vm1, %v5379_v57, %v5388_v62  ;;  %v6189_v37 = vshrl.u32 %v5803_v31, 16  ;;  %v6192_v39 = vshll.u32 %v5803_v31, 16  ;;  %v13906_v20 = vsel %vm5237_vm1, %v5388_v62, %v13891_v44  ;;  %v15683_v31 = vld [vmem:[#allocation17_spill] sm:$0xff] }
 0xb59   : > { %v13915_v28 = vsel %vm5624_vm2, %v15194_v11, %v5628_v46  ;;  %v13918_v57 = vsel %vm5624_vm2, %v5628_v46, %v5630_v21  ;;  %v5239_v36 = vshrl.u32 %v12886_v29, 16  ;;  %v5764_v10 = vsel %vm2639_vm10, %v15683_v31, %v5095_v48  ;;  %7401 = vmatpush1.bf16.msra.mxu0 %v9010_v54  ;;  %5217 = vrot.lane.b32.xlu0 %v13731_v3, %s9060_s20 }
 0xb5a   : > { %v6191_v63 = vrot.slane %v6189_v37, 2  ;;  %v6194_v62 = vrot.slane %v6192_v39, 3  ;;  %v13929_v11 = vsel %vm2139_vm6, %v15684_v47, %v13908_v9  ;;  %v13931_v46 = vor.u32 %v6186_v42, %v6183_v26  ;;  %7402 = vmatprep.subr.bf16.mxu0 %v15503_v14  ;;  %v15687_v42 = vld [vmem:[#allocation31_spill] sm:$0xff]  ;;  %5718 = vrot.lane.b32.xlu1 %v15688_v2, %s9060_s20 }
 0xb5b   : > { %v13933_v58 = vrot.slane %v4780_v17, 7  ;;  %v15685_v37 = vrot.slane %v13120_v45, 7  ;;  %v5241_v48 = vrot.slane %v5239_v36, 5  ;;  %v5242_v17 = vshll.u32 %v12886_v29, 16 }
 0xb5c   : > { %v13943_v31 = vor.u32 %v6194_v62, %v6191_v63  ;;  %v5247_v26 = vshrl.u32 %v15687_v42, 16  ;;  %v5250_v47 = vshll.u32 %v15687_v42, 16  ;;  %v6221_v54 = vshrl.u32 %v5764_v10, 16  ;;  %v9013_v63 = vld [vmem:[%s9181_s16 + $0xa0] sm:$0xff]  ;;  %v9014_v62 = vld [vmem:[%s9181_s16 + $0xa8] sm:$0xff] }
 0xb5d   : > { %v13941_v39 = vsel %vm5624_vm2, %v5630_v21, %v15685_v37  ;;  %v6224_v27 = vshll.u32 %v5764_v10, 16  ;;  %v9012_v21 = vld [vmem:[%s9181_s16 + $0x98] sm:$0xff]  ;;  %v4783_v37 = vpack.c.bf16 %v9014_v62, %v9013_v63  ;;  %v5244_v8 = vrot.slane %v5242_v17, 6  ;;  %v9015_v62 = vld [vmem:[%s9181_s16 + $0xb0] sm:$0xff]  ;;  %5122 = vrot.lane.b32.xlu0 %v13770_v43, %s9060_s20  ;;  %v15697_v43 = vld [vmem:[#allocation13_spill] sm:$0xff] }
 0xb5e   : > { %15686 = vst [vmem:[#allocation55_spill] sm:$0xff] %v13941_v39  ;;  %v4782_v36 = vpack.c.bf16 %v9012_v21, %v9011_v12  ;;  %v6196_v42 = vsel %vm2448_vm9, %v13694_v18, %v13943_v31  ;;  %v5249_v35 = vrot.slane %v5247_v26, 5  ;;  %v5252_v3 = vrot.slane %v5250_v47, 6  ;;  %v9016_v18 = vld [vmem:[%s9181_s16 + $0xb8] sm:$0xff]  ;;  %v9017_v26 = vld [vmem:[%s14933_s13 + $0xa8] sm:$0xff]   ;;  %5722 = vrot.lane.b32.xlu1 %v13783_v59, %s9060_s20 }
 0xb5f   : > { %7255 = vmatprep.mubr.bf16.mxu0 %v6196_v42  ;;  %v6188_v10 = vsel %vm2448_vm9, %v13733_v49, %v13931_v46  ;;  %v15689_v12 = vpack.c.bf16 %v13867_v22, %v13864_v7  ;;  %v15690_v63 = vrot.slane %v12968_v50, 6  ;;  %v4784_v17 = vpack.c.bf16 %v9016_v18, %v9015_v62  ;;  %7403 = vmatpush1.bf16.msra.mxu0 %v9017_v26 }
 0xb60   : > { %7256 = vmatmul.mubr.bf16.gmra.mrb[52].mxu0 %v6188_v10  ;;  %7404 = vmatprep.subr.bf16.mxu0 %v15503_v14  ;;  %v13978_v49 = vor.u32 %v5244_v8, %v5241_v48  ;;  %v5253_v7 = vor.u32 %v5252_v3, %v5249_v35  ;;  %v15692_v22 = vshrl.u32 %v12968_v50, 16  ;;  %v15693_v42 = vshll.u32 %v12968_v50, 16 }
 0xb61   : > { %v5694_v21 = vrot.slane %v15689_v12, 7  ;;  %v13970_v2 = vsel %vm5402_vm0, %v13323_v16, %v15690_v63  ;;  %v6223_v63 = vrot.slane %v6221_v54, 2  ;;  %v6226_v62 = vrot.slane %v6224_v27, 3  ;;  %5724 = vrot.lane.b32.xlu0 %v13803_v25, %s9060_s20 }
 0xb62   : > { %15691 = vst [vmem:[#allocation15_spill] sm:$0xff] %v13978_v49  ;;  %v5258_v47 = vrot.slane %v15692_v22, 5  ;;  %v5261_v12 = vrot.slane %v15693_v42, 6  ;;  %v5696_v18 = vrot.slane %v4782_v36, 7  ;;  %v5698_v10 = vrot.slane %v4783_v37, 7  ;;  %v5188_v42 = vpop.permute.xlu1 %5187  ;;  %v9018_v36 = vld [vmem:[%s9181_s16 + $0xc0] sm:$0xff]  ;;  %5124 = vrot.lane.b32.xlu1 %v13805_v0, %s9060_s20 }
 0xb63   : > { %v13990_v35 = vsel %vm5237_vm1, %v13978_v49, %v5253_v7  ;;  %v15695_v48 = vshrl.u32 %v13058_v5, 16  ;;  %v15696_v26 = vshll.u32 %v13058_v5, 16  ;;  %v13999_v27 = vsel %vm5237_vm1, %v13889_v6, %v15697_v43  ;;  %v9019_v37 = vld [vmem:[%s9181_s16 + $0xc8] sm:$0xff]  ;;  %v9020_v5 = vld [vmem:[%s14933_s13 + $0xb0] sm:$0xff]  }
 0xb64   : > { %15694 = vst [vmem:[#allocation5_spill] sm:$0xff] %v13990_v35  ;;  %v5262_v8 = vor.u32 %v5261_v12, %v5258_v47  ;;  %v14004_v59 = vsel %vm5624_vm2, %v13793_v38, %v13933_v58  ;;  %v14006_v54 = vrot.slane %v4784_v17, 7  ;;  %v4785_v47 = vpack.c.bf16 %v9019_v37, %v9018_v36  ;;  %7405 = vmatpush1.bf16.msra.mxu0 %v9020_v5  ;;  %v15698_v12 = vld [vmem:[#allocation32_spill] sm:$0xff] }
 0xb65   : > { %v5267_v3 = vrot.slane %v15695_v48, 5  ;;  %v5270_v22 = vrot.slane %v15696_v26, 6  ;;  %v5806_v48 = vsel %vm2639_vm10, %v15698_v12, %v5188_v42  ;;  %7406 = vmatprep.subr.bf16.mxu0 %v15503_v14  ;;  %v15700_v17 = vshrl.u32 %v13107_v60, 16  ;;  %v5457_v12 = vpop.permute.xlu0 %5456  ;;  %5583 = vrot.lane.b32.xlu0 %v13814_v52, %s9060_s20 }
 0xb66   : > { %v14017_v26 = vsel %vm5237_vm1, %v5253_v7, %v5262_v8  ;;  %v6229_v51 = vshrl.u32 %v5806_v48, 16  ;;  %v6232_v35 = vshll.u32 %v5806_v48, 16  ;;  %v14025_v36 = vsel %vm5624_vm2, %v13933_v58, %v5694_v21  ;;  %v15705_v48 = vld [vmem:[#allocation30_spill] sm:$0xff]  ;;  %5726 = vrot.lane.b32.xlu1 %v13822_v53, %s9060_s20  ;;  %v9022_v53 = vld [vmem:[%s14933_s13 + $0xc0] sm:$0xff]  }
 0xb67   : > { %15699 = vst [vmem:[#allocation17_spill] sm:$0xff] %v14017_v26  ;;  %v5271_v38 = vor.u32 %v5270_v22, %v5267_v3  ;;  %v5276_v43 = vrot.slane %v15700_v17, 5  ;;  %v14028_v42 = vsel %vm5624_vm2, %v5694_v21, %v5696_v18  ;;  %v14030_v37 = vor.u32 %v6226_v62, %v6223_v63  ;;  %v9021_v21 = vld [vmem:[%s14933_s13 + $0xb8] sm:$0xff]   ;;  %v5190_v17 = vpop.permute.xlu1 %5189 }
 0xb68   : > { %v14035_v7 = vsel %vm5624_vm2, %v5696_v18, %v5698_v10  ;;  %v15702_v25 = vshll.u32 %v13107_v60, 16  ;;  %v6231_v5 = vrot.slane %v6229_v51, 2  ;;  %v6234_v58 = vrot.slane %v6232_v35, 3  ;;  %7407 = vmatpush1.bf16.msra.mxu0 %v9021_v21 }
 0xb69   : > { %v14038_v3 = vsel %vm5237_vm1, %v5262_v8, %v5271_v38  ;;  %v15703_v63 = vshrl.u32 %v13120_v45, 16  ;;  %v15704_v62 = vshll.u32 %v13120_v45, 16  ;;  %v5878_v8 = vsel %vm2639_vm10, %v15705_v48, %v5457_v12  ;;  %7408 = vmatprep.subr.bf16.mxu0 %v15503_v14 }
 0xb6a   : > { %15701 = vst [vmem:[#allocation43_spill] sm:$0xff] %v14038_v3  ;;  %v5279_v22 = vrot.slane %v15702_v25, 6  ;;  %v14053_v60 = vsel %vm5624_vm2, %v5698_v10, %v14006_v54  ;;  %v14055_v51 = vrot.slane %v4785_v47, 7  ;;  %v6235_v25 = vor.u32 %v6234_v58, %v6231_v5  ;;  %v15706_v3 = vld [vmem:[#allocation25_spill] sm:$0xff]  ;;  %v5097_v5 = vpop.permute.xlu0 %5096  ;;  %5442 = vrot.lane.b32.xlu1 %v13828_v34, %s9060_s20 }
 0xb6b   : > { %v5285_v0 = vrot.slane %v15703_v63, 5  ;;  %v5288_v18 = vrot.slane %v15704_v62, 6  ;;  %v6437_v21 = vshrl.u32 %v5878_v8, 16  ;;  %v5809_v63 = vsel %vm2639_vm10, %v15706_v3, %v5190_v17 }
 0xb6c   : > { %v5280_v35 = vor.u32 %v5279_v22, %v5276_v43  ;;  %v15707_v12 = vshrl.u32 %v13142_v19, 16  ;;  %v6269_v48 = vshrl.u32 %v5809_v63, 16  ;;  %v6272_v10 = vshll.u32 %v5809_v63, 16  ;;  %7409 = vmatpush1.bf16.msra.mxu0 %v9022_v53 }
 0xb6d   : > { %v5289_v43 = vor.u32 %v5288_v18, %v5285_v0  ;;  %v6440_v22 = vshll.u32 %v5878_v8, 16  ;;  %v6236_v3 = vsel %vm2448_vm9, %v13943_v31, %v6235_v25  ;;  %v6228_v52 = vsel %vm2448_vm9, %v13931_v46, %v14030_v37  ;;  %v15710_v18 = vld [vmem:[#allocation18_spill] sm:$0xff]  ;;  %v5192_v8 = vpop.permute.xlu1 %5191  ;;  %7410 = vmatprep.subr.bf16.mxu0 %v15503_v14 }
 0xb6e   : > { %v14064_v62 = vrot.slane %v15707_v12, 6  ;;  %v14069_v47 = vsel %vm5237_vm1, %v5271_v38, %v5280_v35  ;;  %v15709_v58 = vshll.u32 %v13142_v19, 16  ;;  %v6271_v38 = vrot.slane %v6269_v48, 2  ;;  %7263 = vmatprep.mubr.bf16.mxu0 %v6236_v3  ;;  %v9023_v48 = vld [vmem:[%s9181_s16 + $0xd0] sm:$0xff]  ;;  %v5459_v39 = vpop.permute.xlu0 %5458  ;;  %5585 = vrot.lane.b32.xlu1 %v13882_v55, %s9060_s20 }
 0xb6f   : > { %15708 = vst [vmem:[#allocation31_spill] sm:$0xff] %v14069_v47  ;;  %v6274_v0 = vrot.slane %v6272_v10, 3  ;;  %v5766_v31 = vsel %vm2639_vm10, %v15710_v18, %v5097_v5  ;;  %v14087_v46 = vsel %vm5237_vm1, %v5280_v35, %v5289_v43  ;;  %v15713_v53 = vrot.slane %v12886_v29, 6  ;;  %7264 = vmatmul.mubr.bf16.gmra.mrb[56].mxu0 %v6228_v52  ;;  %v9024_v10 = vld [vmem:[%s9181_s16 + $0xd8] sm:$0xff]  ;;  %v9025_v29 = vld [vmem:[%s14933_s13 + $0xc8] sm:$0xff]  }
 0xb70   : > { %v14078_v17 = vrot.slane %v15709_v58, 7  ;;  %15711 = vst [vmem:[#allocation59_spill] sm:$0xff] %v14087_v46  ;;  %v6261_v63 = vshrl.u32 %v5766_v31, 16  ;;  %v6264_v12 = vshll.u32 %v5766_v31, 16  ;;  %v15712_v58 = vld [vmem:[#allocation51_spill] sm:$0xff]  ;;  %v4786_v5 = vpack.c.bf16 %v9024_v10, %v9023_v48  ;;  %7411 = vmatpush1.bf16.msra.mxu0 %v9025_v29 }
 0xb71   : > { %v5812_v47 = vsel %vm2639_vm10, %v15712_v58, %v5192_v8  ;;  %5440 = vrot.lane.b32.xlu0 %v15713_v53, %s9060_s20  ;;  %v6439_v18 = vrot.slane %v6437_v21, 2  ;;  %v6275_v3 = vor.u32 %v6274_v0, %v6271_v38  ;;  %v6442_v35 = vrot.slane %v6440_v22, 3  ;;  %v5194_v22 = vpop.permute.xlu1 %5193  ;;  %7412 = vmatprep.subr.bf16.mxu0 %v15503_v14  ;;  %v15715_v58 = vld [vmem:[#allocation23_spill] sm:$0xff] }
 0xb72   : > { %v6309_v26 = vshrl.u32 %v5812_v47, 16  ;;  %v6312_v49 = vshll.u32 %v5812_v47, 16  ;;  %v6263_v31 = vrot.slane %v6261_v63, 2  ;;  %v6266_v46 = vrot.slane %v6264_v12, 3  ;;  %v15714_v47 = vld [vmem:[#allocation8_spill] sm:$0xff]  ;;  %v9028_v29 = vld [vmem:[%s14933_s13 + $0xd0] sm:$0xff]   ;;  %5730 = vrot.lane.b32.xlu1 %v14004_v59, %s9060_s20 }
 0xb73   : > { %v14103_v52 = vsel %vm5237_vm1, %v5289_v43, %v13889_v6  ;;  %v5881_v34 = vsel %vm2639_vm10, %v15714_v47, %v5459_v39  ;;  %v6276_v0 = vsel %vm2448_vm9, %v6235_v25, %v6275_v3  ;;  %v5815_v6 = vsel %vm2639_vm10, %v15715_v58, %v5194_v22  ;;  %v9026_v25 = vld [vmem:[%s9181_s16 + $0xe0] sm:$0xff]  ;;  %v9027_v43 = vld [vmem:[%s9181_s16 + $0xe8] sm:$0xff]  ;;  %v15716_v55 = vld [vmem:[#allocation67_spill] sm:$0xff] }
 0xb74   : > { %v6311_v21 = vrot.slane %v6309_v26, 2  ;;  %v6314_v38 = vrot.slane %v6312_v49, 3  ;;  %v14109_v8 = vor.u32 %v6266_v46, %v6263_v31  ;;  %v6477_v63 = vshrl.u32 %v5881_v34, 16  ;;  %7271 = vmatprep.mubr.bf16.mxu0 %v6276_v0  ;;  %v5099_v31 = vpop.permute.xlu0 %5098  ;;  %7413 = vmatpush1.bf16.msra.mxu0 %v9028_v29  ;;  %v9029_v59 = vld [vmem:[%s14933_s13 + $0xd8] sm:$0xff]  }
 0xb75   : > { %v6480_v12 = vshll.u32 %v5881_v34, 16  ;;  %5728 = vrot.lane.b32.xlu0 %v13839_v24, %s9060_s20  ;;  %v6349_v26 = vshrl.u32 %v5815_v6, 16  ;;  %v6352_v39 = vshll.u32 %v5815_v6, 16  ;;  %v4787_v46 = vpack.c.bf16 %v9027_v43, %v9026_v25  ;;  %v5455_v34 = vpop.permute.xlu1 %5454  ;;  %7414 = vmatprep.subr.bf16.mxu0 %v15503_v14 }
 0xb76   : > { %v14115_v49 = vor.u32 %v6314_v38, %v6311_v21  ;;  %v14121_v53 = vor.u32 %v6442_v35, %v6439_v18  ;;  %v6479_v48 = vrot.slane %v6477_v63, 2  ;;  %v6268_v24 = vsel %vm2448_vm9, %v14030_v37, %v14109_v8  ;;  %v15717_v63 = vld [vmem:[#allocation52_spill] sm:$0xff]  ;;  %5444 = vrot.lane.b32.xlu1 %v13970_v2, %s9060_s20 }
 0xb77   : > { %v6482_v10 = vrot.slane %v6480_v12, 3  ;;  %v6351_v21 = vrot.slane %v6349_v26, 2  ;;  %v6354_v38 = vrot.slane %v6352_v39, 3  ;;  %v5768_v47 = vsel %vm2639_vm10, %v15716_v55, %v5099_v31  ;;  %7272 = vmatmul.mubr.bf16.gmra.mrb[60].mxu0 %v6268_v24  ;;  %v9030_v31 = vld [vmem:[%s9181_s16 + $0xf0] sm:$0xff]  ;;  %v9031_v24 = vld [vmem:[%s9181_s16 + $0xf8] sm:$0xff] }
 0xb78   : > { %v6316_v18 = vsel %vm2448_vm9, %v6275_v3, %v14115_v49  ;;  %v6301_v22 = vshrl.u32 %v5768_v47, 16  ;;  %v6304_v37 = vshll.u32 %v5768_v47, 16  ;;  %v5875_v0 = vsel %vm2639_vm10, %v13999_v27, %v5455_v34  ;;  %v5101_v25 = vpop.permute.xlu0 %5100  ;;  %7415 = vmatpush1.bf16.msra.mxu0 %v9029_v59 }
 0xb79   : > { %v14134_v35 = vor.u32 %v6482_v10, %v6479_v48  ;;  %5587 = vrot.lane.b32.xlu0 %v15717_v63, %s9060_s20  ;;  %v6397_v12 = vshrl.u32 %v5875_v0, 16  ;;  %v6400_v58 = vshll.u32 %v5875_v0, 16  ;;  %7279 = vmatprep.mubr.bf16.mxu0 %v6316_v18  ;;  %v5519_v3 = vor.u32 %v14078_v17, %v14064_v62  ;;  %v15718_v10 = vld [vmem:[#allocation50_spill] sm:$0xff]  ;;  %v5196_v17 = vpop.permute.xlu1 %5195 }
 0xb7a   : > { %v5704_v6 = vrot.slane %v4786_v5, 7  ;;  %v6303_v26 = vrot.slane %v6301_v22, 2  ;;  %v6306_v39 = vrot.slane %v6304_v37, 3  ;;  %v14149_v43 = vrot.slane %v4787_v46, 7  ;;  %7416 = vmatprep.subr.bf16.mxu0 %v15503_v14  ;;  %5734 = vrot.lane.b32.xlu1 %v14028_v42, %s9060_s20  ;;  %v14221_v42 = vld [vmem:[%s9181_s16 + $0x108] sm:$0xff] }
 0xb7b   : > { %v14147_v27 = vsel %vm2448_vm9, %v14121_v53, %v14134_v35  ;;  %v14154_v48 = vor.u32 %v6354_v38, %v6351_v21  ;;  %v5770_v62 = vsel %vm2639_vm10, %v15718_v10, %v5101_v25  ;;  %v14161_v5 = vsel %vm5624_vm2, %v14006_v54, %v14055_v51  ;;  %v15719_v21 = vld [vmem:[#allocation16_spill] sm:$0xff] }
 0xb7c   : > { %v4788_v46 = vpack.c.bf16 %v9031_v24, %v9030_v31  ;;  %v14166_v29 = vor.u32 %v6306_v39, %v6303_v26  ;;  %v6399_v55 = vrot.slane %v6397_v12, 2  ;;  %v6402_v47 = vrot.slane %v6400_v58, 3  ;;  %v5600_v63 = vpop.permute.xlu0 %5599  ;;  %v15721_v26 = vld [vmem:[#allocation20_spill] sm:$0xff]  ;;  %v15723_v24 = vld [vmem:[#allocation10_spill] sm:$0xff] }
 0xb7d   : > { %v5818_v38 = vsel %vm2639_vm10, %v15719_v21, %v5196_v17  ;;  %5732 = vrot.lane.b32.xlu0 %v14025_v36, %s9060_s20  ;;  %v6341_v34 = vshrl.u32 %v5770_v62, 16  ;;  %v6344_v18 = vshll.u32 %v5770_v62, 16  ;;  %v14176_v54 = vsel %vm642_vm14, %v13682_v61, %v5519_v3  ;;  %v15720_v36 = vld [vmem:[#allocation49_spill] sm:$0xff]  ;;  %v5598_v39 = vpop.permute.xlu1 %5597  ;;  %v15722_v17 = vld [vmem:[#allocation26_spill] sm:$0xff] }
 0xb7e   : > { %v14180_v22 = vsel %vm5624_vm2, %v14055_v51, %v5704_v6  ;;  %v6389_v37 = vshrl.u32 %v5818_v38, 16  ;;  %v6392_v0 = vshll.u32 %v5818_v38, 16  ;;  %v14184_v12 = vsel %vm5624_vm2, %v5704_v6, %v14149_v43  ;;  %v9032_v61 = vld [vmem:[%s14933_s13 + $0xe0] sm:$0xff]  }
 0xb7f   : > { %v14188_v58 = vsel %vm642_vm14, %v5519_v3, %v15720_v36  ;;  %7417 = vmatpush1.bf16.msra.mxu0 %v9032_v61  ;;  %v5935_v51 = vsel %vm2639_vm10, %v15721_v26, %v5600_v63  ;;  %v6308_v25 = vsel %vm2448_vm9, %v14109_v8, %v14166_v29  ;;  %v6356_v6 = vsel %vm2448_vm9, %v14115_v49, %v14154_v48  ;;  %v9033_v61 = vld [vmem:[%s14933_s13 + $0xe8] sm:$0xff]   ;;  %v15724_v26 = vld [vmem:[#allocation27_spill] sm:$0xff] }
 0xb80   : > { %v14201_v59 = vrot.slane %v4788_v46, 7  ;;  %7418 = vmatprep.subr.bf16.mxu0 %v15503_v14  ;;  %v14204_v3 = vor.u32 %v6402_v47, %v6399_v55  ;;  %v6445_v10 = vshrl.u32 %v5935_v51, 16  ;;  %v6448_v62 = vshll.u32 %v5935_v51, 16  ;;  %7280 = vmatmul.mubr.bf16.gmra.mrb[64].mxu0 %v6308_v25  ;;  %v5461_v36 = vpop.permute.xlu0 %5460  ;;  %v14218_v25 = vld [vmem:[%s9181_s16 + $0x100] sm:$0xff] }
 0xb81   : > { %v5932_v31 = vsel %vm2639_vm10, %v15722_v17, %v5598_v39  ;;  %5589 = vrot.lane.b32.xlu0 %v15723_v24, %s9060_s20  ;;  %v6343_v8 = vrot.slane %v6341_v34, 2  ;;  %v6346_v21 = vrot.slane %v6344_v18, 3  ;;  %7287 = vmatprep.mubr.bf16.mxu0 %v6356_v6  ;;  %v6391_v46 = vrot.slane %v6389_v37, 2  ;;  %v5198_v39 = vpop.permute.xlu1 %5197 }
 0xb82   : > { %v6405_v38 = vshrl.u32 %v5932_v31, 16  ;;  %v6408_v49 = vshll.u32 %v5932_v31, 16  ;;  %v6394_v55 = vrot.slane %v6392_v0, 3  ;;  %v6447_v47 = vrot.slane %v6445_v10, 2 }
 0xb83   : > { %v6450_v63 = vrot.slane %v6448_v62, 3  ;;  %7419 = vmatpush1.bf16.msra.mxu0 %v9033_v61  ;;  %v5884_v51 = vsel %vm2639_vm10, %v15724_v26, %v5461_v36  ;;  %v4789_v37 = vpack.c.bf16 %v14221_v42, %v14218_v25  ;;  %v15725_v62 = vld [vmem:[#allocation24_spill] sm:$0xff]  ;;  %v14232_v31 = vor.u32 %v6346_v21, %v6343_v8  ;;  %v15726_v36 = vld [vmem:[#allocation21_spill] sm:$0xff] }
 0xb84   : > { %v6407_v34 = vrot.slane %v6405_v38, 2  ;;  %v6410_v18 = vrot.slane %v6408_v49, 3  ;;  %7420 = vmatprep.subr.bf16.mxu0 %v15503_v14  ;;  %v6517_v6 = vshrl.u32 %v5884_v51, 16  ;;  %v6520_v10 = vshll.u32 %v5884_v51, 16  ;;  %5446 = vrot.lane.b32.xlu1 %v15726_v36, %s9060_s20  ;;  %v5103_v26 = vpop.permute.xlu0 %5102  ;;  %v8668_v42 = vld [vmem:[%s14933_s13 + $0x118] sm:$0xff]  }
 0xb85   : > { %v14226_v0 = vor.u32 %v6450_v63, %v6447_v47  ;;  %v5821_v17 = vsel %vm2639_vm10, %v15725_v62, %v5198_v39  ;;  %5736 = vrot.lane.b32.xlu0 %v14035_v7, %s9060_s20  ;;  %v14238_v61 = vor.u32 %v6394_v55, %v6391_v46  ;;  %v6444_v51 = vsel %vm2448_vm9, %v14204_v3, %v14121_v53  ;;  %v9036_v7 = vld [vmem:[%s14933_s13 + $0xf0] sm:$0xff]   ;;  %v5602_v39 = vpop.permute.xlu1 %5601  ;;  %v8666_v55 = vld [vmem:[%s14933_s13 + $0x108] sm:$0xff]  }
 0xb86   : > { %v14234_v24 = vor.u32 %v6410_v18, %v6407_v34  ;;  %v6429_v38 = vshrl.u32 %v5821_v17, 16  ;;  %v6432_v49 = vshll.u32 %v5821_v17, 16  ;;  %v6519_v47 = vrot.slane %v6517_v6, 2  ;;  %v15727_v34 = vld [vmem:[#allocation66_spill] sm:$0xff]  ;;  %v15728_v62 = vld [vmem:[#allocation3_spill] sm:$0xff] }
 0xb87   : > { %v6522_v63 = vrot.slane %v6520_v10, 3  ;;  %7421 = vmatpush1.bf16.msra.mxu0 %v9036_v7  ;;  %v5772_v18 = vsel %vm2639_vm10, %v15727_v34, %v5103_v26  ;;  %v5938_v17 = vsel %vm2639_vm10, %v15728_v62, %v5602_v39  ;;  %v8667_v39 = vld [vmem:[%s14933_s13 + $0x110] sm:$0xff]   ;;  %v9040_v62 = vld [vmem:[%s14933_s13 + $0xf8] sm:$0xff]  }
 0xb88   : > { %v6431_v8 = vrot.slane %v6429_v38, 2  ;;  %v6434_v21 = vrot.slane %v6432_v49, 3  ;;  %v6452_v46 = vsel %vm2448_vm9, %v14234_v24, %v14226_v0  ;;  %7422 = vmatprep.subr.bf16.mxu0 %v15503_v14  ;;  %v6381_v6 = vshrl.u32 %v5772_v18, 16  ;;  %5738 = vrot.lane.b32.xlu1 %v14053_v60, %s9060_s20  ;;  %v5463_v7 = vpop.permute.xlu0 %5462  ;;  %v9037_v60 = vld [vmem:[%s14933_s13 + $0x100] sm:$0xff]  }
 0xb89   : > { %v14255_v53 = vor.u32 %v6522_v63, %v6519_v47  ;;  %v6384_v10 = vshll.u32 %v5772_v18, 16  ;;  %7480 = vmatprep.mubr.bf16.mxu1 %v6452_v46  ;;  %5591 = vrot.lane.b32.xlu0 %v13690_v15, %s9060_s20  ;;  %v6485_v38 = vshrl.u32 %v5938_v17, 16  ;;  %v6488_v49 = vshll.u32 %v5938_v17, 16 }
 0xb8a   : > { %7481 = vmatmul.mubr.bf16.vlgmr.msra.gmra.mrb[76].mxu1 %v6444_v51  ;;  %v6348_v14 = vsel %vm2448_vm9, %v14166_v29, %v14232_v31  ;;  %v14269_v47 = vsel %vm5624_vm2, %v14149_v43, %v14201_v59  ;;  %v6383_v63 = vrot.slane %v6381_v6, 2  ;;  %v6396_v15 = vsel %vm2448_vm9, %v14154_v48, %v14238_v61  ;;  %v5200_v48 = vpop.permute.xlu1 %5199 }
 0xb8b   : > { %v6386_v26 = vrot.slane %v6384_v10, 3  ;;  %7288 = vmatmul.mubr.bf16.gmra.mrb[68].mxu0 %v6348_v14  ;;  %8357 = vmatpush3.bf16.msra.mxu1 %v9037_v60  ;;  %v14280_v43 = vsel %vm2448_vm9, %v14134_v35, %v14255_v53  ;;  %v14282_v29 = vor.u32 %v6434_v21, %v6431_v8  ;;  %v6487_v51 = vrot.slane %v6485_v38, 2  ;;  %v15729_v35 = vld [vmem:[#allocation56_spill] sm:$0xff]  ;;  %v9038_v21 = vld [vmem:[%s9181_s16 + $0x110] sm:$0xff] }
 0xb8c   : > { %v6490_v34 = vrot.slane %v6488_v49, 3  ;;  %v5887_v18 = vsel %vm2639_vm10, %v13709_v33, %v5463_v7  ;;  %7295 = vmatprep.mubr.bf16.mxu0 %v6396_v15  ;;  %8358 = vmatprep.subr.bf16.mxu1 %v8666_v55  ;;  %v5824_v8 = vsel %vm2639_vm10, %v15729_v35, %v5200_v48  ;;  %v9039_v10 = vld [vmem:[%s9181_s16 + $0x118] sm:$0xff]  ;;  %v9041_v14 = vld [vmem:[%s9181_s16 + $0x120] sm:$0xff]  ;;  %v9042_v7 = vld [vmem:[%s9181_s16 + $0x128] sm:$0xff]  ;;  %v5105_v48 = vpop.permute.xlu0 %5104  ;;  %v14309_v35 = vrot.slane %v4789_v37, 7 }
 0xb8d   : > { %v6557_v46 = vshrl.u32 %v5887_v18, 16  ;;  %v6560_v6 = vshll.u32 %v5887_v18, 16  ;;  %5740 = vrot.lane.b32.xlu0 %v14161_v5, %s9060_s20  ;;  %v4790_v33 = vpack.c.bf16 %v9039_v10, %v9038_v21  ;;  %7423 = vmatpush1.bf16.msra.mxu0 %v9040_v62  ;;  %v14298_v17 = vor.u32 %v6386_v26, %v6383_v63  ;;  %v15730_v63 = vld [vmem:[#allocation46_spill] sm:$0xff] }
 0xb8e   : > { %v14300_v38 = vor.u32 %v6490_v34, %v6487_v51  ;;  %v6469_v49 = vshrl.u32 %v5824_v8, 16  ;;  %5448 = vrot.lane.b32.xlu1 %v13721_v13, %s9060_s20  ;;  %v4791_v5 = vpack.c.bf16 %v9042_v7, %v9041_v14  ;;  %v6472_v18 = vshll.u32 %v5824_v8, 16  ;;  %v5604_v51 = vpop.permute.xlu1 %5603  ;;  %v15731_v21 = vld [vmem:[#allocation58_spill] sm:$0xff] }
 0xb8f   : > { %v6559_v15 = vrot.slane %v6557_v46, 2  ;;  %v6562_v60 = vrot.slane %v6560_v6, 3  ;;  %8359 = vmatpush3.bf16.msra.mxu1 %v8666_v55  ;;  %v5774_v26 = vsel %vm2639_vm10, %v15730_v63, %v5105_v48  ;;  %v6436_v46 = vsel %vm2448_vm9, %v14238_v61, %v14282_v29  ;;  %v14320_v6 = vld [vmem:[%s9181_s16 + $0x130] sm:$0xff] }
 0xb90   : > { %v6492_v34 = vsel %vm2448_vm9, %v14226_v0, %v14300_v38  ;;  %v4792_v25 = vpack.c.bf16 %v14320_v6, %v14320_v6  ;;  %8360 = vmatprep.subr.bf16.mxu1 %v8667_v39  ;;  %v6421_v55 = vshrl.u32 %v5774_v26, 16  ;;  %v6424_v8 = vshll.u32 %v5774_v26, 16  ;;  %v5465_v48 = vpop.permute.xlu0 %5464 }
 0xb91   : > { %v14327_v37 = vor.u32 %v6562_v60, %v6559_v15  ;;  %v5941_v0 = vsel %vm2639_vm10, %v15731_v21, %v5604_v51  ;;  %7488 = vmatprep.mubr.bf16.mxu1 %v6492_v34  ;;  %5593 = vrot.lane.b32.xlu0 %v14176_v54, %s9060_s20  ;;  %v6471_v61 = vrot.slane %v6469_v49, 2  ;;  %v6388_v14 = vsel %vm2448_vm9, %v14232_v31, %v14298_v17  ;;  %v8669_v31 = vld [vmem:[%s14933_s13 + $0x120] sm:$0xff]   ;;  %v15732_v34 = vld [vmem:[#allocation11_spill] sm:$0xff] }
 0xb92   : > { %v6525_v10 = vshrl.u32 %v5941_v0, 16  ;;  %v6528_v62 = vshll.u32 %v5941_v0, 16  ;;  %5742 = vrot.lane.b32.xlu1 %v14180_v22, %s9060_s20  ;;  %7489 = vmatmul.mubr.bf16.gmra.mrb[80].mxu1 %v14147_v27  ;;  %v6474_v7 = vrot.slane %v6472_v18, 3  ;;  %v6423_v15 = vrot.slane %v6421_v55, 2  ;;  %v5202_v22 = vpop.permute.xlu1 %5201 }
 0xb93   : > { %v6426_v60 = vrot.slane %v6424_v8, 3  ;;  %7296 = vmatmul.mubr.bf16.gmra.mrb[72].mxu0 %v6388_v14  ;;  %v14342_v54 = vsel %vm2448_vm9, %v14255_v53, %v14327_v37  ;;  %8361 = vmatpush3.bf16.msra.mxu1 %v8667_v39  ;;  %v5890_v27 = vsel %vm2639_vm10, %v13789_v56, %v5465_v48  ;;  %v14346_v26 = vrot.slane %v4790_v33, 7  ;;  %v15733_v14 = vld [vmem:[#allocation47_spill] sm:$0xff] }
 0xb94   : > { %v6527_v49 = vrot.slane %v6525_v10, 2  ;;  %v6530_v63 = vrot.slane %v6528_v62, 3  ;;  %7303 = vmatprep.mubr.bf16.mxu0 %v6436_v46  ;;  %8362 = vmatprep.subr.bf16.mxu1 %v8668_v42  ;;  %v6597_v18 = vshrl.u32 %v5890_v27, 16  ;;  %v6600_v51 = vshll.u32 %v5890_v27, 16  ;;  %v5107_v10 = vpop.permute.xlu0 %5106 }
 0xb95   : > { %v5827_v53 = vsel %vm2639_vm10, %v15732_v34, %v5202_v22  ;;  %5744 = vrot.lane.b32.xlu0 %v14184_v12, %s9060_s20  ;;  %v14355_v39 = vrot.slane %v4791_v5, 7  ;;  %v14357_v56 = vor.u32 %v6426_v60, %v6423_v15  ;;  %v6475_v8 = vor.u32 %v6474_v7, %v6471_v61  ;;  %v8671_v61 = vld [vmem:[%s14933_s13 + $0x128] sm:$0xff]  }
 0xb96   : > { %v6531_v46 = vor.u32 %v6530_v63, %v6527_v49  ;;  %v6509_v33 = vshrl.u32 %v5827_v53, 16  ;;  %v6512_v55 = vshll.u32 %v5827_v53, 16  ;;  %5450 = vrot.lane.b32.xlu1 %v13779_v30, %s9060_s20  ;;  %v6599_v21 = vrot.slane %v6597_v18, 2  ;;  %v5606_v60 = vpop.permute.xlu1 %5605 }
 0xb97   : > { %v6602_v0 = vrot.slane %v6600_v51, 3  ;;  %v5711_v62 = vsel %vm5624_vm2, %v14201_v59, %v14309_v35  ;;  %8363 = vmatpush3.bf16.msra.mxu1 %v8668_v42  ;;  %v5776_v15 = vsel %vm2639_vm10, %v15733_v14, %v5107_v10  ;;  %v15734_v59 = vld [vmem:[#allocation60_spill] sm:$0xff]  ;;  %v5716_v18 = vrot.slane %v4792_v25, 7 }
 0xb98   : > { %v6511_v12 = vrot.slane %v6509_v33, 2  ;;  %v6514_v5 = vrot.slane %v6512_v55, 3  ;;  %v6532_v48 = vsel %vm2448_vm9, %v14300_v38, %v6531_v46  ;;  %8364 = vmatprep.subr.bf16.mxu1 %v8669_v31  ;;  %v6461_v49 = vshrl.u32 %v5776_v15, 16  ;;  %v5467_v53 = vpop.permute.xlu0 %5466 }
 0xb99   : > { %v14371_v7 = vor.u32 %v6602_v0, %v6599_v21  ;;  %v6464_v63 = vshll.u32 %v5776_v15, 16  ;;  %v5944_v42 = vsel %vm2639_vm10, %v15734_v59, %v5606_v60  ;;  %7496 = vmatprep.mubr.bf16.mxu1 %v6532_v48  ;;  %5595 = vrot.lane.b32.xlu0 %v14188_v58, %s9060_s20  ;;  %v6428_v38 = vsel %vm2448_vm9, %v14298_v17, %v14357_v56  ;;  %v15735_v0 = vld [vmem:[#allocation61_spill] sm:$0xff] }
 0xb9a   : > { %v6565_v27 = vshrl.u32 %v5944_v42, 16  ;;  %v6568_v22 = vshll.u32 %v5944_v42, 16  ;;  %5746 = vrot.lane.b32.xlu1 %v14269_v47, %s9060_s20  ;;  %7497 = vmatmul.mubr.bf16.gmra.mrb[84].mxu1 %v14280_v43  ;;  %v6463_v51 = vrot.slane %v6461_v49, 2  ;;  %v6476_v58 = vsel %vm2448_vm9, %v14282_v29, %v6475_v8  ;;  %v5204_v25 = vpop.permute.xlu1 %5203 }
 0xb9b   : > { %v6466_v34 = vrot.slane %v6464_v63, 3  ;;  %7304 = vmatmul.mubr.bf16.gmra.mrb[76].mxu0 %v6428_v38  ;;  %v14391_v47 = vsel %vm2448_vm9, %v14327_v37, %v14371_v7  ;;  %8365 = vmatpush3.bf16.msra.mxu1 %v8669_v31  ;;  %v14393_v43 = vor.u32 %v6514_v5, %v6511_v12  ;;  %v5893_v6 = vsel %vm2639_vm10, %v13844_v40, %v5467_v53  ;;  %v15738_v63 = vld [vmem:[#allocation48_spill] sm:$0xff] }
 0xb9c   : > { %v6567_v17 = vrot.slane %v6565_v27, 2  ;;  %v6570_v33 = vrot.slane %v6568_v22, 3  ;;  %7311 = vmatprep.mubr.bf16.mxu0 %v6476_v58  ;;  %8366 = vmatprep.subr.bf16.mxu1 %v8671_v61  ;;  %v6637_v55 = vshrl.u32 %v5893_v6, 16  ;;  %v6640_v21 = vshll.u32 %v5893_v6, 16  ;;  %v5109_v48 = vpop.permute.xlu0 %5108  ;;  %v15739_v58 = vld [vmem:[#allocation62_spill] sm:$0xff] }
 0xb9d   : > { %v5830_v29 = vsel %vm2639_vm10, %v15735_v0, %v5204_v25  ;;  %5748 = vrot.lane.b32.xlu0 %v5711_v62, %s9060_s20  ;;  %v15736_v37 = vrot.slane %v13142_v19, 6  ;;  %v15737_v31 = vrot.slane %v13120_v45, 6  ;;  %v14407_v12 = vor.u32 %v6466_v34, %v6463_v51 }
 0xb9e   : > { %v6571_v40 = vor.u32 %v6570_v33, %v6567_v17  ;;  %v6549_v5 = vshrl.u32 %v5830_v29, 16  ;;  %v5715_v14 = vsel %vm5624_vm2, %v14346_v26, %v14355_v39  ;;  %v6639_v15 = vrot.slane %v6637_v55, 2  ;;  %v5608_v42 = vpop.permute.xlu1 %5607 }
 0xb9f   : > { %v14405_v10 = vsel %vm5402_vm0, %v15737_v31, %v15736_v37  ;;  %v6642_v62 = vrot.slane %v6640_v21, 3  ;;  %v6552_v60 = vshll.u32 %v5830_v29, 16  ;;  %v5713_v49 = vsel %vm5624_vm2, %v14309_v35, %v14346_v26  ;;  %8367 = vmatpush3.bf16.msra.mxu1 %v8671_v61  ;;  %v15740_v37 = vld [vmem:[#allocation38_spill] sm:$0xff] }
 0xba0   : > { %5452 = vrot.lane.b32.xlu1 %v14405_v10, %s9060_s20  ;;  %v5778_v59 = vsel %vm2639_vm10, %v15738_v63, %v5109_v48  ;;  %v6572_v27 = vsel %vm2448_vm9, %v6531_v46, %v6571_v40  ;;  %v5717_v22 = vsel %vm5624_vm2, %v14355_v39, %v5716_v18  ;;  %v6516_v38 = vsel %vm2448_vm9, %v6475_v8, %v14393_v43  ;;  %v5469_v33 = vpop.permute.xlu0 %5468 }
 0xba1   : > { %v6643_v51 = vor.u32 %v6642_v62, %v6639_v15  ;;  %v6501_v34 = vshrl.u32 %v5778_v59, 16  ;;  %v6504_v53 = vshll.u32 %v5778_v59, 16  ;;  %v5947_v17 = vsel %vm2639_vm10, %v15739_v58, %v5608_v42  ;;  %7504 = vmatprep.mubr.bf16.mxu1 %v6572_v27  ;;  %5752 = vrot.lane.b32.xlu0 %v5715_v14, %s9060_s20  ;;  %v15742_v58 = vld [vmem:[#allocation9_spill] sm:$0xff] }
 0xba2   : > { %v6551_v35 = vrot.slane %v6549_v5, 2  ;;  %v6605_v26 = vshrl.u32 %v5947_v17, 16  ;;  %v6608_v61 = vshll.u32 %v5947_v17, 16  ;;  %7505 = vmatmul.mubr.bf16.gmra.mrb[88].mxu1 %v14342_v54  ;;  %v6468_v39 = vsel %vm2448_vm9, %v14357_v56, %v14407_v12  ;;  %v5206_v0 = vpop.permute.xlu1 %5205 }
 0xba3   : > { %v6554_v46 = vrot.slane %v6552_v60, 3  ;;  %v6503_v8 = vrot.slane %v6501_v34, 2  ;;  %v6506_v18 = vrot.slane %v6504_v53, 3  ;;  %7312 = vmatmul.mubr.bf16.gmra.mrb[80].mxu0 %v6468_v39  ;;  %v14434_v6 = vsel %vm2448_vm9, %v14371_v7, %v6643_v51 }
 0xba4   : > { %5750 = vrot.lane.b32.xlu1 %v5713_v49, %s9060_s20  ;;  %v6607_v25 = vrot.slane %v6605_v26, 2  ;;  %v6610_v55 = vrot.slane %v6608_v61, 3  ;;  %v5896_v21 = vsel %vm2639_vm10, %v13855_v1, %v5469_v33  ;;  %7319 = vmatprep.mubr.bf16.mxu0 %v6516_v38  ;;  %v5833_v56 = vsel %vm2639_vm10, %v15740_v37, %v5206_v0  ;;  %v5111_v48 = vpop.permute.xlu0 %5110  ;;  %v15741_v1 = vld [vmem:[#allocation4_spill] sm:$0xff]  ;;  %v15743_v0 = vld [vmem:[#allocation41_spill] sm:$0xff] }
 0xba5   : > { %v6677_v54 = vshrl.u32 %v5896_v21, 16  ;;  %v6680_v29 = vshll.u32 %v5896_v21, 16  ;;  %v6507_v31 = vor.u32 %v6506_v18, %v6503_v8  ;;  %v6589_v14 = vshrl.u32 %v5833_v56, 16 }
 0xba6   : > { %v6611_v5 = vor.u32 %v6610_v55, %v6607_v25  ;;  %v6592_v15 = vshll.u32 %v5833_v56, 16  ;;  %v6555_v7 = vor.u32 %v6554_v46, %v6551_v35  ;;  %v5780_v59 = vsel %vm2639_vm10, %v15741_v1, %v5111_v48  ;;  %v5610_v42 = vpop.permute.xlu1 %5609 }
 0xba7   : > { %v6679_v62 = vrot.slane %v6677_v54, 2  ;;  %v6682_v60 = vrot.slane %v6680_v29, 3  ;;  %v6591_v49 = vrot.slane %v6589_v14, 2  ;;  %v6541_v34 = vshrl.u32 %v5780_v59, 16 }
 0xba8   : > { %5754 = vrot.lane.b32.xlu1 %v5717_v22, %s9060_s20  ;;  %v6594_v63 = vrot.slane %v6592_v15, 3  ;;  %v6612_v27 = vsel %vm2448_vm9, %v6571_v40, %v6611_v5  ;;  %v6544_v53 = vshll.u32 %v5780_v59, 16  ;;  %v5950_v17 = vsel %vm2639_vm10, %v15742_v58, %v5610_v42  ;;  %v5471_v46 = vpop.permute.xlu0 %5470  ;;  %v15745_v42 = vld [vmem:[#allocation63_spill] sm:$0xff] }
 0xba9   : > { %v6683_v38 = vor.u32 %v6682_v60, %v6679_v62  ;;  %7512 = vmatprep.mubr.bf16.mxu1 %v6612_v27  ;;  %v6645_v22 = vshrl.u32 %v5950_v17, 16  ;;  %v6648_v35 = vshll.u32 %v5950_v17, 16  ;;  %v6508_v26 = vsel %vm2448_vm9, %v14407_v12, %v6507_v31  ;;  %v15744_v62 = vld [vmem:[#allocation34_spill] sm:$0xff] }
 0xbaa   : > { %7513 = vmatmul.mubr.bf16.gmra.mrb[92].mxu1 %v14391_v47  ;;  %v6543_v61 = vrot.slane %v6541_v34, 2  ;;  %v6546_v39 = vrot.slane %v6544_v53, 3  ;;  %v6556_v40 = vsel %vm2448_vm9, %v14393_v43, %v6555_v7  ;;  %v14454_v18 = vor.u32 %v6594_v63, %v6591_v49  ;;  %v5208_v55 = vpop.permute.xlu1 %5207 }
 0xbab   : > { %7320 = vmatmul.mubr.bf16.gmra.mrb[84].mxu0 %v6508_v26  ;;  %v14452_v8 = vsel %vm2448_vm9, %v6643_v51, %v6683_v38  ;;  %v6647_v33 = vrot.slane %v6645_v22, 2  ;;  %v6650_v25 = vrot.slane %v6648_v35, 3  ;;  %v5899_v47 = vsel %vm2639_vm10, %v13873_v23, %v5471_v46 }
 0xbac   : > { %7327 = vmatprep.mubr.bf16.mxu0 %v6556_v40  ;;  %v6717_v12 = vshrl.u32 %v5899_v47, 16  ;;  %v6720_v21 = vshll.u32 %v5899_v47, 16  ;;  %v5836_v54 = vsel %vm2639_vm10, %v15743_v0, %v5208_v55  ;;  %v6547_v29 = vor.u32 %v6546_v39, %v6543_v61  ;;  %v5113_v15 = vpop.permute.xlu0 %5112 }
 0xbad   : > { %v6651_v37 = vor.u32 %v6650_v25, %v6647_v33  ;;  %v6629_v43 = vshrl.u32 %v5836_v54, 16  ;;  %v6632_v14 = vshll.u32 %v5836_v54, 16  ;;  %v5782_v60 = vsel %vm2639_vm10, %v15744_v62, %v5113_v15 }
 0xbae   : > { %v6719_v56 = vrot.slane %v6717_v12, 2  ;;  %v6722_v51 = vrot.slane %v6720_v21, 3  ;;  %v5612_v48 = vpop.permute.xlu1 %5611  ;;  %v6596_v49 = vsel %vm2448_vm9, %v6555_v7, %v14454_v18  ;;  %v6581_v1 = vshrl.u32 %v5782_v60, 16 }
 0xbaf   : > { %v6652_v23 = vsel %vm2448_vm9, %v6611_v5, %v6651_v37  ;;  %v6584_v59 = vshll.u32 %v5782_v60, 16  ;;  %v5953_v27 = vsel %vm2639_vm10, %v15745_v42, %v5612_v48  ;;  %v6631_v34 = vrot.slane %v6629_v43, 2 }
 0xbb0   : > { %v6723_v63 = vor.u32 %v6722_v51, %v6719_v56  ;;  %7520 = vmatprep.mubr.bf16.mxu1 %v6652_v23  ;;  %v6685_v53 = vshrl.u32 %v5953_v27, 16  ;;  %v6688_v58 = vshll.u32 %v5953_v27, 16  ;;  %v6548_v17 = vsel %vm2448_vm9, %v6507_v31, %v6547_v29  ;;  %v5473_v26 = vpop.permute.xlu0 %5472 }
 0xbb1   : > { %v6634_v22 = vrot.slane %v6632_v14, 3  ;;  %v6583_v35 = vrot.slane %v6581_v1, 2  ;;  %v6586_v5 = vrot.slane %v6584_v59, 3  ;;  %v5902_v46 = vsel %vm2639_vm10, %v13901_v4, %v5473_v26  ;;  %v15747_v14 = vld [vmem:[#allocation36_spill] sm:$0xff] }
 0xbb2   : > { %7521 = vmatmul.mubr.bf16.gmra.mrb[96].mxu1 %v14434_v6  ;;  %v14470_v7 = vsel %vm2448_vm9, %v6683_v38, %v6723_v63  ;;  %v6687_v61 = vrot.slane %v6685_v53, 2  ;;  %v6690_v39 = vrot.slane %v6688_v58, 3  ;;  %v5210_v40 = vpop.permute.xlu1 %5209  ;;  %v6757_v33 = vshrl.u32 %v5902_v46, 16  ;;  %v15746_v6 = vld [vmem:[#allocation12_spill] sm:$0xff] }
 0xbb3   : > { %7328 = vmatmul.mubr.bf16.gmra.mrb[88].mxu0 %v6548_v17  ;;  %v6760_v25 = vshll.u32 %v5902_v46, 16  ;;  %v5839_v31 = vsel %vm2639_vm10, %v15746_v6, %v5210_v40  ;;  %v6587_v47 = vor.u32 %v6586_v5, %v6583_v35  ;;  %v6635_v0 = vor.u32 %v6634_v22, %v6631_v34 }
 0xbb4   : > { %7335 = vmatprep.mubr.bf16.mxu0 %v6596_v49  ;;  %v6691_v55 = vor.u32 %v6690_v39, %v6687_v61  ;;  %v6669_v12 = vshrl.u32 %v5839_v31, 16  ;;  %v6672_v21 = vshll.u32 %v5839_v31, 16  ;;  %v6759_v54 = vrot.slane %v6757_v33, 2  ;;  %v5115_v43 = vpop.permute.xlu0 %5114  ;;  %v15748_v49 = vld [vmem:[#allocation64_spill] sm:$0xff] }
 0xbb5   : > { %v6762_v38 = vrot.slane %v6760_v25, 3  ;;  %v5784_v4 = vsel %vm2639_vm10, %v15747_v14, %v5115_v43  ;;  %v6588_v27 = vsel %vm2448_vm9, %v6547_v29, %v6587_v47  ;;  %v14494_v31 = vld [vmem:[#allocation2 + $0xa0] sm:$0xff]   ;;  %v9045_v43 = vld [vmem:[#allocation2 + $0xa8] ss:$0 sps:$4 sm:$0x11]  }
 0xbb6   : > { %v6671_v56 = vrot.slane %v6669_v12, 2  ;;  %v6674_v51 = vrot.slane %v6672_v21, 3  ;;  %v5614_v15 = vpop.permute.xlu1 %5613  ;;  %v6692_v62 = vsel %vm2448_vm9, %v6651_v37, %v6691_v55  ;;  %v6621_v48 = vshrl.u32 %v5784_v4, 16  ;;  %v15749_v21 = vld [vmem:[#allocation7_spill] sm:$0xff] }
 0xbb7   : > { %v6763_v60 = vor.u32 %v6762_v38, %v6759_v54  ;;  %v6624_v23 = vshll.u32 %v5784_v4, 16  ;;  %v5956_v1 = vsel %vm2639_vm10, %v15748_v49, %v5614_v15  ;;  %7528 = vmatprep.mubr.bf16.mxu1 %v6692_v62  ;;  %v6636_v37 = vsel %vm2448_vm9, %v14454_v18, %v6635_v0 }
 0xbb8   : > { %v6725_v59 = vshrl.u32 %v5956_v1, 16  ;;  %v6728_v42 = vshll.u32 %v5956_v1, 16  ;;  %v6623_v34 = vrot.slane %v6621_v48, 2  ;;  %v5475_v58 = vpop.permute.xlu0 %5474  ;;  %v14488_v22 = vor.u32 %v6674_v51, %v6671_v56 }
 0xbb9   : > { %v6626_v53 = vrot.slane %v6624_v23, 3  ;;  %v14486_v17 = vsel %vm2448_vm9, %v6723_v63, %v6763_v60  ;;  %v5905_v26 = vsel %vm2639_vm10, %v13906_v20, %v5475_v58  ;;  %v5486_v12 = vrot.slane %v14494_v31, 6 }
 0xbba   : > { %7529 = vmatmul.mubr.bf16.gmra.mrb[100].mxu1 %v14452_v8  ;;  %v6727_v35 = vrot.slane %v6725_v59, 2  ;;  %v6730_v5 = vrot.slane %v6728_v42, 3  ;;  %v5212_v8 = vpop.permute.xlu1 %5211  ;;  %v6797_v29 = vshrl.u32 %v5905_v26, 16  ;;  %v6800_v61 = vshll.u32 %v5905_v26, 16 }
 0xbbb   : > { %7336 = vmatmul.mubr.bf16.gmra.mrb[92].mxu0 %v6588_v27  ;;  %v5842_v39 = vsel %vm2639_vm10, %v13503_v41, %v5212_v8  ;;  %v6627_v46 = vor.u32 %v6626_v53, %v6623_v34  ;;  %v6676_v41 = vsel %vm2448_vm9, %v6635_v0, %v14488_v22  ;;  %v5488_v56 = vrot.slane %v9045_v43, 6 }
 0xbbc   : > { %7343 = vmatprep.mubr.bf16.mxu0 %v6636_v37  ;;  %v6731_v40 = vor.u32 %v6730_v5, %v6727_v35  ;;  %v6709_v18 = vshrl.u32 %v5842_v39, 16  ;;  %v6799_v33 = vrot.slane %v6797_v29, 2  ;;  %v6802_v63 = vrot.slane %v6800_v61, 3  ;;  %v5117_v6 = vpop.permute.xlu0 %5116 }
 0xbbd   : > { %v6712_v25 = vshll.u32 %v5842_v39, 16  ;;  %v5786_v20 = vsel %vm2639_vm10, %v15749_v21, %v5117_v6 }
 0xbbe   : > { %v5616_v54 = vpop.permute.xlu1 %5615  ;;  %v6732_v38 = vsel %vm2448_vm9, %v6691_v55, %v6731_v40  ;;  %v14502_v51 = vor.u32 %v6802_v63, %v6799_v33  ;;  %v6661_v14 = vshrl.u32 %v5786_v20, 16  ;;  %v6664_v4 = vshll.u32 %v5786_v20, 16  ;;  %v15753_v33 = vld [vmem:[#allocation45_spill] sm:$0xff] }
 0xbbf   : > { %v5959_v15 = vsel %vm2639_vm10, %v13545_v32, %v5616_v54  ;;  %7536 = vmatprep.mubr.bf16.mxu1 %v6732_v38  ;;  %v6711_v62 = vrot.slane %v6709_v18, 2  ;;  %v6628_v55 = vsel %vm2448_vm9, %v6587_v47, %v6627_v46  ;;  %v6714_v49 = vrot.slane %v6712_v25, 3  ;;  %v15750_v32 = vld [vmem:[#allocation39_spill] sm:$0xff]  ;;  %v15751_v47 = vld [vmem:[#allocation14_spill] sm:$0xff] }
 0xbc0   : > { %v6765_v48 = vshrl.u32 %v5959_v15, 16  ;;  %v6768_v23 = vshll.u32 %v5959_v15, 16  ;;  %v6663_v1 = vrot.slane %v6661_v14, 2  ;;  %v6666_v0 = vrot.slane %v6664_v4, 3  ;;  %v5119_v59 = vpop.permute.xlu0 %5118 }
 0xbc1   : > { %v14510_v42 = vsel %vm2448_vm9, %v6763_v60, %v14502_v51  ;;  %v5788_v53 = vsel %vm2639_vm10, %v15750_v32, %v5119_v59  ;;  %v6715_v61 = vor.u32 %v6714_v49, %v6711_v62  ;;  %v15752_v60 = vld [vmem:[#allocation42_spill] sm:$0xff]  ;;  %v5625_v63 = vrot.slane %v15753_v33, 7 }
 0xbc2   : > { %7537 = vmatmul.mubr.bf16.gmra.mrb[104].mxu1 %v14470_v7  ;;  %v6767_v27 = vrot.slane %v6765_v48, 2  ;;  %v6770_v34 = vrot.slane %v6768_v23, 3  ;;  %v5214_v58 = vpop.permute.xlu1 %5213  ;;  %v6667_v37 = vor.u32 %v6666_v0, %v6663_v1  ;;  %v6701_v7 = vshrl.u32 %v5788_v53, 16 }
 0xbc3   : > { %7344 = vmatmul.mubr.bf16.gmra.mrb[96].mxu0 %v6628_v55  ;;  %v6704_v35 = vshll.u32 %v5788_v53, 16  ;;  %v5845_v5 = vsel %vm2639_vm10, %v15751_v47, %v5214_v58  ;;  %v5487_v18 = vsel %vm5402_vm0, %v15752_v60, %v5486_v12  ;;  %v5489_v25 = vsel %vm5402_vm0, %v5486_v12, %v5488_v56 }
 0xbc4   : > { %7351 = vmatprep.mubr.bf16.mxu0 %v6676_v41  ;;  %v6771_v26 = vor.u32 %v6770_v34, %v6767_v27  ;;  %v6749_v8 = vshrl.u32 %v5845_v5, 16  ;;  %v6752_v29 = vshll.u32 %v5845_v5, 16  ;;  %v5477_v39 = vpop.permute.xlu0 %5476  ;;  %v6703_v6 = vrot.slane %v6701_v7, 2 }
 0xbc5   : > { %v6706_v21 = vrot.slane %v6704_v35, 3  ;;  %v5908_v20 = vsel %vm2639_vm10, %v13891_v44, %v5477_v39  ;;  %v6668_v4 = vsel %vm2448_vm9, %v6627_v46, %v6667_v37  ;;  %v15754_v44 = vrot.slane %v12968_v50, 7 }
 0xbc6   : > { %v5618_v54 = vpop.permute.xlu1 %5617  ;;  %v6772_v38 = vsel %vm2448_vm9, %v6731_v40, %v6771_v26  ;;  %v6837_v41 = vshrl.u32 %v5908_v20, 16  ;;  %v6840_v43 = vshll.u32 %v5908_v20, 16  ;;  %v6751_v15 = vrot.slane %v6749_v8, 2 }
 0xbc7   : > { %v5962_v14 = vsel %vm2639_vm10, %v5487_v18, %v5618_v54  ;;  %7544 = vmatprep.mubr.bf16.mxu1 %v6772_v38  ;;  %v6754_v62 = vrot.slane %v6752_v29, 3  ;;  %v5627_v40 = vsel %vm5624_vm2, %v5625_v63, %v15754_v44  ;;  %v6716_v49 = vsel %vm2448_vm9, %v14488_v22, %v6715_v61  ;;  %v15755_v29 = vld [vmem:[#allocation40_spill] sm:$0xff] }
 0xbc8   : > { %v6805_v48 = vshrl.u32 %v5962_v14, 16  ;;  %v6808_v23 = vshll.u32 %v5962_v14, 16  ;;  %v6839_v12 = vrot.slane %v6837_v41, 2  ;;  %v6842_v56 = vrot.slane %v6840_v43, 3  ;;  %v5721_v55 = vpop.permute.xlu0 %5720 }
 0xbc9   : > { %v5971_v0 = vsel %vm2639_vm10, %v5627_v40, %v5721_v55  ;;  %v14537_v34 = vor.u32 %v6754_v62, %v6751_v15 }
 0xbca   : > { %7545 = vmatmul.mubr.bf16.gmra.mrb[108].mxu1 %v14486_v17  ;;  %v6807_v46 = vrot.slane %v6805_v48, 2  ;;  %v6810_v1 = vrot.slane %v6808_v23, 3  ;;  %v5620_v59 = vpop.permute.xlu1 %5619  ;;  %v14534_v17 = vor.u32 %v6706_v21, %v6703_v6  ;;  %v6843_v27 = vor.u32 %v6842_v56, %v6839_v12 }
 0xbcb   : > { %7352 = vmatmul.mubr.bf16.gmra.mrb[100].mxu0 %v6668_v4  ;;  %v5965_v50 = vsel %vm2639_vm10, %v5489_v25, %v5620_v59  ;;  %v6173_v7 = vshrl.u32 %v5971_v0, 16  ;;  %v6176_v35 = vshll.u32 %v5971_v0, 16  ;;  %v6756_v41 = vsel %vm2448_vm9, %v6715_v61, %v14537_v34 }
 0xbcc   : > { %7359 = vmatprep.mubr.bf16.mxu0 %v6716_v49  ;;  %v6811_v32 = vor.u32 %v6810_v1, %v6807_v46  ;;  %v6845_v53 = vshrl.u32 %v5965_v50, 16  ;;  %v6848_v58 = vshll.u32 %v5965_v50, 16  ;;  %v5121_v47 = vpop.permute.xlu0 %5120  ;;  %v6844_v22 = vsel %vm2448_vm9, %v14502_v51, %v6843_v27  ;;  %v15756_v27 = vld [vmem:[#allocation54_spill] sm:$0xff] }
 0xbcd   : > { %v5790_v39 = vsel %vm2639_vm10, %v15755_v29, %v5121_v47  ;;  %v6708_v20 = vsel %vm2448_vm9, %v6667_v37, %v14534_v17  ;;  %v6175_v43 = vrot.slane %v6173_v7, 2  ;;  %v6178_v14 = vrot.slane %v6176_v35, 3 }
 0xbce   : > { %v6847_v5 = vrot.slane %v6845_v53, 2  ;;  %v6850_v8 = vrot.slane %v6848_v58, 3  ;;  %v5216_v60 = vpop.permute.xlu1 %5215  ;;  %v6812_v18 = vsel %vm2448_vm9, %v6771_v26, %v6811_v32  ;;  %v6741_v25 = vshrl.u32 %v5790_v39, 16 }
 0xbcf   : > { %v6744_v6 = vshll.u32 %v5790_v39, 16  ;;  %v5848_v21 = vsel %vm2639_vm10, %v13929_v11, %v5216_v60  ;;  %7552 = vmatprep.mubr.bf16.mxu1 %v6812_v18  ;;  %v6179_v0 = vor.u32 %v6178_v14, %v6175_v43 }
 0xbd0   : > { %v6851_v54 = vor.u32 %v6850_v8, %v6847_v5  ;;  %v6789_v38 = vshrl.u32 %v5848_v21, 16  ;;  %v6792_v51 = vshll.u32 %v5848_v21, 16  ;;  %v6743_v26 = vrot.slane %v6741_v25, 2  ;;  %v5218_v15 = vpop.permute.xlu0 %5217 }
 0xbd1   : > { %v6746_v4 = vrot.slane %v6744_v6, 3  ;;  %v5851_v48 = vsel %vm2639_vm10, %v13908_v9, %v5218_v15 }
 0xbd2   : > { %7553 = vmatmul.mubr.bf16.gmra.mrb[112].mxu1 %v14510_v42  ;;  %v6791_v62 = vrot.slane %v6789_v38, 2  ;;  %v6794_v11 = vrot.slane %v6792_v51, 3  ;;  %v5719_v37 = vpop.permute.xlu1 %5718  ;;  %v6852_v23 = vsel %vm2448_vm9, %v6811_v32, %v6851_v54  ;;  %v6829_v12 = vshrl.u32 %v5851_v48, 16  ;;  %v9046_v38 = vld [vmem:[#allocation2 + $0x94] ss:$0 sps:$4 sm:$0x77]  }
 0xbd3   : > { %7360 = vmatmul.mubr.bf16.gmra.mrb[104].mxu0 %v6708_v20  ;;  %v6832_v42 = vshll.u32 %v5851_v48, 16  ;;  %v5968_v61 = vsel %vm2639_vm10, %v5625_v63, %v5719_v37  ;;  %7560 = vmatprep.mubr.bf16.mxu1 %v6852_v23  ;;  %v6747_v56 = vor.u32 %v6746_v4, %v6743_v26  ;;  %v15757_v48 = vld [vmem:[#allocation65_spill] sm:$0xff] }
 0xbd4   : > { %7367 = vmatprep.mubr.bf16.mxu0 %v6756_v41  ;;  %v6166_v44 = vshrl.u32 %v5968_v61, 16  ;;  %v6169_v40 = vshll.u32 %v5968_v61, 16  ;;  %v6795_v55 = vor.u32 %v6794_v11, %v6791_v62  ;;  %v6831_v49 = vrot.slane %v6829_v12, 2  ;;  %v5123_v1 = vpop.permute.xlu0 %5122  ;;  %v15758_v12 = vld [vmem:[#allocation55_spill] sm:$0xff] }
 0xbd5   : > { %v6834_v46 = vrot.slane %v6832_v42, 3  ;;  %v5792_v50 = vsel %vm2639_vm10, %v15756_v27, %v5123_v1  ;;  %v6748_v5 = vsel %vm2448_vm9, %v14534_v17, %v6747_v56  ;;  %v5636_v37 = vrot.slane %v15757_v48, 7  ;;  %v15763_v48 = vld [vmem:[#allocation19_spill] sm:$0xff] }
 0xbd6   : > { %v6168_v9 = vrot.slane %v6166_v44, 2  ;;  %v6171_v59 = vrot.slane %v6169_v40, 3  ;;  %v5723_v32 = vpop.permute.xlu1 %5722  ;;  %v6781_v58 = vshrl.u32 %v5792_v50, 16  ;;  %v6784_v33 = vshll.u32 %v5792_v50, 16  ;;  %v15759_v44 = vld [vmem:[#allocation6_spill] sm:$0xff] }
 0xbd7   : > { %v6835_v53 = vor.u32 %v6834_v46, %v6831_v49  ;;  %v5974_v63 = vsel %vm2639_vm10, %v13915_v28, %v5723_v32  ;;  %v6796_v60 = vsel %vm2448_vm9, %v14537_v34, %v6795_v55  ;;  %v5638_v40 = vrot.slane %v15759_v44, 7  ;;  %v15761_v32 = vld [vmem:[#allocation15_spill] sm:$0xff] }
 0xbd8   : > { %v6172_v7 = vor.u32 %v6171_v59, %v6168_v9  ;;  %v6213_v35 = vshrl.u32 %v5974_v63, 16  ;;  %v6216_v47 = vshll.u32 %v5974_v63, 16  ;;  %v6783_v8 = vrot.slane %v6781_v58, 2  ;;  %v5725_v39 = vpop.permute.xlu0 %5724 }
 0xbd9   : > { %v6786_v29 = vrot.slane %v6784_v33, 3  ;;  %v6836_v18 = vsel %vm2448_vm9, %v6795_v55, %v6835_v53  ;;  %v5977_v28 = vsel %vm2639_vm10, %v13918_v57, %v5725_v39  ;;  %v5634_v57 = vrot.slane %v13142_v19, 7 }
 0xbda   : > { %7561 = vmatmul.mubr.bf16.gmra.mrb[116].mxu1 %v6844_v22  ;;  %v6215_v25 = vrot.slane %v6213_v35, 2  ;;  %v6218_v6 = vrot.slane %v6216_v47, 3  ;;  %v5125_v21 = vpop.permute.xlu1 %5124  ;;  %v6180_v22 = vsel %vm2448_vm9, %v6172_v7, %v6179_v0  ;;  %v6253_v17 = vshrl.u32 %v5977_v28, 16  ;;  %v15762_v35 = vld [vmem:[#allocation5_spill] sm:$0xff] }
 0xbdb   : > { %7368 = vmatmul.mubr.bf16.gmra.mrb[108].mxu0 %v6748_v5  ;;  %v14569_v20 = vor.u32 %v6786_v29, %v6783_v8  ;;  %v6256_v54 = vshll.u32 %v5977_v28, 16  ;;  %v5794_v51 = vsel %vm2639_vm10, %v9046_v38, %v5125_v21  ;;  %8368 = vmatprep.mubr.msk.bf16.mxu1 %vm2676_vm11, %v6180_v22  ;;  %v15760_v59 = vrot.slane %v13120_v45, 7 }
 0xbdc   : > { %7375 = vmatprep.mubr.bf16.mxu0 %v6796_v60  ;;  %v6219_v34 = vor.u32 %v6218_v6, %v6215_v25  ;;  %v6821_v41 = vshrl.u32 %v5794_v51, 16  ;;  %v6824_v43 = vshll.u32 %v5794_v51, 16  ;;  %v6255_v14 = vrot.slane %v6253_v17, 2  ;;  %v5584_v4 = vpop.permute.xlu0 %5583 }
 0xbdd   : > { %v6258_v26 = vrot.slane %v6256_v54, 3  ;;  %v5911_v15 = vsel %vm2639_vm10, %v13323_v16, %v5584_v4  ;;  %v6788_v61 = vsel %vm2448_vm9, %v6747_v56, %v14569_v20  ;;  %v5635_v27 = vsel %vm5624_vm2, %v15760_v59, %v5634_v57 }
 0xbde   : > { %v5727_v62 = vpop.permute.xlu1 %5726  ;;  %v6220_v11 = vsel %vm2448_vm9, %v6179_v0, %v6219_v34  ;;  %v6823_v55 = vrot.slane %v6821_v41, 2  ;;  %v6826_v49 = vrot.slane %v6824_v43, 3  ;;  %v6151_v16 = vshrl.u32 %v5911_v15, 16 }
 0xbdf   : > { %v6259_v23 = vor.u32 %v6258_v26, %v6255_v14  ;;  %v5980_v42 = vsel %vm2639_vm10, %v15758_v12, %v5727_v62  ;;  %v6154_v1 = vshll.u32 %v5911_v15, 16  ;;  %v5637_v33 = vsel %vm5624_vm2, %v5634_v57, %v5636_v37 }
 0xbe0   : > { %v6293_v19 = vshrl.u32 %v5980_v42, 16  ;;  %v6296_v46 = vshll.u32 %v5980_v42, 16  ;;  %v5639_v45 = vsel %vm5624_vm2, %v5636_v37, %v5638_v40  ;;  %v6827_v5 = vor.u32 %v6826_v49, %v6823_v55 }
 0xbe1   : > { %v6260_v9 = vsel %vm2448_vm9, %v6219_v34, %v6259_v23  ;;  %v6153_v60 = vrot.slane %v6151_v16, 2  ;;  %v6156_v25 = vrot.slane %v6154_v1, 3  ;;  %v5640_v37 = vrot.slane %v15763_v48, 7 }
 0xbe2   : > { %8369 = vmatmul.mubr.msk.bf16.vlgmr.msra.gmra.mrb[120].mxu1 %vm2676_vm11, %v6220_v11  ;;  %v6295_v50 = vrot.slane %v6293_v19, 2  ;;  %v6298_v56 = vrot.slane %v6296_v46, 3  ;;  %v5443_v58 = vpop.permute.xlu1 %5442  ;;  %v6828_v57 = vsel %vm2448_vm9, %v14569_v20, %v6827_v5 }
 0xbe3   : > { %v5441_v0 = vpop.permute.xlu0 %5440  ;;  %7376 = vmatmul.mubr.bf16.gmra.mrb[112].mxu0 %v6788_v61  ;;  %8372 = vmatprep.mubr.msk.bf16.mxu1 %vm2676_vm11, %v6260_v9  ;;  %v5857_v47 = vsel %vm2639_vm10, %v15762_v35, %v5443_v58  ;;  %v6157_v1 = vor.u32 %v6156_v25, %v6153_v60 }
 0xbe4   : > { %v5854_v53 = vsel %vm2639_vm10, %v15761_v32, %v5441_v0  ;;  %7383 = vmatprep.mubr.bf16.mxu0 %v6836_v18  ;;  %v6299_v8 = vor.u32 %v6298_v56, %v6295_v50  ;;  %v6143_v29 = vshrl.u32 %v5857_v47, 16  ;;  %v6146_v39 = vshll.u32 %v5857_v47, 16 }
 0xbe5   : > { %v6136_v63 = vshrl.u32 %v5854_v53, 16  ;;  %v6139_v7 = vshll.u32 %v5854_v53, 16 }
 0xbe6   : > { %v6145_v21 = vrot.slane %v6143_v29, 2  ;;  %v6148_v22 = vrot.slane %v6146_v39, 3  ;;  %v5586_v54 = vpop.permute.xlu1 %5585  ;;  %v6300_v38 = vsel %vm2448_vm9, %v6259_v23, %v6299_v8  ;;  %v15764_v23 = vld [vmem:[#allocation22_spill] sm:$0xff]  ;;  %v15765_v29 = vld [vmem:[#allocation17_spill] sm:$0xff] }
 0xbe7   : > { %v6138_v6 = vrot.slane %v6136_v63, 2  ;;  %v6141_v28 = vrot.slane %v6139_v7, 3  ;;  %v5729_v18 = vpop.permute.xlu0 %5728  ;;  %v5914_v43 = vsel %vm2639_vm10, %v13970_v2, %v5586_v54  ;;  %v5642_v12 = vrot.slane %v15764_v23, 7 }
 0xbe8   : > { %v5983_v17 = vsel %vm2639_vm10, %v5635_v27, %v5729_v18  ;;  %v14601_v14 = vor.u32 %v6148_v22, %v6145_v21  ;;  %v6158_v26 = vshrl.u32 %v5914_v43, 16  ;;  %v6161_v4 = vshll.u32 %v5914_v43, 16  ;;  %v15766_v18 = vld [vmem:[#allocation44_spill] sm:$0xff] }
 0xbe9   : > { %v6142_v51 = vor.u32 %v6141_v28, %v6138_v6  ;;  %v6333_v34 = vshrl.u32 %v5983_v17, 16  ;;  %v6336_v41 = vshll.u32 %v5983_v17, 16  ;;  %v5644_v21 = vrot.slane %v15766_v18, 7 }
 0xbea   : > { %8373 = vmatmul.mubr.msk.bf16.gmra.mrb[124].mxu1 %vm2676_vm11, %v6300_v38  ;;  %v6160_v42 = vrot.slane %v6158_v26, 2  ;;  %v6163_v61 = vrot.slane %v6161_v4, 3  ;;  %v5731_v55 = vpop.permute.xlu1 %5730 }
 0xbeb   : > { %v6335_v15 = vrot.slane %v6333_v34, 2  ;;  %v6338_v62 = vrot.slane %v6336_v41, 3  ;;  %v5588_v11 = vpop.permute.xlu0 %5587  ;;  %7384 = vmatmul.mubr.bf16.gmra.mrb[116].mxu0 %v6828_v57  ;;  %v6150_v49 = vsel %vm2448_vm9, %v6142_v51, %v14601_v14  ;;  %v5986_v16 = vsel %vm2639_vm10, %v5637_v33, %v5731_v55 }
 0xbec   : > { %v5917_v2 = vsel %vm2639_vm10, %v15726_v36, %v5588_v11  ;;  %v6164_v0 = vor.u32 %v6163_v61, %v6160_v42  ;;  %v6373_v9 = vshrl.u32 %v5986_v16, 16  ;;  %v6376_v59 = vshll.u32 %v5986_v16, 16 }
 0xbed   : > { %v6339_v19 = vor.u32 %v6338_v62, %v6335_v15  ;;  %v6205_v46 = vshrl.u32 %v5917_v2, 16  ;;  %v6208_v20 = vshll.u32 %v5917_v2, 16  ;;  %v5641_v36 = vsel %vm5624_vm2, %v5638_v40, %v5640_v37  ;;  %v15767_v62 = vld [vmem:[#allocation57_spill] sm:$0xff] }
 0xbee   : > { %v6375_v53 = vrot.slane %v6373_v9, 2  ;;  %v6378_v58 = vrot.slane %v6376_v59, 3  ;;  %v5445_v7 = vpop.permute.xlu1 %5444  ;;  %v6165_v33 = vsel %vm2448_vm9, %v6157_v1, %v6164_v0  ;;  %v5643_v40 = vsel %vm5624_vm2, %v5640_v37, %v5642_v12  ;;  %v15768_v1 = vld [vmem:[#allocation43_spill] sm:$0xff] }
 0xbef   : > { %v6207_v27 = vrot.slane %v6205_v46, 2  ;;  %v6210_v50 = vrot.slane %v6208_v20, 3  ;;  %v5733_v56 = vpop.permute.xlu0 %5732  ;;  %v6340_v32 = vsel %vm2448_vm9, %v6299_v8, %v6339_v19  ;;  %v5860_v39 = vsel %vm2639_vm10, %v15765_v29, %v5445_v7  ;;  %7424 = vmatprep.mubr.bf16.mxu0 %v6165_v33 }
 0xbf0   : > { %v5989_v63 = vsel %vm2639_vm10, %v5639_v45, %v5733_v56  ;;  %8376 = vmatprep.mubr.msk.bf16.mxu1 %vm2676_vm11, %v6340_v32  ;;  %v6379_v8 = vor.u32 %v6378_v58, %v6375_v53  ;;  %v6197_v44 = vshrl.u32 %v5860_v39, 16  ;;  %v6200_v60 = vshll.u32 %v5860_v39, 16  ;;  %v15769_v53 = vld [vmem:[#allocation35_spill] sm:$0xff] }
 0xbf1   : > { %v6211_v35 = vor.u32 %v6210_v50, %v6207_v27  ;;  %v6413_v47 = vshrl.u32 %v5989_v63, 16  ;;  %v6416_v5 = vshll.u32 %v5989_v63, 16  ;;  %v5646_v11 = vrot.slane %v15767_v62, 7 }
 0xbf2   : > { %v6199_v22 = vrot.slane %v6197_v44, 2  ;;  %v6202_v17 = vrot.slane %v6200_v60, 3  ;;  %v5735_v38 = vpop.permute.xlu1 %5734  ;;  %v6380_v51 = vsel %vm2448_vm9, %v6339_v19, %v6379_v8  ;;  %v5645_v42 = vsel %vm5624_vm2, %v5642_v12, %v5644_v21 }
 0xbf3   : > { %v6415_v25 = vrot.slane %v6413_v47, 2  ;;  %v6418_v6 = vrot.slane %v6416_v5, 3  ;;  %v5590_v45 = vpop.permute.xlu0 %5589  ;;  %7425 = vmatmul.mubr.bf16.vlgmr.msra.gmra.mrb[48].mxu0 %v6150_v49  ;;  %v6212_v28 = vsel %vm2448_vm9, %v6164_v0, %v6211_v35  ;;  %v5992_v26 = vsel %vm2639_vm10, %v5641_v36, %v5735_v38  ;;  %8377 = vmatmul.mubr.msk.bf16.gmra.mrb[128].mxu1 %vm2676_vm11, %v6380_v51 }
 0xbf4   : > { %v5920_v54 = vsel %vm2639_vm10, %v13721_v13, %v5590_v45  ;;  %7432 = vmatprep.mubr.bf16.mxu0 %v6212_v28  ;;  %v6203_v4 = vor.u32 %v6202_v17, %v6199_v22  ;;  %v6453_v57 = vshrl.u32 %v5992_v26, 16  ;;  %v6456_v15 = vshll.u32 %v5992_v26, 16 }
 0xbf5   : > { %v6419_v34 = vor.u32 %v6418_v6, %v6415_v25  ;;  %v6245_v41 = vshrl.u32 %v5920_v54, 16  ;;  %v6248_v43 = vshll.u32 %v5920_v54, 16  ;;  %v5647_v12 = vsel %vm5624_vm2, %v5644_v21, %v5646_v11 }
 0xbf6   : > { %v6455_v61 = vrot.slane %v6453_v57, 2  ;;  %v6458_v2 = vrot.slane %v6456_v15, 3  ;;  %v5447_v49 = vpop.permute.xlu1 %5446  ;;  %v6204_v19 = vsel %vm2448_vm9, %v14601_v14, %v6203_v4  ;;  %v5648_v58 = vrot.slane %v15769_v53, 7 }
 0xbf7   : > { %v6247_v48 = vrot.slane %v6245_v41, 2  ;;  %v6250_v37 = vrot.slane %v6248_v43, 3  ;;  %v5737_v23 = vpop.permute.xlu0 %5736  ;;  %v6420_v13 = vsel %vm2448_vm9, %v6379_v8, %v6419_v34  ;;  %v5863_v0 = vsel %vm2639_vm10, %v15768_v1, %v5447_v49  ;;  %v15771_v43 = vld [vmem:[#allocation31_spill] sm:$0xff] }
 0xbf8   : > { %v5995_v55 = vsel %vm2639_vm10, %v5643_v40, %v5737_v23  ;;  %8380 = vmatprep.mubr.msk.bf16.mxu1 %vm2676_vm11, %v6420_v13  ;;  %v6459_v9 = vor.u32 %v6458_v2, %v6455_v61  ;;  %v6237_v59 = vshrl.u32 %v5863_v0, 16  ;;  %v6240_v27 = vshll.u32 %v5863_v0, 16  ;;  %v15770_v40 = vld [vmem:[#allocation37_spill] sm:$0xff] }
 0xbf9   : > { %v6251_v46 = vor.u32 %v6250_v37, %v6247_v48  ;;  %v6493_v20 = vshrl.u32 %v5995_v55, 16  ;;  %v6496_v16 = vshll.u32 %v5995_v55, 16  ;;  %v5650_v25 = vrot.slane %v15770_v40, 7 }
 0xbfa   : > { %v6239_v14 = vrot.slane %v6237_v59, 2  ;;  %v6242_v63 = vrot.slane %v6240_v27, 3  ;;  %v5739_v33 = vpop.permute.xlu1 %5738  ;;  %v6460_v47 = vsel %vm2448_vm9, %v6419_v34, %v6459_v9  ;;  %v5649_v18 = vsel %vm5624_vm2, %v5646_v11, %v5648_v58  ;;  %v15773_v27 = vld [vmem:[#allocation28_spill] sm:$0xff] }
 0xbfb   : > { %v6495_v50 = vrot.slane %v6493_v20, 2  ;;  %v6498_v56 = vrot.slane %v6496_v16, 3  ;;  %v5592_v32 = vpop.permute.xlu0 %5591  ;;  %7433 = vmatmul.mubr.bf16.gmra.mrb[52].mxu0 %v6204_v19  ;;  %v6252_v36 = vsel %vm2448_vm9, %v6211_v35, %v6251_v46  ;;  %v5998_v8 = vsel %vm2639_vm10, %v5645_v42, %v5739_v33  ;;  %8381 = vmatmul.mubr.msk.bf16.gmra.mrb[132].mxu1 %vm2676_vm11, %v6460_v47  ;;  %v15772_v42 = vld [vmem:[#allocation53_spill] sm:$0xff] }
 0xbfc   : > { %v5923_v7 = vsel %vm2639_vm10, %v13779_v30, %v5592_v32  ;;  %7440 = vmatprep.mubr.bf16.mxu0 %v6252_v36  ;;  %v6243_v44 = vor.u32 %v6242_v63, %v6239_v14  ;;  %v6533_v35 = vshrl.u32 %v5998_v8, 16  ;;  %v6536_v60 = vshll.u32 %v5998_v8, 16 }
 0xbfd   : > { %v6499_v5 = vor.u32 %v6498_v56, %v6495_v50  ;;  %v6285_v29 = vshrl.u32 %v5923_v7, 16  ;;  %v6288_v39 = vshll.u32 %v5923_v7, 16  ;;  %v5651_v11 = vsel %vm5624_vm2, %v5648_v58, %v5650_v25 }
 0xbfe   : > { %v6535_v21 = vrot.slane %v6533_v35, 2  ;;  %v6538_v22 = vrot.slane %v6536_v60, 3  ;;  %v6244_v38 = vsel %vm2448_vm9, %v6203_v4, %v6243_v44  ;;  %v5652_v61 = vrot.slane %v15772_v42, 7 }
 0xbff   : > { %v6287_v6 = vrot.slane %v6285_v29, 2  ;;  %v6290_v45 = vrot.slane %v6288_v39, 3  ;;  %v5741_v28 = vpop.permute.xlu0 %5740  ;;  %v6500_v30 = vsel %vm2448_vm9, %v6459_v9, %v6499_v5  ;;  %v15774_v29 = vld [vmem:[#allocation59_spill] sm:$0xff] }
 0xc00   : > { %v6001_v17 = vsel %vm2639_vm10, %v5647_v12, %v5741_v28  ;;  %v5449_v54 = vpop.permute.xlu1 %5448  ;;  %8384 = vmatprep.mubr.msk.bf16.mxu1 %vm2676_vm11, %v6500_v30  ;;  %v6539_v57 = vor.u32 %v6538_v22, %v6535_v21  ;;  %v5654_v12 = vrot.slane %v15773_v27, 7  ;;  %v5653_v36 = vsel %vm5624_vm2, %v5650_v25, %v5652_v61  ;;  %v15775_v30 = vld [vmem:[#allocation29_spill] sm:$0xff] }
 0xc01   : > { %v6291_v51 = vor.u32 %v6290_v45, %v6287_v6  ;;  %v6573_v34 = vshrl.u32 %v6001_v17, 16  ;;  %v6576_v41 = vshll.u32 %v6001_v17, 16  ;;  %v5866_v26 = vsel %vm2639_vm10, %v15771_v43, %v5449_v54  ;;  %v15776_v22 = vld [vmem:[#allocation33_spill] sm:$0xff] }
 0xc02   : > { %v6277_v15 = vshrl.u32 %v5866_v26, 16  ;;  %v6280_v62 = vshll.u32 %v5866_v26, 16  ;;  %v6540_v19 = vsel %vm2448_vm9, %v6499_v5, %v6539_v57  ;;  %v5655_v40 = vsel %vm5624_vm2, %v5652_v61, %v5654_v12 }
 0xc03   : > { %v6575_v48 = vrot.slane %v6573_v34, 2  ;;  %v6578_v37 = vrot.slane %v6576_v41, 3  ;;  %v5594_v23 = vpop.permute.xlu0 %5593  ;;  %7441 = vmatmul.mubr.bf16.gmra.mrb[56].mxu0 %v6244_v38  ;;  %v6292_v13 = vsel %vm2448_vm9, %v6251_v46, %v6291_v51  ;;  %8385 = vmatmul.mubr.msk.bf16.gmra.mrb[136].mxu1 %vm2676_vm11, %v6540_v19 }
 0xc04   : > { %v6279_v4 = vrot.slane %v6277_v15, 2  ;;  %v6282_v2 = vrot.slane %v6280_v62, 3  ;;  %v5926_v55 = vsel %vm2639_vm10, %v14405_v10, %v5594_v23  ;;  %v5743_v49 = vpop.permute.xlu1 %5742  ;;  %7448 = vmatprep.mubr.bf16.mxu0 %v6292_v13  ;;  %v5658_v62 = vrot.slane %v14494_v31, 7 }
 0xc05   : > { %v6579_v20 = vor.u32 %v6578_v37, %v6575_v48  ;;  %v6325_v16 = vshrl.u32 %v5926_v55, 16  ;;  %v6328_v1 = vshll.u32 %v5926_v55, 16  ;;  %v6004_v0 = vsel %vm2639_vm10, %v5649_v18, %v5743_v49 }
 0xc06   : > { %v6283_v9 = vor.u32 %v6282_v2, %v6279_v4  ;;  %v6613_v46 = vshrl.u32 %v6004_v0, 16  ;;  %v6616_v59 = vshll.u32 %v6004_v0, 16  ;;  %v5656_v18 = vrot.slane %v15775_v30, 7 }
 0xc07   : > { %v6327_v50 = vrot.slane %v6325_v16, 2  ;;  %v6330_v56 = vrot.slane %v6328_v1, 3  ;;  %v5745_v32 = vpop.permute.xlu0 %5744  ;;  %v6580_v10 = vsel %vm2448_vm9, %v6539_v57, %v6579_v20 }
 0xc08   : > { %v6615_v53 = vrot.slane %v6613_v46, 2  ;;  %v6618_v58 = vrot.slane %v6616_v59, 3  ;;  %v6007_v14 = vsel %vm2639_vm10, %v5651_v11, %v5745_v32  ;;  %v5451_v63 = vpop.permute.xlu1 %5450  ;;  %8388 = vmatprep.mubr.msk.bf16.mxu1 %vm2676_vm11, %v6580_v10  ;;  %v6284_v7 = vsel %vm2448_vm9, %v6243_v44, %v6283_v9  ;;  %v8672_v11 = vld [vmem:[#allocation2 + $0xa8] ss:$0 sps:$4 sm:$0x33]  }
 0xc09   : > { %v6331_v33 = vor.u32 %v6330_v56, %v6327_v50  ;;  %v6653_v47 = vshrl.u32 %v6007_v14, 16  ;;  %v6656_v5 = vshll.u32 %v6007_v14, 16  ;;  %v5869_v39 = vsel %vm2639_vm10, %v15774_v29, %v5451_v63 }
 0xc0a   : > { %v6619_v8 = vor.u32 %v6618_v58, %v6615_v53  ;;  %v6317_v35 = vshrl.u32 %v5869_v39, 16  ;;  %v6320_v60 = vshll.u32 %v5869_v39, 16  ;;  %v5657_v42 = vsel %vm5624_vm2, %v5654_v12, %v5656_v18 }
 0xc0b   : > { %v6655_v25 = vrot.slane %v6653_v47, 2  ;;  %v6658_v6 = vrot.slane %v6656_v5, 3  ;;  %v5596_v45 = vpop.permute.xlu0 %5595  ;;  %7449 = vmatmul.mubr.bf16.gmra.mrb[60].mxu0 %v6284_v7  ;;  %v6332_v28 = vsel %vm2448_vm9, %v6291_v51, %v6331_v33  ;;  %v5660_v59 = vrot.slane %v8672_v11, 7 }
 0xc0c   : > { %v6319_v44 = vrot.slane %v6317_v35, 2  ;;  %v6322_v21 = vrot.slane %v6320_v60, 3  ;;  %v5929_v17 = vsel %vm2639_vm10, %v15776_v22, %v5596_v45  ;;  %v5747_v54 = vpop.permute.xlu1 %5746  ;;  %v6620_v38 = vsel %vm2448_vm9, %v6579_v20, %v6619_v8  ;;  %7456 = vmatprep.mubr.bf16.mxu0 %v6332_v28 }
 0xc0d   : > { %v6659_v34 = vor.u32 %v6658_v6, %v6655_v25  ;;  %v6365_v41 = vshrl.u32 %v5929_v17, 16  ;;  %v6368_v43 = vshll.u32 %v5929_v17, 16  ;;  %v6010_v26 = vsel %vm2639_vm10, %v5653_v36, %v5747_v54  ;;  %8389 = vmatmul.mubr.msk.bf16.gmra.mrb[140].mxu1 %vm2676_vm11, %v6620_v38 }
 0xc0e   : > { %v6323_v57 = vor.u32 %v6322_v21, %v6319_v44  ;;  %v6693_v51 = vshrl.u32 %v6010_v26, 16  ;;  %v6696_v15 = vshll.u32 %v6010_v26, 16  ;;  %v5659_v50 = vsel %vm5624_vm2, %v5656_v18, %v5658_v62 }
 0xc0f   : > { %v6367_v48 = vrot.slane %v6365_v41, 2  ;;  %v6370_v37 = vrot.slane %v6368_v43, 3  ;;  %v5749_v23 = vpop.permute.xlu0 %5748  ;;  %v6660_v13 = vsel %vm2448_vm9, %v6619_v8, %v6659_v34 }
 0xc10   : > { %v6695_v61 = vrot.slane %v6693_v51, 2  ;;  %v6698_v4 = vrot.slane %v6696_v15, 3  ;;  %v6013_v2 = vsel %vm2639_vm10, %v5655_v40, %v5749_v23  ;;  %8392 = vmatprep.mubr.msk.bf16.mxu1 %vm2676_vm11, %v6660_v13  ;;  %v6324_v49 = vsel %vm2448_vm9, %v6283_v9, %v6323_v57 }
 0xc11   : > { %v6371_v19 = vor.u32 %v6370_v37, %v6367_v48  ;;  %v6733_v20 = vshrl.u32 %v6013_v2, 16  ;;  %v6736_v31 = vshll.u32 %v6013_v2, 16  ;;  %v14711_v37 = vld [vmem:[%s14934_s14] ss:$0 sm:$0xff] }
 0xc12   : > { %v5453_v55 = vpop.permute.xlu1 %5452  ;;  %v6699_v1 = vor.u32 %v6698_v4, %v6695_v61 }
 0xc13   : > { %v5872_v16 = vsel %vm2639_vm10, %v14103_v52, %v5453_v55  ;;  %v6735_v27 = vrot.slane %v6733_v20, 2  ;;  %v6738_v12 = vrot.slane %v6736_v31, 3  ;;  %v5753_v56 = vpop.permute.xlu0 %5752  ;;  %7457 = vmatmul.mubr.bf16.gmra.mrb[64].mxu0 %v6324_v49  ;;  %v6372_v32 = vsel %vm2448_vm9, %v6331_v33, %v6371_v19 }
 0xc14   : > { %v6357_v0 = vshrl.u32 %v5872_v16, 16  ;;  %v6360_v46 = vshll.u32 %v5872_v16, 16  ;;  %v6019_v36 = vsel %vm2639_vm10, %v5659_v50, %v5753_v56  ;;  %v6700_v58 = vsel %vm2448_vm9, %v6659_v34, %v6699_v1  ;;  %7464 = vmatprep.mubr.bf16.mxu0 %v6372_v32 }
 0xc15   : > { %v6739_v52 = vor.u32 %v6738_v12, %v6735_v27  ;;  %v6813_v14 = vshrl.u32 %v6019_v36, 16  ;;  %v6816_v63 = vshll.u32 %v6019_v36, 16  ;;  %8393 = vmatmul.mubr.msk.bf16.gmra.mrb[144].mxu1 %vm2676_vm11, %v6700_v58  ;;  %v5661_v33 = vsel %vm5624_vm2, %v5658_v62, %v5660_v59 }
 0xc16   : > { %v6359_v10 = vrot.slane %v6357_v0, 2  ;;  %v6362_v9 = vrot.slane %v6360_v46, 3  ;;  %v5751_v53 = vpop.permute.xlu1 %5750  ;;  %v6412_v21 = vsel %vm2448_vm9, %v6371_v19, %v14234_v24 }
 0xc17   : > { %v6016_v7 = vsel %vm2639_vm10, %v5657_v42, %v5751_v53  ;;  %v6815_v39 = vrot.slane %v6813_v14, 2  ;;  %v6818_v8 = vrot.slane %v6816_v63, 3  ;;  %v6740_v35 = vsel %vm2448_vm9, %v6699_v1, %v6739_v52 }
 0xc18   : > { %v6363_v47 = vor.u32 %v6362_v9, %v6359_v10  ;;  %v6773_v5 = vshrl.u32 %v6016_v7, 16  ;;  %v6776_v29 = vshll.u32 %v6016_v7, 16  ;;  %8396 = vmatprep.mubr.msk.bf16.mxu1 %vm2676_vm11, %v6740_v35 }
 0xc19   : > { %v6819_v45 = vor.u32 %v6818_v8, %v6815_v39 }
 0xc1a   : > { %v6775_v60 = vrot.slane %v6773_v5, 2  ;;  %v6778_v40 = vrot.slane %v6776_v29, 3  ;;  %v5755_v25 = vpop.permute.xlu1 %5754  ;;  %v6364_v6 = vsel %vm2448_vm9, %v6323_v57, %v6363_v47  ;;  %v6404_v41 = vsel %vm2448_vm9, %v6363_v47, %v14204_v3 }
 0xc1b   : > { %v6022_v28 = vsel %vm2639_vm10, %v5661_v33, %v5755_v25  ;;  %7465 = vmatmul.mubr.bf16.gmra.mrb[68].mxu0 %v6364_v6 }
 0xc1c   : > { %v6779_v30 = vor.u32 %v6778_v40, %v6775_v60  ;;  %v6853_v18 = vshrl.u32 %v6022_v28, 16  ;;  %v6856_v44 = vshll.u32 %v6022_v28, 16  ;;  %7472 = vmatprep.mubr.bf16.mxu0 %v6412_v21 }
 0xc1e   : > { %v6855_v22 = vrot.slane %v6853_v18, 2  ;;  %v6858_v17 = vrot.slane %v6856_v44, 3  ;;  %v6780_v54 = vsel %vm2448_vm9, %v6739_v52, %v6779_v30  ;;  %v6820_v38 = vsel %vm2448_vm9, %v6779_v30, %v6819_v45 }
 0xc1f   : > { %8397 = vmatmul.mubr.msk.bf16.gmra.mrb[148].mxu1 %vm2676_vm11, %v6780_v54 }
 0xc20   : > { %8400 = vmatprep.mubr.msk.bf16.mxu1 %vm2676_vm11, %v6820_v38  ;;  %v6859_v34 = vor.u32 %v6858_v17, %v6855_v22 }
 0xc22   : > { %v6860_v43 = vsel %vm2448_vm9, %v6819_v45, %v6859_v34 }
 0xc23   : > { %7473 = vmatmul.mubr.bf16.gmra.mrb[72].mxu0 %v6404_v41 }
 0xc27   : > { %8401 = vmatmul.mubr.msk.bf16.gmra.mrb[152].mxu1 %vm2676_vm11, %v6860_v43 }
 0xc5d   : > { %v7482_v24 = vpop.f32.mrb[76].mxu1 }
 0xc5e   : > { %v7484_v26 = vpop.f32.mrb[77].mxu1 }
 0xc5f   : > { %v7485_v57 = vpop.f32.mrb[78].mxu1 }
 0xc60   : > { %v7487_v51 = vpop.f32.mrb[79].mxu1 }
 0xc65   : > { %v7490_v15 = vpop.f32.mrb[80].mxu1 }
 0xc66   : > { %v7492_v62 = vpop.f32.mrb[81].mxu1 }
 0xc67   : > { %v7493_v11 = vpop.f32.mrb[82].mxu1 }
 0xc68   : > { %v7495_v48 = vpop.f32.mrb[83].mxu1 }
 0xc6d   : > { %v7498_v23 = vpop.f32.mrb[84].mxu1 }
 0xc6e   : > { %v7500_v3 = vpop.f32.mrb[85].mxu1  ;;  %v7305_v13 = vpop.f32.mrb[76].mxu0 }
 0xc6f   : > { %v7501_v42 = vpop.f32.mrb[86].mxu1  ;;  %v7306_v61 = vadd.f32 %v14711_v37, %v7305_v13  ;;  %v7307_v4 = vpop.f32.mrb[77].mxu0 }
 0xc70   : > { %v7503_v2 = vpop.f32.mrb[87].mxu1  ;;  %v7308_v55 = vpop.f32.mrb[78].mxu0 }
 0xc71   : > { %v7309_v49 = vadd.f32 %v14711_v37, %v7308_v55  ;;  %v7310_v19 = vpop.f32.mrb[79].mxu0  ;;  %v14715_v20 = vadd.f32 %v7482_v24, %v7306_v61 }
 0xc73   : > { %v14717_v31 = vadd.f32 %v7485_v57, %v7309_v49 }
 0xc75   : > { %v7506_v16 = vpop.f32.mrb[88].mxu1 }
 0xc76   : > { %v7508_v1 = vpop.f32.mrb[89].mxu1  ;;  %v7313_v0 = vpop.f32.mrb[80].mxu0 }
 0xc77   : > { %v7509_v46 = vpop.f32.mrb[90].mxu1  ;;  %v7314_v59 = vadd.f32 %v14711_v37, %v7313_v0  ;;  %v7315_v27 = vpop.f32.mrb[81].mxu0 }
 0xc78   : > { %v7511_v12 = vpop.f32.mrb[91].mxu1  ;;  %v7316_v50 = vpop.f32.mrb[82].mxu0 }
 0xc79   : > { %v7317_v56 = vadd.f32 %v14711_v37, %v7316_v50  ;;  %v7318_v32 = vpop.f32.mrb[83].mxu0  ;;  %v14721_v10 = vadd.f32 %v7490_v15, %v7314_v59 }
 0xc7b   : > { %v14723_v9 = vadd.f32 %v7493_v11, %v7317_v56 }
 0xc7d   : > { %v7514_v36 = vpop.f32.mrb[92].mxu1 }
 0xc7e   : > { %v7516_v53 = vpop.f32.mrb[93].mxu1  ;;  %v7321_v58 = vpop.f32.mrb[84].mxu0 }
 0xc7f   : > { %v7517_v52 = vpop.f32.mrb[94].mxu1  ;;  %v7322_v14 = vadd.f32 %v14711_v37, %v7321_v58  ;;  %v7323_v63 = vpop.f32.mrb[85].mxu0 }
 0xc80   : > { %v7519_v7 = vpop.f32.mrb[95].mxu1  ;;  %v7324_v47 = vpop.f32.mrb[86].mxu0 }
 0xc81   : > { %v7325_v5 = vadd.f32 %v14711_v37, %v7324_v47  ;;  %v7326_v29 = vpop.f32.mrb[87].mxu0  ;;  %v14727_v33 = vadd.f32 %v7498_v23, %v7322_v14 }
 0xc83   : > { %v14729_v39 = vadd.f32 %v7501_v42, %v7325_v5 }
 0xc85   : > { %v7522_v8 = vpop.f32.mrb[96].mxu1 }
 0xc86   : > { %v7524_v35 = vpop.f32.mrb[97].mxu1  ;;  %v7329_v60 = vpop.f32.mrb[88].mxu0 }
 0xc87   : > { %v7525_v40 = vpop.f32.mrb[98].mxu1  ;;  %v7330_v25 = vadd.f32 %v14711_v37, %v7329_v60  ;;  %v7331_v6 = vpop.f32.mrb[89].mxu0 }
 0xc88   : > { %v7527_v45 = vpop.f32.mrb[99].mxu1  ;;  %v7332_v28 = vpop.f32.mrb[90].mxu0 }
 0xc89   : > { %v7333_v30 = vadd.f32 %v14711_v37, %v7332_v28  ;;  %v7334_v18 = vpop.f32.mrb[91].mxu0  ;;  %v14733_v44 = vadd.f32 %v7506_v16, %v7330_v25 }
 0xc8b   : > { %v14735_v21 = vadd.f32 %v7509_v46, %v7333_v30 }
 0xc8d   : > { %v7530_v22 = vpop.f32.mrb[100].mxu1 }
 0xc8e   : > { %v7532_v17 = vpop.f32.mrb[101].mxu1  ;;  %v7337_v54 = vpop.f32.mrb[92].mxu0 }
 0xc8f   : > { %v7533_v38 = vpop.f32.mrb[102].mxu1  ;;  %v7338_v34 = vadd.f32 %v14711_v37, %v7337_v54  ;;  %v7339_v41 = vpop.f32.mrb[93].mxu0 }
 0xc90   : > { %v7535_v43 = vpop.f32.mrb[103].mxu1  ;;  %v7340_v24 = vpop.f32.mrb[94].mxu0 }
 0xc91   : > { %v7341_v26 = vadd.f32 %v14711_v37, %v7340_v24  ;;  %v7342_v57 = vpop.f32.mrb[95].mxu0  ;;  %v14739_v51 = vadd.f32 %v7514_v36, %v7338_v34 }
 0xc93   : > { %v14741_v15 = vadd.f32 %v7517_v52, %v7341_v26 }
 0xc95   : > { %v7538_v62 = vpop.f32.mrb[104].mxu1 }
 0xc96   : > { %v7540_v11 = vpop.f32.mrb[105].mxu1  ;;  %v7345_v48 = vpop.f32.mrb[96].mxu0 }
 0xc97   : > { %v7541_v23 = vpop.f32.mrb[106].mxu1  ;;  %v7346_v3 = vadd.f32 %v14711_v37, %v7345_v48  ;;  %v7347_v13 = vpop.f32.mrb[97].mxu0 }
 0xc98   : > { %v7543_v42 = vpop.f32.mrb[107].mxu1  ;;  %v7348_v61 = vpop.f32.mrb[98].mxu0 }
 0xc99   : > { %v7349_v4 = vadd.f32 %v14711_v37, %v7348_v61  ;;  %v7350_v2 = vpop.f32.mrb[99].mxu0  ;;  %v14745_v55 = vadd.f32 %v7522_v8, %v7346_v3 }
 0xc9b   : > { %v14747_v49 = vadd.f32 %v7525_v40, %v7349_v4 }
 0xc9d   : > { %v7546_v19 = vpop.f32.mrb[108].mxu1 }
 0xc9e   : > { %v7548_v16 = vpop.f32.mrb[109].mxu1  ;;  %v7353_v1 = vpop.f32.mrb[100].mxu0 }
 0xc9f   : > { %v7549_v0 = vpop.f32.mrb[110].mxu1  ;;  %v7354_v46 = vadd.f32 %v14711_v37, %v7353_v1  ;;  %v7355_v59 = vpop.f32.mrb[101].mxu0 }
 0xca0   : > { %v7551_v27 = vpop.f32.mrb[111].mxu1  ;;  %v7356_v12 = vpop.f32.mrb[102].mxu0 }
 0xca1   : > { %v7357_v50 = vadd.f32 %v14711_v37, %v7356_v12  ;;  %v7358_v56 = vpop.f32.mrb[103].mxu0  ;;  %v14751_v32 = vadd.f32 %v7530_v22, %v7354_v46 }
 0xca3   : > { %v14753_v36 = vadd.f32 %v7533_v38, %v7357_v50 }
 0xca5   : > { %v7554_v53 = vpop.f32.mrb[112].mxu1 }
 0xca6   : > { %v7556_v58 = vpop.f32.mrb[113].mxu1  ;;  %v7361_v52 = vpop.f32.mrb[104].mxu0 }
 0xca7   : > { %v7557_v14 = vpop.f32.mrb[114].mxu1  ;;  %v7362_v63 = vadd.f32 %v14711_v37, %v7361_v52  ;;  %v7363_v7 = vpop.f32.mrb[105].mxu0 }
 0xca8   : > { %v7559_v47 = vpop.f32.mrb[115].mxu1  ;;  %v7364_v5 = vpop.f32.mrb[106].mxu0 }
 0xca9   : > { %v7365_v29 = vadd.f32 %v14711_v37, %v7364_v5  ;;  %v7366_v8 = vpop.f32.mrb[107].mxu0  ;;  %v14757_v35 = vadd.f32 %v7538_v62, %v7362_v63 }
 0xcab   : > { %v14759_v60 = vadd.f32 %v7541_v23, %v7365_v29 }
 0xcad   : > { %v7562_v40 = vpop.f32.mrb[116].mxu1 }
 0xcae   : > { %v7564_v25 = vpop.f32.mrb[117].mxu1  ;;  %v7369_v6 = vpop.f32.mrb[108].mxu0 }
 0xcaf   : > { %v7565_v45 = vpop.f32.mrb[118].mxu1  ;;  %v7370_v28 = vadd.f32 %v14711_v37, %v7369_v6  ;;  %v7371_v30 = vpop.f32.mrb[109].mxu0 }
 0xcb0   : > { %v7567_v18 = vpop.f32.mrb[119].mxu1  ;;  %v7372_v22 = vpop.f32.mrb[110].mxu0 }
 0xcb1   : > { %v7373_v17 = vadd.f32 %v14711_v37, %v7372_v22  ;;  %v7374_v54 = vpop.f32.mrb[111].mxu0  ;;  %v14763_v38 = vadd.f32 %v7546_v19, %v7370_v28 }
 0xcb3   : > { %v14765_v34 = vadd.f32 %v7549_v0, %v7373_v17 }
 0xcb5   : > { %v8370_v41 = vpop.f32.mrb[120].mxu1 }
 0xcb6   : > { %v7603_v43 = vpop.f32.mrb[121].mxu1  ;;  %v7377_v24 = vpop.f32.mrb[112].mxu0 }
 0xcb7   : > { %v8371_v26 = vpop.f32.mrb[122].mxu1  ;;  %v7378_v57 = vadd.f32 %v14711_v37, %v7377_v24  ;;  %v7379_v62 = vpop.f32.mrb[113].mxu0 }
 0xcb8   : > { %v7606_v11 = vpop.f32.mrb[123].mxu1  ;;  %v7380_v48 = vpop.f32.mrb[114].mxu0 }
 0xcb9   : > { %v7381_v23 = vadd.f32 %v14711_v37, %v7380_v48  ;;  %v7382_v3 = vpop.f32.mrb[115].mxu0  ;;  %v14769_v13 = vadd.f32 %v7554_v53, %v7378_v57 }
 0xcbb   : > { %v14771_v42 = vadd.f32 %v7557_v14, %v7381_v23 }
 0xcbd   : > { %v14773_v61 = vpop.f32.mrb[124].mxu1 }
 0xcbe   : > { %v7619_v4 = vpop.f32.mrb[125].mxu1  ;;  %v7385_v2 = vpop.f32.mrb[116].mxu0 }
 0xcbf   : > { %v14775_v19 = vpop.f32.mrb[126].mxu1  ;;  %v7386_v16 = vadd.f32 %v14711_v37, %v7385_v2  ;;  %v7387_v1 = vpop.f32.mrb[117].mxu0 }
 0xcc0   : > { %v7622_v0 = vpop.f32.mrb[127].mxu1  ;;  %v7388_v46 = vpop.f32.mrb[118].mxu0 }
 0xcc1   : > { %v7389_v59 = vadd.f32 %v14711_v37, %v7388_v46  ;;  %v7390_v27 = vpop.f32.mrb[119].mxu0  ;;  %v14779_v12 = vadd.f32 %v7562_v40, %v7386_v16 }
 0xcc3   : > { %v14781_v50 = vadd.f32 %v7565_v45, %v7389_v59 }
 0xcc6   : > { %v7426_v56 = vpop.f32.mrb[48].mxu0  ;;  %v14785_v52 = vpop.f32.mrb[128].mxu1 }
 0xcc7   : > { %v8472_v53 = vadd.f32 %v14711_v37, %v7426_v56  ;;  %v7428_v58 = vpop.f32.mrb[49].mxu0  ;;  %v14792_v63 = vpop.f32.mrb[129].mxu1 }
 0xcc8   : > { %v7429_v14 = vpop.f32.mrb[50].mxu0  ;;  %v14795_v29 = vpop.f32.mrb[130].mxu1 }
 0xcc9   : > { %v7604_v7 = vadd.f32 %v8472_v53, %v7603_v43  ;;  %v8473_v47 = vadd.f32 %v14711_v37, %v7429_v14  ;;  %v7431_v5 = vpop.f32.mrb[51].mxu0  ;;  %v14797_v8 = vpop.f32.mrb[131].mxu1 }
 0xccb   : > { %7746 = vst.msk [vmem:[%s14790_s27] sm:$0xff] %vm2639_vm10, %v7604_v7  ;;  %v7607_v40 = vadd.f32 %v8473_v47, %v7606_v11 }
 0xccd   : > { %7747 = vst.msk [vmem:[%s14790_s27 + $0x8] sm:$0xff] %vm2639_vm10, %v7607_v40 }
 0xcce   : > { %v7434_v25 = vpop.f32.mrb[52].mxu0  ;;  %v8382_v28 = vpop.f32.mrb[132].mxu1 }
 0xccf   : > { %v8474_v6 = vadd.f32 %v14711_v37, %v7434_v25  ;;  %v7436_v45 = vpop.f32.mrb[53].mxu0  ;;  %v7660_v18 = vadd.f32 %v8382_v28, %v14715_v20  ;;  %v14805_v22 = vpop.f32.mrb[133].mxu1 }
 0xcd0   : > { %v7437_v30 = vpop.f32.mrb[54].mxu0  ;;  %v8383_v24 = vpop.f32.mrb[134].mxu1 }
 0xcd1   : > { %v7612_v17 = vadd.f32 %v8474_v6, %v8370_v41  ;;  %v8475_v54 = vadd.f32 %v14711_v37, %v7437_v30  ;;  %v7439_v43 = vpop.f32.mrb[55].mxu0  ;;  %7760 = vst.msk [vmem:[%s14790_s27 + $0x70] sm:$0xff] %vm2639_vm10, %v7660_v18  ;;  %v7663_v57 = vadd.f32 %v8383_v24, %v14717_v31  ;;  %v14811_v62 = vpop.f32.mrb[135].mxu1 }
 0xcd3   : > { %7748 = vst.msk [vmem:[%s14790_s27 + $0x10] sm:$0xff] %vm2639_vm10, %v7612_v17  ;;  %v7615_v11 = vadd.f32 %v8475_v54, %v8371_v26  ;;  %7761 = vst.msk [vmem:[%s14790_s27 + $0x78] sm:$0xff] %vm2639_vm10, %v7663_v57 }
 0xcd5   : > { %7749 = vst.msk [vmem:[%s14790_s27 + $0x18] sm:$0xff] %vm2639_vm10, %v7615_v11 }
 0xcd6   : > { %v7442_v20 = vpop.f32.mrb[56].mxu0  ;;  %v8386_v23 = vpop.f32.mrb[136].mxu1 }
 0xcd7   : > { %v8476_v41 = vadd.f32 %v14711_v37, %v7442_v20  ;;  %v7444_v48 = vpop.f32.mrb[57].mxu0  ;;  %v7676_v31 = vadd.f32 %v8386_v23, %v14727_v33  ;;  %v7667_v2 = vpop.f32.mrb[137].mxu1 }
 0xcd8   : > { %v7445_v3 = vpop.f32.mrb[58].mxu0  ;;  %v7668_v46 = vadd.f32 %v7667_v2, %v14721_v10  ;;  %v8387_v59 = vpop.f32.mrb[138].mxu1 }
 0xcd9   : > { %v7620_v16 = vadd.f32 %v8476_v41, %v7619_v4  ;;  %v8477_v26 = vadd.f32 %v14711_v37, %v7445_v3  ;;  %v7447_v1 = vpop.f32.mrb[59].mxu0  ;;  %7764 = vst.msk [vmem:[%s14790_s27 + $0x90] sm:$0xff] %vm2639_vm10, %v7676_v31  ;;  %v7679_v27 = vadd.f32 %v8387_v59, %v14729_v39  ;;  %v7670_v56 = vpop.f32.mrb[139].mxu1 }
 0xcda   : > { %7762 = vst.msk [vmem:[%s14790_s27 + $0x80] sm:$0xff] %vm2639_vm10, %v7668_v46  ;;  %v7671_v33 = vadd.f32 %v7670_v56, %v14723_v9 }
 0xcdb   : > { %7750 = vst.msk [vmem:[%s14790_s27 + $0x20] sm:$0xff] %vm2639_vm10, %v7620_v16  ;;  %v7623_v53 = vadd.f32 %v8477_v26, %v7622_v0  ;;  %7765 = vst.msk [vmem:[%s14790_s27 + $0x98] sm:$0xff] %vm2639_vm10, %v7679_v27 }
 0xcdc   : > { %7763 = vst.msk [vmem:[%s14790_s27 + $0x88] sm:$0xff] %vm2639_vm10, %v7671_v33 }
 0xcdd   : > { %7751 = vst.msk [vmem:[%s14790_s27 + $0x28] sm:$0xff] %vm2639_vm10, %v7623_v53 }
 0xcde   : > { %v7450_v10 = vpop.f32.mrb[60].mxu0 }
 0xcdf   : > { %v8478_v4 = vadd.f32 %v14711_v37, %v7450_v10  ;;  %v7452_v39 = vpop.f32.mrb[61].mxu0 }
 0xce0   : > { %v8390_v58 = vpop.f32.mrb[140].mxu1  ;;  %v7453_v0 = vpop.f32.mrb[62].mxu0 }
 0xce1   : > { %v7692_v14 = vadd.f32 %v8390_v58, %v14739_v51  ;;  %v7683_v9 = vpop.f32.mrb[141].mxu1  ;;  %v7628_v7 = vadd.f32 %v8478_v4, %v14773_v61  ;;  %v8479_v47 = vadd.f32 %v14711_v37, %v7453_v0  ;;  %v7455_v5 = vpop.f32.mrb[63].mxu0 }
 0xce2   : > { %v7684_v40 = vadd.f32 %v7683_v9, %v14733_v44  ;;  %v8391_v25 = vpop.f32.mrb[142].mxu1 }
 0xce3   : > { %7768 = vst.msk [vmem:[%s14790_s27 + $0xb0] sm:$0xff] %vm2639_vm10, %v7692_v14  ;;  %v7695_v6 = vadd.f32 %v8391_v25, %v14741_v15  ;;  %v7686_v45 = vpop.f32.mrb[143].mxu1  ;;  %7752 = vst.msk [vmem:[%s14790_s27 + $0x30] sm:$0xff] %vm2639_vm10, %v7628_v7  ;;  %v7631_v28 = vadd.f32 %v8479_v47, %v14775_v19 }
 0xce4   : > { %7766 = vst.msk [vmem:[%s14790_s27 + $0xa0] sm:$0xff] %vm2639_vm10, %v7684_v40  ;;  %v7687_v51 = vadd.f32 %v7686_v45, %v14735_v21 }
 0xce5   : > { %7769 = vst.msk [vmem:[%s14790_s27 + $0xb8] sm:$0xff] %vm2639_vm10, %v7695_v6  ;;  %7753 = vst.msk [vmem:[%s14790_s27 + $0x38] sm:$0xff] %vm2639_vm10, %v7631_v28 }
 0xce6   : > { %7767 = vst.msk [vmem:[%s14790_s27 + $0xa8] sm:$0xff] %vm2639_vm10, %v7687_v51  ;;  %v7458_v44 = vpop.f32.mrb[64].mxu0 }
 0xce7   : > { %v8480_v15 = vadd.f32 %v14711_v37, %v7458_v44  ;;  %v7460_v61 = vpop.f32.mrb[65].mxu0 }
 0xce8   : > { %v8394_v30 = vpop.f32.mrb[144].mxu1  ;;  %v7461_v19 = vpop.f32.mrb[66].mxu0 }
 0xce9   : > { %v7708_v18 = vadd.f32 %v8394_v30, %v14751_v32  ;;  %v7699_v21 = vpop.f32.mrb[145].mxu1  ;;  %v7636_v17 = vadd.f32 %v8480_v15, %v14792_v63  ;;  %v8481_v54 = vadd.f32 %v14711_v37, %v7461_v19  ;;  %v7463_v43 = vpop.f32.mrb[67].mxu0 }
 0xcea   : > { %v7700_v24 = vadd.f32 %v7699_v21, %v14745_v55  ;;  %v8395_v57 = vpop.f32.mrb[146].mxu1 }
 0xceb   : > { %7772 = vst.msk [vmem:[%s14790_s27 + $0xd0] sm:$0xff] %vm2639_vm10, %v7708_v18  ;;  %v7711_v11 = vadd.f32 %v8395_v57, %v14753_v36  ;;  %v7702_v20 = vpop.f32.mrb[147].mxu1  ;;  %7754 = vst.msk [vmem:[%s14790_s27 + $0x40] sm:$0xff] %vm2639_vm10, %v7636_v17  ;;  %v7639_v41 = vadd.f32 %v8481_v54, %v14797_v8 }
 0xcec   : > { %7770 = vst.msk [vmem:[%s14790_s27 + $0xc0] sm:$0xff] %vm2639_vm10, %v7700_v24  ;;  %v7703_v32 = vadd.f32 %v7702_v20, %v14747_v49 }
 0xced   : > { %7773 = vst.msk [vmem:[%s14790_s27 + $0xd8] sm:$0xff] %vm2639_vm10, %v7711_v11  ;;  %7755 = vst.msk [vmem:[%s14790_s27 + $0x48] sm:$0xff] %vm2639_vm10, %v7639_v41 }
 0xcee   : > { %7771 = vst.msk [vmem:[%s14790_s27 + $0xc8] sm:$0xff] %vm2639_vm10, %v7703_v32  ;;  %v7466_v55 = vpop.f32.mrb[68].mxu0 }
 0xcef   : > { %v8482_v36 = vadd.f32 %v14711_v37, %v7466_v55  ;;  %v7468_v63 = vpop.f32.mrb[69].mxu0 }
 0xcf0   : > { %v7469_v8 = vpop.f32.mrb[70].mxu0 }
 0xcf1   : > { %v7644_v3 = vadd.f32 %v8482_v36, %v14785_v52  ;;  %v8483_v31 = vadd.f32 %v14711_v37, %v7469_v8  ;;  %v7471_v2 = vpop.f32.mrb[71].mxu0 }
 0xcf2   : > { %v8398_v48 = vpop.f32.mrb[148].mxu1 }
 0xcf3   : > { %v7724_v23 = vadd.f32 %v8398_v48, %v14763_v38  ;;  %v7715_v49 = vpop.f32.mrb[149].mxu1  ;;  %7756 = vst.msk [vmem:[%s14790_s27 + $0x50] sm:$0xff] %vm2639_vm10, %v7644_v3  ;;  %v7647_v59 = vadd.f32 %v8483_v31, %v14795_v29 }
 0xcf4   : > { %v7716_v16 = vadd.f32 %v7715_v49, %v14757_v35  ;;  %v8399_v26 = vpop.f32.mrb[150].mxu1 }
 0xcf5   : > { %7776 = vst.msk [vmem:[%s14790_s27 + $0xf0] sm:$0xff] %vm2639_vm10, %v7724_v23  ;;  %v7727_v1 = vadd.f32 %v8399_v26, %v14765_v34  ;;  %v7718_v46 = vpop.f32.mrb[151].mxu1  ;;  %7757 = vst.msk [vmem:[%s14790_s27 + $0x58] sm:$0xff] %vm2639_vm10, %v7647_v59 }
 0xcf6   : > { %7774 = vst.msk [vmem:[%s14790_s27 + $0xe0] sm:$0xff] %vm2639_vm10, %v7716_v16  ;;  %v7719_v38 = vadd.f32 %v7718_v46, %v14759_v60  ;;  %v7474_v35 = vpop.f32.mrb[72].mxu0 }
 0xcf7   : > { %7777 = vst.msk [vmem:[%s14790_s27 + $0xf8] sm:$0xff] %vm2639_vm10, %v7727_v1  ;;  %v8484_v34 = vadd.f32 %v14711_v37, %v7474_v35  ;;  %v7476_v52 = vpop.f32.mrb[73].mxu0 }
 0xcf8   : > { %7775 = vst.msk [vmem:[%s14790_s27 + $0xe8] sm:$0xff] %vm2639_vm10, %v7719_v38  ;;  %v7477_v29 = vpop.f32.mrb[74].mxu0 }
 0xcf9   : > { %v7652_v53 = vadd.f32 %v8484_v34, %v14805_v22  ;;  %v8485_v33 = vadd.f32 %v14711_v37, %v7477_v29  ;;  %v7479_v10 = vpop.f32.mrb[75].mxu0 }
 0xcfa   : > { %v8402_v27 = vpop.f32.mrb[152].mxu1 }
 0xcfb   : > { %v7740_v56 = vadd.f32 %v8402_v27, %v14779_v12  ;;  %v7731_v60 = vpop.f32.mrb[153].mxu1  ;;  %7758 = vst.msk [vmem:[%s14790_s27 + $0x60] sm:$0xff] %vm2639_vm10, %v7652_v53  ;;  %v7655_v14 = vadd.f32 %v8485_v33, %v14811_v62 }
 0xcfc   : > { %v7732_v4 = vadd.f32 %v7731_v60, %v14769_v13  ;;  %v8403_v39 = vpop.f32.mrb[154].mxu1 }
 0xcfd   : > { %7780 = vst.msk [vmem:[%s14790_s27 + $0x110] sm:$0xff] %vm2639_vm10, %v7740_v56  ;;  %v7743_v58 = vadd.f32 %v8403_v39, %v14781_v50  ;;  %v7734_v0 = vpop.f32.mrb[155].mxu1  ;;  %7759 = vst.msk [vmem:[%s14790_s27 + $0x68] sm:$0xff] %vm2639_vm10, %v7655_v14 }
 0xcfe   : > { %7778 = vst.msk [vmem:[%s14790_s27 + $0x100] sm:$0xff] %vm2639_vm10, %v7732_v4  ;;  %v7735_v12 = vadd.f32 %v7734_v0, %v14771_v42 }
 0xcff   : > { %7781 = vst.msk [vmem:[%s14790_s27 + $0x118] sm:$0xff] %vm2639_vm10, %v7743_v58 }
 0xd00   : > { %7779 = vst.msk [vmem:[%s14790_s27 + $0x108] sm:$0xff] %vm2639_vm10, %v7735_v12 }
 0xd01 PF: > { %s25_s18 = sadd.s32 1, %s9053_s18  }
 0xd02   : > { %p22_p4 = scmp.ge.s32.totalorder %s25_s18, 4  }
 0xd04   :  { %24 = sbr.rel (!%p22_p4) target bundleno = 1 (0x1), region = 113 }

</bundles_post_ra>
